<compile_context>
chip_gen: v6e
topology: v6e:2x2x1
jax: 0.10.0
libtpu: 0.0.40
codegen_flags: <defaults>
</compile_context>

<pallas_src>
import jax
import jax.numpy as jnp
from jax.experimental import pallas as pl
from jax.experimental.pallas import tpu as pltpu

# ---- config (mirrors the PyTorch Config dataclass) ----
NOISE_SIZE = 100
NUM_CHANNELS = 3
INITIAL_SIZE = 64
HIDDEN = 1024
OUT_FEATURES = NUM_CHANNELS * INITIAL_SIZE * INITIAL_SIZE  # 12288

TEXT_EMBED_SIZE = 28          # chosen so that 100 + 28 = 128 (lane-aligned)
IN_FEATURES = NOISE_SIZE + TEXT_EMBED_SIZE

TN = 3072                     # output-feature tile for layer 2 (int8 tile = 3 MiB)
N_TILES = OUT_FEATURES // TN  # 4 -> even split across 2 TensorCores on v7x


def _generator_kernel(x_ref, w1_ref, b1_ref, w2_ref, s2_ref, b2_ref, o_ref):
    """out tile = tanh(relu(x@W1+b1) @ (W2_int8 * scale) + b2), computed per TN-wide tile.

    Layer 1 is recomputed per grid step (tiny matmul, resident operands) so there is
    no cross-iteration dependency and the grid axis can be "parallel".
    """
    # Layer 1 (bf16 inputs, f32 accumulate).  x/W1/b1 are resident in VMEM.
    h = jnp.dot(x_ref[...], w1_ref[...], preferred_element_type=jnp.float32)
    h = jnp.maximum(h + b1_ref[...], 0.0).astype(jnp.bfloat16)

    # Layer 2 tile: int8 W2 streamed from HBM.  int8 values are exactly representable
    # in bf16, so cast (VPU work, hidden under the DMA) and use the bf16 MXU path with
    # f32 accumulation, then apply the per-column f32 dequant scale and bias.
    w2_t = w2_ref[...].astype(jnp.bfloat16)
    out = jnp.dot(h, w2_t, preferred_element_type=jnp.float32)
    out = out * s2_ref[...] + b2_ref[...]
    o_ref[...] = jnp.tanh(out)


def generator_forward(noise, text_embedding, params):
    """noise: (B, NOISE_SIZE) f32, text_embedding: (B, TEXT_EMBED_SIZE) f32.
    params = (w1 bf16, b1 f32, w2 int8, w2_scale f32, b2 f32) from prepare_params().
    Returns (B, NUM_CHANNELS, INITIAL_SIZE, INITIAL_SIZE) f32 (NCHW)."""
    w1, b1, w2_q, w2_scale, b2 = params

    x = jnp.concatenate([noise, text_embedding], axis=1).astype(jnp.float32)
    B = x.shape[0]
    B_pad = -(-B // 16) * 16                   # pad batch to bf16 packed-sublane pair
    if B_pad != B:
        x = jnp.pad(x, ((0, B_pad - B), (0, 0)))
    x = x.astype(jnp.bfloat16)

    cost = pl.CostEstimate(
        flops=2 * B_pad * (IN_FEATURES * HIDDEN * N_TILES + HIDDEN * OUT_FEATURES),
        transcendentals=B_pad * OUT_FEATURES,
        bytes_accessed=int(x.size * 2 + w1.size * 2 + b1.size * 4
                           + w2_q.size * 1 + w2_scale.size * 4 + b2.size * 4
                           + B_pad * OUT_FEATURES * 4),
    )

    flat = pl.pallas_call(
        _generator_kernel,
        out_shape=jax.ShapeDtypeStruct((B_pad, OUT_FEATURES), jnp.float32),
        grid_spec=pltpu.PrefetchScalarGridSpec(
            num_scalar_prefetch=0,
            grid=(N_TILES,),
            in_specs=[
                pl.BlockSpec((B_pad, IN_FEATURES), lambda j: (0, 0)),        # x        (resident, bf16)
                pl.BlockSpec((IN_FEATURES, HIDDEN), lambda j: (0, 0)),       # W1       (resident, bf16)
                pl.BlockSpec((1, HIDDEN), lambda j: (0, 0)),                 # b1       (resident, f32)
                pl.BlockSpec((HIDDEN, TN), lambda j: (0, j),                 # W2 tile  (streamed, int8)
                             pipeline_mode=pl.Buffered(2)),
                pl.BlockSpec((1, TN), lambda j: (0, j)),                     # scale tile (f32)
                pl.BlockSpec((1, TN), lambda j: (0, j)),                     # b2 tile    (f32)
            ],
            out_specs=pl.BlockSpec((B_pad, TN), lambda j: (0, j)),
        ),
        compiler_params=pltpu.CompilerParams(
            dimension_semantics=("parallel",),       # no cross-step deps -> megacore OK on v7x
            vmem_limit_bytes=32 * 1024 * 1024,       # lift v5e's 16 MiB scoped default
        ),
        cost_estimate=cost,
    )(x, w1, b1, w2_q, w2_scale, b2)

    flat = flat[:B]
    # matches torch .view(-1, C, H, W) on a row-major (B, C*H*W) tensor
    return flat.reshape(B, NUM_CHANNELS, INITIAL_SIZE, INITIAL_SIZE)


def init_params(key):
    """Deterministic f32 init mimicking nn.Linear default (uniform(-1/sqrt(fan_in), 1/sqrt(fan_in)))."""
    k1, k2, k3, k4 = jax.random.split(key, 4)
    lim1 = 1.0 / jnp.sqrt(jnp.float32(IN_FEATURES))
    lim2 = 1.0 / jnp.sqrt(jnp.float32(HIDDEN))
    w1 = jax.random.uniform(k1, (IN_FEATURES, HIDDEN), jnp.float32, -lim1, lim1)
    b1 = jax.random.uniform(k2, (1, HIDDEN), jnp.float32, -lim1, lim1)
    w2 = jax.random.uniform(k3, (HIDDEN, OUT_FEATURES), jnp.float32, -lim2, lim2)
    b2 = jax.random.uniform(k4, (1, OUT_FEATURES), jnp.float32, -lim2, lim2)
    return (w1, b1, w2, b2)


def prepare_params(params):
    """Cast W1 to bf16; quantize W2 to int8 with a per-output-column f32 scale."""
    w1, b1, w2, b2 = params
    amax = jnp.max(jnp.abs(w2), axis=0, keepdims=True)            # (1, OUT_FEATURES)
    w2_scale = (jnp.maximum(amax, 1e-12) / 127.0).astype(jnp.float32)
    w2_q = jnp.clip(jnp.round(w2 / w2_scale), -127.0, 127.0).astype(jnp.int8)
    return (w1.astype(jnp.bfloat16),
            b1.astype(jnp.float32).reshape(1, HIDDEN),
            w2_q,
            w2_scale,
            b2.astype(jnp.float32).reshape(1, OUT_FEATURES))


def _reference_forward(noise, text_embedding, params):
    """Pure-JAX reference emulating the kernel's dtypes (bf16 L1, int8->bf16 W2, f32 accumulate)."""
    w1, b1, w2_q, w2_scale, b2 = params
    x = jnp.concatenate([noise, text_embedding], axis=1)
    h = jnp.dot(x.astype(jnp.bfloat16), w1, preferred_element_type=jnp.float32) + b1
    h = jnp.maximum(h, 0.0).astype(jnp.bfloat16)
    out = jnp.dot(h, w2_q.astype(jnp.bfloat16), preferred_element_type=jnp.float32)
    out = out * w2_scale + b2
    out = jnp.tanh(out)
    return out.reshape(-1, NUM_CHANNELS, INITIAL_SIZE, INITIAL_SIZE)


if __name__ == "__main__":
    key = jax.random.PRNGKey(0)
    kp, kn, kt = jax.random.split(key, 3)

    B = 2
    params = prepare_params(init_params(kp))
    noise = jax.random.normal(kn, (B, NOISE_SIZE), jnp.float32)
    text_embedding = jax.random.normal(kt, (B, TEXT_EMBED_SIZE), jnp.float32)

    out = generator_forward(noise, text_embedding, params)
    out = jax.block_until_ready(out)

    ref = _reference_forward(noise, text_embedding, params)
    assert out.shape == (B, NUM_CHANNELS, INITIAL_SIZE, INITIAL_SIZE)
    # Quantized/bf16 path: compare against a dtype-matched JAX reference.  Outputs are
    # tanh-bounded in [-1, 1]; f32-accumulated bf16 matmuls may differ slightly in
    # accumulation order between MXU and XLA.
    assert jnp.allclose(out, ref, atol=2e-3, rtol=2e-3), "mismatch vs dtype-matched JAX reference"

    print("KERNEL_OK")
</pallas_src>

<mosaic_0001>
module attributes {stable_mosaic.version = 11 : i64} {
  func.func @_generator_kernel(%arg0: i32, %arg1: memref<16x128xbf16, #tpu.memory_space<vmem>>, %arg2: memref<128x1024xbf16, #tpu.memory_space<vmem>>, %arg3: memref<1x1024xf32, #tpu.memory_space<vmem>>, %arg4: memref<1024x3072xi8, #tpu.memory_space<vmem>>, %arg5: memref<1x3072xf32, #tpu.memory_space<vmem>>, %arg6: memref<1x3072xf32, #tpu.memory_space<vmem>>, %arg7: memref<16x3072xf32, #tpu.memory_space<vmem>>) attributes {dimension_semantics = [#tpu.dimension_semantics<parallel>], iteration_bounds = array<i64: 4>, scalar_prefetch = 0 : i64, scratch_operands = 0 : i64, tpu.core_type = #tpu.core_type<tc>, window_params = [{pipeline_mode = #tpu.pipeline_mode<synchronous>, transform_indices = @transform_0, window_bounds = array<i64: 16, 128>}, {pipeline_mode = #tpu.pipeline_mode<synchronous>, transform_indices = @transform_1, window_bounds = array<i64: 128, 1024>}, {pipeline_mode = #tpu.pipeline_mode<synchronous>, transform_indices = @transform_2, window_bounds = array<i64: 1, 1024>}, {pipeline_mode = #tpu.pipeline_mode<double_buffered>, transform_indices = @transform_3, window_bounds = array<i64: 1024, 3072>}, {transform_indices = @transform_4, window_bounds = array<i64: 1, 3072>}, {transform_indices = @transform_5, window_bounds = array<i64: 1, 3072>}, {transform_indices = @transform_6, window_bounds = array<i64: 16, 3072>}]} {
    %c0 = arith.constant 0 : index
    %c0_0 = arith.constant 0 : index
    %0 = vector.load %arg1[%c0, %c0_0] : memref<16x128xbf16, #tpu.memory_space<vmem>>, vector<16x128xbf16>
    %c0_1 = arith.constant 0 : index
    %c0_2 = arith.constant 0 : index
    %1 = vector.load %arg2[%c0_1, %c0_2] : memref<128x1024xbf16, #tpu.memory_space<vmem>>, vector<128x1024xbf16>
    %cst = arith.constant dense<0.000000e+00> : vector<16x1024xf32>
    %2 = tpu.matmul %0, %1, %cst {dimension_numbers = #tpu.dot_dimension_numbers<[1], [0], [0], [1], [0, 0, 1, 1], [], []>} : vector<16x128xbf16>, vector<128x1024xbf16>, vector<16x1024xf32> -> vector<16x1024xf32>
    %c0_3 = arith.constant 0 : index
    %c0_4 = arith.constant 0 : index
    %3 = vector.load %arg3[%c0_3, %c0_4] : memref<1x1024xf32, #tpu.memory_space<vmem>>, vector<1x1024xf32>
    %4 = vector.broadcast %3 : vector<1x1024xf32> to vector<16x1024xf32>
    %5 = arith.addf %2, %4 : vector<16x1024xf32>
    %cst_5 = arith.constant 0.000000e+00 : f32
    %6 = vector.broadcast %cst_5 : f32 to vector<16x1024xf32>
    %7 = arith.maximumf %5, %6 : vector<16x1024xf32>
    %8 = arith.truncf %7 : vector<16x1024xf32> to vector<16x1024xbf16>
    %c0_6 = arith.constant 0 : index
    %c0_7 = arith.constant 0 : index
    %9 = vector.load %arg4[%c0_6, %c0_7] : memref<1024x3072xi8, #tpu.memory_space<vmem>>, vector<1024x3072xi8>
    %10 = arith.sitofp %9 : vector<1024x3072xi8> to vector<1024x3072xbf16>
    %cst_8 = arith.constant dense<0.000000e+00> : vector<16x3072xf32>
    %11 = tpu.matmul %8, %10, %cst_8 {dimension_numbers = #tpu.dot_dimension_numbers<[1], [0], [0], [1], [0, 0, 1, 1], [], []>} : vector<16x1024xbf16>, vector<1024x3072xbf16>, vector<16x3072xf32> -> vector<16x3072xf32>
    %c0_9 = arith.constant 0 : index
    %c0_10 = arith.constant 0 : index
    %12 = vector.load %arg5[%c0_9, %c0_10] : memref<1x3072xf32, #tpu.memory_space<vmem>>, vector<1x3072xf32>
    %13 = vector.broadcast %12 : vector<1x3072xf32> to vector<16x3072xf32>
    %14 = arith.mulf %11, %13 : vector<16x3072xf32>
    %c0_11 = arith.constant 0 : index
    %c0_12 = arith.constant 0 : index
    %15 = vector.load %arg6[%c0_11, %c0_12] : memref<1x3072xf32, #tpu.memory_space<vmem>>, vector<1x3072xf32>
    %16 = vector.broadcast %15 : vector<1x3072xf32> to vector<16x3072xf32>
    %17 = arith.addf %14, %16 : vector<16x3072xf32>
    %18 = math.tanh %17 : vector<16x3072xf32>
    %c0_13 = arith.constant 0 : index
    %c0_14 = arith.constant 0 : index
    %19 = vector.load %arg7[%c0_13, %c0_14] : memref<16x3072xf32, #tpu.memory_space<vmem>>, vector<16x3072xf32>
    tpu.vector_store %arg7[%c0_13, %c0_14], %18 {strides = array<i32>} : memref<16x3072xf32, #tpu.memory_space<vmem>>, vector<16x3072xf32>,
    return
  }
  func.func @transform_0(%arg0: i32) -> (i32, i32) {
    %c0_i32 = arith.constant 0 : i32
    %c0_i32_0 = arith.constant 0 : i32
    %c0_i32_1 = arith.constant 0 : i32
    return %c0_i32, %c0_i32_0 : i32, i32
  }
  func.func @transform_1(%arg0: i32) -> (i32, i32) {
    %c0_i32 = arith.constant 0 : i32
    %c0_i32_0 = arith.constant 0 : i32
    %c0_i32_1 = arith.constant 0 : i32
    return %c0_i32, %c0_i32_0 : i32, i32
  }
  func.func @transform_2(%arg0: i32) -> (i32, i32) {
    %c0_i32 = arith.constant 0 : i32
    %c0_i32_0 = arith.constant 0 : i32
    %c0_i32_1 = arith.constant 0 : i32
    return %c0_i32, %c0_i32_0 : i32, i32
  }
  func.func @transform_3(%arg0: i32) -> (i32, i32) {
    %c0_i32 = arith.constant 0 : i32
    %c0_i32_0 = arith.constant 0 : i32
    return %c0_i32, %arg0 : i32, i32
  }
  func.func @transform_4(%arg0: i32) -> (i32, i32) {
    %c0_i32 = arith.constant 0 : i32
    %c0_i32_0 = arith.constant 0 : i32
    return %c0_i32, %arg0 : i32, i32
  }
  func.func @transform_5(%arg0: i32) -> (i32, i32) {
    %c0_i32 = arith.constant 0 : i32
    %c0_i32_0 = arith.constant 0 : i32
    return %c0_i32, %arg0 : i32, i32
  }
  func.func @transform_6(%arg0: i32) -> (i32, i32) {
    %c0_i32 = arith.constant 0 : i32
    %c0_i32_0 = arith.constant 0 : i32
    return %c0_i32, %arg0 : i32, i32
  }
}

</mosaic_0001>

<bundles_post_ra>
// kernel: tpu_custom_call.1
= control target key start
LH: loop header
LB: loop body
LE: loop exit
PB: predicated region body
PF: predicated region fallthrough
CT: control target
= control target key end

     0   :  { %s7988_s0 = inlined_call_operand.hbm [shape: bf16[16,128], index: 0, kind: input, shape index: {}]   ;;  %s7989_s1 = inlined_call_operand.hbm [shape: bf16[128,1024], index: 1, kind: input, shape index: {}]   ;;  %s7990_s2 = inlined_call_operand.hbm [shape: f32[1,1024], index: 2, kind: input, shape index: {}]   ;;  %s7991_s3 = inlined_call_operand.hbm [shape: s8[1024,12288], index: 3, kind: input, shape index: {}]   ;;  %s7992_s4 = inlined_call_operand.hbm [shape: f32[1,12288], index: 4, kind: input, shape index: {}]   ;;  %s7993_s5 = inlined_call_operand.hbm [shape: f32[1,12288], index: 5, kind: input, shape index: {}]   ;;  %s7994_s6 = inlined_call_operand.hbm [shape: f32[16,12288], index: 6, kind: output, shape index: {}]  }
   0x1   :  { %8005 = sst [smem:[#allocation21_spill]] %s7988_s0 }
   0x2   :  { %8006 = sst [smem:[#allocation22_spill]] %s7989_s1 }
   0x3   :  { %11 = vsyncpa [#allocation3], 0 }
   0x4   :  { %12 = vsyncpa [#allocation6], 0 }
   0x5   :  { %13 = vsyncpa [#allocation9], 0 }
   0x6   :  { %15 = vsyncpa [#allocation9 + $0x1], 0 }
   0x7   :  { %16 = vsyncpa [#allocation12], 0 }
   0x8   :  { %18 = vsyncpa [#allocation12 + $0x1], 0 }
   0x9   :  { %19 = vsyncpa [#allocation4], 0 }
   0xa   :  { %21 = vsyncpa [#allocation4 + $0x1], 0  ;;  %s6578_s21 = smov 0   ;;  %s6580_s22 = smov 0  }
   0xb   :  { %s6582_s23 = smov 0   ;;  %s6584_s24 = smov 0  }
   0xc LB: > { %s6599_s25 = sadd.s32 4294967295, %s6523_s24   ;;  %s5993_s26 = sadd.s32 4294967294, %s6523_s24   ;;  %s6523_s24 = sphi %s6584_s24, %s8031_s24   ;;  %s6519_s23 = sphi %s6582_s23, %s8035_s23   ;;  %s6515_s22 = sphi %s6580_s22, %s8034_s22   ;;  %s6511_s21 = sphi %s6578_s21, %s8033_s21  }
   0xd   : > { %s6603_s27 = sadd.s32 1, %s6523_s24   ;;  %s97_s28 = sadd.s32 1, %s6519_s23 }
   0xe   : > { %8007 = sst [smem:[#allocation19_spill]] %s6603_s27  ;;  %s94_s29 = ssub.s32 %s6523_s24, %s6603_s27 }
   0xf   : > { %p104_p0 = scmp.ne.s32.totalorder %s6519_s23, %s6515_s22  ;;  %p95_p1 = scmp.eq.s32.totalorder %s94_s29, 0 }
  0x10   : > { %p105_p2 = scmp.eq.s32.totalorder %s6523_s24, 0  ;;  %p110_p3 = scmp.ne.s32.totalorder %s6515_s22, %s6511_s21 }
  0x11   : > { %p7999_p4 = scmp.eq.s32.totalorder %s6599_s25, 0  ;;  %p186_p7 = scmp.eq.s32.totalorder %s6599_s25, 3 }
  0x12   : > { %s6615_s30 = scalar_select %p95_p1, %s6519_s23, %s97_s28  }
  0x13   : > { %p6617_p5 = por %p105_p2, %p104_p0  ;;  %p6623_p6 = por %p7999_p4, %p110_p3 }
  0x14   : > { %8008 = sst [smem:[#allocation20_spill]] %s6615_s30  ;;  %p192_p8 = scmp.eq.s32.totalorder %s5993_s26, 3 }
  0x15   : > { %s8010_s8 = scalar_select %p6623_p6, 1, 0 }
  0x16   : > { %p5994_p9 = scmp.ge.s32.totalorder %s6523_s24, 1  ;;  %p199_p10 = scmp.lt.s32.totalorder %s6523_s24, 5 }
  0x17   : > { %p6630_p11 = por %p186_p7, %p104_p0  ;;  %p6634_p12 = por %p192_p8, %p110_p3 }
  0x18   : > { %p6638_p13 = pnand %p5994_p9, %p199_p10  ;;  %s6525_s12 = smov [#allocation5]  }
  0x19   : > { %s8011_s9 = scalar_select %p6630_p11, 1, 0 }
  0x1a   : > { %s8012_s10 = scalar_select %p6634_p12, 1, 0 }
  0x1b   : > { %s8013_s11 = scalar_select %p6638_p13, 1, 0 }
  0x1c   : > { %p6104_p1 = pneg %p6638_p13  ;;  %s224_s13 = sshll.u32 %s6525_s12, 4  ;;  %s225_s13 = int_to_ptr.vmem [resolvable:$true] %s224_s13 }
  0x1d   : > { %p6131_p0 = scmp.lt.s32.totalorder %s6523_s24, 4  ;;  %s249_s15 = sand.u32 1, %s6523_s24  }
  0x1e   : > { %p6646_p2 = pnand %p6104_p1, %p7999_p4  ;;  %s6296_s16 = scalar_lea.vmem %s225_s13, 8192 }
  0x1f   : > { %p6297_p7 = scmp.ne.s32.totalorder %s225_s13, %s6296_s16  ;;  %p6304_p10 = scmp.lt.s32.totalorder %s225_s13, %s225_s13 }
  0x20   : > { %s8014_s14 = scalar_select %p6646_p2, 1, 0 }
  0x21   : > { %p8000_p3 = pneg %p6646_p2  ;;  %p6305_p12 = scmp.lt.s32.totalorder %s6296_s16, %s6296_s16 }
  0x23   : > { %p6299_p8 = pnand %p6297_p7, %p8000_p3  ;;  %p6306_p11 = por %p6305_p12, %p6304_p10 }
  0x25   : > { %p6300_p9 = pneg %p6299_p8 }
  0x27   : > { %p6307_p6 = pnand %p6306_p11, %p6300_p9 }
  0x29   : > { %6310 = shalt.err (!%p6307_p6)
}
  0x2a   : > { %s6526_s17 = smov 512   ;;  %s6527_s18 = smov 32  }
  0x2b   : > { %s8015_s1 = sld [smem:[#allocation22_spill]]  ;;  %p6666_p1 = pnand %p6131_p0, %p6617_p5 }
  0x2c   : > { %s6671_s28 = sand.u32 1, %s6519_s23   ;;  %s6074_s12 = smul.u32 3072, %s6523_s24 }
  0x2d   : > { %s6078_s29 = smul.u32 6144, %s6671_s28  ;;  %p6688_p6 = pneg %p6666_p1 }
  0x2e   : > { %s6678_s27 = scalar_lea.hbm %s7991_s3, %s6074_s12 }
  0x2f   : > { %s253_s7 = scalar_lea.vmem [#allocation8], %s6078_s29  ;;  %s6316_s29 = scalar_lea.hbm %s7991_s3, 393216 }
  0x30   : > { %p6317_p0 = scmp.lt.s32.totalorder %s6678_s27, %s7991_s3 }
  0x31   : > { %6110 = dma.hbm_to_vmem [thread:$0]  (!%p6646_p2), %s8015_s1, 8192, %s225_s13, [#allocation6], %s6526_s17, %s6526_s17, %s6527_s18  }
  0x32   : > { %s260_s13 = sshll.u32 %s253_s7, 4  ;;  %s6682_s17 = scalar_lea.sflag [#allocation9], %s249_s15  ;;  %s6680_s13 = int_to_ptr.vmem [resolvable:$true] %s260_s13 }
  0x33   : > { %s6311_s18 = scalar_lea.hbm %s6678_s27, 98304 }
  0x34   : > { %p6312_p5 = scmp.ne.s32.totalorder %s6678_s27, %s6311_s18  ;;  %p6318_p7 = scmp.lt.s32.totalorder %s6316_s29, %s6311_s18 }
  0x36   : > { %p6314_p11 = pnand %p6688_p6, %p6312_p5  ;;  %p6319_p8 = por %p6318_p7, %p6317_p0 }
  0x38   : > { %p6315_p12 = pneg %p6314_p11 }
  0x3a   : > { %p6320_p9 = pnand %p6319_p8, %p6315_p12 }
  0x3c   : > { %6323 = shalt.err (!%p6320_p9)
}
  0x3d   : > { %s6324_s15 = scalar_lea.vmem %s6680_s13, 98304  ;;  %s6528_s7 = smov [#allocation8]  }
  0x3e   : > { %p6325_p10 = scmp.ne.s32.totalorder %s6680_s13, %s6324_s15  ;;  %s6329_s30 = sshll.u32 %s6528_s7, 4  ;;  %s6330_s30 = int_to_ptr.vmem [resolvable:$false] %s6329_s30 }
  0x3f   : > { %s6331_s20 = scalar_lea.vmem %s6330_s30, 196608  ;;  %p6332_p4 = scmp.lt.s32.totalorder %s6680_s13, %s6330_s30 }
  0x40   : > { %p6327_p5 = pnand %p6325_p10, %p6688_p6  ;;  %p6333_p3 = scmp.lt.s32.totalorder %s6331_s20, %s6324_s15 }
  0x42   : > { %p6328_p11 = pneg %p6327_p5  ;;  %p6334_p13 = por %p6333_p3, %p6332_p4 }
  0x44   : > { %p6335_p2 = pnand %p6334_p13, %p6328_p11 }
  0x46   : > { %6338 = shalt.err (!%p6335_p2)
}
  0x47   : > { %s6529_s18 = smov 12288   ;;  %s6530_s29 = smov 3072  }
  0x48   : > { %s6531_s12 = smov 192   ;;  %s6532_s16 = smov [#allocation2]  }
  0x49   : > { %6117 = dma.hbm_to_vmem [thread:$0]  (!%p6666_p1), %s6678_s27, 98304, %s6680_s13, %s6682_s17, %s6529_s18, %s6530_s29, %s6531_s12  }
  0x4a   : > { %s211_s1 = sshll.u32 %s6532_s16, 4  ;;  %p8018_p0 = scmp.ne.s32.totalorder %s8014_s14, 0  ;;  %s212_s1 = int_to_ptr.vmem [resolvable:$true] %s211_s1 }
  0x4b   : > { %s6350_s7 = scalar_lea.vmem %s212_s1, 128  ;;  %p6358_p2 = scmp.lt.s32.totalorder %s212_s1, %s212_s1 }
  0x4c   : > { %p6351_p12 = scmp.ne.s32.totalorder %s212_s1, %s6350_s7  ;;  %p8019_p7 = pneg %p8018_p0 }
  0x4d   : > { %p6359_p3 = scmp.lt.s32.totalorder %s6350_s7, %s6350_s7 }
  0x4e   : > { %p6353_p4 = pnand %p6351_p12, %p8019_p7 }
  0x4f   : > { %p6360_p8 = por %p6359_p3, %p6358_p2 }
  0x50   : > { %p6354_p13 = pneg %p6353_p4 }
  0x52   : > { %p6361_p9 = pnand %p6360_p8, %p6354_p13 }
  0x54   : > { %6364 = shalt.err (!%p6361_p9)
}
  0x55   : > { %s6533_s15 = smov 64   ;;  %s6534_s27 = smov 4  }
  0x56   : > { %s8020_s0 = sld [smem:[#allocation21_spill]]  ;;  %s6535_s20 = smov [#allocation7]  }
  0x57   : > { %s238_s18 = sshll.u32 %s6535_s20, 4  ;;  %s8004_s29 = smul.u32 24, %s6671_s28  ;;  %s239_s18 = int_to_ptr.vmem [resolvable:$true] %s238_s18 }
  0x58   : > { %s6075_s12 = smul.u32 384, %s6523_s24  ;;  %s6376_s16 = scalar_lea.vmem %s239_s18, 128 }
  0x59   : > { %p6377_p10 = scmp.ne.s32.totalorder %s239_s18, %s6376_s16  ;;  %p8021_p5 = pmov %p8019_p7 }
  0x5a   : > { %p6384_p7 = scmp.lt.s32.totalorder %s239_s18, %s239_s18  ;;  %p6385_p4 = scmp.lt.s32.totalorder %s6376_s16, %s6376_s16 }
  0x5b   : > { %p6379_p11 = pnand %p6377_p10, %p8021_p5 }
  0x5c   : > { %6107 = dma.hbm_to_vmem [thread:$0]  (!%p8018_p0), %s8020_s0, 128, %s212_s1, [#allocation3], %s6533_s15, %s6533_s15, %s6534_s27  }
  0x5d   : > { %p6380_p12 = pneg %p6379_p11  ;;  %p6386_p13 = por %p6385_p4, %p6384_p7 }
  0x5f   : > { %p6387_p2 = pnand %p6386_p13, %p6380_p12 }
  0x61   : > { %6390 = shalt.err (!%p6387_p2)
}
  0x62   : > { %6113 = dma.hbm_to_vmem [thread:$0]  (!%p8018_p0), %s7990_s2, 128, %s239_s18, [#allocation6]  }
  0x63   : > { %s280_s13 = scalar_lea.hbm %s7992_s4, %s6075_s12  ;;  %s274_s30 = scalar_lea.vmem [#allocation10], %s8004_s29 }
  0x64   : > { %s282_s20 = sshll.u32 %s274_s30, 4  ;;  %s6391_s16 = scalar_lea.hbm %s280_s13, 384  ;;  %s283_s20 = int_to_ptr.vmem [resolvable:$true] %s282_s20 }
  0x65   : > { %p6392_p3 = scmp.ne.s32.totalorder %s280_s13, %s6391_s16  ;;  %s6396_s1 = scalar_lea.hbm %s7992_s4, 1536 }
  0x66   : > { %p6397_p0 = scmp.lt.s32.totalorder %s280_s13, %s7992_s4  ;;  %p6398_p10 = scmp.lt.s32.totalorder %s6396_s1, %s6391_s16 }
  0x67   : > { %p6394_p8 = pnand %p6392_p3, %p6688_p6 }
  0x68   : > { %p6399_p5 = por %p6398_p10, %p6397_p0 }
  0x69   : > { %p6395_p9 = pneg %p6394_p8 }
  0x6b   : > { %p6400_p11 = pnand %p6399_p5, %p6395_p9 }
  0x6d   : > { %6403 = shalt.err (!%p6400_p11)
}
  0x6e   : > { %s6404_s15 = scalar_lea.vmem %s283_s20, 384  ;;  %s6536_s27 = smov [#allocation10]  }
  0x6f   : > { %p6405_p12 = scmp.ne.s32.totalorder %s283_s20, %s6404_s15  ;;  %s6409_s30 = sshll.u32 %s6536_s27, 4  ;;  %s6410_s30 = int_to_ptr.vmem [resolvable:$false] %s6409_s30 }
  0x70   : > { %s6411_s29 = scalar_lea.vmem %s6410_s30, 768  ;;  %p6412_p13 = scmp.lt.s32.totalorder %s283_s20, %s6410_s30 }
  0x71   : > { %p6407_p7 = pnand %p6405_p12, %p6688_p6  ;;  %p6413_p2 = scmp.lt.s32.totalorder %s6411_s29, %s6404_s15 }
  0x73   : > { %p6408_p4 = pneg %p6407_p7  ;;  %p6414_p3 = por %p6413_p2, %p6412_p13 }
  0x75   : > { %p6415_p8 = pnand %p6414_p3, %p6408_p4 }
  0x77   : > { %6418 = shalt.err (!%p6415_p8)
}
  0x78   : > { %6120 = dma.hbm_to_vmem [thread:$0]  (!%p6666_p1), %s280_s13, 384, %s283_s20, %s6682_s17  }
  0x79   : > { %s6754_s14 = scalar_lea.hbm %s7993_s5, %s6075_s12  ;;  %s8022_s7 = smul.u32 24, %s6671_s28 }
  0x7a   : > { %s290_s18 = scalar_lea.sflag [#allocation12], %s6671_s28  ;;  %s6419_s15 = scalar_lea.hbm %s6754_s14, 384 }
  0x7b   : > { %s293_s29 = scalar_lea.vmem [#allocation11], %s8022_s7  ;;  %p6420_p9 = scmp.ne.s32.totalorder %s6754_s14, %s6419_s15 }
  0x7c   : > { %s301_s1 = sshll.u32 %s293_s29, 4  ;;  %s6424_s20 = scalar_lea.hbm %s7993_s5, 1536  ;;  %s302_s1 = int_to_ptr.vmem [resolvable:$true] %s301_s1 }
  0x7d   : > { %p6422_p0 = pnand %p6420_p9, %p6688_p6  ;;  %p6425_p5 = scmp.lt.s32.totalorder %s6754_s14, %s7993_s5 }
  0x7e   : > { %p6426_p11 = scmp.lt.s32.totalorder %s6424_s20, %s6419_s15 }
  0x7f   : > { %p6423_p10 = pneg %p6422_p0 }
  0x80   : > { %p6427_p12 = por %p6426_p11, %p6425_p5 }
  0x82   : > { %p6428_p7 = pnand %p6427_p12, %p6423_p10 }
  0x84   : > { %6431 = shalt.err (!%p6428_p7)
}
  0x85   : > { %s6432_s30 = scalar_lea.vmem %s302_s1, 384  ;;  %s6537_s28 = smov [#allocation11]  }
  0x86   : > { %p6433_p4 = scmp.ne.s32.totalorder %s302_s1, %s6432_s30  ;;  %s6437_s0 = sshll.u32 %s6537_s28, 4  ;;  %s6438_s0 = int_to_ptr.vmem [resolvable:$false] %s6437_s0 }
  0x87   : > { %s6439_s16 = scalar_lea.vmem %s6438_s0, 768  ;;  %p6440_p3 = scmp.lt.s32.totalorder %s302_s1, %s6438_s0 }
  0x88   : > { %p6435_p13 = pnand %p6433_p4, %p6688_p6  ;;  %p6441_p8 = scmp.lt.s32.totalorder %s6439_s16, %s6432_s30 }
  0x8a   : > { %p6436_p2 = pneg %p6435_p13  ;;  %p6442_p9 = por %p6441_p8, %p6440_p3 }
  0x8c   : > { %p6443_p0 = pnand %p6442_p9, %p6436_p2 }
  0x8e   : > { %6446 = shalt.err (!%p6443_p0)
}
  0x8f   : > { %6123 = dma.hbm_to_vmem [thread:$0]  (!%p6666_p1), %s6754_s14, 384, %s302_s1, %s290_s18  }
  0x90   : > { %p8023_p10 = scmp.ne.s32.totalorder %s8013_s11, 0 }
  0x91   : > { %p8024_p5 = scmp.eq.s32.totalorder (!%p8023_p10), %s6599_s25, 0 }
  0x92   : > { %310 = sbr.rel (%p8023_p10) target bundleno = 2114 (0x842), region = 44 }
  0x97   : > { %6490 = dma.done.wait (%p8024_p5), [#allocation3], 128   ;;  %p8025_p6 = pmov %p8024_p5 }
  0x98   : > { %p8026_p11 = pmov %p8024_p5 }
  0x99   : > { %6492 = vsyncadd (%p8025_p6), [#allocation3], 4294967168 }
  0x9a   : > { %6494 = dma.done.wait (%p8026_p11), [#allocation6], 8320   ;;  %p8027_p12 = pmov %p8024_p5 }
  0x9b   : > { %s324_s26 = sand.u32 1, %s6599_s25   ;;  %s6787_s19 = sand.u32 1, %s6515_s22  }
  0x9c   : > { %6496 = vsyncadd (%p8027_p12), [#allocation6], 4294958976  ;;  %s6081_s11 = smul.u32 6144, %s6787_s19  ;;  %s325_s14 = scalar_lea.sflag [#allocation9], %s324_s26 }
  0x9d   : > { %p8028_p1 = scmp.ne.s32.totalorder %s8010_s8, 0 }
  0x9e   : > { %s6790_s7 = scalar_lea.vmem [#allocation8], %s6081_s11 }
  0x9f   : > { %6498 = dma.done.wait (%p8028_p1), %s325_s14, 98688  }
  0xa0   : > { %6500 = vsyncadd (%p8028_p1), %s325_s14, 4294868608  ;;  %s6082_s29 = smul.u32 24, %s6787_s19  ;;  %s343_s18 = scalar_lea.sflag [#allocation12], %s6787_s19 }
  0xa2   : > { %s6797_s1 = scalar_lea.vmem [#allocation10], %s6082_s29  ;;  %s6800_s15 = scalar_lea.vmem [#allocation11], %s6082_s29 }
  0xa3   : > { %6502 = dma.done.wait (%p8028_p1), %s343_s18, 384  }
  0xa4   : > { %6504 = vsyncadd (%p8028_p1), %s343_s18, 4294966912  ;;  %v6538_v0 = vmov 0   ;;  %v448_v1 = vld [vmem:[#allocation5 + $0x1c0] sm:$0xff]  ;;  %v449_v3 = vld [vmem:[#allocation5 + $0x1c8] sm:$0xff]  ;;  %s6083_s8 = smul.u32 384, %s6787_s19  ;;  %s5833_s28 = scalar_lea.sflag [#allocation4], %s6787_s19 }
  0xa5   : > { %856 = vmatprep.mubr.bf16.mxu0 %v6538_v0  ;;  %899 = vmatprep.mubr.bf16.mxu1 %v6538_v0  ;;  %v452_v2 = vld [vmem:[#allocation5 + $0x1e0] sm:$0xff]  ;;  %v453_v5 = vld [vmem:[#allocation5 + $0x1e8] sm:$0xff]  ;;  %v450_v63 = vld [vmem:[#allocation5 + $0x1d0] sm:$0xff]  ;;  %s6077_s13 = smul.u32 3072, %s6599_s25  ;;  %p8029_p4 = scmp.ne.s32.totalorder %s8011_s9, 0 }
  0xa6   : > { %v6064_v4 = vcombine.high %v448_v1, %v452_v2  ;;  %v6063_v6 = vcombine.low %v448_v1, %v452_v2  ;;  %v440_v7 = vld [vmem:[#allocation5 + $0x180] sm:$0xff]  ;;  %v6066_v9 = vcombine.high %v449_v3, %v453_v5  ;;  %v6065_v10 = vcombine.low %v449_v3, %v453_v5  ;;  %v441_v12 = vld [vmem:[#allocation5 + $0x188] sm:$0xff]  ;;  %v454_v1 = vld [vmem:[#allocation5 + $0x1f0] sm:$0xff]  ;;  %s7109_s17 = scalar_lea.vmem [#allocation13], %s6083_s8  ;;  %s6539_s0 = smov [#allocation13]  }
  0xa7   : > { %v444_v8 = vld [vmem:[#allocation5 + $0x1a0] sm:$0xff]  ;;  %v445_v13 = vld [vmem:[#allocation5 + $0x1a8] sm:$0xff]  ;;  %v451_v2 = vld [vmem:[#allocation5 + $0x1d8] sm:$0xff]  ;;  %s5846_s20 = sshll.u32 %s7109_s17, 4  ;;  %s7942_s30 = scalar_lea.hbm %s7994_s6, %s6077_s13  ;;  %s7944_s20 = int_to_ptr.vmem [resolvable:$true] %s5846_s20 }
  0xa8   : > { %v6056_v11 = vcombine.high %v440_v7, %v444_v8  ;;  %v432_v14 = vld [vmem:[#allocation5 + $0x140] sm:$0xff]  ;;  %824 = vmatprep.subr.bf16.mxu0 %v6064_v4  ;;  %v6058_v15 = vcombine.high %v441_v12, %v445_v13  ;;  %v433_v17 = vld [vmem:[#allocation5 + $0x148] sm:$0xff]  ;;  %867 = vmatprep.subr.bf16.mxu1 %v6066_v9  ;;  %v6055_v19 = vcombine.low %v440_v7, %v444_v8  ;;  %v455_v3 = vld [vmem:[#allocation5 + $0x1f8] sm:$0xff]  ;;  %s6447_s25 = scalar_lea.vmem %s7944_s20, 6144  ;;  %s6451_s16 = sshll.u32 %s6539_s0, 4  ;;  %s6452_s16 = int_to_ptr.vmem [resolvable:$false] %s6451_s16 }
  0xa9   : > { %v436_v16 = vld [vmem:[#allocation5 + $0x160] sm:$0xff]  ;;  %v437_v18 = vld [vmem:[#allocation5 + $0x168] sm:$0xff]  ;;  %825 = vmatpush1.bf16.msra.mxu0 %v6063_v6  ;;  %868 = vmatpush1.bf16.msra.mxu1 %v6065_v10  ;;  %v6057_v20 = vcombine.low %v441_v12, %v445_v13  ;;  %v6068_v6 = vcombine.high %v450_v63, %v454_v1  ;;  %v6070_v7 = vcombine.high %v451_v2, %v455_v3  ;;  %v442_v8 = vld [vmem:[#allocation5 + $0x190] sm:$0xff]  ;;  %p6448_p7 = scmp.ne.s32.totalorder %s7944_s20, %s6447_s25  ;;  %s6453_s26 = scalar_lea.vmem %s6452_s16, 12288 }
  0xaa   : > { %826 = vmatprep.subr.bf16.mxu0 %v6056_v11  ;;  %v6048_v21 = vcombine.high %v432_v14, %v436_v16  ;;  %869 = vmatprep.subr.bf16.mxu1 %v6058_v15  ;;  %v6050_v22 = vcombine.high %v433_v17, %v437_v18  ;;  %v424_v23 = vld [vmem:[#allocation5 + $0x100] sm:$0xff]  ;;  %v425_v25 = vld [vmem:[#allocation5 + $0x108] sm:$0xff]  ;;  %v6047_v27 = vcombine.low %v432_v14, %v436_v16  ;;  %v446_v9 = vld [vmem:[#allocation5 + $0x1b0] sm:$0xff]  ;;  %p6454_p3 = scmp.lt.s32.totalorder %s7944_s20, %s6452_s16  ;;  %p6455_p8 = scmp.lt.s32.totalorder %s6453_s26, %s6447_s25 }
  0xab   : > { %v428_v24 = vld [vmem:[#allocation5 + $0x120] sm:$0xff]  ;;  %v429_v26 = vld [vmem:[#allocation5 + $0x128] sm:$0xff]  ;;  %v6049_v28 = vcombine.low %v433_v17, %v437_v18  ;;  %v6808_v10 = vld [vmem:[#allocation2] sm:$0xff]   ;;  %v6067_v13 = vcombine.low %v450_v63, %v454_v1  ;;  %v6069_v14 = vcombine.low %v451_v2, %v455_v3  ;;  %v6060_v15 = vcombine.high %v442_v8, %v446_v9  ;;  %p6449_p13 = pnand %p6448_p7, %p8029_p4 }
  0xac   : > { %v6040_v29 = vcombine.high %v424_v23, %v428_v24  ;;  %v6042_v30 = vcombine.high %v425_v25, %v429_v26  ;;  %v416_v31 = vld [vmem:[#allocation5 + $0xc0] sm:$0xff]  ;;  %v417_v33 = vld [vmem:[#allocation5 + $0xc8] sm:$0xff]  ;;  %v6039_v35 = vcombine.low %v424_v23, %v428_v24  ;;  %v6041_v36 = vcombine.low %v425_v25, %v429_v26  ;;  %v443_v11 = vld [vmem:[#allocation5 + $0x198] sm:$0xff]  ;;  %p6456_p9 = por %p6455_p8, %p6454_p3 }
  0xad   : > { %827 = vmatpush1.bf16.msra.mxu0 %v6055_v19  ;;  %870 = vmatpush1.bf16.msra.mxu1 %v6057_v20  ;;  %v420_v32 = vld [vmem:[#allocation5 + $0xe0] sm:$0xff]  ;;  %v421_v34 = vld [vmem:[#allocation5 + $0xe8] sm:$0xff]  ;;  %v447_v12 = vld [vmem:[#allocation5 + $0x1b8] sm:$0xff]  ;;  %p6450_p2 = pneg %p6449_p13 }
  0xae   : > { %828 = vmatprep.subr.bf16.mxu0 %v6048_v21  ;;  %871 = vmatprep.subr.bf16.mxu1 %v6050_v22  ;;  %v6032_v37 = vcombine.high %v416_v31, %v420_v32  ;;  %v6034_v38 = vcombine.high %v417_v33, %v421_v34  ;;  %v408_v39 = vld [vmem:[#allocation5 + $0x80] sm:$0xff]  ;;  %v409_v41 = vld [vmem:[#allocation5 + $0x88] sm:$0xff]  ;;  %v6031_v43 = vcombine.low %v416_v31, %v420_v32  ;;  %v434_v17 = vld [vmem:[#allocation5 + $0x150] sm:$0xff] }
  0xaf   : > { %v412_v40 = vld [vmem:[#allocation5 + $0xa0] sm:$0xff]  ;;  %v413_v42 = vld [vmem:[#allocation5 + $0xa8] sm:$0xff]  ;;  %v6033_v44 = vcombine.low %v417_v33, %v421_v34  ;;  %v6062_v16 = vcombine.high %v443_v11, %v447_v12  ;;  %v438_v18 = vld [vmem:[#allocation5 + $0x170] sm:$0xff]  ;;  %v6059_v21 = vcombine.low %v442_v8, %v446_v9  ;;  %v6061_v22 = vcombine.low %v443_v11, %v447_v12  ;;  %p6457_p0 = pnand %p6456_p9, %p6450_p2 }
  0xb0   : > { %v6024_v45 = vcombine.high %v408_v39, %v412_v40  ;;  %v6026_v46 = vcombine.high %v409_v41, %v413_v42  ;;  %v400_v47 = vld [vmem:[#allocation5 + $0x40] sm:$0xff]  ;;  %v401_v49 = vld [vmem:[#allocation5 + $0x48] sm:$0xff]  ;;  %v6023_v51 = vcombine.low %v408_v39, %v412_v40  ;;  %v6025_v52 = vcombine.low %v409_v41, %v413_v42  ;;  %v435_v19 = vld [vmem:[#allocation5 + $0x158] sm:$0xff] }
  0xb1   : > { %829 = vmatpush1.bf16.msra.mxu0 %v6047_v27  ;;  %872 = vmatpush1.bf16.msra.mxu1 %v6049_v28  ;;  %v404_v48 = vld [vmem:[#allocation5 + $0x60] sm:$0xff]  ;;  %v405_v50 = vld [vmem:[#allocation5 + $0x68] sm:$0xff]  ;;  %v439_v20 = vld [vmem:[#allocation5 + $0x178] sm:$0xff]  ;;  %v6052_v23 = vcombine.high %v434_v17, %v438_v18 }
  0xb2   : > { %830 = vmatprep.subr.bf16.mxu0 %v6040_v29  ;;  %873 = vmatprep.subr.bf16.mxu1 %v6042_v30  ;;  %v6016_v53 = vcombine.high %v400_v47, %v404_v48  ;;  %v6018_v54 = vcombine.high %v401_v49, %v405_v50  ;;  %v392_v55 = vld [vmem:[#allocation5] sm:$0xff]  ;;  %v393_v57 = vld [vmem:[#allocation5 + $0x8] sm:$0xff]  ;;  %v6015_v59 = vcombine.low %v400_v47, %v404_v48  ;;  %v426_v25 = vld [vmem:[#allocation5 + $0x110] sm:$0xff] }
  0xb3   : > { %v396_v56 = vld [vmem:[#allocation5 + $0x20] sm:$0xff]  ;;  %v397_v58 = vld [vmem:[#allocation5 + $0x28] sm:$0xff]  ;;  %v6017_v60 = vcombine.low %v401_v49, %v405_v50  ;;  %v6054_v24 = vcombine.high %v435_v19, %v439_v20  ;;  %v430_v26 = vld [vmem:[#allocation5 + $0x130] sm:$0xff]  ;;  %v6051_v29 = vcombine.low %v434_v17, %v438_v18  ;;  %v6053_v30 = vcombine.low %v435_v19, %v439_v20 }
  0xb4   : > { %v6008_v61 = vcombine.high %v392_v55, %v396_v56  ;;  %v6010_v62 = vcombine.high %v393_v57, %v397_v58  ;;  %v6007_v4 = vcombine.low %v392_v55, %v396_v56  ;;  %v6009_v5 = vcombine.low %v393_v57, %v397_v58  ;;  %v427_v27 = vld [vmem:[#allocation5 + $0x118] sm:$0xff]  ;;  %v418_v33 = vld [vmem:[#allocation5 + $0xd0] sm:$0xff]  ;;  %v1284_v8 = vld [vmem:[%s6790_s7 + $0x840] sm:$0xff] }
  0xb5   : > { %831 = vmatpush1.bf16.msra.mxu0 %v6039_v35  ;;  %874 = vmatpush1.bf16.msra.mxu1 %v6041_v36  ;;  %v431_v28 = vld [vmem:[#allocation5 + $0x138] sm:$0xff]  ;;  %v6044_v31 = vcombine.high %v426_v25, %v430_v26  ;;  %v422_v34 = vld [vmem:[#allocation5 + $0xf0] sm:$0xff]  ;;  %v2340_v11 = vunpack.c.h.s8.bf16 %v1284_v8  ;;  %v2316_v17 = vunpack.c.l.s8.bf16 %v1284_v8  ;;  %v1068_v19 = vld [vmem:[%s6790_s7 + $0x180] sm:$0xff] }
  0xb6   : > { %832 = vmatprep.subr.bf16.mxu0 %v6032_v37  ;;  %875 = vmatprep.subr.bf16.mxu1 %v6034_v38  ;;  %v6046_v32 = vcombine.high %v427_v27, %v431_v28  ;;  %v419_v35 = vld [vmem:[#allocation5 + $0xd8] sm:$0xff]  ;;  %v6043_v37 = vcombine.low %v426_v25, %v430_v26  ;;  %v6045_v38 = vcombine.low %v427_v27, %v431_v28  ;;  %v410_v40 = vld [vmem:[#allocation5 + $0x90] sm:$0xff]  ;;  %v1884_v27 = vunpack.c.l.s8.bf16 %v1068_v19 }
  0xb7   : > { %v423_v36 = vld [vmem:[#allocation5 + $0xf8] sm:$0xff]  ;;  %v6036_v39 = vcombine.high %v418_v33, %v422_v34  ;;  %v414_v41 = vld [vmem:[#allocation5 + $0xb0] sm:$0xff] }
  0xb8   : > { %v411_v42 = vld [vmem:[#allocation5 + $0x98] sm:$0xff]  ;;  %v402_v48 = vld [vmem:[#allocation5 + $0x50] sm:$0xff] }
  0xb9   : > { %833 = vmatpush1.bf16.msra.mxu0 %v6031_v43  ;;  %876 = vmatpush1.bf16.msra.mxu1 %v6033_v44  ;;  %v415_v43 = vld [vmem:[#allocation5 + $0xb8] sm:$0xff]  ;;  %v6035_v44 = vcombine.low %v418_v33, %v422_v34  ;;  %v406_v49 = vld [vmem:[#allocation5 + $0x70] sm:$0xff] }
  0xba   : > { %834 = vmatprep.subr.bf16.mxu0 %v6024_v45  ;;  %877 = vmatprep.subr.bf16.mxu1 %v6026_v46  ;;  %v6037_v45 = vcombine.low %v419_v35, %v423_v36  ;;  %v6028_v46 = vcombine.high %v410_v40, %v414_v41  ;;  %v6030_v47 = vcombine.high %v411_v42, %v415_v43  ;;  %v403_v50 = vld [vmem:[#allocation5 + $0x58] sm:$0xff]  ;;  %v394_v56 = vld [vmem:[#allocation5 + $0x10] sm:$0xff] }
  0xbb   : > { %v398_v57 = vld [vmem:[#allocation5 + $0x30] sm:$0xff]  ;;  %v395_v58 = vld [vmem:[#allocation5 + $0x18] sm:$0xff] }
  0xbc   : > { %v1093_v1 = vld [vmem:[%s6790_s7 + $0x248] sm:$0xff]  ;;  %v6011_v3 = vcombine.low %v394_v56, %v398_v57 }
  0xbd   : > { %835 = vmatpush1.bf16.msra.mxu0 %v6023_v51  ;;  %878 = vmatpush1.bf16.msra.mxu1 %v6025_v52  ;;  %v407_v51 = vld [vmem:[#allocation5 + $0x78] sm:$0xff]  ;;  %v6027_v52 = vcombine.low %v410_v40, %v414_v41  ;;  %v1285_v2 = vld [vmem:[%s6790_s7 + $0x848] sm:$0xff]  ;;  %v1933_v12 = vunpack.c.l.s8.bf16 %v1093_v1  ;;  %v1020_v41 = vld [vmem:[%s6790_s7] sm:$0xff] }
  0xbe   : > { %836 = vmatprep.subr.bf16.mxu0 %v6016_v53  ;;  %879 = vmatprep.subr.bf16.mxu1 %v6018_v54  ;;  %v6029_v53 = vcombine.low %v411_v42, %v415_v43  ;;  %v6020_v54 = vcombine.high %v402_v48, %v406_v49  ;;  %v6022_v55 = vcombine.high %v403_v50, %v407_v51  ;;  %v1045_v25 = vld [vmem:[%s6790_s7 + $0xc8] sm:$0xff]  ;;  %v1212_v43 = vld [vmem:[%s6790_s7 + $0x600] sm:$0xff] }
  0xbf   : > { %v1237_v26 = vld [vmem:[%s6790_s7 + $0x6c8] sm:$0xff] }
  0xc1   : > { %837 = vmatpush1.bf16.msra.mxu0 %v6015_v59  ;;  %880 = vmatpush1.bf16.msra.mxu1 %v6017_v60  ;;  %v399_v59 = vld [vmem:[#allocation5 + $0x38] sm:$0xff]  ;;  %v6019_v60 = vcombine.low %v402_v48, %v406_v49  ;;  %v1189_v48 = vld [vmem:[%s6790_s7 + $0x548] sm:$0xff] }
  0xc2   : > { %838 = vmatprep.subr.bf16.mxu0 %v6008_v61  ;;  %881 = vmatprep.subr.bf16.mxu1 %v6010_v62  ;;  %v6021_v61 = vcombine.low %v403_v50, %v407_v51  ;;  %v6012_v62 = vcombine.high %v394_v56, %v398_v57  ;;  %v6014_v63 = vcombine.high %v395_v58, %v399_v59  ;;  %v1381_v49 = vld [vmem:[%s6790_s7 + $0xb48] sm:$0xff]  ;;  %v1788_v50 = vunpack.c.l.s8.bf16 %v1020_v41 }
  0xc3   : > { %v2172_v51 = vunpack.c.l.s8.bf16 %v1212_v43 }
  0xc5   : > { %839 = vmatpush1.bf16.msra.mxu0 %v6007_v4  ;;  %882 = vmatpush1.bf16.msra.mxu1 %v6009_v5  ;;  %v6013_v4 = vcombine.low %v395_v58, %v399_v59  ;;  %v1957_v5 = vunpack.c.h.s8.bf16 %v1093_v1  ;;  %v2125_v58 = vunpack.c.l.s8.bf16 %v1189_v48  ;;  %v2509_v59 = vunpack.c.l.s8.bf16 %v1381_v49 }
  0xc6   : > { %910 = vmatprep.subr.bf16.mxu0 %v6068_v6  ;;  %953 = vmatprep.subr.bf16.mxu1 %v6070_v7  ;;  %v1092_v6 = vld [vmem:[%s6790_s7 + $0x240] sm:$0xff]  ;;  %v2341_v7 = vunpack.c.h.s8.bf16 %v1285_v2 }
  0xc7   : > { %v1956_v9 = vunpack.c.h.s8.bf16 %v1092_v6 }
  0xc8   : > { %857 = vmatmul.mubr.bf16.vlgmr.msra.gmra.mxu0 %v6808_v10  ;;  %900 = vmatmul.mubr.bf16.vlgmr.msra.gmra.mxu1 %v6808_v10 }
  0xc9   : > { %911 = vmatpush1.bf16.msra.mxu0 %v6067_v13  ;;  %954 = vmatpush1.bf16.msra.mxu1 %v6069_v14  ;;  %v2317_v13 = vunpack.c.l.s8.bf16 %v1285_v2  ;;  %v1069_v14 = vld [vmem:[%s6790_s7 + $0x188] sm:$0xff]  ;;  %v1164_v2 = vld [vmem:[%s6790_s7 + $0x480] sm:$0xff] }
  0xca   : > { %912 = vmatprep.subr.bf16.mxu0 %v6060_v15  ;;  %955 = vmatprep.subr.bf16.mxu1 %v6062_v16  ;;  %v1261_v15 = vld [vmem:[%s6790_s7 + $0x788] sm:$0xff]  ;;  %v1932_v16 = vunpack.c.l.s8.bf16 %v1092_v6  ;;  %v1909_v18 = vunpack.c.h.s8.bf16 %v1069_v14 }
  0xcb   : > { %942 = vmatprep.mubr.bf16.mxu0 %v6538_v0  ;;  %985 = vmatprep.mubr.bf16.mxu1 %v6538_v0  ;;  %v6038_v0 = vcombine.high %v419_v35, %v423_v36  ;;  %v2293_v20 = vunpack.c.h.s8.bf16 %v1261_v15  ;;  %v1837_v35 = vunpack.c.l.s8.bf16 %v1045_v25  ;;  %v2221_v36 = vunpack.c.l.s8.bf16 %v1237_v26 }
  0xcd   : > { %913 = vmatpush1.bf16.msra.mxu0 %v6059_v21  ;;  %956 = vmatpush1.bf16.msra.mxu1 %v6061_v22  ;;  %v1260_v21 = vld [vmem:[%s6790_s7 + $0x780] sm:$0xff]  ;;  %v1908_v22 = vunpack.c.h.s8.bf16 %v1068_v19 }
  0xce   : > { %914 = vmatprep.subr.bf16.mxu0 %v6052_v23  ;;  %957 = vmatprep.subr.bf16.mxu1 %v6054_v24  ;;  %v2292_v23 = vunpack.c.h.s8.bf16 %v1260_v21  ;;  %v2269_v24 = vunpack.c.l.s8.bf16 %v1261_v15  ;;  %v2268_v28 = vunpack.c.l.s8.bf16 %v1260_v21  ;;  %v1140_v15 = vld [vmem:[%s6790_s7 + $0x3c0] sm:$0xff] }
  0xd1   : > { %915 = vmatpush1.bf16.msra.mxu0 %v6051_v29  ;;  %958 = vmatpush1.bf16.msra.mxu1 %v6053_v30  ;;  %v1861_v29 = vunpack.c.h.s8.bf16 %v1045_v25  ;;  %v1044_v30 = vld [vmem:[%s6790_s7 + $0xc0] sm:$0xff] }
  0xd2   : > { %916 = vmatprep.subr.bf16.mxu0 %v6044_v31  ;;  %959 = vmatprep.subr.bf16.mxu1 %v6046_v32  ;;  %v2245_v31 = vunpack.c.h.s8.bf16 %v1237_v26  ;;  %v1236_v32 = vld [vmem:[%s6790_s7 + $0x6c0] sm:$0xff]  ;;  %v1860_v33 = vunpack.c.h.s8.bf16 %v1044_v30 }
  0xd3   : > { %v2244_v34 = vunpack.c.h.s8.bf16 %v1236_v32  ;;  %v1116_v26 = vld [vmem:[%s6790_s7 + $0x300] sm:$0xff] }
  0xd5   : > { %917 = vmatpush1.bf16.msra.mxu0 %v6043_v37  ;;  %960 = vmatpush1.bf16.msra.mxu1 %v6045_v38  ;;  %v1021_v37 = vld [vmem:[%s6790_s7 + $0x8] sm:$0xff] }
  0xd6   : > { %918 = vmatprep.subr.bf16.mxu0 %v6036_v39  ;;  %961 = vmatprep.subr.bf16.mxu1 %v6038_v0  ;;  %v1213_v38 = vld [vmem:[%s6790_s7 + $0x608] sm:$0xff]  ;;  %v1836_v39 = vunpack.c.l.s8.bf16 %v1044_v30  ;;  %v2220_v0 = vunpack.c.l.s8.bf16 %v1236_v32  ;;  %v1813_v40 = vunpack.c.h.s8.bf16 %v1021_v37 }
  0xd7   : > { %v2197_v42 = vunpack.c.h.s8.bf16 %v1213_v38 }
  0xd9   : > { %919 = vmatpush1.bf16.msra.mxu0 %v6035_v44  ;;  %962 = vmatpush1.bf16.msra.mxu1 %v6037_v45  ;;  %v1812_v44 = vunpack.c.h.s8.bf16 %v1020_v41  ;;  %v2196_v45 = vunpack.c.h.s8.bf16 %v1212_v43  ;;  %v6867_v43 = vld [vmem:[#allocation7] sm:$0xff] }
  0xda   : > { %920 = vmatprep.subr.bf16.mxu0 %v6028_v46  ;;  %963 = vmatprep.subr.bf16.mxu1 %v6030_v47  ;;  %v1789_v46 = vunpack.c.l.s8.bf16 %v1021_v37  ;;  %v2173_v47 = vunpack.c.l.s8.bf16 %v1213_v38 }
  0xdd   : > { %921 = vmatpush1.bf16.msra.mxu0 %v6027_v52  ;;  %964 = vmatpush1.bf16.msra.mxu1 %v6029_v53  ;;  %v2149_v52 = vunpack.c.h.s8.bf16 %v1189_v48  ;;  %v1188_v53 = vld [vmem:[%s6790_s7 + $0x540] sm:$0xff] }
  0xde   : > { %922 = vmatprep.subr.bf16.mxu0 %v6020_v54  ;;  %965 = vmatprep.subr.bf16.mxu1 %v6022_v55  ;;  %v2533_v54 = vunpack.c.h.s8.bf16 %v1381_v49  ;;  %v1380_v55 = vld [vmem:[%s6790_s7 + $0xb40] sm:$0xff]  ;;  %v2148_v56 = vunpack.c.h.s8.bf16 %v1188_v53 }
  0xdf   : > { %v2532_v57 = vunpack.c.h.s8.bf16 %v1380_v55 }
  0xe1   : > { %923 = vmatpush1.bf16.msra.mxu0 %v6019_v60  ;;  %966 = vmatpush1.bf16.msra.mxu1 %v6021_v61  ;;  %v1165_v60 = vld [vmem:[%s6790_s7 + $0x488] sm:$0xff] }
  0xe2   : > { %924 = vmatprep.subr.bf16.mxu0 %v6012_v62  ;;  %967 = vmatprep.subr.bf16.mxu1 %v6014_v63  ;;  %v1357_v61 = vld [vmem:[%s6790_s7 + $0xa88] sm:$0xff]  ;;  %v2124_v62 = vunpack.c.l.s8.bf16 %v1188_v53  ;;  %v2508_v63 = vunpack.c.l.s8.bf16 %v1380_v55  ;;  %v2101_v1 = vunpack.c.h.s8.bf16 %v1165_v60 }
  0xe3   : > { %v2461_v8 = vunpack.c.l.s8.bf16 %v1357_v61 }
  0xe5   : > { %925 = vmatpush1.bf16.msra.mxu0 %v6011_v3  ;;  %968 = vmatpush1.bf16.msra.mxu1 %v6013_v4  ;;  %v2485_v3 = vunpack.c.h.s8.bf16 %v1357_v61  ;;  %v1356_v4 = vld [vmem:[%s6790_s7 + $0xa80] sm:$0xff] }
  0xe6   : > { %3324 = vmatprep.subr.bf16.mxu0 %v1957_v5  ;;  %3367 = vmatprep.subr.bf16.mxu1 %v2341_v7  ;;  %v2100_v5 = vunpack.c.h.s8.bf16 %v1164_v2  ;;  %v2484_v6 = vunpack.c.h.s8.bf16 %v1356_v4  ;;  %v2077_v7 = vunpack.c.l.s8.bf16 %v1165_v60 }
  0xe8   : > { %943 = vmatmul.mubr.bf16.vlgmr.msra.gmra.mxu0 %v6808_v10  ;;  %986 = vmatmul.mubr.bf16.vlgmr.msra.gmra.mxu1 %v6808_v10  ;;  %v1885_v10 = vunpack.c.l.s8.bf16 %v1069_v14 }
  0xe9   : > { %3325 = vmatpush1.bf16.msra.mxu0 %v1956_v9  ;;  %3368 = vmatpush1.bf16.msra.mxu1 %v2340_v11  ;;  %v1141_v9 = vld [vmem:[%s6790_s7 + $0x3c8] sm:$0xff] }
  0xea   : > { %3326 = vmatprep.subr.bf16.mxu0 %v1933_v12  ;;  %3369 = vmatprep.subr.bf16.mxu1 %v2317_v13  ;;  %v1333_v11 = vld [vmem:[%s6790_s7 + $0x9c8] sm:$0xff]  ;;  %v2076_v12 = vunpack.c.l.s8.bf16 %v1164_v2  ;;  %v2460_v13 = vunpack.c.l.s8.bf16 %v1356_v4  ;;  %v2053_v14 = vunpack.c.h.s8.bf16 %v1141_v9 }
  0xeb   : > { %v2413_v21 = vunpack.c.l.s8.bf16 %v1333_v11 }
  0xed   : > { %3327 = vmatpush1.bf16.msra.mxu0 %v1932_v16  ;;  %3370 = vmatpush1.bf16.msra.mxu1 %v2316_v17  ;;  %v2437_v16 = vunpack.c.h.s8.bf16 %v1333_v11  ;;  %v1332_v17 = vld [vmem:[%s6790_s7 + $0x9c0] sm:$0xff] }
  0xee   : > { %3328 = vmatprep.subr.bf16.mxu0 %v1909_v18  ;;  %3371 = vmatprep.subr.bf16.mxu1 %v2293_v20  ;;  %v2052_v18 = vunpack.c.h.s8.bf16 %v1140_v15  ;;  %v2436_v19 = vunpack.c.h.s8.bf16 %v1332_v17  ;;  %v2029_v20 = vunpack.c.l.s8.bf16 %v1141_v9 }
  0xf1   : > { %3329 = vmatpush1.bf16.msra.mxu0 %v1908_v22  ;;  %3372 = vmatpush1.bf16.msra.mxu1 %v2292_v23  ;;  %v1117_v22 = vld [vmem:[%s6790_s7 + $0x308] sm:$0xff] }
  0xf2   : > { %3330 = vmatprep.subr.bf16.mxu0 %v1885_v10  ;;  %3373 = vmatprep.subr.bf16.mxu1 %v2269_v24  ;;  %v1309_v23 = vld [vmem:[%s6790_s7 + $0x908] sm:$0xff]  ;;  %v2028_v10 = vunpack.c.l.s8.bf16 %v1140_v15  ;;  %v2412_v24 = vunpack.c.l.s8.bf16 %v1332_v17  ;;  %v2005_v25 = vunpack.c.h.s8.bf16 %v1117_v22 }
  0xf3   : > { %v2365_v32 = vunpack.c.l.s8.bf16 %v1309_v23 }
  0xf5   : > { %3331 = vmatpush1.bf16.msra.mxu0 %v1884_v27  ;;  %3374 = vmatpush1.bf16.msra.mxu1 %v2268_v28  ;;  %v2389_v27 = vunpack.c.h.s8.bf16 %v1309_v23  ;;  %v1308_v28 = vld [vmem:[%s6790_s7 + $0x900] sm:$0xff] }
  0xf6   : > { %3332 = vmatprep.subr.bf16.mxu0 %v1861_v29  ;;  %3375 = vmatprep.subr.bf16.mxu1 %v2245_v31  ;;  %v2004_v29 = vunpack.c.h.s8.bf16 %v1116_v26  ;;  %v2388_v30 = vunpack.c.h.s8.bf16 %v1308_v28  ;;  %v1981_v31 = vunpack.c.l.s8.bf16 %v1117_v22  ;;  %v1645_v22 = vld [vmem:[%s6790_s7 + $0x1388] sm:$0xff] }
  0xf9   : > { %3333 = vmatpush1.bf16.msra.mxu0 %v1860_v33  ;;  %3376 = vmatpush1.bf16.msra.mxu1 %v2244_v34  ;;  %v6849_v33 = vld [vmem:[%s6790_s7 + $0xe48] sm:$0xff] }
  0xfa   : > { %3334 = vmatprep.subr.bf16.mxu0 %v1837_v35  ;;  %3377 = vmatprep.subr.bf16.mxu1 %v2221_v36  ;;  %v6852_v34 = vld [vmem:[%s6790_s7 + $0x1448] sm:$0xff]  ;;  %v1980_v35 = vunpack.c.l.s8.bf16 %v1116_v26  ;;  %v2364_v36 = vunpack.c.l.s8.bf16 %v1308_v28  ;;  %v2725_v37 = vunpack.c.h.s8.bf16 %v6849_v33  ;;  %v3061_v26 = vunpack.c.h.s8.bf16 %v1645_v22 }
  0xfb   : > { %v3109_v38 = vunpack.c.h.s8.bf16 %v6852_v34 }
  0xfd   : > { %3335 = vmatpush1.bf16.msra.mxu0 %v1836_v39  ;;  %3378 = vmatpush1.bf16.msra.mxu1 %v2220_v0  ;;  %v458_v39 = vlaneseq }
  0xfe   : > { %3336 = vmatprep.subr.bf16.mxu0 %v1813_v40  ;;  %3379 = vmatprep.subr.bf16.mxu1 %v2197_v42 }
  0xff   : > { %v6856_v0 = vshrl.u32 %v458_v39, 7  ;;  %v1620_v39 = vld [vmem:[%s6790_s7 + $0x12c0] sm:$0xff] }
 0x101   : > { %3337 = vmatpush1.bf16.msra.mxu0 %v1812_v44  ;;  %3380 = vmatpush1.bf16.msra.mxu1 %v2196_v45  ;;  %v6859_v40 = vsub.s32 1, %v6856_v0  ;;  %v6862_v41 = vsub.s32 0, %v6856_v0  ;;  %v6865_v42 = vsub.s32 3, %v6856_v0  ;;  %v6870_v44 = vsub.s32 2, %v6856_v0 }
 0x102   : > { %3338 = vmatprep.subr.bf16.mxu0 %v1789_v46  ;;  %3381 = vmatprep.subr.bf16.mxu1 %v2173_v47 }
 0x103   : > { %v465_v47 = vrot.slane %v6867_v43, %v6859_v40  ;;  %v461_v48 = vrot.slane %v6867_v43, %v6862_v41 }
 0x105   : > { %3339 = vmatpush1.bf16.msra.mxu0 %v1788_v50  ;;  %3382 = vmatpush1.bf16.msra.mxu1 %v2172_v51  ;;  %v473_v50 = vrot.slane %v6867_v43, %v6865_v42  ;;  %v469_v51 = vrot.slane %v6867_v43, %v6870_v44 }
 0x106   : > { %3340 = vmatprep.subr.bf16.mxu0 %v2149_v52  ;;  %3383 = vmatprep.subr.bf16.mxu1 %v2533_v54 }
 0x109   : > { %3341 = vmatpush2.bf16.msra.mxu0 %v2148_v56  ;;  %3384 = vmatpush2.bf16.msra.mxu1 %v2532_v57 }
 0x10a   : > { %3342 = vmatprep.subr.bf16.mxu0 %v2125_v58  ;;  %3385 = vmatprep.subr.bf16.mxu1 %v2509_v59 }
 0x10d   : > { %3343 = vmatpush2.bf16.msra.mxu0 %v2124_v62  ;;  %3386 = vmatpush2.bf16.msra.mxu1 %v2508_v63 }
 0x10e   : > { %3344 = vmatprep.subr.bf16.mxu0 %v2101_v1  ;;  %3387 = vmatprep.subr.bf16.mxu1 %v2485_v3  ;;  %v1476_v3 = vld [vmem:[%s6790_s7 + $0xe40] sm:$0xff] }
 0x10f   : > { %v2700_v23 = vunpack.c.l.s8.bf16 %v1476_v3 }
 0x111   : > { %3345 = vmatpush2.bf16.msra.mxu0 %v2100_v5  ;;  %3388 = vmatpush2.bf16.msra.mxu1 %v2484_v6 }
 0x112   : > { %3346 = vmatprep.subr.bf16.mxu0 %v2077_v7  ;;  %3389 = vmatprep.subr.bf16.mxu1 %v2461_v8  ;;  %v1668_v7 = vld [vmem:[%s6790_s7 + $0x1440] sm:$0xff] }
 0x113   : > { %v3108_v17 = vunpack.c.h.s8.bf16 %v1668_v7 }
 0x115   : > { %3347 = vmatpush2.bf16.msra.mxu0 %v2076_v12  ;;  %3390 = vmatpush2.bf16.msra.mxu1 %v2460_v13 }
 0x116   : > { %3348 = vmatprep.subr.bf16.mxu0 %v2053_v14  ;;  %3391 = vmatprep.subr.bf16.mxu1 %v2437_v16  ;;  %v2724_v14 = vunpack.c.h.s8.bf16 %v1476_v3 }
 0x119   : > { %3349 = vmatpush2.bf16.msra.mxu0 %v2052_v18  ;;  %3392 = vmatpush2.bf16.msra.mxu1 %v2436_v19  ;;  %v2701_v18 = vunpack.c.l.s8.bf16 %v6849_v33  ;;  %v1621_v33 = vld [vmem:[%s6790_s7 + $0x12c8] sm:$0xff] }
 0x11a   : > { %3350 = vmatprep.subr.bf16.mxu0 %v2029_v20  ;;  %3393 = vmatprep.subr.bf16.mxu1 %v2413_v21  ;;  %v3085_v20 = vunpack.c.l.s8.bf16 %v6852_v34  ;;  %v1453_v21 = vld [vmem:[%s6790_s7 + $0xd88] sm:$0xff] }
 0x11d   : > { %3351 = vmatpush2.bf16.msra.mxu0 %v2028_v10  ;;  %3394 = vmatpush2.bf16.msra.mxu1 %v2412_v24  ;;  %v3084_v10 = vunpack.c.l.s8.bf16 %v1668_v7  ;;  %v2677_v24 = vunpack.c.h.s8.bf16 %v1453_v21 }
 0x11e   : > { %3352 = vmatprep.subr.bf16.mxu0 %v2005_v25  ;;  %3395 = vmatprep.subr.bf16.mxu1 %v2389_v27  ;;  %v1452_v25 = vld [vmem:[%s6790_s7 + $0xd80] sm:$0xff] }
 0x11f   : > { %v1644_v27 = vld [vmem:[%s6790_s7 + $0x1380] sm:$0xff]  ;;  %v2676_v28 = vunpack.c.h.s8.bf16 %v1452_v25  ;;  %v2652_v34 = vunpack.c.l.s8.bf16 %v1452_v25 }
 0x121   : > { %3353 = vmatpush2.bf16.msra.mxu0 %v2004_v29  ;;  %3396 = vmatpush2.bf16.msra.mxu1 %v2388_v30  ;;  %v3060_v29 = vunpack.c.h.s8.bf16 %v1644_v27  ;;  %v2653_v30 = vunpack.c.l.s8.bf16 %v1453_v21 }
 0x122   : > { %3354 = vmatprep.subr.bf16.mxu0 %v1981_v31  ;;  %3397 = vmatprep.subr.bf16.mxu1 %v2365_v32  ;;  %v3037_v31 = vunpack.c.l.s8.bf16 %v1645_v22  ;;  %v1429_v32 = vld [vmem:[%s6790_s7 + $0xcc8] sm:$0xff] }
 0x125   : > { %3355 = vmatpush2.bf16.msra.mxu0 %v1980_v35  ;;  %3398 = vmatpush2.bf16.msra.mxu1 %v2364_v36  ;;  %v3036_v35 = vunpack.c.l.s8.bf16 %v1644_v27  ;;  %v2629_v36 = vunpack.c.h.s8.bf16 %v1429_v32  ;;  %v1764_v27 = vld [vmem:[%s6790_s7 + $0x1740] sm:$0xff] }
 0x126   : > { %3410 = vmatprep.subr.bf16.mxu0 %v2725_v37  ;;  %3453 = vmatprep.subr.bf16.mxu1 %v3109_v38  ;;  %v1428_v37 = vld [vmem:[%s6790_s7 + $0xcc0] sm:$0xff]  ;;  %v3013_v38 = vunpack.c.h.s8.bf16 %v1621_v33 }
 0x188   : > { %v858_v45 = vpop.f32.mrf.mxu0  ;;  %v901_v46 = vpop.f32.mrf.mxu1 }
 0x189   : > { %v859_v57 = vadd.f32 %v858_v45, %v461_v48  ;;  %v902_v61 = vadd.f32 %v901_v46, %v469_v51  ;;  %v2628_v45 = vunpack.c.h.s8.bf16 %v1428_v37  ;;  %v6905_v46 = vsub.s32 5, %v6856_v0 }
 0x18a   : > { %v860_v49 = vpop.f32.mrf.mxu0  ;;  %v903_v52 = vpop.f32.mrf.mxu1 }
 0x18b   : > { %v861_v54 = vadd.f32 %v860_v49, %v465_v47  ;;  %v904_v58 = vadd.f32 %v903_v52, %v473_v50  ;;  %v996_v8 = vmax.f32 %v859_v57, 0.0  ;;  %v998_v12 = vmax.f32 %v902_v61, 0.0  ;;  %v1597_v52 = vld [vmem:[%s6790_s7 + $0x1208] sm:$0xff]  ;;  %v1404_v57 = vld [vmem:[%s6790_s7 + $0xc00] sm:$0xff] }
 0x18c   : > { %v862_v53 = vpop.f32.mrf.mxu0  ;;  %v905_v56 = vpop.f32.mrf.mxu1  ;;  %v6908_v49 = vsub.s32 7, %v6856_v0  ;;  %v1596_v61 = vld [vmem:[%s6790_s7 + $0x1200] sm:$0xff] }
 0x18d   : > { %v863_v55 = vadd.f32 %v862_v53, %v461_v48  ;;  %v906_v59 = vadd.f32 %v905_v56, %v469_v51  ;;  %v997_v4 = vmax.f32 %v861_v54, 0.0  ;;  %v999_v9 = vmax.f32 %v904_v58, 0.0  ;;  %v1405_v51 = vld [vmem:[%s6790_s7 + $0xc08] sm:$0xff] }
 0x18e   : > { %v864_v60 = vpop.f32.mrf.mxu0  ;;  %v907_v63 = vpop.f32.mrf.mxu1  ;;  %v2605_v48 = vunpack.c.l.s8.bf16 %v1429_v32  ;;  %v2604_v53 = vunpack.c.l.s8.bf16 %v1428_v37  ;;  %v481_v54 = vrot.slane %v6867_v43, %v6905_v46  ;;  %v2581_v56 = vunpack.c.h.s8.bf16 %v1405_v51  ;;  %v1741_v37 = vld [vmem:[%s6790_s7 + $0x1688] sm:$0xff] }
 0x18f   : > { %v865_v62 = vadd.f32 %v864_v60, %v465_v47  ;;  %v1004_v1 = vmax.f32 %v863_v55, 0.0  ;;  %v908_v2 = vadd.f32 %v907_v63, %v473_v50  ;;  %v1006_v5 = vmax.f32 %v906_v59, 0.0 }
 0x190   : > { %v3012_v47 = vunpack.c.h.s8.bf16 %v1620_v39  ;;  %v2989_v50 = vunpack.c.l.s8.bf16 %v1621_v33  ;;  %v2988_v55 = vunpack.c.l.s8.bf16 %v1620_v39  ;;  %v489_v59 = vrot.slane %v6867_v43, %v6908_v49 }
 0x191   : > { %v1005_v6 = vmax.f32 %v865_v62, 0.0  ;;  %v1007_v11 = vmax.f32 %v908_v2, 0.0  ;;  %v6884_v15 = vpack.c.bf16 %v1004_v1, %v996_v8  ;;  %v6889_v19 = vpack.c.bf16 %v1006_v5, %v998_v12  ;;  %v1765_v12 = vld [vmem:[%s6790_s7 + $0x1748] sm:$0xff] }
 0x192   : > { %v2965_v60 = vunpack.c.h.s8.bf16 %v1597_v52  ;;  %v2580_v1 = vunpack.c.h.s8.bf16 %v1404_v57  ;;  %v2557_v5 = vunpack.c.l.s8.bf16 %v1405_v51  ;;  %v2941_v8 = vunpack.c.l.s8.bf16 %v1597_v52 }
 0x193   : > { %v6882_v13 = vpack.c.bf16 %v1005_v6, %v997_v4  ;;  %v6886_v16 = vpack.c.bf16 %v1007_v11, %v999_v9  ;;  %v2964_v4 = vunpack.c.h.s8.bf16 %v1596_v61  ;;  %v1573_v9 = vld [vmem:[%s6790_s7 + $0x1148] sm:$0xff]  ;;  %v2940_v22 = vunpack.c.l.s8.bf16 %v1596_v61  ;;  %v1524_v61 = vld [vmem:[%s6790_s7 + $0xfc0] sm:$0xff] }
 0x194   : > { %v3300_v32 = vunpack.c.h.s8.bf16 %v1764_v27  ;;  %v2893_v33 = vunpack.c.l.s8.bf16 %v1573_v9  ;;  %v3276_v39 = vunpack.c.l.s8.bf16 %v1764_v27 }
 0x195   : > { %3356 = vmatprep.mubr.bf16.mxu0 %v6882_v13  ;;  %3399 = vmatprep.mubr.bf16.mxu1 %v6886_v16 }
 0x196   : > { %3357 = vmatmul.mubr.bf16.vlgmr.msra.gmra.mxu0 %v6884_v15  ;;  %3400 = vmatmul.mubr.bf16.vlgmr.msra.gmra.mxu1 %v6889_v19 }
 0x197   : > { %3411 = vmatpush1.bf16.msra.mxu0 %v2724_v14  ;;  %3454 = vmatpush1.bf16.msra.mxu1 %v3108_v17  ;;  %v2556_v17 = vunpack.c.l.s8.bf16 %v1404_v57 }
 0x198   : > { %3412 = vmatprep.subr.bf16.mxu0 %v2701_v18  ;;  %3455 = vmatprep.subr.bf16.mxu1 %v3085_v20 }
 0x19b   : > { %3413 = vmatpush1.bf16.msra.mxu0 %v2700_v23  ;;  %3456 = vmatpush1.bf16.msra.mxu1 %v3084_v10  ;;  %v2917_v23 = vunpack.c.h.s8.bf16 %v1573_v9  ;;  %v1572_v10 = vld [vmem:[%s6790_s7 + $0x1140] sm:$0xff]  ;;  %v1501_v9 = vld [vmem:[%s6790_s7 + $0xf08] sm:$0xff] }
 0x19c   : > { %3414 = vmatprep.subr.bf16.mxu0 %v2677_v24  ;;  %3457 = vmatprep.subr.bf16.mxu1 %v3061_v26  ;;  %v3301_v26 = vunpack.c.h.s8.bf16 %v1765_v12  ;;  %v2749_v27 = vunpack.c.l.s8.bf16 %v1501_v9 }
 0x19f   : > { %3415 = vmatpush1.bf16.msra.mxu0 %v2676_v28  ;;  %3458 = vmatpush1.bf16.msra.mxu1 %v3060_v29 }
 0x1a0   : > { %3416 = vmatprep.subr.bf16.mxu0 %v2653_v30  ;;  %3459 = vmatprep.subr.bf16.mxu1 %v3037_v31  ;;  %v2916_v30 = vunpack.c.h.s8.bf16 %v1572_v10 }
 0x1a3   : > { %3417 = vmatpush1.bf16.msra.mxu0 %v2652_v34  ;;  %3460 = vmatpush1.bf16.msra.mxu1 %v3036_v35  ;;  %v3277_v35 = vunpack.c.l.s8.bf16 %v1765_v12  ;;  %v1693_v12 = vld [vmem:[%s6790_s7 + $0x1508] sm:$0xff] }
 0x1a4   : > { %3418 = vmatprep.subr.bf16.mxu0 %v2629_v36  ;;  %3461 = vmatprep.subr.bf16.mxu1 %v3013_v38  ;;  %v1549_v36 = vld [vmem:[%s6790_s7 + $0x1088] sm:$0xff]  ;;  %v2892_v38 = vunpack.c.l.s8.bf16 %v1572_v10 }
 0x1a7   : > { %3419 = vmatpush1.bf16.msra.mxu0 %v2628_v45  ;;  %3462 = vmatpush1.bf16.msra.mxu1 %v3012_v47  ;;  %v2869_v45 = vunpack.c.h.s8.bf16 %v1549_v36  ;;  %v1548_v47 = vld [vmem:[%s6790_s7 + $0x1080] sm:$0xff] }
 0x1a8   : > { %3420 = vmatprep.subr.bf16.mxu0 %v2605_v48  ;;  %v6915_v58 = vpop.f32.mrf.mxu0  ;;  %3463 = vmatprep.subr.bf16.mxu1 %v2989_v50  ;;  %v6920_v62 = vpop.f32.mrf.mxu1  ;;  %v3253_v48 = vunpack.c.h.s8.bf16 %v1741_v37  ;;  %v1740_v50 = vld [vmem:[%s6790_s7 + $0x1680] sm:$0xff]  ;;  %v2868_v51 = vunpack.c.h.s8.bf16 %v1548_v47  ;;  %v2844_v57 = vunpack.c.l.s8.bf16 %v1548_v47 }
 0x1a9   : > { %v3252_v52 = vunpack.c.h.s8.bf16 %v1740_v50 }
 0x1aa   : > { %v946_v63 = vpop.f32.mrf.mxu0  ;;  %v989_v3 = vpop.f32.mrf.mxu1 }
 0x1ab   : > { %3421 = vmatpush1.bf16.msra.mxu0 %v2604_v53  ;;  %v947_v2 = vadd.f32 %v946_v63, %v481_v54  ;;  %3464 = vmatpush1.bf16.msra.mxu1 %v2988_v55  ;;  %v990_v7 = vadd.f32 %v989_v3, %v489_v59  ;;  %v2845_v53 = vunpack.c.l.s8.bf16 %v1549_v36  ;;  %v1525_v55 = vld [vmem:[%s6790_s7 + $0xfc8] sm:$0xff]  ;;  %v6945_v3 = vsub.s32 4, %v6856_v0 }
 0x1ac   : > { %3422 = vmatprep.subr.bf16.mxu0 %v2581_v56  ;;  %v6922_v6 = vpop.f32.mrf.mxu0  ;;  %3465 = vmatprep.subr.bf16.mxu1 %v2965_v60  ;;  %v6925_v11 = vpop.f32.mrf.mxu1  ;;  %v1717_v56 = vld [vmem:[%s6790_s7 + $0x15c8] sm:$0xff]  ;;  %v2821_v60 = vunpack.c.h.s8.bf16 %v1525_v55 }
 0x1ad   : > { %v1001_v18 = vmax.f32 %v947_v2, 0.0  ;;  %v1003_v24 = vmax.f32 %v990_v7, 0.0  ;;  %v3205_v63 = vunpack.c.h.s8.bf16 %v1717_v56  ;;  %v2820_v2 = vunpack.c.h.s8.bf16 %v1524_v61 }
 0x1ae   : > { %v950_v14 = vpop.f32.mrf.mxu0  ;;  %v993_v21 = vpop.f32.mrf.mxu1  ;;  %v6948_v7 = vsub.s32 6, %v6856_v0  ;;  %v3157_v0 = vunpack.c.h.s8.bf16 %v1693_v12 }
 0x1af   : > { %3423 = vmatpush1.bf16.msra.mxu0 %v2580_v1  ;;  %v951_v20 = vadd.f32 %v950_v14, %v481_v54  ;;  %3466 = vmatpush1.bf16.msra.mxu1 %v2964_v4  ;;  %v994_v25 = vadd.f32 %v993_v21, %v489_v59  ;;  %v3229_v54 = vunpack.c.l.s8.bf16 %v1741_v37  ;;  %v3228_v59 = vunpack.c.l.s8.bf16 %v1740_v50  ;;  %v1716_v1 = vld [vmem:[%s6790_s7 + $0x15c0] sm:$0xff]  ;;  %v1094_v37 = vld [vmem:[%s6790_s7 + $0x250] sm:$0xff] }
 0x1b0   : > { %3424 = vmatprep.subr.bf16.mxu0 %v2557_v5  ;;  %3467 = vmatprep.subr.bf16.mxu1 %v2941_v8  ;;  %v3204_v4 = vunpack.c.h.s8.bf16 %v1716_v1  ;;  %v2797_v5 = vunpack.c.l.s8.bf16 %v1525_v55  ;;  %v3181_v8 = vunpack.c.l.s8.bf16 %v1717_v56  ;;  %v2796_v14 = vunpack.c.l.s8.bf16 %v1524_v61  ;;  %v1500_v21 = vld [vmem:[%s6790_s7 + $0xf00] sm:$0xff]  ;;  %v1262_v61 = vld [vmem:[%s6790_s7 + $0x790] sm:$0xff] }
 0x1b1   : > { %v1009_v28 = vmax.f32 %v951_v20, 0.0  ;;  %v1011_v29 = vmax.f32 %v994_v25, 0.0  ;;  %v2773_v20 = vunpack.c.h.s8.bf16 %v1501_v9  ;;  %v2772_v10 = vunpack.c.h.s8.bf16 %v1500_v21 }
 0x1b2   : > { %v1934_v55 = vunpack.c.l.s8.bf16 %v1094_v37 }
 0x1b3   : > { %3425 = vmatpush1.bf16.msra.mxu0 %v2556_v17  ;;  %v6930_v31 = vpack.c.bf16 %v1009_v28, %v1001_v18  ;;  %3468 = vmatpush1.bf16.msra.mxu1 %v2940_v22  ;;  %v6932_v34 = vpack.c.bf16 %v1011_v29, %v1003_v24  ;;  %v477_v17 = vrot.slane %v6867_v43, %v6945_v3  ;;  %v3180_v18 = vunpack.c.l.s8.bf16 %v1716_v1 }
 0x1b4   : > { %3426 = vmatprep.subr.bf16.mxu0 %v2917_v23  ;;  %3469 = vmatprep.subr.bf16.mxu1 %v3301_v26  ;;  %v485_v22 = vrot.slane %v6867_v43, %v6948_v7  ;;  %v1692_v23 = vld [vmem:[%s6790_s7 + $0x1500] sm:$0xff]  ;;  %v3133_v29 = vunpack.c.l.s8.bf16 %v1693_v12  ;;  %v2294_v1 = vunpack.c.h.s8.bf16 %v1262_v61  ;;  %v2270_v12 = vunpack.c.l.s8.bf16 %v1262_v61  ;;  %v1358_v61 = vld [vmem:[%s6790_s7 + $0xa90] sm:$0xff] }
 0x1b5   : > { %3442 = vmatprep.mubr.bf16.mxu0 %v6930_v31  ;;  %3485 = vmatprep.mubr.bf16.mxu1 %v6932_v34  ;;  %v945_v24 = vadd.f32 %v6915_v58, %v477_v17  ;;  %v949_v25 = vadd.f32 %v6922_v6, %v477_v17  ;;  %v3156_v26 = vunpack.c.h.s8.bf16 %v1692_v23  ;;  %v3132_v6 = vunpack.c.l.s8.bf16 %v1692_v23  ;;  %v1046_v17 = vld [vmem:[%s6790_s7 + $0xd0] sm:$0xff] }
 0x1b6   : > { %v988_v28 = vadd.f32 %v6920_v62, %v485_v22  ;;  %v992_v43 = vadd.f32 %v6925_v11, %v485_v22  ;;  %v1286_v11 = vld [vmem:[%s6790_s7 + $0x850] sm:$0xff] }
 0x1b7   : > { %3427 = vmatpush2.bf16.msra.mxu0 %v2916_v30  ;;  %3470 = vmatpush2.bf16.msra.mxu1 %v3300_v32  ;;  %v1095_v30 = vld [vmem:[%s6790_s7 + $0x258] sm:$0xff]  ;;  %v1008_v58 = vmax.f32 %v949_v25, 0.0  ;;  %v2318_v56 = vunpack.c.l.s8.bf16 %v1286_v11  ;;  %v1838_v25 = vunpack.c.l.s8.bf16 %v1046_v17 }
 0x1b8   : > { %3428 = vmatprep.subr.bf16.mxu0 %v2893_v33  ;;  %3471 = vmatprep.subr.bf16.mxu1 %v3277_v35  ;;  %v1287_v32 = vld [vmem:[%s6790_s7 + $0x858] sm:$0xff]  ;;  %v2748_v33 = vunpack.c.l.s8.bf16 %v1500_v21  ;;  %v1000_v35 = vmax.f32 %v945_v24, 0.0  ;;  %v1959_v36 = vunpack.c.h.s8.bf16 %v1095_v30  ;;  %v1862_v21 = vunpack.c.h.s8.bf16 %v1046_v17  ;;  %v1142_v17 = vld [vmem:[%s6790_s7 + $0x3d0] sm:$0xff] }
 0x1b9   : > { %v2343_v62 = vunpack.c.h.s8.bf16 %v1287_v32  ;;  %v1215_v24 = vld [vmem:[%s6790_s7 + $0x618] sm:$0xff] }
 0x1ba   : > { %v6966_v47 = vpack.c.bf16 %v1008_v58, %v1000_v35  ;;  %v2175_v35 = vunpack.c.l.s8.bf16 %v1215_v24  ;;  %v1191_v58 = vld [vmem:[%s6790_s7 + $0x558] sm:$0xff] }
 0x1bb   : > { %3429 = vmatpush2.bf16.msra.mxu0 %v2892_v38  ;;  %3472 = vmatpush2.bf16.msra.mxu1 %v3276_v39  ;;  %v1002_v38 = vmax.f32 %v988_v28, 0.0  ;;  %v1010_v39 = vmax.f32 %v992_v43, 0.0  ;;  %v1022_v28 = vld [vmem:[%s6790_s7 + $0x10] sm:$0xff]  ;;  %v2199_v43 = vunpack.c.h.s8.bf16 %v1215_v24  ;;  %v1311_v24 = vld [vmem:[%s6790_s7 + $0x918] sm:$0xff] }
 0x1bc   : > { %3430 = vmatprep.subr.bf16.mxu0 %v2869_v45  ;;  %3473 = vmatprep.subr.bf16.mxu1 %v3253_v48  ;;  %v1958_v45 = vunpack.c.h.s8.bf16 %v1094_v37  ;;  %v2342_v48 = vunpack.c.h.s8.bf16 %v1286_v11  ;;  %v1382_v11 = vld [vmem:[%s6790_s7 + $0xb50] sm:$0xff] }
 0x1bd   : > { %v6968_v50 = vpack.c.bf16 %v1010_v39, %v1002_v38  ;;  %v2151_v38 = vunpack.c.h.s8.bf16 %v1191_v58  ;;  %v1190_v39 = vld [vmem:[%s6790_s7 + $0x550] sm:$0xff] }
 0x1bf   : > { %3431 = vmatpush2.bf16.msra.mxu0 %v2868_v51  ;;  %3474 = vmatpush2.bf16.msra.mxu1 %v3252_v52  ;;  %v1935_v51 = vunpack.c.l.s8.bf16 %v1095_v30  ;;  %v1071_v52 = vld [vmem:[%s6790_s7 + $0x198] sm:$0xff]  ;;  %v1814_v30 = vunpack.c.h.s8.bf16 %v1022_v28 }
 0x1c0   : > { %3432 = vmatprep.subr.bf16.mxu0 %v2845_v53  ;;  %3475 = vmatprep.subr.bf16.mxu1 %v3229_v54  ;;  %v2319_v53 = vunpack.c.l.s8.bf16 %v1287_v32  ;;  %v1263_v54 = vld [vmem:[%s6790_s7 + $0x798] sm:$0xff] }
 0x1c3   : > { %3433 = vmatpush2.bf16.msra.mxu0 %v2844_v57  ;;  %3476 = vmatpush2.bf16.msra.mxu1 %v3228_v59  ;;  %v1911_v57 = vunpack.c.h.s8.bf16 %v1071_v52  ;;  %v1070_v59 = vld [vmem:[%s6790_s7 + $0x190] sm:$0xff] }
 0x1c4   : > { %3434 = vmatprep.subr.bf16.mxu0 %v2821_v60  ;;  %3477 = vmatprep.subr.bf16.mxu1 %v3205_v63  ;;  %v2295_v60 = vunpack.c.h.s8.bf16 %v1263_v54  ;;  %v1910_v63 = vunpack.c.h.s8.bf16 %v1070_v59  ;;  %v1886_v9 = vunpack.c.l.s8.bf16 %v1070_v59  ;;  %v1166_v59 = vld [vmem:[%s6790_s7 + $0x490] sm:$0xff] }
 0x1c7   : > { %3435 = vmatpush2.bf16.msra.mxu0 %v2820_v2  ;;  %3478 = vmatpush2.bf16.msra.mxu1 %v3204_v4  ;;  %v1887_v2 = vunpack.c.l.s8.bf16 %v1071_v52  ;;  %v2271_v4 = vunpack.c.l.s8.bf16 %v1263_v54  ;;  %v1359_v54 = vld [vmem:[%s6790_s7 + $0xa98] sm:$0xff] }
 0x1c8   : > { %3436 = vmatprep.subr.bf16.mxu0 %v2797_v5  ;;  %3479 = vmatprep.subr.bf16.mxu1 %v3181_v8  ;;  %v1047_v5 = vld [vmem:[%s6790_s7 + $0xd8] sm:$0xff] }
 0x1c9   : > { %v1239_v8 = vld [vmem:[%s6790_s7 + $0x6d8] sm:$0xff] }
 0x1ca   : > { %v2223_v23 = vunpack.c.l.s8.bf16 %v1239_v8 }
 0x1cb   : > { %3437 = vmatpush2.bf16.msra.mxu0 %v2796_v14  ;;  %3480 = vmatpush2.bf16.msra.mxu1 %v3180_v18  ;;  %v1863_v14 = vunpack.c.h.s8.bf16 %v1047_v5  ;;  %v2247_v18 = vunpack.c.h.s8.bf16 %v1239_v8  ;;  %v1335_v8 = vld [vmem:[%s6790_s7 + $0x9d8] sm:$0xff] }
 0x1cc   : > { %3438 = vmatprep.subr.bf16.mxu0 %v2773_v20  ;;  %3481 = vmatprep.subr.bf16.mxu1 %v3157_v0  ;;  %v1238_v20 = vld [vmem:[%s6790_s7 + $0x6d0] sm:$0xff]  ;;  %v1839_v0 = vunpack.c.l.s8.bf16 %v1047_v5  ;;  %v1143_v5 = vld [vmem:[%s6790_s7 + $0x3d8] sm:$0xff] }
 0x1cd   : > { %v2246_v22 = vunpack.c.h.s8.bf16 %v1238_v20 }
 0x1cf   : > { %3439 = vmatpush2.bf16.msra.mxu0 %v2772_v10  ;;  %3482 = vmatpush2.bf16.msra.mxu1 %v3156_v26  ;;  %v1023_v10 = vld [vmem:[%s6790_s7 + $0x18] sm:$0xff]  ;;  %v2222_v26 = vunpack.c.l.s8.bf16 %v1238_v20  ;;  %v1334_v20 = vld [vmem:[%s6790_s7 + $0x9d0] sm:$0xff] }
 0x1d0   : > { %3440 = vmatprep.subr.bf16.mxu0 %v2749_v27  ;;  %3483 = vmatprep.subr.bf16.mxu1 %v3133_v29  ;;  %v1815_v27 = vunpack.c.h.s8.bf16 %v1023_v10  ;;  %v1214_v29 = vld [vmem:[%s6790_s7 + $0x610] sm:$0xff] }
 0x1d1   : > { %v2198_v32 = vunpack.c.h.s8.bf16 %v1214_v29  ;;  %v2174_v37 = vunpack.c.l.s8.bf16 %v1214_v29  ;;  %v1310_v29 = vld [vmem:[%s6790_s7 + $0x910] sm:$0xff] }
 0x1d3   : > { %3441 = vmatpush2.bf16.msra.mxu0 %v2748_v33  ;;  %3484 = vmatpush2.bf16.msra.mxu1 %v3132_v6  ;;  %v1791_v33 = vunpack.c.l.s8.bf16 %v1023_v10  ;;  %v1383_v6 = vld [vmem:[%s6790_s7 + $0xb58] sm:$0xff] }
 0x1d4   : > { %3496 = vmatprep.subr.bf16.mxu0 %v1959_v36  ;;  %3539 = vmatprep.subr.bf16.mxu1 %v2343_v62  ;;  %v1790_v36 = vunpack.c.l.s8.bf16 %v1022_v28  ;;  %v2535_v62 = vunpack.c.h.s8.bf16 %v1383_v6  ;;  %v2511_v52 = vunpack.c.l.s8.bf16 %v1383_v6  ;;  %v1119_v10 = vld [vmem:[%s6790_s7 + $0x318] sm:$0xff]  ;;  %v1118_v28 = vld [vmem:[%s6790_s7 + $0x310] sm:$0xff] }
 0x1d5   : > { %v1671_v6 = vld [vmem:[%s6790_s7 + $0x1458] sm:$0xff] }
 0x1d6   : > { %3443 = vmatmul.mubr.bf16.vlgmr.msra.gmra.mxu0 %v6966_v47  ;;  %3486 = vmatmul.mubr.bf16.vlgmr.msra.gmra.mxu1 %v6968_v50 }
 0x1d7   : > { %3497 = vmatpush1.bf16.msra.mxu0 %v1958_v45  ;;  %3528 = vmatprep.mubr.bf16.mxu0 %v6882_v13  ;;  %v2150_v45 = vunpack.c.h.s8.bf16 %v1190_v39 }
 0x1d8   : > { %3540 = vmatpush1.bf16.msra.mxu1 %v2342_v48  ;;  %3571 = vmatprep.mubr.bf16.mxu1 %v6886_v16  ;;  %v2534_v48 = vunpack.c.h.s8.bf16 %v1382_v11 }
 0x1d9   : > { %3498 = vmatprep.subr.bf16.mxu0 %v1935_v51  ;;  %3541 = vmatprep.subr.bf16.mxu1 %v2319_v53  ;;  %v2127_v51 = vunpack.c.l.s8.bf16 %v1191_v58  ;;  %v1167_v53 = vld [vmem:[%s6790_s7 + $0x498] sm:$0xff] }
 0x1da   : > { %v1479_v58 = vld [vmem:[%s6790_s7 + $0xe58] sm:$0xff] }
 0x1db   : > { %3499 = vmatpush1.bf16.msra.mxu0 %v1934_v55  ;;  %v2126_v55 = vunpack.c.l.s8.bf16 %v1190_v39  ;;  %v1478_v39 = vld [vmem:[%s6790_s7 + $0xe50] sm:$0xff] }
 0x1dc   : > { %3542 = vmatpush1.bf16.msra.mxu1 %v2318_v56  ;;  %3500 = vmatprep.subr.bf16.mxu0 %v1911_v57  ;;  %v2510_v56 = vunpack.c.l.s8.bf16 %v1382_v11  ;;  %v2103_v57 = vunpack.c.h.s8.bf16 %v1167_v53  ;;  %v1670_v11 = vld [vmem:[%s6790_s7 + $0x1450] sm:$0xff] }
 0x1dd   : > { %3543 = vmatprep.subr.bf16.mxu1 %v2295_v60  ;;  %v2487_v60 = vunpack.c.h.s8.bf16 %v1359_v54 }
 0x1df   : > { %3501 = vmatpush1.bf16.msra.mxu0 %v1910_v63  ;;  %v2102_v63 = vunpack.c.h.s8.bf16 %v1166_v59 }
 0x1e0   : > { %3544 = vmatpush1.bf16.msra.mxu1 %v2294_v1  ;;  %3502 = vmatprep.subr.bf16.mxu0 %v1887_v2  ;;  %v2486_v1 = vunpack.c.h.s8.bf16 %v1358_v61  ;;  %v2079_v2 = vunpack.c.l.s8.bf16 %v1167_v53  ;;  %v3087_v53 = vunpack.c.l.s8.bf16 %v1671_v6 }
 0x1e1   : > { %3545 = vmatprep.subr.bf16.mxu1 %v2271_v4  ;;  %v2463_v4 = vunpack.c.l.s8.bf16 %v1359_v54  ;;  %v1647_v54 = vld [vmem:[%s6790_s7 + $0x1398] sm:$0xff] }
 0x1e3   : > { %3503 = vmatpush1.bf16.msra.mxu0 %v1886_v9  ;;  %v2078_v9 = vunpack.c.l.s8.bf16 %v1166_v59  ;;  %v1454_v59 = vld [vmem:[%s6790_s7 + $0xd90] sm:$0xff] }
 0x1e4   : > { %3546 = vmatpush1.bf16.msra.mxu1 %v2270_v12  ;;  %3504 = vmatprep.subr.bf16.mxu0 %v1863_v14  ;;  %v2462_v12 = vunpack.c.l.s8.bf16 %v1358_v61  ;;  %v2055_v14 = vunpack.c.h.s8.bf16 %v1143_v5  ;;  %v1646_v61 = vld [vmem:[%s6790_s7 + $0x1390] sm:$0xff] }
 0x1e5   : > { %3547 = vmatprep.subr.bf16.mxu1 %v2247_v18  ;;  %v2439_v18 = vunpack.c.h.s8.bf16 %v1335_v8 }
 0x1e7   : > { %3505 = vmatpush1.bf16.msra.mxu0 %v1862_v21  ;;  %v2054_v21 = vunpack.c.h.s8.bf16 %v1142_v17 }
 0x1e8   : > { %3548 = vmatpush1.bf16.msra.mxu1 %v2246_v22  ;;  %3506 = vmatprep.subr.bf16.mxu0 %v1839_v0  ;;  %v2438_v22 = vunpack.c.h.s8.bf16 %v1334_v20  ;;  %v2031_v0 = vunpack.c.l.s8.bf16 %v1143_v5  ;;  %v1431_v5 = vld [vmem:[%s6790_s7 + $0xcd8] sm:$0xff] }
 0x1e9   : > { %3549 = vmatprep.subr.bf16.mxu1 %v2223_v23  ;;  %v2415_v23 = vunpack.c.l.s8.bf16 %v1335_v8  ;;  %v1623_v8 = vld [vmem:[%s6790_s7 + $0x12d8] sm:$0xff] }
 0x1eb   : > { %3507 = vmatpush1.bf16.msra.mxu0 %v1838_v25  ;;  %v2030_v25 = vunpack.c.l.s8.bf16 %v1142_v17  ;;  %v1430_v17 = vld [vmem:[%s6790_s7 + $0xcd0] sm:$0xff] }
 0x1ec   : > { %3550 = vmatpush1.bf16.msra.mxu1 %v2222_v26  ;;  %3508 = vmatprep.subr.bf16.mxu0 %v1815_v27  ;;  %v2414_v26 = vunpack.c.l.s8.bf16 %v1334_v20  ;;  %v2007_v27 = vunpack.c.h.s8.bf16 %v1119_v10  ;;  %v1622_v20 = vld [vmem:[%s6790_s7 + $0x12d0] sm:$0xff] }
 0x1ed   : > { %3551 = vmatprep.subr.bf16.mxu1 %v2199_v43  ;;  %v2391_v43 = vunpack.c.h.s8.bf16 %v1311_v24 }
 0x1ef   : > { %3509 = vmatpush1.bf16.msra.mxu0 %v1814_v30  ;;  %v2006_v30 = vunpack.c.h.s8.bf16 %v1118_v28 }
 0x1f0   : > { %3552 = vmatpush1.bf16.msra.mxu1 %v2198_v32  ;;  %3510 = vmatprep.subr.bf16.mxu0 %v1791_v33  ;;  %v2390_v32 = vunpack.c.h.s8.bf16 %v1310_v29  ;;  %v1983_v33 = vunpack.c.l.s8.bf16 %v1119_v10  ;;  %v1407_v10 = vld [vmem:[%s6790_s7 + $0xc18] sm:$0xff] }
 0x1f1   : > { %3553 = vmatprep.subr.bf16.mxu1 %v2175_v35  ;;  %v2367_v35 = vunpack.c.l.s8.bf16 %v1311_v24  ;;  %v1599_v24 = vld [vmem:[%s6790_s7 + $0x1218] sm:$0xff] }
 0x1f3   : > { %3511 = vmatpush1.bf16.msra.mxu0 %v1790_v36  ;;  %v1982_v36 = vunpack.c.l.s8.bf16 %v1118_v28  ;;  %v1406_v28 = vld [vmem:[%s6790_s7 + $0xc10] sm:$0xff] }
 0x1f4   : > { %3554 = vmatpush1.bf16.msra.mxu1 %v2174_v37  ;;  %3512 = vmatprep.subr.bf16.mxu0 %v2151_v38  ;;  %v2366_v37 = vunpack.c.l.s8.bf16 %v1310_v29  ;;  %v2727_v38 = vunpack.c.h.s8.bf16 %v1479_v58  ;;  %v1598_v29 = vld [vmem:[%s6790_s7 + $0x1210] sm:$0xff] }
 0x1f5   : > { %3555 = vmatprep.subr.bf16.mxu1 %v2535_v62  ;;  %v3111_v62 = vunpack.c.h.s8.bf16 %v1671_v6  ;;  %v1767_v6 = vld [vmem:[%s6790_s7 + $0x1758] sm:$0xff] }
 0x1f7   : > { %3513 = vmatpush2.bf16.msra.mxu0 %v2150_v45  ;;  %v2726_v45 = vunpack.c.h.s8.bf16 %v1478_v39 }
 0x1f8   : > { %3556 = vmatpush2.bf16.msra.mxu1 %v2534_v48  ;;  %3514 = vmatprep.subr.bf16.mxu0 %v2127_v51  ;;  %v3110_v48 = vunpack.c.h.s8.bf16 %v1670_v11  ;;  %v2703_v51 = vunpack.c.l.s8.bf16 %v1479_v58  ;;  %v1575_v58 = vld [vmem:[%s6790_s7 + $0x1158] sm:$0xff] }
 0x1f9   : > { %3557 = vmatprep.subr.bf16.mxu1 %v2511_v52  ;;  %v1455_v52 = vld [vmem:[%s6790_s7 + $0xd98] sm:$0xff] }
 0x1fb   : > { %3515 = vmatpush2.bf16.msra.mxu0 %v2126_v55  ;;  %v2702_v55 = vunpack.c.l.s8.bf16 %v1478_v39  ;;  %v1574_v39 = vld [vmem:[%s6790_s7 + $0x1150] sm:$0xff] }
 0x1fc   : > { %3558 = vmatpush2.bf16.msra.mxu1 %v2510_v56  ;;  %3516 = vmatprep.subr.bf16.mxu0 %v2103_v57  ;;  %v3086_v56 = vunpack.c.l.s8.bf16 %v1670_v11  ;;  %v2679_v57 = vunpack.c.h.s8.bf16 %v1455_v52  ;;  %v1766_v11 = vld [vmem:[%s6790_s7 + $0x1750] sm:$0xff] }
 0x1fd   : > { %3559 = vmatprep.subr.bf16.mxu1 %v2487_v60  ;;  %v3063_v60 = vunpack.c.h.s8.bf16 %v1647_v54 }
 0x1ff   : > { %3517 = vmatpush2.bf16.msra.mxu0 %v2102_v63  ;;  %v2678_v63 = vunpack.c.h.s8.bf16 %v1454_v59 }
 0x200   : > { %3560 = vmatpush2.bf16.msra.mxu1 %v2486_v1  ;;  %3518 = vmatprep.subr.bf16.mxu0 %v2079_v2  ;;  %v3062_v1 = vunpack.c.h.s8.bf16 %v1646_v61  ;;  %v2655_v2 = vunpack.c.l.s8.bf16 %v1455_v52  ;;  %v3279_v52 = vunpack.c.l.s8.bf16 %v1767_v6 }
 0x201   : > { %3561 = vmatprep.subr.bf16.mxu1 %v2463_v4  ;;  %v3039_v4 = vunpack.c.l.s8.bf16 %v1647_v54  ;;  %v1743_v54 = vld [vmem:[%s6790_s7 + $0x1698] sm:$0xff] }
 0x203   : > { %3519 = vmatpush2.bf16.msra.mxu0 %v2078_v9  ;;  %v2654_v9 = vunpack.c.l.s8.bf16 %v1454_v59  ;;  %v1550_v59 = vld [vmem:[%s6790_s7 + $0x1090] sm:$0xff] }
 0x204   : > { %3562 = vmatpush2.bf16.msra.mxu1 %v2462_v12  ;;  %3520 = vmatprep.subr.bf16.mxu0 %v2055_v14  ;;  %v3038_v12 = vunpack.c.l.s8.bf16 %v1646_v61  ;;  %v2631_v14 = vunpack.c.h.s8.bf16 %v1431_v5  ;;  %v1742_v61 = vld [vmem:[%s6790_s7 + $0x1690] sm:$0xff] }
 0x205   : > { %3563 = vmatprep.subr.bf16.mxu1 %v2439_v18  ;;  %v3015_v18 = vunpack.c.h.s8.bf16 %v1623_v8 }
 0x207   : > { %3521 = vmatpush2.bf16.msra.mxu0 %v2054_v21  ;;  %v2630_v21 = vunpack.c.h.s8.bf16 %v1430_v17 }
 0x208   : > { %3564 = vmatpush2.bf16.msra.mxu1 %v2438_v22  ;;  %3522 = vmatprep.subr.bf16.mxu0 %v2031_v0  ;;  %v3014_v22 = vunpack.c.h.s8.bf16 %v1622_v20  ;;  %v2607_v0 = vunpack.c.l.s8.bf16 %v1431_v5  ;;  %v1527_v5 = vld [vmem:[%s6790_s7 + $0xfd8] sm:$0xff] }
 0x209   : > { %3565 = vmatprep.subr.bf16.mxu1 %v2415_v23  ;;  %v2991_v23 = vunpack.c.l.s8.bf16 %v1623_v8  ;;  %v1719_v8 = vld [vmem:[%s6790_s7 + $0x15d8] sm:$0xff] }
 0x20b   : > { %3523 = vmatpush2.bf16.msra.mxu0 %v2030_v25  ;;  %v2606_v25 = vunpack.c.l.s8.bf16 %v1430_v17  ;;  %v1526_v17 = vld [vmem:[%s6790_s7 + $0xfd0] sm:$0xff] }
 0x20c   : > { %3566 = vmatpush2.bf16.msra.mxu1 %v2414_v26  ;;  %3524 = vmatprep.subr.bf16.mxu0 %v2007_v27  ;;  %v2990_v26 = vunpack.c.l.s8.bf16 %v1622_v20  ;;  %v2583_v27 = vunpack.c.h.s8.bf16 %v1407_v10  ;;  %v1718_v20 = vld [vmem:[%s6790_s7 + $0x15d0] sm:$0xff] }
 0x20d   : > { %3567 = vmatprep.subr.bf16.mxu1 %v2391_v43  ;;  %v2967_v43 = vunpack.c.h.s8.bf16 %v1599_v24 }
 0x20f   : > { %3525 = vmatpush2.bf16.msra.mxu0 %v2006_v30  ;;  %v2582_v30 = vunpack.c.h.s8.bf16 %v1406_v28 }
 0x210   : > { %3568 = vmatpush2.bf16.msra.mxu1 %v2390_v32  ;;  %3526 = vmatprep.subr.bf16.mxu0 %v1983_v33  ;;  %v2966_v32 = vunpack.c.h.s8.bf16 %v1598_v29  ;;  %v2559_v33 = vunpack.c.l.s8.bf16 %v1407_v10  ;;  %v1503_v10 = vld [vmem:[%s6790_s7 + $0xf18] sm:$0xff] }
 0x211   : > { %3569 = vmatprep.subr.bf16.mxu1 %v2367_v35  ;;  %v2943_v35 = vunpack.c.l.s8.bf16 %v1599_v24  ;;  %v1695_v24 = vld [vmem:[%s6790_s7 + $0x1518] sm:$0xff] }
 0x213   : > { %3527 = vmatpush2.bf16.msra.mxu0 %v1982_v36  ;;  %v2558_v36 = vunpack.c.l.s8.bf16 %v1406_v28  ;;  %v1502_v28 = vld [vmem:[%s6790_s7 + $0xf10] sm:$0xff] }
 0x214   : > { %3570 = vmatpush2.bf16.msra.mxu1 %v2366_v37  ;;  %3582 = vmatprep.subr.bf16.mxu0 %v2727_v38  ;;  %v2942_v37 = vunpack.c.l.s8.bf16 %v1598_v29  ;;  %v2919_v38 = vunpack.c.h.s8.bf16 %v1575_v58  ;;  %v1694_v29 = vld [vmem:[%s6790_s7 + $0x1510] sm:$0xff] }
 0x215   : > { %3625 = vmatprep.subr.bf16.mxu1 %v3111_v62  ;;  %v3303_v62 = vunpack.c.h.s8.bf16 %v1767_v6  ;;  %v1289_v6 = vld [vmem:[%s6790_s7 + $0x868] sm:$0xff] }
 0x216   : > { %3529 = vmatmul.mubr.bf16.vlgmr.msra.gmra.mxu0 %v6884_v15 }
 0x217   : > { %3572 = vmatmul.mubr.bf16.vlgmr.msra.gmra.mxu1 %v6889_v19  ;;  %3583 = vmatpush1.bf16.msra.mxu0 %v2726_v45  ;;  %v2918_v45 = vunpack.c.h.s8.bf16 %v1574_v39 }
 0x218   : > { %3614 = vmatprep.mubr.bf16.mxu0 %v6930_v31  ;;  %3626 = vmatpush1.bf16.msra.mxu1 %v3110_v48  ;;  %v3302_v48 = vunpack.c.h.s8.bf16 %v1766_v11 }
 0x219   : > { %3657 = vmatprep.mubr.bf16.mxu1 %v6932_v34  ;;  %3584 = vmatprep.subr.bf16.mxu0 %v2703_v51  ;;  %v2895_v51 = vunpack.c.l.s8.bf16 %v1575_v58  ;;  %v1097_v58 = vld [vmem:[%s6790_s7 + $0x268] sm:$0xff] }
 0x21a   : > { %3627 = vmatprep.subr.bf16.mxu1 %v3087_v53  ;;  %v1551_v53 = vld [vmem:[%s6790_s7 + $0x1098] sm:$0xff] }
 0x21b   : > { %3585 = vmatpush1.bf16.msra.mxu0 %v2702_v55  ;;  %v2894_v55 = vunpack.c.l.s8.bf16 %v1574_v39  ;;  %v1096_v39 = vld [vmem:[%s6790_s7 + $0x260] sm:$0xff] }
 0x21c   : > { %3628 = vmatpush1.bf16.msra.mxu1 %v3086_v56  ;;  %3586 = vmatprep.subr.bf16.mxu0 %v2679_v57  ;;  %v3278_v56 = vunpack.c.l.s8.bf16 %v1766_v11  ;;  %v2871_v57 = vunpack.c.h.s8.bf16 %v1551_v53  ;;  %v1288_v11 = vld [vmem:[%s6790_s7 + $0x860] sm:$0xff] }
 0x21d   : > { %3629 = vmatprep.subr.bf16.mxu1 %v3063_v60  ;;  %v3255_v60 = vunpack.c.h.s8.bf16 %v1743_v54 }
 0x21f   : > { %3587 = vmatpush1.bf16.msra.mxu0 %v2678_v63  ;;  %v2870_v63 = vunpack.c.h.s8.bf16 %v1550_v59 }
 0x220   : > { %3630 = vmatpush1.bf16.msra.mxu1 %v3062_v1  ;;  %3588 = vmatprep.subr.bf16.mxu0 %v2655_v2  ;;  %v3254_v1 = vunpack.c.h.s8.bf16 %v1742_v61  ;;  %v2847_v2 = vunpack.c.l.s8.bf16 %v1551_v53  ;;  %v2321_v53 = vunpack.c.l.s8.bf16 %v1289_v6 }
 0x221   : > { %3631 = vmatprep.subr.bf16.mxu1 %v3039_v4  ;;  %v3231_v4 = vunpack.c.l.s8.bf16 %v1743_v54  ;;  %v1265_v54 = vld [vmem:[%s6790_s7 + $0x7a8] sm:$0xff] }
 0x223   : > { %3589 = vmatpush1.bf16.msra.mxu0 %v2654_v9  ;;  %v2846_v9 = vunpack.c.l.s8.bf16 %v1550_v59  ;;  %v1072_v59 = vld [vmem:[%s6790_s7 + $0x1a0] sm:$0xff] }
 0x224   : > { %3632 = vmatpush1.bf16.msra.mxu1 %v3038_v12  ;;  %3590 = vmatprep.subr.bf16.mxu0 %v2631_v14  ;;  %v3230_v12 = vunpack.c.l.s8.bf16 %v1742_v61  ;;  %v2823_v14 = vunpack.c.h.s8.bf16 %v1527_v5  ;;  %v1264_v61 = vld [vmem:[%s6790_s7 + $0x7a0] sm:$0xff] }
 0x225   : > { %3633 = vmatprep.subr.bf16.mxu1 %v3015_v18  ;;  %v3207_v18 = vunpack.c.h.s8.bf16 %v1719_v8 }
 0x227   : > { %3591 = vmatpush1.bf16.msra.mxu0 %v2630_v21  ;;  %v2822_v21 = vunpack.c.h.s8.bf16 %v1526_v17 }
 0x228   : > { %3634 = vmatpush1.bf16.msra.mxu1 %v3014_v22  ;;  %3592 = vmatprep.subr.bf16.mxu0 %v2607_v0  ;;  %v3206_v22 = vunpack.c.h.s8.bf16 %v1718_v20  ;;  %v2799_v0 = vunpack.c.l.s8.bf16 %v1527_v5  ;;  %v1049_v5 = vld [vmem:[%s6790_s7 + $0xe8] sm:$0xff] }
 0x229   : > { %3635 = vmatprep.subr.bf16.mxu1 %v2991_v23  ;;  %v3183_v23 = vunpack.c.l.s8.bf16 %v1719_v8  ;;  %v1241_v8 = vld [vmem:[%s6790_s7 + $0x6e8] sm:$0xff] }
 0x22b   : > { %3593 = vmatpush1.bf16.msra.mxu0 %v2606_v25  ;;  %v2798_v25 = vunpack.c.l.s8.bf16 %v1526_v17  ;;  %v1048_v17 = vld [vmem:[%s6790_s7 + $0xe0] sm:$0xff] }
 0x22c   : > { %3636 = vmatpush1.bf16.msra.mxu1 %v2990_v26  ;;  %3594 = vmatprep.subr.bf16.mxu0 %v2583_v27  ;;  %v3182_v26 = vunpack.c.l.s8.bf16 %v1718_v20  ;;  %v2775_v27 = vunpack.c.h.s8.bf16 %v1503_v10  ;;  %v1240_v20 = vld [vmem:[%s6790_s7 + $0x6e0] sm:$0xff] }
 0x22d   : > { %3637 = vmatprep.subr.bf16.mxu1 %v2967_v43  ;;  %v3159_v43 = vunpack.c.h.s8.bf16 %v1695_v24 }
 0x22f   : > { %3595 = vmatpush1.bf16.msra.mxu0 %v2582_v30  ;;  %v2774_v30 = vunpack.c.h.s8.bf16 %v1502_v28 }
 0x230   : > { %3638 = vmatpush1.bf16.msra.mxu1 %v2966_v32  ;;  %3596 = vmatprep.subr.bf16.mxu0 %v2559_v33  ;;  %v3158_v32 = vunpack.c.h.s8.bf16 %v1694_v29  ;;  %v2751_v33 = vunpack.c.l.s8.bf16 %v1503_v10  ;;  %v1025_v10 = vld [vmem:[%s6790_s7 + $0x28] sm:$0xff] }
 0x231   : > { %3639 = vmatprep.subr.bf16.mxu1 %v2943_v35  ;;  %v3135_v35 = vunpack.c.l.s8.bf16 %v1695_v24  ;;  %v1217_v24 = vld [vmem:[%s6790_s7 + $0x628] sm:$0xff] }
 0x233   : > { %3597 = vmatpush1.bf16.msra.mxu0 %v2558_v36  ;;  %v2750_v36 = vunpack.c.l.s8.bf16 %v1502_v28  ;;  %v1024_v28 = vld [vmem:[%s6790_s7 + $0x20] sm:$0xff] }
 0x234   : > { %3640 = vmatpush1.bf16.msra.mxu1 %v2942_v37  ;;  %3598 = vmatprep.subr.bf16.mxu0 %v2919_v38  ;;  %v3134_v37 = vunpack.c.l.s8.bf16 %v1694_v29  ;;  %v1961_v38 = vunpack.c.h.s8.bf16 %v1097_v58  ;;  %v1216_v29 = vld [vmem:[%s6790_s7 + $0x620] sm:$0xff] }
 0x235   : > { %3641 = vmatprep.subr.bf16.mxu1 %v3303_v62  ;;  %v2345_v62 = vunpack.c.h.s8.bf16 %v1289_v6  ;;  %v1385_v6 = vld [vmem:[%s6790_s7 + $0xb68] sm:$0xff] }
 0x237   : > { %3599 = vmatpush2.bf16.msra.mxu0 %v2918_v45  ;;  %v1960_v45 = vunpack.c.h.s8.bf16 %v1096_v39 }
 0x238   : > { %3642 = vmatpush2.bf16.msra.mxu1 %v3302_v48  ;;  %3600 = vmatprep.subr.bf16.mxu0 %v2895_v51  ;;  %v2344_v48 = vunpack.c.h.s8.bf16 %v1288_v11  ;;  %v1937_v51 = vunpack.c.l.s8.bf16 %v1097_v58  ;;  %v1193_v58 = vld [vmem:[%s6790_s7 + $0x568] sm:$0xff] }
 0x239   : > { %3643 = vmatprep.subr.bf16.mxu1 %v3279_v52  ;;  %v1073_v52 = vld [vmem:[%s6790_s7 + $0x1a8] sm:$0xff] }
 0x23b   : > { %3601 = vmatpush2.bf16.msra.mxu0 %v2894_v55  ;;  %v1936_v55 = vunpack.c.l.s8.bf16 %v1096_v39  ;;  %v1192_v39 = vld [vmem:[%s6790_s7 + $0x560] sm:$0xff] }
 0x23c   : > { %3644 = vmatpush2.bf16.msra.mxu1 %v3278_v56  ;;  %3602 = vmatprep.subr.bf16.mxu0 %v2871_v57  ;;  %v2320_v56 = vunpack.c.l.s8.bf16 %v1288_v11  ;;  %v1913_v57 = vunpack.c.h.s8.bf16 %v1073_v52  ;;  %v1384_v11 = vld [vmem:[%s6790_s7 + $0xb60] sm:$0xff] }
 0x23d   : > { %3645 = vmatprep.subr.bf16.mxu1 %v3255_v60  ;;  %v2297_v60 = vunpack.c.h.s8.bf16 %v1265_v54 }
 0x23f   : > { %3603 = vmatpush2.bf16.msra.mxu0 %v2870_v63  ;;  %v1912_v63 = vunpack.c.h.s8.bf16 %v1072_v59 }
 0x240   : > { %3646 = vmatpush2.bf16.msra.mxu1 %v3254_v1  ;;  %3604 = vmatprep.subr.bf16.mxu0 %v2847_v2  ;;  %v2296_v1 = vunpack.c.h.s8.bf16 %v1264_v61  ;;  %v1889_v2 = vunpack.c.l.s8.bf16 %v1073_v52  ;;  %v2513_v52 = vunpack.c.l.s8.bf16 %v1385_v6 }
 0x241   : > { %3647 = vmatprep.subr.bf16.mxu1 %v3231_v4  ;;  %v2273_v4 = vunpack.c.l.s8.bf16 %v1265_v54  ;;  %v1361_v54 = vld [vmem:[%s6790_s7 + $0xaa8] sm:$0xff] }
 0x243   : > { %3605 = vmatpush2.bf16.msra.mxu0 %v2846_v9  ;;  %v1888_v9 = vunpack.c.l.s8.bf16 %v1072_v59  ;;  %v1168_v59 = vld [vmem:[%s6790_s7 + $0x4a0] sm:$0xff] }
 0x244   : > { %3648 = vmatpush2.bf16.msra.mxu1 %v3230_v12  ;;  %3606 = vmatprep.subr.bf16.mxu0 %v2823_v14  ;;  %v2272_v12 = vunpack.c.l.s8.bf16 %v1264_v61  ;;  %v1865_v14 = vunpack.c.h.s8.bf16 %v1049_v5  ;;  %v1360_v61 = vld [vmem:[%s6790_s7 + $0xaa0] sm:$0xff] }
 0x245   : > { %3649 = vmatprep.subr.bf16.mxu1 %v3207_v18  ;;  %v2249_v18 = vunpack.c.h.s8.bf16 %v1241_v8 }
 0x247   : > { %3607 = vmatpush2.bf16.msra.mxu0 %v2822_v21  ;;  %v1864_v21 = vunpack.c.h.s8.bf16 %v1048_v17 }
 0x248   : > { %3650 = vmatpush2.bf16.msra.mxu1 %v3206_v22  ;;  %3608 = vmatprep.subr.bf16.mxu0 %v2799_v0  ;;  %v2248_v22 = vunpack.c.h.s8.bf16 %v1240_v20  ;;  %v1841_v0 = vunpack.c.l.s8.bf16 %v1049_v5  ;;  %v1145_v5 = vld [vmem:[%s6790_s7 + $0x3e8] sm:$0xff] }
 0x249   : > { %3651 = vmatprep.subr.bf16.mxu1 %v3183_v23  ;;  %v2225_v23 = vunpack.c.l.s8.bf16 %v1241_v8  ;;  %v1337_v8 = vld [vmem:[%s6790_s7 + $0x9e8] sm:$0xff] }
 0x24b   : > { %3609 = vmatpush2.bf16.msra.mxu0 %v2798_v25  ;;  %v1840_v25 = vunpack.c.l.s8.bf16 %v1048_v17  ;;  %v1144_v17 = vld [vmem:[%s6790_s7 + $0x3e0] sm:$0xff] }
 0x24c   : > { %3652 = vmatpush2.bf16.msra.mxu1 %v3182_v26  ;;  %3610 = vmatprep.subr.bf16.mxu0 %v2775_v27  ;;  %v2224_v26 = vunpack.c.l.s8.bf16 %v1240_v20  ;;  %v1817_v27 = vunpack.c.h.s8.bf16 %v1025_v10  ;;  %v1336_v20 = vld [vmem:[%s6790_s7 + $0x9e0] sm:$0xff] }
 0x24d   : > { %3653 = vmatprep.subr.bf16.mxu1 %v3159_v43  ;;  %v2201_v43 = vunpack.c.h.s8.bf16 %v1217_v24 }
 0x24f   : > { %3611 = vmatpush2.bf16.msra.mxu0 %v2774_v30  ;;  %v1816_v30 = vunpack.c.h.s8.bf16 %v1024_v28 }
 0x250   : > { %3654 = vmatpush2.bf16.msra.mxu1 %v3158_v32  ;;  %3612 = vmatprep.subr.bf16.mxu0 %v2751_v33  ;;  %v2200_v32 = vunpack.c.h.s8.bf16 %v1216_v29  ;;  %v1793_v33 = vunpack.c.l.s8.bf16 %v1025_v10  ;;  %v1121_v10 = vld [vmem:[%s6790_s7 + $0x328] sm:$0xff] }
 0x251   : > { %3655 = vmatprep.subr.bf16.mxu1 %v3135_v35  ;;  %v2177_v35 = vunpack.c.l.s8.bf16 %v1217_v24  ;;  %v1313_v24 = vld [vmem:[%s6790_s7 + $0x928] sm:$0xff] }
 0x253   : > { %3613 = vmatpush2.bf16.msra.mxu0 %v2750_v36  ;;  %v1792_v36 = vunpack.c.l.s8.bf16 %v1024_v28  ;;  %v2009_v28 = vunpack.c.h.s8.bf16 %v1121_v10 }
 0x254   : > { %3656 = vmatpush2.bf16.msra.mxu1 %v3134_v37  ;;  %3668 = vmatprep.subr.bf16.mxu0 %v1961_v38  ;;  %v2176_v37 = vunpack.c.l.s8.bf16 %v1216_v29  ;;  %v2153_v38 = vunpack.c.h.s8.bf16 %v1193_v58 }
 0x255   : > { %3711 = vmatprep.subr.bf16.mxu1 %v2345_v62  ;;  %v2537_v62 = vunpack.c.h.s8.bf16 %v1385_v6  ;;  %v1985_v6 = vunpack.c.l.s8.bf16 %v1121_v10 }
 0x256   : > { %3615 = vmatmul.mubr.bf16.vlgmr.msra.gmra.mxu0 %v6966_v47  ;;  %v3401_v29 = vpop.f32.mrf.mxu1 }
 0x257   : > { %3658 = vmatmul.mubr.bf16.vlgmr.msra.gmra.mxu1 %v6968_v50  ;;  %3669 = vmatpush1.bf16.msra.mxu0 %v1960_v45  ;;  %v2152_v45 = vunpack.c.h.s8.bf16 %v1192_v39 }
 0x258   : > { %3700 = vmatprep.mubr.bf16.mxu0 %v6882_v13  ;;  %3712 = vmatpush1.bf16.msra.mxu1 %v2344_v48  ;;  %v2536_v48 = vunpack.c.h.s8.bf16 %v1384_v11 }
 0x259   : > { %3743 = vmatprep.mubr.bf16.mxu1 %v6886_v16  ;;  %3670 = vmatprep.subr.bf16.mxu0 %v1937_v51  ;;  %v2129_v51 = vunpack.c.l.s8.bf16 %v1193_v58 }
 0x25a   : > { %3713 = vmatprep.subr.bf16.mxu1 %v2321_v53  ;;  %v1169_v53 = vld [vmem:[%s6790_s7 + $0x4a8] sm:$0xff] }
 0x25b   : > { %3671 = vmatpush1.bf16.msra.mxu0 %v1936_v55  ;;  %v2128_v55 = vunpack.c.l.s8.bf16 %v1192_v39  ;;  %v1673_v39 = vld [vmem:[%s6790_s7 + $0x1468] sm:$0xff] }
 0x25c   : > { %3714 = vmatpush1.bf16.msra.mxu1 %v2320_v56  ;;  %3672 = vmatprep.subr.bf16.mxu0 %v1913_v57  ;;  %v2512_v56 = vunpack.c.l.s8.bf16 %v1384_v11  ;;  %v2105_v57 = vunpack.c.h.s8.bf16 %v1169_v53 }
 0x25d   : > { %3715 = vmatprep.subr.bf16.mxu1 %v2297_v60  ;;  %v2489_v60 = vunpack.c.h.s8.bf16 %v1361_v54 }
 0x25f   : > { %3673 = vmatpush1.bf16.msra.mxu0 %v1912_v63  ;;  %v2104_v63 = vunpack.c.h.s8.bf16 %v1168_v59 }
 0x260   : > { %3716 = vmatpush1.bf16.msra.mxu1 %v2296_v1  ;;  %3674 = vmatprep.subr.bf16.mxu0 %v1889_v2  ;;  %v2488_v1 = vunpack.c.h.s8.bf16 %v1360_v61  ;;  %v2081_v2 = vunpack.c.l.s8.bf16 %v1169_v53  ;;  %v3113_v53 = vunpack.c.h.s8.bf16 %v1673_v39 }
 0x261   : > { %3717 = vmatprep.subr.bf16.mxu1 %v2273_v4  ;;  %v2465_v4 = vunpack.c.l.s8.bf16 %v1361_v54  ;;  %v1672_v54 = vld [vmem:[%s6790_s7 + $0x1460] sm:$0xff] }
 0x263   : > { %3675 = vmatpush1.bf16.msra.mxu0 %v1888_v9  ;;  %v2080_v9 = vunpack.c.l.s8.bf16 %v1168_v59  ;;  %v3112_v59 = vunpack.c.h.s8.bf16 %v1672_v54 }
 0x264   : > { %3718 = vmatpush1.bf16.msra.mxu1 %v2272_v12  ;;  %3676 = vmatprep.subr.bf16.mxu0 %v1865_v14  ;;  %v2464_v12 = vunpack.c.l.s8.bf16 %v1360_v61  ;;  %v2057_v14 = vunpack.c.h.s8.bf16 %v1145_v5 }
 0x265   : > { %3719 = vmatprep.subr.bf16.mxu1 %v2249_v18  ;;  %v2441_v18 = vunpack.c.h.s8.bf16 %v1337_v8 }
 0x267   : > { %3677 = vmatpush1.bf16.msra.mxu0 %v1864_v21  ;;  %v2056_v21 = vunpack.c.h.s8.bf16 %v1144_v17 }
 0x268   : > { %3720 = vmatpush1.bf16.msra.mxu1 %v2248_v22  ;;  %3678 = vmatprep.subr.bf16.mxu0 %v1841_v0  ;;  %v2440_v22 = vunpack.c.h.s8.bf16 %v1336_v20  ;;  %v2033_v0 = vunpack.c.l.s8.bf16 %v1145_v5  ;;  %v3089_v5 = vunpack.c.l.s8.bf16 %v1673_v39 }
 0x269   : > { %3721 = vmatprep.subr.bf16.mxu1 %v2225_v23  ;;  %v2417_v23 = vunpack.c.l.s8.bf16 %v1337_v8  ;;  %v1649_v8 = vld [vmem:[%s6790_s7 + $0x13a8] sm:$0xff] }
 0x26b   : > { %3679 = vmatpush1.bf16.msra.mxu0 %v1840_v25  ;;  %v2032_v25 = vunpack.c.l.s8.bf16 %v1144_v17 }
 0x26c   : > { %3722 = vmatpush1.bf16.msra.mxu1 %v2224_v26  ;;  %3680 = vmatprep.subr.bf16.mxu0 %v1817_v27  ;;  %v3358_v26 = vpop.f32.mrf.mxu0  ;;  %v2416_v27 = vunpack.c.l.s8.bf16 %v1336_v20  ;;  %v1456_v20 = vld [vmem:[%s6790_s7 + $0xda0] sm:$0xff] }
 0x26d   : > { %3723 = vmatprep.subr.bf16.mxu1 %v2201_v43  ;;  %v1120_v43 = vld [vmem:[%s6790_s7 + $0x320] sm:$0xff] }
 0x26f   : > { %3681 = vmatpush1.bf16.msra.mxu0 %v1816_v30  ;;  %v2393_v30 = vunpack.c.h.s8.bf16 %v1313_v24 }
 0x270   : > { %3724 = vmatpush1.bf16.msra.mxu1 %v2200_v32  ;;  %3682 = vmatprep.subr.bf16.mxu0 %v1793_v33  ;;  %v1312_v32 = vld [vmem:[%s6790_s7 + $0x920] sm:$0xff]  ;;  %v2008_v33 = vunpack.c.h.s8.bf16 %v1120_v43 }
 0x271   : > { %3725 = vmatprep.subr.bf16.mxu1 %v2177_v35  ;;  %v3360_v35 = vpop.f32.mrf.mxu0  ;;  %v2392_v58 = vunpack.c.h.s8.bf16 %v1312_v32 }
 0x273   : > { %3683 = vmatpush1.bf16.msra.mxu0 %v1792_v36  ;;  %v3403_v36 = vpop.f32.mrf.mxu1  ;;  %v3362_v11 = vpop.f32.mrf.mxu0 }
 0x274   : > { %3726 = vmatpush1.bf16.msra.mxu1 %v2176_v37  ;;  %3684 = vmatprep.subr.bf16.mxu0 %v2153_v38  ;;  %v2369_v37 = vunpack.c.l.s8.bf16 %v1313_v24  ;;  %v1481_v38 = vld [vmem:[%s6790_s7 + $0xe68] sm:$0xff] }
 0x275   : > { %3727 = vmatprep.subr.bf16.mxu1 %v2537_v62  ;;  %v1984_v62 = vunpack.c.l.s8.bf16 %v1120_v43  ;;  %v1648_v43 = vld [vmem:[%s6790_s7 + $0x13a0] sm:$0xff] }
 0x277   : > { %3685 = vmatpush2.bf16.msra.mxu0 %v2152_v45  ;;  %v2368_v45 = vunpack.c.l.s8.bf16 %v1312_v32  ;;  %v2680_v32 = vunpack.c.h.s8.bf16 %v1456_v20 }
 0x278   : > { %3728 = vmatpush2.bf16.msra.mxu1 %v2536_v48  ;;  %3686 = vmatprep.subr.bf16.mxu0 %v2129_v51  ;;  %v2729_v48 = vunpack.c.h.s8.bf16 %v1481_v38  ;;  %v1480_v51 = vld [vmem:[%s6790_s7 + $0xe60] sm:$0xff] }
 0x279   : > { %3729 = vmatprep.subr.bf16.mxu1 %v2513_v52  ;;  %v3405_v52 = vpop.f32.mrf.mxu1 }
 0x27a   : > { %v3406_v24 = vadd.f32 %v3405_v52, %v3362_v11  ;;  %v1433_v52 = vld [vmem:[%s6790_s7 + $0xce8] sm:$0xff] }
 0x27b   : > { %3687 = vmatpush2.bf16.msra.mxu0 %v2128_v55  ;;  %v2728_v55 = vunpack.c.h.s8.bf16 %v1480_v51  ;;  %v3407_v61 = vpop.f32.mrf.mxu1 }
 0x27c   : > { %3730 = vmatpush2.bf16.msra.mxu1 %v2512_v56  ;;  %3688 = vmatprep.subr.bf16.mxu0 %v2105_v57  ;;  %v3364_v56 = vpop.f32.mrf.mxu0  ;;  %v7079_v57 = vld [vmem:[%s6797_s1] sm:$0xff] }
 0x27d   : > { %3731 = vmatprep.subr.bf16.mxu1 %v2489_v60  ;;  %v3402_v60 = vadd.f32 %v3401_v29, %v3358_v26  ;;  %v5397_v17 = vrot.slane %v7079_v57, %v6862_v41 }
 0x27f   : > { %3689 = vmatpush2.bf16.msra.mxu0 %v2104_v63  ;;  %v7082_v63 = vld [vmem:[%s6800_s15] sm:$0xff] }
 0x280   : > { %3732 = vmatpush2.bf16.msra.mxu1 %v2488_v1  ;;  %3690 = vmatprep.subr.bf16.mxu0 %v2081_v2  ;;  %v2705_v1 = vunpack.c.l.s8.bf16 %v1481_v38  ;;  %v1457_v2 = vld [vmem:[%s6790_s7 + $0xda8] sm:$0xff]  ;;  %v5575_v29 = vrot.slane %v7082_v63, %v6859_v40  ;;  %v3064_v38 = vunpack.c.h.s8.bf16 %v1648_v43 }
 0x281   : > { %3733 = vmatprep.subr.bf16.mxu1 %v2465_v4  ;;  %v2681_v10 = vunpack.c.h.s8.bf16 %v1457_v2  ;;  %v2657_v39 = vunpack.c.l.s8.bf16 %v1457_v2  ;;  %v1432_v2 = vld [vmem:[%s6790_s7 + $0xce0] sm:$0xff] }
 0x283   : > { %3691 = vmatpush2.bf16.msra.mxu0 %v2080_v9  ;;  %v3404_v9 = vadd.f32 %v3403_v36, %v3360_v35 }
 0x284   : > { %3734 = vmatpush2.bf16.msra.mxu1 %v2464_v12  ;;  %3692 = vmatprep.subr.bf16.mxu0 %v2057_v14 }
 0x285   : > { %3735 = vmatprep.subr.bf16.mxu1 %v2441_v18  ;;  %v2704_v18 = vunpack.c.l.s8.bf16 %v1480_v51 }
 0x287   : > { %3693 = vmatpush2.bf16.msra.mxu0 %v2056_v21  ;;  %v5571_v21 = vrot.slane %v7082_v63, %v6862_v41 }
 0x288   : > { %3736 = vmatpush2.bf16.msra.mxu1 %v2440_v22  ;;  %3694 = vmatprep.subr.bf16.mxu0 %v2033_v0  ;;  %v5401_v0 = vrot.slane %v7079_v57, %v6859_v40 }
 0x289   : > { %3737 = vmatprep.subr.bf16.mxu1 %v2417_v23  ;;  %v3088_v23 = vunpack.c.l.s8.bf16 %v1672_v54  ;;  %v2656_v54 = vunpack.c.l.s8.bf16 %v1456_v20 }
 0x28b   : > { %3695 = vmatpush2.bf16.msra.mxu0 %v2032_v25 }
 0x28c   : > { %3738 = vmatpush2.bf16.msra.mxu1 %v2416_v27  ;;  %3696 = vmatprep.subr.bf16.mxu0 %v2009_v28  ;;  %v3065_v28 = vunpack.c.h.s8.bf16 %v1649_v8 }
 0x28d   : > { %3739 = vmatprep.subr.bf16.mxu1 %v2393_v30 }
 0x28f   : > { %3697 = vmatpush2.bf16.msra.mxu0 %v2008_v33  ;;  %v3408_v33 = vadd.f32 %v3407_v61, %v3364_v56  ;;  %v3040_v61 = vunpack.c.l.s8.bf16 %v1648_v43 }
 0x290   : > { %3740 = vmatpush2.bf16.msra.mxu1 %v2392_v58  ;;  %3698 = vmatprep.subr.bf16.mxu0 %v1985_v6 }
 0x291   : > { %3741 = vmatprep.subr.bf16.mxu1 %v2369_v37 }
 0x293   : > { %3699 = vmatpush2.bf16.msra.mxu0 %v1984_v62  ;;  %v3041_v62 = vunpack.c.l.s8.bf16 %v1649_v8 }
 0x294   : > { %3742 = vmatpush2.bf16.msra.mxu1 %v2368_v45  ;;  %3754 = vmatprep.subr.bf16.mxu0 %v2729_v48 }
 0x295   : > { %3797 = vmatprep.subr.bf16.mxu1 %v3113_v53 }
 0x296   : > { %v3444_v4 = vpop.f32.mrf.mxu0  ;;  %3701 = vmatmul.mubr.bf16.vlgmr.msra.gmra.mxu0 %v6884_v15  ;;  %v3487_v14 = vpop.f32.mrf.mxu1 }
 0x297   : > { %v3445_v12 = vadd.f32 %v3444_v4, %v3402_v60  ;;  %3744 = vmatmul.mubr.bf16.vlgmr.msra.gmra.mxu1 %v6889_v19  ;;  %3755 = vmatpush1.bf16.msra.mxu0 %v2728_v55  ;;  %v1625_v55 = vld [vmem:[%s6790_s7 + $0x12e8] sm:$0xff] }
 0x298   : > { %3786 = vmatprep.mubr.bf16.mxu0 %v6930_v31  ;;  %3798 = vmatpush1.bf16.msra.mxu1 %v3112_v59  ;;  %v3446_v22 = vpop.f32.mrf.mxu0  ;;  %v3489_v27 = vpop.f32.mrf.mxu1  ;;  %v3017_v8 = vunpack.c.h.s8.bf16 %v1625_v55  ;;  %v2993_v20 = vunpack.c.l.s8.bf16 %v1625_v55 }
 0x299   : > { %v3488_v25 = vadd.f32 %v3487_v14, %v3445_v12  ;;  %3829 = vmatprep.mubr.bf16.mxu1 %v6932_v34  ;;  %v3447_v26 = vadd.f32 %v3446_v22, %v3404_v9  ;;  %3756 = vmatprep.subr.bf16.mxu0 %v2705_v1  ;;  %v2633_v1 = vunpack.c.h.s8.bf16 %v1433_v52  ;;  %v1624_v9 = vld [vmem:[%s6790_s7 + $0x12e0] sm:$0xff]  ;;  %v2632_v14 = vunpack.c.h.s8.bf16 %v1432_v2  ;;  %v1601_v22 = vld [vmem:[%s6790_s7 + $0x1228] sm:$0xff] }
 0x29a   : > { %v3448_v30 = vpop.f32.mrf.mxu0  ;;  %3799 = vmatprep.subr.bf16.mxu1 %v3089_v5  ;;  %v3491_v36 = vpop.f32.mrf.mxu1 }
 0x29b   : > { %v5514_v35 = vmul.f32 %v5397_v17, %v3488_v25  ;;  %v3490_v58 = vadd.f32 %v3489_v27, %v3447_v26  ;;  %v3449_v6 = vadd.f32 %v3448_v30, %v3406_v24  ;;  %3757 = vmatpush1.bf16.msra.mxu0 %v2704_v18  ;;  %v2609_v18 = vunpack.c.l.s8.bf16 %v1433_v52  ;;  %v1408_v24 = vld [vmem:[%s6790_s7 + $0xc20] sm:$0xff] }
 0x29c   : > { %3800 = vmatpush1.bf16.msra.mxu1 %v3088_v23  ;;  %v3450_v37 = vpop.f32.mrf.mxu0  ;;  %3758 = vmatprep.subr.bf16.mxu0 %v2681_v10  ;;  %v3493_v53 = vpop.f32.mrf.mxu1  ;;  %v2992_v23 = vunpack.c.l.s8.bf16 %v1624_v9  ;;  %v2969_v25 = vunpack.c.h.s8.bf16 %v1601_v22  ;;  %v1600_v26 = vld [vmem:[%s6790_s7 + $0x1220] sm:$0xff]  ;;  %v2584_v27 = vunpack.c.h.s8.bf16 %v1408_v24  ;;  %v2945_v30 = vunpack.c.l.s8.bf16 %v1601_v22 }
 0x29d   : > { %v5688_v11 = vadd.f32 %v5571_v21, %v5514_v35  ;;  %v5515_v45 = vmul.f32 %v5401_v0, %v3490_v58  ;;  %v3492_v48 = vadd.f32 %v3491_v36, %v3449_v6  ;;  %v3451_v51 = vadd.f32 %v3450_v37, %v3408_v33  ;;  %3801 = vmatprep.subr.bf16.mxu1 %v3065_v28  ;;  %v1769_v35 = vld [vmem:[%s6790_s7 + $0x1768] sm:$0xff]  ;;  %v1720_v22 = vld [vmem:[%s6790_s7 + $0x15e0] sm:$0xff] }
 0x29e   : > { %v2968_v43 = vunpack.c.h.s8.bf16 %v1600_v26  ;;  %v2560_v58 = vunpack.c.l.s8.bf16 %v1408_v24  ;;  %v2944_v36 = vunpack.c.l.s8.bf16 %v1600_v26  ;;  %v3281_v52 = vunpack.c.l.s8.bf16 %v1769_v35  ;;  %v1697_v26 = vld [vmem:[%s6790_s7 + $0x1528] sm:$0xff] }
 0x29f   : > { %6183 = vtanh.f32 %v5688_v11  ;;  %v5689_v56 = vadd.f32 %v5575_v29, %v5515_v45  ;;  %v5538_v59 = vmul.f32 %v5397_v17, %v3492_v48  ;;  %v3494_v60 = vadd.f32 %v3493_v53, %v3451_v51  ;;  %3759 = vmatpush1.bf16.msra.mxu0 %v2680_v32  ;;  %v1577_v32 = vld [vmem:[%s6790_s7 + $0x1168] sm:$0xff] }
 0x2a0   : > { %3802 = vmatpush1.bf16.msra.mxu1 %v3064_v38  ;;  %3760 = vmatprep.subr.bf16.mxu0 %v2657_v39  ;;  %v3016_v17 = vunpack.c.h.s8.bf16 %v1624_v9  ;;  %v2921_v37 = vunpack.c.h.s8.bf16 %v1577_v32  ;;  %v1576_v38 = vld [vmem:[%s6790_s7 + $0x1160] sm:$0xff]  ;;  %v3305_v39 = vunpack.c.h.s8.bf16 %v1769_v35  ;;  %v2897_v51 = vunpack.c.l.s8.bf16 %v1577_v32  ;;  %v1553_v53 = vld [vmem:[%s6790_s7 + $0x10a8] sm:$0xff] }
 0x2a1   : > { %6185 = vtanh.f32 %v5689_v56  ;;  %v5712_v4 = vadd.f32 %v5571_v21, %v5538_v59  ;;  %v5539_v5 = vmul.f32 %v5401_v0, %v3494_v60  ;;  %3803 = vmatprep.subr.bf16.mxu1 %v3041_v62  ;;  %v1409_v21 = vld [vmem:[%s6790_s7 + $0xc28] sm:$0xff]  ;;  %v2608_v0 = vunpack.c.l.s8.bf16 %v1432_v2  ;;  %v1768_v62 = vld [vmem:[%s6790_s7 + $0x1760] sm:$0xff] }
 0x2a2   : > { %v2585_v10 = vunpack.c.h.s8.bf16 %v1409_v21  ;;  %v2920_v45 = vunpack.c.h.s8.bf16 %v1576_v38  ;;  %v3304_v48 = vunpack.c.h.s8.bf16 %v1768_v62  ;;  %v2896_v55 = vunpack.c.l.s8.bf16 %v1576_v38  ;;  %v1552_v60 = vld [vmem:[%s6790_s7 + $0x10a0] sm:$0xff]  ;;  %v1529_v9 = vld [vmem:[%s6790_s7 + $0xfe8] sm:$0xff] }
 0x2a3   : > { %6187 = vtanh.f32 %v5712_v4  ;;  %v5713_v12 = vadd.f32 %v5575_v29, %v5539_v5  ;;  %3761 = vmatpush1.bf16.msra.mxu0 %v2656_v54  ;;  %v2561_v29 = vunpack.c.l.s8.bf16 %v1409_v21  ;;  %v1745_v54 = vld [vmem:[%s6790_s7 + $0x16a8] sm:$0xff]  ;;  %v3280_v56 = vunpack.c.l.s8.bf16 %v1768_v62  ;;  %v1696_v32 = vld [vmem:[%s6790_s7 + $0x1520] sm:$0xff] }
 0x2a4   : > { %3804 = vmatpush1.bf16.msra.mxu1 %v3040_v61  ;;  %3762 = vmatprep.subr.bf16.mxu0 %v2633_v1  ;;  %v2873_v59 = vunpack.c.h.s8.bf16 %v1553_v53  ;;  %v3257_v61 = vunpack.c.h.s8.bf16 %v1745_v54  ;;  %v1744_v1 = vld [vmem:[%s6790_s7 + $0x16a0] sm:$0xff]  ;;  %v2872_v2 = vunpack.c.h.s8.bf16 %v1552_v60  ;;  %v2849_v5 = vunpack.c.l.s8.bf16 %v1553_v53 }
 0x2a5   : > { %6189 = vtanh.f32 %v5713_v12  ;;  %3805 = vmatprep.subr.bf16.mxu1 %v3017_v8  ;;  %v3256_v4 = vunpack.c.h.s8.bf16 %v1744_v1  ;;  %v3233_v8 = vunpack.c.l.s8.bf16 %v1745_v54  ;;  %v1721_v12 = vld [vmem:[%s6790_s7 + $0x15e8] sm:$0xff]  ;;  %v3160_v35 = vunpack.c.h.s8.bf16 %v1696_v32  ;;  %v1075_v54 = vld [vmem:[%s6790_s7 + $0x1b8] sm:$0xff] }
 0x2a6   : > { %v3209_v21 = vunpack.c.h.s8.bf16 %v1721_v12  ;;  %v3185_v24 = vunpack.c.l.s8.bf16 %v1721_v12 }
 0x2a7   : > { %3763 = vmatpush1.bf16.msra.mxu0 %v2632_v14  ;;  %v2848_v14 = vunpack.c.l.s8.bf16 %v1552_v60 }
 0x2a8   : > { %3806 = vmatpush1.bf16.msra.mxu1 %v3016_v17  ;;  %3764 = vmatprep.subr.bf16.mxu0 %v2609_v18  ;;  %v3232_v17 = vunpack.c.l.s8.bf16 %v1744_v1  ;;  %v2825_v18 = vunpack.c.h.s8.bf16 %v1529_v9  ;;  %v1074_v1 = vld [vmem:[%s6790_s7 + $0x1b0] sm:$0xff] }
 0x2a9   : > { %3807 = vmatprep.subr.bf16.mxu1 %v2993_v20  ;;  %v1528_v20 = vld [vmem:[%s6790_s7 + $0xfe0] sm:$0xff] }
 0x2ab   : > { %3765 = vmatpush1.bf16.msra.mxu0 %v2608_v0  ;;  %v2824_v0 = vunpack.c.h.s8.bf16 %v1528_v20 }
 0x2ac   : > { %v6184_v28 = vpop.eup %6183  ;;  %3808 = vmatpush1.bf16.msra.mxu1 %v2992_v23  ;;  %3766 = vmatprep.subr.bf16.mxu0 %v2585_v10  ;;  %v3208_v23 = vunpack.c.h.s8.bf16 %v1720_v22  ;;  %v2801_v10 = vunpack.c.l.s8.bf16 %v1529_v9  ;;  %v1891_v9 = vunpack.c.l.s8.bf16 %v1075_v54 }
 0x2ad   : > { %5784 = vst [vmem:[%s7109_s17] sm:$0xff] %v6184_v28  ;;  %3809 = vmatprep.subr.bf16.mxu1 %v2969_v25  ;;  %v1505_v25 = vld [vmem:[%s6790_s7 + $0xf28] sm:$0xff]  ;;  %v3184_v28 = vunpack.c.l.s8.bf16 %v1720_v22  ;;  %v1050_v22 = vld [vmem:[%s6790_s7 + $0xf0] sm:$0xff] }
 0x2ae   : > { %v6186_v33 = vpop.eup %6185 }
 0x2af   : > { %5785 = vst [vmem:[%s7109_s17 + $0x8] sm:$0xff] %v6186_v33  ;;  %3767 = vmatpush1.bf16.msra.mxu0 %v2584_v27  ;;  %v2800_v27 = vunpack.c.l.s8.bf16 %v1528_v20 }
 0x2b0   : > { %v6188_v6 = vpop.eup %6187  ;;  %3810 = vmatpush1.bf16.msra.mxu1 %v2968_v43  ;;  %3768 = vmatprep.subr.bf16.mxu0 %v2561_v29  ;;  %v2777_v43 = vunpack.c.h.s8.bf16 %v1505_v25  ;;  %v1504_v29 = vld [vmem:[%s6790_s7 + $0xf20] sm:$0xff] }
 0x2b1   : > { %5808 = vst [vmem:[%s7109_s17 + $0xc0] sm:$0xff] %v6188_v6  ;;  %3811 = vmatprep.subr.bf16.mxu1 %v2945_v30  ;;  %v3161_v30 = vunpack.c.h.s8.bf16 %v1697_v26  ;;  %v2776_v33 = vunpack.c.h.s8.bf16 %v1504_v29  ;;  %v3137_v6 = vunpack.c.l.s8.bf16 %v1697_v26  ;;  %v2752_v38 = vunpack.c.l.s8.bf16 %v1504_v29 }
 0x2b2   : > { %v6190_v11 = vpop.eup %6189 }
 0x2b3   : > { %5809 = vst [vmem:[%s7109_s17 + $0xc8] sm:$0xff] %v6190_v11  ;;  %3769 = vmatpush1.bf16.msra.mxu0 %v2560_v58  ;;  %v2753_v58 = vunpack.c.l.s8.bf16 %v1505_v25  ;;  %v1098_v11 = vld [vmem:[%s6790_s7 + $0x270] sm:$0xff] }
 0x2b4   : > { %3812 = vmatpush1.bf16.msra.mxu1 %v2944_v36  ;;  %3770 = vmatprep.subr.bf16.mxu0 %v2921_v37  ;;  %v1099_v36 = vld [vmem:[%s6790_s7 + $0x278] sm:$0xff] }
 0x2b5   : > { %3813 = vmatprep.subr.bf16.mxu1 %v3305_v39  ;;  %v1291_v37 = vld [vmem:[%s6790_s7 + $0x878] sm:$0xff]  ;;  %v3136_v39 = vunpack.c.l.s8.bf16 %v1696_v32  ;;  %v1963_v62 = vunpack.c.h.s8.bf16 %v1099_v36  ;;  %v1939_v53 = vunpack.c.l.s8.bf16 %v1099_v36  ;;  %v1026_v32 = vld [vmem:[%s6790_s7 + $0x30] sm:$0xff] }
 0x2b7   : > { %3771 = vmatpush2.bf16.msra.mxu0 %v2920_v45  ;;  %v2347_v45 = vunpack.c.h.s8.bf16 %v1291_v37 }
 0x2b8   : > { %3814 = vmatpush2.bf16.msra.mxu1 %v3304_v48  ;;  %3772 = vmatprep.subr.bf16.mxu0 %v2897_v51  ;;  %v1290_v48 = vld [vmem:[%s6790_s7 + $0x870] sm:$0xff]  ;;  %v1962_v51 = vunpack.c.h.s8.bf16 %v1098_v11 }
 0x2b9   : > { %3815 = vmatprep.subr.bf16.mxu1 %v3281_v52  ;;  %v2346_v52 = vunpack.c.h.s8.bf16 %v1290_v48  ;;  %v2322_v60 = vunpack.c.l.s8.bf16 %v1290_v48  ;;  %v1194_v48 = vld [vmem:[%s6790_s7 + $0x570] sm:$0xff] }
 0x2bb   : > { %3773 = vmatpush2.bf16.msra.mxu0 %v2896_v55  ;;  %v2323_v55 = vunpack.c.l.s8.bf16 %v1291_v37 }
 0x2bc   : > { %3816 = vmatpush2.bf16.msra.mxu1 %v3280_v56  ;;  %3774 = vmatprep.subr.bf16.mxu0 %v2873_v59  ;;  %v1267_v56 = vld [vmem:[%s6790_s7 + $0x7b8] sm:$0xff]  ;;  %v1938_v59 = vunpack.c.l.s8.bf16 %v1098_v11 }
 0x2bd   : > { %3817 = vmatprep.subr.bf16.mxu1 %v3257_v61  ;;  %v1915_v61 = vunpack.c.h.s8.bf16 %v1075_v54  ;;  %v2275_v12 = vunpack.c.l.s8.bf16 %v1267_v56 }
 0x2bf   : > { %3775 = vmatpush2.bf16.msra.mxu0 %v2872_v2  ;;  %v2299_v2 = vunpack.c.h.s8.bf16 %v1267_v56 }
 0x2c0   : > { %3818 = vmatpush2.bf16.msra.mxu1 %v3256_v4  ;;  %3776 = vmatprep.subr.bf16.mxu0 %v2849_v5  ;;  %v1266_v4 = vld [vmem:[%s6790_s7 + $0x7b0] sm:$0xff]  ;;  %v1914_v5 = vunpack.c.h.s8.bf16 %v1074_v1 }
 0x2c1   : > { %3819 = vmatprep.subr.bf16.mxu1 %v3233_v8  ;;  %v2298_v8 = vunpack.c.h.s8.bf16 %v1266_v4  ;;  %v2274_v20 = vunpack.c.l.s8.bf16 %v1266_v4  ;;  %v1170_v4 = vld [vmem:[%s6790_s7 + $0x4b0] sm:$0xff] }
 0x2c3   : > { %3777 = vmatpush2.bf16.msra.mxu0 %v2848_v14  ;;  %v1051_v14 = vld [vmem:[%s6790_s7 + $0xf8] sm:$0xff] }
 0x2c4   : > { %3820 = vmatpush2.bf16.msra.mxu1 %v3232_v17  ;;  %3778 = vmatprep.subr.bf16.mxu0 %v2825_v18  ;;  %v1243_v17 = vld [vmem:[%s6790_s7 + $0x6f8] sm:$0xff]  ;;  %v1890_v18 = vunpack.c.l.s8.bf16 %v1074_v1  ;;  %v1843_v25 = vunpack.c.l.s8.bf16 %v1051_v14 }
 0x2c5   : > { %3821 = vmatprep.subr.bf16.mxu1 %v3209_v21  ;;  %v1867_v21 = vunpack.c.h.s8.bf16 %v1051_v14  ;;  %v2227_v26 = vunpack.c.l.s8.bf16 %v1243_v17 }
 0x2c7   : > { %3779 = vmatpush2.bf16.msra.mxu0 %v2824_v0  ;;  %v2251_v0 = vunpack.c.h.s8.bf16 %v1243_v17 }
 0x2c8   : > { %3822 = vmatpush2.bf16.msra.mxu1 %v3208_v23  ;;  %3780 = vmatprep.subr.bf16.mxu0 %v2801_v10  ;;  %v1242_v23 = vld [vmem:[%s6790_s7 + $0x6f0] sm:$0xff]  ;;  %v1866_v10 = vunpack.c.h.s8.bf16 %v1050_v22 }
 0x2c9   : > { %3823 = vmatprep.subr.bf16.mxu1 %v3185_v24  ;;  %v2250_v24 = vunpack.c.h.s8.bf16 %v1242_v23  ;;  %v2226_v29 = vunpack.c.l.s8.bf16 %v1242_v23  ;;  %v1146_v23 = vld [vmem:[%s6790_s7 + $0x3f0] sm:$0xff] }
 0x2cb   : > { %3781 = vmatpush2.bf16.msra.mxu0 %v2800_v27  ;;  %v1027_v27 = vld [vmem:[%s6790_s7 + $0x38] sm:$0xff] }
 0x2cc   : > { %3824 = vmatpush2.bf16.msra.mxu1 %v3184_v28  ;;  %3782 = vmatprep.subr.bf16.mxu0 %v2777_v43  ;;  %v1219_v28 = vld [vmem:[%s6790_s7 + $0x638] sm:$0xff]  ;;  %v1842_v43 = vunpack.c.l.s8.bf16 %v1050_v22  ;;  %v1795_v36 = vunpack.c.l.s8.bf16 %v1027_v27 }
 0x2cd   : > { %3825 = vmatprep.subr.bf16.mxu1 %v3161_v30  ;;  %v1819_v30 = vunpack.c.h.s8.bf16 %v1027_v27  ;;  %v2179_v37 = vunpack.c.l.s8.bf16 %v1219_v28 }
 0x2cf   : > { %3783 = vmatpush2.bf16.msra.mxu0 %v2776_v33  ;;  %v2203_v33 = vunpack.c.h.s8.bf16 %v1219_v28 }
 0x2d0   : > { %3826 = vmatpush2.bf16.msra.mxu1 %v3160_v35  ;;  %3784 = vmatprep.subr.bf16.mxu0 %v2753_v58  ;;  %v1218_v35 = vld [vmem:[%s6790_s7 + $0x630] sm:$0xff]  ;;  %v1818_v58 = vunpack.c.h.s8.bf16 %v1026_v32 }
 0x2d1   : > { %3827 = vmatprep.subr.bf16.mxu1 %v3137_v6  ;;  %v2202_v6 = vunpack.c.h.s8.bf16 %v1218_v35  ;;  %v2178_v11 = vunpack.c.l.s8.bf16 %v1218_v35 }
 0x2d3   : > { %3785 = vmatpush2.bf16.msra.mxu0 %v2752_v38  ;;  %v1195_v38 = vld [vmem:[%s6790_s7 + $0x578] sm:$0xff] }
 0x2d4   : > { %3828 = vmatpush2.bf16.msra.mxu1 %v3136_v39  ;;  %3840 = vmatprep.subr.bf16.mxu0 %v1963_v62  ;;  %v1387_v39 = vld [vmem:[%s6790_s7 + $0xb78] sm:$0xff]  ;;  %v1794_v62 = vunpack.c.l.s8.bf16 %v1026_v32 }
 0x2d5   : > { %3883 = vmatprep.subr.bf16.mxu1 %v2347_v45  ;;  %v2155_v45 = vunpack.c.h.s8.bf16 %v1195_v38  ;;  %v2515_v56 = vunpack.c.l.s8.bf16 %v1387_v39 }
 0x2d6   : > { %3787 = vmatmul.mubr.bf16.vlgmr.msra.gmra.mxu0 %v6966_v47  ;;  %v3530_v32 = vpop.f32.mrf.mxu0 }
 0x2d7   : > { %3830 = vmatmul.mubr.bf16.vlgmr.msra.gmra.mxu1 %v6968_v50  ;;  %3841 = vmatpush1.bf16.msra.mxu0 %v1962_v51  ;;  %v2539_v51 = vunpack.c.h.s8.bf16 %v1387_v39 }
 0x2d8   : > { %3872 = vmatprep.mubr.bf16.mxu0 %v6882_v13  ;;  %3884 = vmatpush1.bf16.msra.mxu1 %v2346_v52  ;;  %v1386_v52 = vld [vmem:[%s6790_s7 + $0xb70] sm:$0xff]  ;;  %v3532_v39 = vpop.f32.mrf.mxu0 }
 0x2d9   : > { %3915 = vmatprep.mubr.bf16.mxu1 %v6886_v16  ;;  %3842 = vmatprep.subr.bf16.mxu0 %v1939_v53  ;;  %v2154_v53 = vunpack.c.h.s8.bf16 %v1194_v48  ;;  %v2538_v54 = vunpack.c.h.s8.bf16 %v1386_v52  ;;  %v2514_v1 = vunpack.c.l.s8.bf16 %v1386_v52  ;;  %v1675_v52 = vld [vmem:[%s6790_s7 + $0x1478] sm:$0xff] }
 0x2da   : > { %3885 = vmatprep.subr.bf16.mxu1 %v2323_v55  ;;  %v2131_v55 = vunpack.c.l.s8.bf16 %v1195_v38 }
 0x2db   : > { %3843 = vmatpush1.bf16.msra.mxu0 %v1938_v59  ;;  %v1171_v59 = vld [vmem:[%s6790_s7 + $0x4b8] sm:$0xff] }
 0x2dc   : > { %3886 = vmatpush1.bf16.msra.mxu1 %v2322_v60  ;;  %3844 = vmatprep.subr.bf16.mxu0 %v1915_v61  ;;  %v1363_v60 = vld [vmem:[%s6790_s7 + $0xab8] sm:$0xff]  ;;  %v2130_v61 = vunpack.c.l.s8.bf16 %v1194_v48  ;;  %v2083_v14 = vunpack.c.l.s8.bf16 %v1171_v59 }
 0x2dd   : > { %3887 = vmatprep.subr.bf16.mxu1 %v2299_v2  ;;  %v2107_v2 = vunpack.c.h.s8.bf16 %v1171_v59  ;;  %v2467_v17 = vunpack.c.l.s8.bf16 %v1363_v60  ;;  %v1482_v59 = vld [vmem:[%s6790_s7 + $0xe70] sm:$0xff] }
 0x2df   : > { %3845 = vmatpush1.bf16.msra.mxu0 %v1914_v5  ;;  %v2491_v5 = vunpack.c.h.s8.bf16 %v1363_v60 }
 0x2e0   : > { %3888 = vmatpush1.bf16.msra.mxu1 %v2298_v8  ;;  %3846 = vmatprep.subr.bf16.mxu0 %v1891_v9  ;;  %v1362_v8 = vld [vmem:[%s6790_s7 + $0xab0] sm:$0xff]  ;;  %v2106_v9 = vunpack.c.h.s8.bf16 %v1170_v4 }
 0x2e1   : > { %3889 = vmatprep.subr.bf16.mxu1 %v2275_v12  ;;  %v2490_v12 = vunpack.c.h.s8.bf16 %v1362_v8  ;;  %v2466_v22 = vunpack.c.l.s8.bf16 %v1362_v8 }
 0x2e3   : > { %3847 = vmatpush1.bf16.msra.mxu0 %v1890_v18  ;;  %v1147_v18 = vld [vmem:[%s6790_s7 + $0x3f8] sm:$0xff] }
 0x2e4   : > { %3890 = vmatpush1.bf16.msra.mxu1 %v2274_v20  ;;  %3848 = vmatprep.subr.bf16.mxu0 %v1867_v21  ;;  %v1339_v20 = vld [vmem:[%s6790_s7 + $0x9f8] sm:$0xff]  ;;  %v2082_v21 = vunpack.c.l.s8.bf16 %v1170_v4  ;;  %v2035_v27 = vunpack.c.l.s8.bf16 %v1147_v18 }
 0x2e5   : > { %3891 = vmatprep.subr.bf16.mxu1 %v2251_v0  ;;  %v2059_v0 = vunpack.c.h.s8.bf16 %v1147_v18  ;;  %v2419_v28 = vunpack.c.l.s8.bf16 %v1339_v20  ;;  %v3091_v18 = vunpack.c.l.s8.bf16 %v1675_v52 }
 0x2e7   : > { %3849 = vmatpush1.bf16.msra.mxu0 %v1866_v10  ;;  %v2443_v10 = vunpack.c.h.s8.bf16 %v1339_v20  ;;  %v1651_v20 = vld [vmem:[%s6790_s7 + $0x13b8] sm:$0xff] }
 0x2e8   : > { %3892 = vmatpush1.bf16.msra.mxu1 %v2250_v24  ;;  %3850 = vmatprep.subr.bf16.mxu0 %v1843_v25  ;;  %v1338_v24 = vld [vmem:[%s6790_s7 + $0x9f0] sm:$0xff]  ;;  %v2058_v25 = vunpack.c.h.s8.bf16 %v1146_v23 }
 0x2e9   : > { %3893 = vmatprep.subr.bf16.mxu1 %v2227_v26  ;;  %v2442_v26 = vunpack.c.h.s8.bf16 %v1338_v24 }
 0x2eb   : > { %3851 = vmatpush1.bf16.msra.mxu0 %v1842_v43  ;;  %v1123_v43 = vld [vmem:[%s6790_s7 + $0x338] sm:$0xff] }
 0x2ec   : > { %3894 = vmatpush1.bf16.msra.mxu1 %v2226_v29  ;;  %3852 = vmatprep.subr.bf16.mxu0 %v1819_v30  ;;  %v1315_v29 = vld [vmem:[%s6790_s7 + $0x938] sm:$0xff]  ;;  %v2034_v30 = vunpack.c.l.s8.bf16 %v1146_v23  ;;  %v2011_v35 = vunpack.c.h.s8.bf16 %v1123_v43  ;;  %v5405_v23 = vrot.slane %v7079_v57, %v6870_v44 }
 0x2ed   : > { %3895 = vmatprep.subr.bf16.mxu1 %v2203_v33  ;;  %v2418_v33 = vunpack.c.l.s8.bf16 %v1338_v24  ;;  %v2371_v48 = vunpack.c.l.s8.bf16 %v1315_v29  ;;  %v1458_v24 = vld [vmem:[%s6790_s7 + $0xdb0] sm:$0xff] }
 0x2ef   : > { %3853 = vmatpush1.bf16.msra.mxu0 %v1818_v58  ;;  %v1122_v58 = vld [vmem:[%s6790_s7 + $0x330] sm:$0xff] }
 0x2f0   : > { %3896 = vmatpush1.bf16.msra.mxu1 %v2202_v6  ;;  %3854 = vmatprep.subr.bf16.mxu0 %v1795_v36  ;;  %v3573_v6 = vpop.f32.mrf.mxu1  ;;  %v2395_v36 = vunpack.c.h.s8.bf16 %v1315_v29  ;;  %v2010_v38 = vunpack.c.h.s8.bf16 %v1122_v58 }
 0x2f1   : > { %3897 = vmatprep.subr.bf16.mxu1 %v2179_v37  ;;  %v1314_v37 = vld [vmem:[%s6790_s7 + $0x930] sm:$0xff]  ;;  %v3574_v8 = vadd.f32 %v3573_v6, %v3530_v32  ;;  %v5583_v6 = vrot.slane %v7082_v63, %v6865_v42 }
 0x2f3   : > { %3855 = vmatpush1.bf16.msra.mxu0 %v1794_v62  ;;  %v2394_v62 = vunpack.c.h.s8.bf16 %v1314_v37 }
 0x2f4   : > { %3898 = vmatpush1.bf16.msra.mxu1 %v2178_v11  ;;  %3856 = vmatprep.subr.bf16.mxu0 %v2155_v45  ;;  %v1987_v11 = vunpack.c.l.s8.bf16 %v1123_v43  ;;  %v3575_v45 = vpop.f32.mrf.mxu1 }
 0x2f5   : > { %3899 = vmatprep.subr.bf16.mxu1 %v2539_v51  ;;  %v1483_v51 = vld [vmem:[%s6790_s7 + $0xe78] sm:$0xff] }
 0x2f6   : > { %v3577_v60 = vpop.f32.mrf.mxu1 }
 0x2f7   : > { %3857 = vmatpush2.bf16.msra.mxu0 %v2154_v53  ;;  %v1986_v53 = vunpack.c.l.s8.bf16 %v1122_v58  ;;  %v1650_v58 = vld [vmem:[%s6790_s7 + $0x13b0] sm:$0xff] }
 0x2f8   : > { %3900 = vmatpush2.bf16.msra.mxu1 %v2538_v54  ;;  %3858 = vmatprep.subr.bf16.mxu0 %v2131_v55  ;;  %v3534_v54 = vpop.f32.mrf.mxu0  ;;  %v2370_v55 = vunpack.c.l.s8.bf16 %v1314_v37  ;;  %v2682_v37 = vunpack.c.h.s8.bf16 %v1458_v24 }
 0x2f9   : > { %3901 = vmatprep.subr.bf16.mxu1 %v2515_v56  ;;  %v2731_v56 = vunpack.c.h.s8.bf16 %v1483_v51  ;;  %v3578_v29 = vadd.f32 %v3577_v60, %v3534_v54  ;;  %v2658_v60 = vunpack.c.l.s8.bf16 %v1458_v24  ;;  %v1603_v24 = vld [vmem:[%s6790_s7 + $0x1238] sm:$0xff] }
 0x2fa   : > { %v3536_v4 = vpop.f32.mrf.mxu0 }
 0x2fb   : > { %3859 = vmatpush2.bf16.msra.mxu0 %v2130_v61  ;;  %v3115_v61 = vunpack.c.h.s8.bf16 %v1675_v52  ;;  %v3043_v52 = vunpack.c.l.s8.bf16 %v1651_v20 }
 0x2fc   : > { %3902 = vmatpush2.bf16.msra.mxu1 %v2514_v1  ;;  %3860 = vmatprep.subr.bf16.mxu0 %v2107_v2  ;;  %v1674_v1 = vld [vmem:[%s6790_s7 + $0x1470] sm:$0xff]  ;;  %v2730_v2 = vunpack.c.h.s8.bf16 %v1482_v59 }
 0x2fd   : > { %3903 = vmatprep.subr.bf16.mxu1 %v2491_v5  ;;  %v3114_v5 = vunpack.c.h.s8.bf16 %v1674_v1 }
 0x2ff   : > { %3861 = vmatpush2.bf16.msra.mxu0 %v2106_v9  ;;  %v3579_v9 = vpop.f32.mrf.mxu1 }
 0x300   : > { %3904 = vmatpush2.bf16.msra.mxu1 %v2490_v12  ;;  %3862 = vmatprep.subr.bf16.mxu0 %v2083_v14  ;;  %v2707_v12 = vunpack.c.l.s8.bf16 %v1483_v51  ;;  %v1459_v14 = vld [vmem:[%s6790_s7 + $0xdb8] sm:$0xff] }
 0x301   : > { %3905 = vmatprep.subr.bf16.mxu1 %v2467_v17  ;;  %v2683_v43 = vunpack.c.h.s8.bf16 %v1459_v14  ;;  %v2659_v51 = vunpack.c.l.s8.bf16 %v1459_v14 }
 0x303   : > { %3863 = vmatpush2.bf16.msra.mxu0 %v2082_v21  ;;  %v3576_v21 = vadd.f32 %v3575_v45, %v3532_v39 }
 0x304   : > { %3906 = vmatpush2.bf16.msra.mxu1 %v2466_v22  ;;  %3864 = vmatprep.subr.bf16.mxu0 %v2059_v0 }
 0x305   : > { %3907 = vmatprep.subr.bf16.mxu1 %v2443_v10  ;;  %v2706_v10 = vunpack.c.l.s8.bf16 %v1482_v59 }
 0x307   : > { %3865 = vmatpush2.bf16.msra.mxu0 %v2058_v25  ;;  %v5579_v25 = vrot.slane %v7082_v63, %v6870_v44 }
 0x308   : > { %3908 = vmatpush2.bf16.msra.mxu1 %v2442_v26  ;;  %3866 = vmatprep.subr.bf16.mxu0 %v2035_v27  ;;  %v5409_v27 = vrot.slane %v7079_v57, %v6865_v42 }
 0x309   : > { %3909 = vmatprep.subr.bf16.mxu1 %v2419_v28  ;;  %v3090_v28 = vunpack.c.l.s8.bf16 %v1674_v1 }
 0x30b   : > { %3867 = vmatpush2.bf16.msra.mxu0 %v2034_v30 }
 0x30c   : > { %3910 = vmatpush2.bf16.msra.mxu1 %v2418_v33  ;;  %3868 = vmatprep.subr.bf16.mxu0 %v2011_v35  ;;  %v3067_v35 = vunpack.c.h.s8.bf16 %v1651_v20 }
 0x30d   : > { %3911 = vmatprep.subr.bf16.mxu1 %v2395_v36 }
 0x30f   : > { %3869 = vmatpush2.bf16.msra.mxu0 %v2010_v38  ;;  %v3580_v38 = vadd.f32 %v3579_v9, %v3536_v4  ;;  %v1434_v9 = vld [vmem:[%s6790_s7 + $0xcf0] sm:$0xff] }
 0x310   : > { %3912 = vmatpush2.bf16.msra.mxu1 %v2394_v62  ;;  %3870 = vmatprep.subr.bf16.mxu0 %v1987_v11 }
 0x311   : > { %3913 = vmatprep.subr.bf16.mxu1 %v2371_v48  ;;  %v3066_v48 = vunpack.c.h.s8.bf16 %v1650_v58 }
 0x313   : > { %3871 = vmatpush2.bf16.msra.mxu0 %v1986_v53 }
 0x314   : > { %3914 = vmatpush2.bf16.msra.mxu1 %v2370_v55  ;;  %3926 = vmatprep.subr.bf16.mxu0 %v2731_v56  ;;  %v1435_v56 = vld [vmem:[%s6790_s7 + $0xcf8] sm:$0xff] }
 0x315   : > { %3969 = vmatprep.subr.bf16.mxu1 %v3115_v61  ;;  %v1627_v61 = vld [vmem:[%s6790_s7 + $0x12f8] sm:$0xff] }
 0x316   : > { %v3616_v17 = vpop.f32.mrf.mxu0  ;;  %3873 = vmatmul.mubr.bf16.vlgmr.msra.gmra.mxu0 %v6884_v15 }
 0x317   : > { %v3617_v22 = vadd.f32 %v3616_v17, %v3574_v8  ;;  %v3659_v0 = vpop.f32.mrf.mxu1  ;;  %3916 = vmatmul.mubr.bf16.vlgmr.msra.gmra.mxu1 %v6889_v19  ;;  %3927 = vmatpush1.bf16.msra.mxu0 %v2730_v2  ;;  %v2635_v8 = vunpack.c.h.s8.bf16 %v1435_v56  ;;  %v3019_v17 = vunpack.c.h.s8.bf16 %v1627_v61 }
 0x318   : > { %3958 = vmatprep.mubr.bf16.mxu0 %v6930_v31  ;;  %3970 = vmatpush1.bf16.msra.mxu1 %v3114_v5  ;;  %v3618_v26 = vpop.f32.mrf.mxu0  ;;  %v3042_v5 = vunpack.c.l.s8.bf16 %v1650_v58  ;;  %v2947_v58 = vunpack.c.l.s8.bf16 %v1603_v24 }
 0x319   : > { %v3660_v30 = vadd.f32 %v3659_v0, %v3617_v22  ;;  %4001 = vmatprep.mubr.bf16.mxu1 %v6932_v34  ;;  %v3619_v32 = vadd.f32 %v3618_v26, %v3576_v21  ;;  %v3661_v33 = vpop.f32.mrf.mxu1  ;;  %3928 = vmatprep.subr.bf16.mxu0 %v2707_v12  ;;  %v2634_v21 = vunpack.c.h.s8.bf16 %v1434_v9  ;;  %v2611_v0 = vunpack.c.l.s8.bf16 %v1435_v56  ;;  %v1747_v56 = vld [vmem:[%s6790_s7 + $0x16b8] sm:$0xff] }
 0x31a   : > { %v3620_v36 = vpop.f32.mrf.mxu0  ;;  %3971 = vmatprep.subr.bf16.mxu1 %v3091_v18  ;;  %v1626_v18 = vld [vmem:[%s6790_s7 + $0x12f0] sm:$0xff] }
 0x31b   : > { %v5516_v39 = vmul.f32 %v5405_v23, %v3660_v30  ;;  %v3662_v57 = vadd.f32 %v3661_v33, %v3619_v32  ;;  %v3621_v62 = vadd.f32 %v3620_v36, %v3578_v29  ;;  %v3663_v11 = vpop.f32.mrf.mxu1  ;;  %3929 = vmatpush1.bf16.msra.mxu0 %v2706_v10  ;;  %v3018_v22 = vunpack.c.h.s8.bf16 %v1626_v18  ;;  %v1411_v10 = vld [vmem:[%s6790_s7 + $0xc38] sm:$0xff]  ;;  %v1602_v29 = vld [vmem:[%s6790_s7 + $0x1230] sm:$0xff] }
 0x31c   : > { %3972 = vmatpush1.bf16.msra.mxu1 %v3090_v28  ;;  %v3622_v45 = vpop.f32.mrf.mxu0  ;;  %3930 = vmatprep.subr.bf16.mxu0 %v2683_v43  ;;  %v2994_v26 = vunpack.c.l.s8.bf16 %v1626_v18  ;;  %v1410_v28 = vld [vmem:[%s6790_s7 + $0xc30] sm:$0xff]  ;;  %v2971_v43 = vunpack.c.h.s8.bf16 %v1603_v24  ;;  %v2970_v33 = vunpack.c.h.s8.bf16 %v1602_v29 }
 0x31d   : > { %v5690_v53 = vadd.f32 %v5579_v25, %v5516_v39  ;;  %v5517_v54 = vmul.f32 %v5409_v27, %v3662_v57  ;;  %v3664_v63 = vadd.f32 %v3663_v11, %v3621_v62  ;;  %v3623_v55 = vadd.f32 %v3622_v45, %v3580_v38  ;;  %3973 = vmatprep.subr.bf16.mxu1 %v3067_v35  ;;  %v3665_v59 = vpop.f32.mrf.mxu1  ;;  %v1578_v11 = vld [vmem:[%s6790_s7 + $0x1170] sm:$0xff] }
 0x31e   : > { %v2586_v30 = vunpack.c.h.s8.bf16 %v1410_v28  ;;  %v2563_v35 = vunpack.c.l.s8.bf16 %v1411_v10  ;;  %v2562_v38 = vunpack.c.l.s8.bf16 %v1410_v28  ;;  %v2946_v57 = vunpack.c.l.s8.bf16 %v1602_v29  ;;  %v1699_v28 = vld [vmem:[%s6790_s7 + $0x1538] sm:$0xff] }
 0x31f   : > { %6191 = vtanh.f32 %v5690_v53  ;;  %v5691_v1 = vadd.f32 %v5583_v6, %v5517_v54  ;;  %v5540_v2 = vmul.f32 %v5405_v23, %v3664_v63  ;;  %v3666_v4 = vadd.f32 %v3665_v59, %v3623_v55  ;;  %3931 = vmatpush1.bf16.msra.mxu0 %v2682_v37  ;;  %v1771_v37 = vld [vmem:[%s6790_s7 + $0x1778] sm:$0xff] }
 0x320   : > { %3974 = vmatpush1.bf16.msra.mxu1 %v3066_v48  ;;  %3932 = vmatprep.subr.bf16.mxu0 %v2659_v51  ;;  %v2995_v23 = vunpack.c.l.s8.bf16 %v1627_v61  ;;  %v3307_v45 = vunpack.c.h.s8.bf16 %v1771_v37  ;;  %v1770_v48 = vld [vmem:[%s6790_s7 + $0x1770] sm:$0xff]  ;;  %v3283_v63 = vunpack.c.l.s8.bf16 %v1771_v37  ;;  %v1555_v55 = vld [vmem:[%s6790_s7 + $0x10b8] sm:$0xff]  ;;  %v2898_v59 = vunpack.c.l.s8.bf16 %v1578_v11 }
 0x321   : > { %6193 = vtanh.f32 %v5691_v1  ;;  %v5714_v12 = vadd.f32 %v5579_v25, %v5540_v2  ;;  %v5541_v14 = vmul.f32 %v5409_v27, %v3666_v4  ;;  %3975 = vmatprep.subr.bf16.mxu1 %v3043_v52  ;;  %v2610_v25 = vunpack.c.l.s8.bf16 %v1434_v9  ;;  %v1554_v1 = vld [vmem:[%s6790_s7 + $0x10b0] sm:$0xff] }
 0x322   : > { %v2587_v27 = vunpack.c.h.s8.bf16 %v1411_v10  ;;  %v2922_v52 = vunpack.c.h.s8.bf16 %v1578_v11  ;;  %v3306_v53 = vunpack.c.h.s8.bf16 %v1770_v48  ;;  %v2875_v61 = vunpack.c.h.s8.bf16 %v1555_v55  ;;  %v1746_v4 = vld [vmem:[%s6790_s7 + $0x16b0] sm:$0xff] }
 0x323   : > { %6195 = vtanh.f32 %v5714_v12  ;;  %v5715_v20 = vadd.f32 %v5583_v6, %v5541_v14  ;;  %3933 = vmatpush1.bf16.msra.mxu0 %v2658_v60  ;;  %v1579_v6 = vld [vmem:[%s6790_s7 + $0x1178] sm:$0xff]  ;;  %v3282_v60 = vunpack.c.l.s8.bf16 %v1770_v48  ;;  %v3259_v2 = vunpack.c.h.s8.bf16 %v1747_v56 }
 0x324   : > { %3976 = vmatpush1.bf16.msra.mxu1 %v3042_v5  ;;  %3934 = vmatprep.subr.bf16.mxu0 %v2635_v8  ;;  %v2923_v62 = vunpack.c.h.s8.bf16 %v1579_v6  ;;  %v2899_v54 = vunpack.c.l.s8.bf16 %v1579_v6  ;;  %v2874_v5 = vunpack.c.h.s8.bf16 %v1554_v1  ;;  %v3258_v8 = vunpack.c.h.s8.bf16 %v1746_v4  ;;  %v1531_v14 = vld [vmem:[%s6790_s7 + $0xff8] sm:$0xff] }
 0x325   : > { %6197 = vtanh.f32 %v5715_v20  ;;  %3977 = vmatprep.subr.bf16.mxu1 %v3019_v17  ;;  %v2851_v9 = vunpack.c.l.s8.bf16 %v1555_v55  ;;  %v3235_v12 = vunpack.c.l.s8.bf16 %v1747_v56  ;;  %v1723_v17 = vld [vmem:[%s6790_s7 + $0x15f8] sm:$0xff]  ;;  %v2850_v18 = vunpack.c.l.s8.bf16 %v1554_v1  ;;  %v1269_v56 = vld [vmem:[%s6790_s7 + $0x7c8] sm:$0xff]  ;;  %v1076_v1 = vld [vmem:[%s6790_s7 + $0x1c0] sm:$0xff] }
 0x326   : > { %v3234_v20 = vunpack.c.l.s8.bf16 %v1746_v4  ;;  %v3139_v37 = vunpack.c.l.s8.bf16 %v1699_v28  ;;  %v1268_v4 = vld [vmem:[%s6790_s7 + $0x7c0] sm:$0xff] }
 0x327   : > { %3935 = vmatpush1.bf16.msra.mxu0 %v2634_v21  ;;  %v2827_v21 = vunpack.c.h.s8.bf16 %v1531_v14 }
 0x328   : > { %3978 = vmatpush1.bf16.msra.mxu1 %v3018_v22  ;;  %3936 = vmatprep.subr.bf16.mxu0 %v2611_v0  ;;  %v1530_v22 = vld [vmem:[%s6790_s7 + $0xff0] sm:$0xff]  ;;  %v3211_v0 = vunpack.c.h.s8.bf16 %v1723_v17 }
 0x329   : > { %3979 = vmatprep.subr.bf16.mxu1 %v2995_v23  ;;  %v1722_v23 = vld [vmem:[%s6790_s7 + $0x15f0] sm:$0xff]  ;;  %v2826_v10 = vunpack.c.h.s8.bf16 %v1530_v22 }
 0x32a   : > { %v3210_v24 = vunpack.c.h.s8.bf16 %v1722_v23  ;;  %v3186_v29 = vunpack.c.l.s8.bf16 %v1722_v23  ;;  %v1244_v23 = vld [vmem:[%s6790_s7 + $0x700] sm:$0xff] }
 0x32b   : > { %3937 = vmatpush1.bf16.msra.mxu0 %v2610_v25  ;;  %v2803_v25 = vunpack.c.l.s8.bf16 %v1531_v14  ;;  %v1053_v14 = vld [vmem:[%s6790_s7 + $0x108] sm:$0xff] }
 0x32c   : > { %v6192_v32 = vpop.eup %6191  ;;  %3980 = vmatpush1.bf16.msra.mxu1 %v2994_v26  ;;  %3938 = vmatprep.subr.bf16.mxu0 %v2587_v27  ;;  %v3187_v26 = vunpack.c.l.s8.bf16 %v1723_v17  ;;  %v1507_v27 = vld [vmem:[%s6790_s7 + $0xf38] sm:$0xff]  ;;  %v1245_v17 = vld [vmem:[%s6790_s7 + $0x708] sm:$0xff] }
 0x32d   : > { %5786 = vst [vmem:[%s7109_s17 + $0x10] sm:$0xff] %v6192_v32  ;;  %3981 = vmatprep.subr.bf16.mxu1 %v2971_v43  ;;  %v2802_v43 = vunpack.c.l.s8.bf16 %v1530_v22  ;;  %v1506_v32 = vld [vmem:[%s6790_s7 + $0xf30] sm:$0xff]  ;;  %v1052_v22 = vld [vmem:[%s6790_s7 + $0x100] sm:$0xff] }
 0x32e   : > { %v6194_v36 = vpop.eup %6193 }
 0x32f   : > { %5787 = vst [vmem:[%s7109_s17 + $0x18] sm:$0xff] %v6194_v36  ;;  %3939 = vmatpush1.bf16.msra.mxu0 %v2586_v30  ;;  %v2779_v30 = vunpack.c.h.s8.bf16 %v1507_v27  ;;  %v2755_v36 = vunpack.c.l.s8.bf16 %v1507_v27  ;;  %v1029_v27 = vld [vmem:[%s6790_s7 + $0x48] sm:$0xff] }
 0x330   : > { %v6196_v39 = vpop.eup %6195  ;;  %3982 = vmatpush1.bf16.msra.mxu1 %v2970_v33  ;;  %3940 = vmatprep.subr.bf16.mxu0 %v2563_v35  ;;  %v3163_v33 = vunpack.c.h.s8.bf16 %v1699_v28  ;;  %v1698_v35 = vld [vmem:[%s6790_s7 + $0x1530] sm:$0xff]  ;;  %v1221_v28 = vld [vmem:[%s6790_s7 + $0x648] sm:$0xff] }
 0x331   : > { %5810 = vst [vmem:[%s7109_s17 + $0xd0] sm:$0xff] %v6196_v39  ;;  %3983 = vmatprep.subr.bf16.mxu1 %v2947_v58  ;;  %v2778_v58 = vunpack.c.h.s8.bf16 %v1506_v32  ;;  %v3162_v6 = vunpack.c.h.s8.bf16 %v1698_v35  ;;  %v1293_v39 = vld [vmem:[%s6790_s7 + $0x888] sm:$0xff] }
 0x332   : > { %v6198_v51 = vpop.eup %6197  ;;  %v2349_v48 = vunpack.c.h.s8.bf16 %v1293_v39  ;;  %v2325_v55 = vunpack.c.l.s8.bf16 %v1293_v39  ;;  %v1389_v39 = vld [vmem:[%s6790_s7 + $0xb88] sm:$0xff] }
 0x333   : > { %5811 = vst [vmem:[%s7109_s17 + $0xd8] sm:$0xff] %v6198_v51  ;;  %3941 = vmatpush1.bf16.msra.mxu0 %v2562_v38  ;;  %v1101_v38 = vld [vmem:[%s6790_s7 + $0x288] sm:$0xff]  ;;  %v1292_v51 = vld [vmem:[%s6790_s7 + $0x880] sm:$0xff] }
 0x334   : > { %3984 = vmatpush1.bf16.msra.mxu1 %v2946_v57  ;;  %3942 = vmatprep.subr.bf16.mxu0 %v2923_v62  ;;  %v2754_v57 = vunpack.c.l.s8.bf16 %v1506_v32  ;;  %v3138_v62 = vunpack.c.l.s8.bf16 %v1698_v35  ;;  %v1965_v11 = vunpack.c.h.s8.bf16 %v1101_v38  ;;  %v1028_v32 = vld [vmem:[%s6790_s7 + $0x40] sm:$0xff] }
 0x335   : > { %3985 = vmatprep.subr.bf16.mxu1 %v3307_v45  ;;  %v1100_v45 = vld [vmem:[%s6790_s7 + $0x280] sm:$0xff] }
 0x336   : > { %v1220_v35 = vld [vmem:[%s6790_s7 + $0x640] sm:$0xff] }
 0x337   : > { %3943 = vmatpush2.bf16.msra.mxu0 %v2922_v52  ;;  %v1964_v52 = vunpack.c.h.s8.bf16 %v1100_v45 }
 0x338   : > { %3986 = vmatpush2.bf16.msra.mxu1 %v3306_v53  ;;  %3944 = vmatprep.subr.bf16.mxu0 %v2899_v54  ;;  %v2348_v53 = vunpack.c.h.s8.bf16 %v1292_v51  ;;  %v1941_v54 = vunpack.c.l.s8.bf16 %v1101_v38  ;;  %v1197_v38 = vld [vmem:[%s6790_s7 + $0x588] sm:$0xff] }
 0x339   : > { %3987 = vmatprep.subr.bf16.mxu1 %v3283_v63  ;;  %v1077_v63 = vld [vmem:[%s6790_s7 + $0x1c8] sm:$0xff] }
 0x33b   : > { %3945 = vmatpush2.bf16.msra.mxu0 %v2898_v59  ;;  %v1940_v59 = vunpack.c.l.s8.bf16 %v1100_v45  ;;  %v1196_v45 = vld [vmem:[%s6790_s7 + $0x580] sm:$0xff] }
 0x33c   : > { %3988 = vmatpush2.bf16.msra.mxu1 %v3282_v60  ;;  %3946 = vmatprep.subr.bf16.mxu0 %v2875_v61  ;;  %v2324_v60 = vunpack.c.l.s8.bf16 %v1292_v51  ;;  %v1917_v61 = vunpack.c.h.s8.bf16 %v1077_v63  ;;  %v1388_v51 = vld [vmem:[%s6790_s7 + $0xb80] sm:$0xff] }
 0x33d   : > { %3989 = vmatprep.subr.bf16.mxu1 %v3259_v2  ;;  %v2301_v2 = vunpack.c.h.s8.bf16 %v1269_v56 }
 0x33f   : > { %3947 = vmatpush2.bf16.msra.mxu0 %v2874_v5  ;;  %v1916_v5 = vunpack.c.h.s8.bf16 %v1076_v1 }
 0x340   : > { %3990 = vmatpush2.bf16.msra.mxu1 %v3258_v8  ;;  %3948 = vmatprep.subr.bf16.mxu0 %v2851_v9  ;;  %v2300_v8 = vunpack.c.h.s8.bf16 %v1268_v4  ;;  %v1893_v9 = vunpack.c.l.s8.bf16 %v1077_v63  ;;  %v2517_v63 = vunpack.c.l.s8.bf16 %v1389_v39 }
 0x341   : > { %3991 = vmatprep.subr.bf16.mxu1 %v3235_v12  ;;  %v2277_v12 = vunpack.c.l.s8.bf16 %v1269_v56  ;;  %v1365_v56 = vld [vmem:[%s6790_s7 + $0xac8] sm:$0xff] }
 0x343   : > { %3949 = vmatpush2.bf16.msra.mxu0 %v2850_v18  ;;  %v1892_v18 = vunpack.c.l.s8.bf16 %v1076_v1  ;;  %v1172_v1 = vld [vmem:[%s6790_s7 + $0x4c0] sm:$0xff] }
 0x344   : > { %3992 = vmatpush2.bf16.msra.mxu1 %v3234_v20  ;;  %3950 = vmatprep.subr.bf16.mxu0 %v2827_v21  ;;  %v2276_v20 = vunpack.c.l.s8.bf16 %v1268_v4  ;;  %v1869_v21 = vunpack.c.h.s8.bf16 %v1053_v14  ;;  %v1364_v4 = vld [vmem:[%s6790_s7 + $0xac0] sm:$0xff] }
 0x345   : > { %3993 = vmatprep.subr.bf16.mxu1 %v3211_v0  ;;  %v2253_v0 = vunpack.c.h.s8.bf16 %v1245_v17 }
 0x347   : > { %3951 = vmatpush2.bf16.msra.mxu0 %v2826_v10  ;;  %v1868_v10 = vunpack.c.h.s8.bf16 %v1052_v22 }
 0x348   : > { %3994 = vmatpush2.bf16.msra.mxu1 %v3210_v24  ;;  %3952 = vmatprep.subr.bf16.mxu0 %v2803_v25  ;;  %v2252_v24 = vunpack.c.h.s8.bf16 %v1244_v23  ;;  %v1845_v25 = vunpack.c.l.s8.bf16 %v1053_v14  ;;  %v1149_v14 = vld [vmem:[%s6790_s7 + $0x408] sm:$0xff] }
 0x349   : > { %3995 = vmatprep.subr.bf16.mxu1 %v3187_v26  ;;  %v2229_v26 = vunpack.c.l.s8.bf16 %v1245_v17  ;;  %v1341_v17 = vld [vmem:[%s6790_s7 + $0xa08] sm:$0xff] }
 0x34b   : > { %3953 = vmatpush2.bf16.msra.mxu0 %v2802_v43  ;;  %v1844_v43 = vunpack.c.l.s8.bf16 %v1052_v22  ;;  %v1148_v22 = vld [vmem:[%s6790_s7 + $0x400] sm:$0xff] }
 0x34c   : > { %3996 = vmatpush2.bf16.msra.mxu1 %v3186_v29  ;;  %3954 = vmatprep.subr.bf16.mxu0 %v2779_v30  ;;  %v2228_v29 = vunpack.c.l.s8.bf16 %v1244_v23  ;;  %v1821_v30 = vunpack.c.h.s8.bf16 %v1029_v27  ;;  %v1340_v23 = vld [vmem:[%s6790_s7 + $0xa00] sm:$0xff] }
 0x34d   : > { %3997 = vmatprep.subr.bf16.mxu1 %v3163_v33  ;;  %v2205_v33 = vunpack.c.h.s8.bf16 %v1221_v28 }
 0x34f   : > { %3955 = vmatpush2.bf16.msra.mxu0 %v2778_v58  ;;  %v1820_v58 = vunpack.c.h.s8.bf16 %v1028_v32 }
 0x350   : > { %3998 = vmatpush2.bf16.msra.mxu1 %v3162_v6  ;;  %3956 = vmatprep.subr.bf16.mxu0 %v2755_v36  ;;  %v2204_v6 = vunpack.c.h.s8.bf16 %v1220_v35  ;;  %v1797_v36 = vunpack.c.l.s8.bf16 %v1029_v27  ;;  %v1125_v27 = vld [vmem:[%s6790_s7 + $0x348] sm:$0xff] }
 0x351   : > { %3999 = vmatprep.subr.bf16.mxu1 %v3139_v37  ;;  %v2181_v37 = vunpack.c.l.s8.bf16 %v1221_v28  ;;  %v1317_v28 = vld [vmem:[%s6790_s7 + $0x948] sm:$0xff] }
 0x353   : > { %3957 = vmatpush2.bf16.msra.mxu0 %v2754_v57  ;;  %v1796_v57 = vunpack.c.l.s8.bf16 %v1028_v32  ;;  %v2013_v32 = vunpack.c.h.s8.bf16 %v1125_v27 }
 0x354   : > { %4000 = vmatpush2.bf16.msra.mxu1 %v3138_v62  ;;  %4012 = vmatprep.subr.bf16.mxu0 %v1965_v11  ;;  %v2180_v62 = vunpack.c.l.s8.bf16 %v1220_v35  ;;  %v2157_v11 = vunpack.c.h.s8.bf16 %v1197_v38 }
 0x355   : > { %4055 = vmatprep.subr.bf16.mxu1 %v2349_v48  ;;  %v2541_v48 = vunpack.c.h.s8.bf16 %v1389_v39  ;;  %v1989_v39 = vunpack.c.l.s8.bf16 %v1125_v27 }
 0x356   : > { %3959 = vmatmul.mubr.bf16.vlgmr.msra.gmra.mxu0 %v6966_v47 }
 0x357   : > { %4002 = vmatmul.mubr.bf16.vlgmr.msra.gmra.mxu1 %v6968_v50  ;;  %4013 = vmatpush1.bf16.msra.mxu0 %v1964_v52  ;;  %v2156_v52 = vunpack.c.h.s8.bf16 %v1196_v45  ;;  %v3745_v35 = vpop.f32.mrf.mxu1 }
 0x358   : > { %4044 = vmatprep.mubr.bf16.mxu0 %v6882_v13  ;;  %4056 = vmatpush1.bf16.msra.mxu1 %v2348_v53  ;;  %v2540_v53 = vunpack.c.h.s8.bf16 %v1388_v51 }
 0x359   : > { %4087 = vmatprep.mubr.bf16.mxu1 %v6886_v16  ;;  %4014 = vmatprep.subr.bf16.mxu0 %v1941_v54  ;;  %v2133_v54 = vunpack.c.l.s8.bf16 %v1197_v38 }
 0x35a   : > { %4057 = vmatprep.subr.bf16.mxu1 %v2325_v55  ;;  %v1173_v55 = vld [vmem:[%s6790_s7 + $0x4c8] sm:$0xff] }
 0x35b   : > { %4015 = vmatpush1.bf16.msra.mxu0 %v1940_v59  ;;  %v2132_v59 = vunpack.c.l.s8.bf16 %v1196_v45  ;;  %v1677_v45 = vld [vmem:[%s6790_s7 + $0x1488] sm:$0xff] }
 0x35c   : > { %4058 = vmatpush1.bf16.msra.mxu1 %v2324_v60  ;;  %4016 = vmatprep.subr.bf16.mxu0 %v1917_v61  ;;  %v2516_v60 = vunpack.c.l.s8.bf16 %v1388_v51  ;;  %v2109_v61 = vunpack.c.h.s8.bf16 %v1173_v55 }
 0x35d   : > { %4059 = vmatprep.subr.bf16.mxu1 %v2301_v2  ;;  %v2493_v2 = vunpack.c.h.s8.bf16 %v1365_v56 }
 0x35f   : > { %4017 = vmatpush1.bf16.msra.mxu0 %v1916_v5  ;;  %v2108_v5 = vunpack.c.h.s8.bf16 %v1172_v1 }
 0x360   : > { %4060 = vmatpush1.bf16.msra.mxu1 %v2300_v8  ;;  %4018 = vmatprep.subr.bf16.mxu0 %v1893_v9  ;;  %v2492_v8 = vunpack.c.h.s8.bf16 %v1364_v4  ;;  %v2085_v9 = vunpack.c.l.s8.bf16 %v1173_v55  ;;  %v3117_v55 = vunpack.c.h.s8.bf16 %v1677_v45 }
 0x361   : > { %4061 = vmatprep.subr.bf16.mxu1 %v2277_v12  ;;  %v2469_v12 = vunpack.c.l.s8.bf16 %v1365_v56  ;;  %v1676_v56 = vld [vmem:[%s6790_s7 + $0x1480] sm:$0xff] }
 0x363   : > { %4019 = vmatpush1.bf16.msra.mxu0 %v1892_v18  ;;  %v2084_v18 = vunpack.c.l.s8.bf16 %v1172_v1 }
 0x364   : > { %4062 = vmatpush1.bf16.msra.mxu1 %v2276_v20  ;;  %4020 = vmatprep.subr.bf16.mxu0 %v1869_v21  ;;  %v2468_v20 = vunpack.c.l.s8.bf16 %v1364_v4  ;;  %v2061_v21 = vunpack.c.h.s8.bf16 %v1149_v14 }
 0x365   : > { %4063 = vmatprep.subr.bf16.mxu1 %v2253_v0  ;;  %v2445_v0 = vunpack.c.h.s8.bf16 %v1341_v17 }
 0x367   : > { %4021 = vmatpush1.bf16.msra.mxu0 %v1868_v10  ;;  %v2060_v10 = vunpack.c.h.s8.bf16 %v1148_v22 }
 0x368   : > { %4064 = vmatpush1.bf16.msra.mxu1 %v2252_v24  ;;  %4022 = vmatprep.subr.bf16.mxu0 %v1845_v25  ;;  %v2444_v24 = vunpack.c.h.s8.bf16 %v1340_v23  ;;  %v2037_v25 = vunpack.c.l.s8.bf16 %v1149_v14 }
 0x369   : > { %4065 = vmatprep.subr.bf16.mxu1 %v2229_v26  ;;  %v2421_v26 = vunpack.c.l.s8.bf16 %v1341_v17 }
 0x36b   : > { %4023 = vmatpush1.bf16.msra.mxu0 %v1844_v43  ;;  %v2036_v43 = vunpack.c.l.s8.bf16 %v1148_v22 }
 0x36c   : > { %4066 = vmatpush1.bf16.msra.mxu1 %v2228_v29  ;;  %4024 = vmatprep.subr.bf16.mxu0 %v1821_v30  ;;  %v3702_v29 = vpop.f32.mrf.mxu0  ;;  %v2420_v30 = vunpack.c.l.s8.bf16 %v1340_v23  ;;  %v7268_v23 = vld [vmem:[%s6800_s15] sm:$0xff] }
 0x36d   : > { %4067 = vmatprep.subr.bf16.mxu1 %v2205_v33  ;;  %v1124_v33 = vld [vmem:[%s6790_s7 + $0x340] sm:$0xff]  ;;  %v3746_v1 = vadd.f32 %v3745_v35, %v3702_v29  ;;  %v5591_v35 = vrot.slane %v7268_v23, %v6905_v46 }
 0x36f   : > { %4025 = vmatpush1.bf16.msra.mxu0 %v1820_v58  ;;  %v2397_v58 = vunpack.c.h.s8.bf16 %v1317_v28 }
 0x370   : > { %4068 = vmatpush1.bf16.msra.mxu1 %v2204_v6  ;;  %4026 = vmatprep.subr.bf16.mxu0 %v1797_v36  ;;  %v1316_v6 = vld [vmem:[%s6790_s7 + $0x940] sm:$0xff]  ;;  %v2012_v36 = vunpack.c.h.s8.bf16 %v1124_v33 }
 0x371   : > { %4069 = vmatprep.subr.bf16.mxu1 %v2181_v37  ;;  %v3704_v37 = vpop.f32.mrf.mxu0  ;;  %v2396_v38 = vunpack.c.h.s8.bf16 %v1316_v6 }
 0x373   : > { %4027 = vmatpush1.bf16.msra.mxu0 %v1796_v57  ;;  %v3747_v57 = vpop.f32.mrf.mxu1  ;;  %v3706_v51 = vpop.f32.mrf.mxu0 }
 0x374   : > { %4070 = vmatpush1.bf16.msra.mxu1 %v2180_v62  ;;  %4028 = vmatprep.subr.bf16.mxu0 %v2157_v11  ;;  %v2373_v62 = vunpack.c.l.s8.bf16 %v1317_v28  ;;  %v1485_v11 = vld [vmem:[%s6790_s7 + $0xe88] sm:$0xff]  ;;  %v3748_v14 = vadd.f32 %v3747_v57, %v3704_v37 }
 0x375   : > { %4071 = vmatprep.subr.bf16.mxu1 %v2541_v48  ;;  %v1988_v48 = vunpack.c.l.s8.bf16 %v1124_v33  ;;  %v2709_v4 = vunpack.c.l.s8.bf16 %v1485_v11  ;;  %v1652_v33 = vld [vmem:[%s6790_s7 + $0x13c0] sm:$0xff] }
 0x377   : > { %4029 = vmatpush2.bf16.msra.mxu0 %v2156_v52  ;;  %v2372_v52 = vunpack.c.l.s8.bf16 %v1316_v6 }
 0x378   : > { %4072 = vmatpush2.bf16.msra.mxu1 %v2540_v53  ;;  %4030 = vmatprep.subr.bf16.mxu0 %v2133_v54  ;;  %v2733_v53 = vunpack.c.h.s8.bf16 %v1485_v11  ;;  %v1484_v54 = vld [vmem:[%s6790_s7 + $0xe80] sm:$0xff]  ;;  %v3068_v11 = vunpack.c.h.s8.bf16 %v1652_v33 }
 0x379   : > { %4073 = vmatprep.subr.bf16.mxu1 %v2517_v63  ;;  %v3749_v63 = vpop.f32.mrf.mxu1  ;;  %v2708_v22 = vunpack.c.l.s8.bf16 %v1484_v54 }
 0x37a   : > { %v3750_v28 = vadd.f32 %v3749_v63, %v3706_v51  ;;  %v1437_v63 = vld [vmem:[%s6790_s7 + $0xd08] sm:$0xff] }
 0x37b   : > { %4031 = vmatpush2.bf16.msra.mxu0 %v2132_v59  ;;  %v2732_v59 = vunpack.c.h.s8.bf16 %v1484_v54 }
 0x37c   : > { %4074 = vmatpush2.bf16.msra.mxu1 %v2516_v60  ;;  %4032 = vmatprep.subr.bf16.mxu0 %v2109_v61  ;;  %v3708_v60 = vpop.f32.mrf.mxu0  ;;  %v3116_v61 = vunpack.c.h.s8.bf16 %v1676_v56 }
 0x37d   : > { %4075 = vmatprep.subr.bf16.mxu1 %v2493_v2  ;;  %v3751_v2 = vpop.f32.mrf.mxu1 }
 0x37f   : > { %4033 = vmatpush2.bf16.msra.mxu0 %v2108_v5  ;;  %v1461_v5 = vld [vmem:[%s6790_s7 + $0xdc8] sm:$0xff] }
 0x380   : > { %4076 = vmatpush2.bf16.msra.mxu1 %v2492_v8  ;;  %4034 = vmatprep.subr.bf16.mxu0 %v2085_v9  ;;  %v3093_v9 = vunpack.c.l.s8.bf16 %v1677_v45  ;;  %v2685_v27 = vunpack.c.h.s8.bf16 %v1461_v5  ;;  %v2661_v45 = vunpack.c.l.s8.bf16 %v1461_v5  ;;  %v1436_v5 = vld [vmem:[%s6790_s7 + $0xd00] sm:$0xff] }
 0x381   : > { %4077 = vmatprep.subr.bf16.mxu1 %v2469_v12  ;;  %v7258_v12 = vld [vmem:[%s6790_s7 + $0x13c8] sm:$0xff] }
 0x383   : > { %4035 = vmatpush2.bf16.msra.mxu0 %v2084_v18 }
 0x384   : > { %4078 = vmatpush2.bf16.msra.mxu1 %v2468_v20  ;;  %4036 = vmatprep.subr.bf16.mxu0 %v2061_v21  ;;  %v7261_v20 = vld [vmem:[%s6797_s1] sm:$0xff] }
 0x385   : > { %4079 = vmatprep.subr.bf16.mxu1 %v2445_v0  ;;  %v5413_v21 = vrot.slane %v7261_v20, %v6945_v3  ;;  %v1460_v0 = vld [vmem:[%s6790_s7 + $0xdc0] sm:$0xff] }
 0x386   : > { %v2684_v6 = vunpack.c.h.s8.bf16 %v1460_v0 }
 0x387   : > { %4037 = vmatpush2.bf16.msra.mxu0 %v2060_v10  ;;  %v5587_v10 = vrot.slane %v7268_v23, %v6945_v3 }
 0x388   : > { %4080 = vmatpush2.bf16.msra.mxu1 %v2444_v24  ;;  %4038 = vmatprep.subr.bf16.mxu0 %v2037_v25  ;;  %v5417_v25 = vrot.slane %v7261_v20, %v6905_v46 }
 0x389   : > { %4081 = vmatprep.subr.bf16.mxu1 %v2421_v26  ;;  %v3092_v26 = vunpack.c.l.s8.bf16 %v1676_v56  ;;  %v2660_v56 = vunpack.c.l.s8.bf16 %v1460_v0 }
 0x38b   : > { %4039 = vmatpush2.bf16.msra.mxu0 %v2036_v43 }
 0x38c   : > { %4082 = vmatpush2.bf16.msra.mxu1 %v2420_v30  ;;  %4040 = vmatprep.subr.bf16.mxu0 %v2013_v32  ;;  %v3069_v32 = vunpack.c.h.s8.bf16 %v7258_v12 }
 0x38d   : > { %4083 = vmatprep.subr.bf16.mxu1 %v2397_v58 }
 0x38f   : > { %4041 = vmatpush2.bf16.msra.mxu0 %v2012_v36  ;;  %v3752_v36 = vadd.f32 %v3751_v2, %v3708_v60  ;;  %v3044_v2 = vunpack.c.l.s8.bf16 %v1652_v33 }
 0x390   : > { %4084 = vmatpush2.bf16.msra.mxu1 %v2396_v38  ;;  %4042 = vmatprep.subr.bf16.mxu0 %v1989_v39 }
 0x391   : > { %4085 = vmatprep.subr.bf16.mxu1 %v2373_v62 }
 0x393   : > { %4043 = vmatpush2.bf16.msra.mxu0 %v1988_v48  ;;  %v3045_v48 = vunpack.c.l.s8.bf16 %v7258_v12 }
 0x394   : > { %4086 = vmatpush2.bf16.msra.mxu1 %v2372_v52  ;;  %4098 = vmatprep.subr.bf16.mxu0 %v2733_v53 }
 0x395   : > { %4141 = vmatprep.subr.bf16.mxu1 %v3117_v55 }
 0x396   : > { %v3788_v8 = vpop.f32.mrf.mxu0  ;;  %4045 = vmatmul.mubr.bf16.vlgmr.msra.gmra.mxu0 %v6884_v15 }
 0x397   : > { %v3789_v17 = vadd.f32 %v3788_v8, %v3746_v1  ;;  %v3831_v18 = vpop.f32.mrf.mxu1  ;;  %4088 = vmatmul.mubr.bf16.vlgmr.msra.gmra.mxu1 %v6889_v19  ;;  %4099 = vmatpush1.bf16.msra.mxu0 %v2732_v59  ;;  %v1629_v59 = vld [vmem:[%s6790_s7 + $0x1308] sm:$0xff] }
 0x398   : > { %4130 = vmatprep.mubr.bf16.mxu0 %v6930_v31  ;;  %4142 = vmatpush1.bf16.msra.mxu1 %v3116_v61  ;;  %v3790_v24 = vpop.f32.mrf.mxu0  ;;  %v3021_v12 = vunpack.c.h.s8.bf16 %v1629_v59  ;;  %v2997_v0 = vunpack.c.l.s8.bf16 %v1629_v59 }
 0x399   : > { %v3832_v43 = vadd.f32 %v3831_v18, %v3789_v17  ;;  %4173 = vmatprep.mubr.bf16.mxu1 %v6932_v34  ;;  %v3791_v29 = vadd.f32 %v3790_v24, %v3748_v14  ;;  %v3833_v30 = vpop.f32.mrf.mxu1  ;;  %4100 = vmatprep.subr.bf16.mxu0 %v2709_v4  ;;  %v2637_v4 = vunpack.c.h.s8.bf16 %v1437_v63  ;;  %v1628_v14 = vld [vmem:[%s6790_s7 + $0x1300] sm:$0xff]  ;;  %v2636_v18 = vunpack.c.h.s8.bf16 %v1436_v5  ;;  %v1605_v24 = vld [vmem:[%s6790_s7 + $0x1248] sm:$0xff] }
 0x39a   : > { %v3792_v58 = vpop.f32.mrf.mxu0  ;;  %4143 = vmatprep.subr.bf16.mxu1 %v3093_v9 }
 0x39b   : > { %v5518_v37 = vmul.f32 %v5413_v21, %v3832_v43  ;;  %v3834_v38 = vadd.f32 %v3833_v30, %v3791_v29  ;;  %v3793_v39 = vadd.f32 %v3792_v58, %v3750_v28  ;;  %v3835_v57 = vpop.f32.mrf.mxu1  ;;  %4101 = vmatpush1.bf16.msra.mxu0 %v2708_v22  ;;  %v2613_v22 = vunpack.c.l.s8.bf16 %v1437_v63  ;;  %v1412_v28 = vld [vmem:[%s6790_s7 + $0xc40] sm:$0xff] }
 0x39c   : > { %4144 = vmatpush1.bf16.msra.mxu1 %v3092_v26  ;;  %v3794_v62 = vpop.f32.mrf.mxu0  ;;  %4102 = vmatprep.subr.bf16.mxu0 %v2685_v27  ;;  %v2996_v26 = vunpack.c.l.s8.bf16 %v1628_v14  ;;  %v2973_v43 = vunpack.c.h.s8.bf16 %v1605_v24  ;;  %v1604_v29 = vld [vmem:[%s6790_s7 + $0x1240] sm:$0xff]  ;;  %v2588_v30 = vunpack.c.h.s8.bf16 %v1412_v28  ;;  %v2949_v58 = vunpack.c.l.s8.bf16 %v1605_v24 }
 0x39d   : > { %v5692_v51 = vadd.f32 %v5587_v10, %v5518_v37  ;;  %v5519_v52 = vmul.f32 %v5417_v25, %v3834_v38  ;;  %v3836_v53 = vadd.f32 %v3835_v57, %v3793_v39  ;;  %v3795_v54 = vadd.f32 %v3794_v62, %v3752_v36  ;;  %4145 = vmatprep.subr.bf16.mxu1 %v3069_v32  ;;  %v3837_v55 = vpop.f32.mrf.mxu1  ;;  %v1773_v37 = vld [vmem:[%s6790_s7 + $0x1788] sm:$0xff]  ;;  %v1724_v24 = vld [vmem:[%s6790_s7 + $0x1600] sm:$0xff] }
 0x39e   : > { %v2972_v33 = vunpack.c.h.s8.bf16 %v1604_v29  ;;  %v2564_v38 = vunpack.c.l.s8.bf16 %v1412_v28  ;;  %v2948_v57 = vunpack.c.l.s8.bf16 %v1604_v29  ;;  %v3285_v63 = vunpack.c.l.s8.bf16 %v1773_v37  ;;  %v1701_v29 = vld [vmem:[%s6790_s7 + $0x1548] sm:$0xff] }
 0x39f   : > { %6199 = vtanh.f32 %v5692_v51  ;;  %v5693_v60 = vadd.f32 %v5591_v35, %v5519_v52  ;;  %v5542_v61 = vmul.f32 %v5413_v21, %v3836_v53  ;;  %v3838_v1 = vadd.f32 %v3837_v55, %v3795_v54  ;;  %4103 = vmatpush1.bf16.msra.mxu0 %v2684_v6  ;;  %v1581_v6 = vld [vmem:[%s6790_s7 + $0x1188] sm:$0xff] }
 0x3a0   : > { %4146 = vmatpush1.bf16.msra.mxu1 %v3068_v11  ;;  %4104 = vmatprep.subr.bf16.mxu0 %v2661_v45  ;;  %v3020_v21 = vunpack.c.h.s8.bf16 %v1628_v14  ;;  %v2925_v62 = vunpack.c.h.s8.bf16 %v1581_v6  ;;  %v1580_v11 = vld [vmem:[%s6790_s7 + $0x1180] sm:$0xff]  ;;  %v3309_v45 = vunpack.c.h.s8.bf16 %v1773_v37  ;;  %v2901_v54 = vunpack.c.l.s8.bf16 %v1581_v6  ;;  %v1557_v55 = vld [vmem:[%s6790_s7 + $0x10c8] sm:$0xff] }
 0x3a1   : > { %6201 = vtanh.f32 %v5693_v60  ;;  %v5716_v8 = vadd.f32 %v5587_v10, %v5542_v61  ;;  %v5543_v9 = vmul.f32 %v5417_v25, %v3838_v1  ;;  %4147 = vmatprep.subr.bf16.mxu1 %v3045_v48  ;;  %v1413_v10 = vld [vmem:[%s6790_s7 + $0xc48] sm:$0xff]  ;;  %v2612_v25 = vunpack.c.l.s8.bf16 %v1436_v5  ;;  %v1772_v48 = vld [vmem:[%s6790_s7 + $0x1780] sm:$0xff] }
 0x3a2   : > { %v2589_v27 = vunpack.c.h.s8.bf16 %v1413_v10  ;;  %v2924_v52 = vunpack.c.h.s8.bf16 %v1580_v11  ;;  %v3308_v53 = vunpack.c.h.s8.bf16 %v1772_v48  ;;  %v2900_v59 = vunpack.c.l.s8.bf16 %v1580_v11  ;;  %v1556_v1 = vld [vmem:[%s6790_s7 + $0x10c0] sm:$0xff]  ;;  %v1533_v14 = vld [vmem:[%s6790_s7 + $0x1008] sm:$0xff] }
 0x3a3   : > { %6203 = vtanh.f32 %v5716_v8  ;;  %v5717_v17 = vadd.f32 %v5591_v35, %v5543_v9  ;;  %4105 = vmatpush1.bf16.msra.mxu0 %v2660_v56  ;;  %v2565_v35 = vunpack.c.l.s8.bf16 %v1413_v10  ;;  %v1749_v56 = vld [vmem:[%s6790_s7 + $0x16c8] sm:$0xff]  ;;  %v3284_v60 = vunpack.c.l.s8.bf16 %v1772_v48  ;;  %v1700_v6 = vld [vmem:[%s6790_s7 + $0x1540] sm:$0xff] }
 0x3a4   : > { %4148 = vmatpush1.bf16.msra.mxu1 %v3044_v2  ;;  %4106 = vmatprep.subr.bf16.mxu0 %v2637_v4  ;;  %v2877_v61 = vunpack.c.h.s8.bf16 %v1557_v55  ;;  %v3261_v2 = vunpack.c.h.s8.bf16 %v1749_v56  ;;  %v1748_v4 = vld [vmem:[%s6790_s7 + $0x16c0] sm:$0xff]  ;;  %v2876_v5 = vunpack.c.h.s8.bf16 %v1556_v1  ;;  %v2853_v9 = vunpack.c.l.s8.bf16 %v1557_v55 }
 0x3a5   : > { %6205 = vtanh.f32 %v5717_v17  ;;  %4149 = vmatprep.subr.bf16.mxu1 %v3021_v12  ;;  %v3260_v8 = vunpack.c.h.s8.bf16 %v1748_v4  ;;  %v3237_v12 = vunpack.c.l.s8.bf16 %v1749_v56  ;;  %v1725_v17 = vld [vmem:[%s6790_s7 + $0x1608] sm:$0xff]  ;;  %v3164_v37 = vunpack.c.h.s8.bf16 %v1700_v6  ;;  %v1079_v56 = vld [vmem:[%s6790_s7 + $0x1d8] sm:$0xff] }
 0x3a6   : > { %v3213_v10 = vunpack.c.h.s8.bf16 %v1725_v17  ;;  %v3189_v28 = vunpack.c.l.s8.bf16 %v1725_v17 }
 0x3a7   : > { %4107 = vmatpush1.bf16.msra.mxu0 %v2636_v18  ;;  %v2852_v18 = vunpack.c.l.s8.bf16 %v1556_v1 }
 0x3a8   : > { %4150 = vmatpush1.bf16.msra.mxu1 %v3020_v21  ;;  %4108 = vmatprep.subr.bf16.mxu0 %v2613_v22  ;;  %v3236_v21 = vunpack.c.l.s8.bf16 %v1748_v4  ;;  %v2829_v22 = vunpack.c.h.s8.bf16 %v1533_v14  ;;  %v1078_v4 = vld [vmem:[%s6790_s7 + $0x1d0] sm:$0xff] }
 0x3a9   : > { %4151 = vmatprep.subr.bf16.mxu1 %v2997_v0  ;;  %v1532_v0 = vld [vmem:[%s6790_s7 + $0x1000] sm:$0xff] }
 0x3ab   : > { %4109 = vmatpush1.bf16.msra.mxu0 %v2612_v25  ;;  %v2828_v25 = vunpack.c.h.s8.bf16 %v1532_v0 }
 0x3ac   : > { %v6200_v32 = vpop.eup %6199  ;;  %4152 = vmatpush1.bf16.msra.mxu1 %v2996_v26  ;;  %4110 = vmatprep.subr.bf16.mxu0 %v2589_v27  ;;  %v3212_v26 = vunpack.c.h.s8.bf16 %v1724_v24  ;;  %v2805_v27 = vunpack.c.l.s8.bf16 %v1533_v14  ;;  %v1895_v14 = vunpack.c.l.s8.bf16 %v1079_v56 }
 0x3ad   : > { %5788 = vst [vmem:[%s7109_s17 + $0x20] sm:$0xff] %v6200_v32  ;;  %4153 = vmatprep.subr.bf16.mxu1 %v2973_v43  ;;  %v1509_v43 = vld [vmem:[%s6790_s7 + $0xf48] sm:$0xff]  ;;  %v3188_v32 = vunpack.c.l.s8.bf16 %v1724_v24  ;;  %v1054_v24 = vld [vmem:[%s6790_s7 + $0x110] sm:$0xff] }
 0x3ae   : > { %v6202_v36 = vpop.eup %6201 }
 0x3af   : > { %5789 = vst [vmem:[%s7109_s17 + $0x28] sm:$0xff] %v6202_v36  ;;  %4111 = vmatpush1.bf16.msra.mxu0 %v2588_v30  ;;  %v2804_v30 = vunpack.c.l.s8.bf16 %v1532_v0 }
 0x3b0   : > { %v6204_v39 = vpop.eup %6203  ;;  %4154 = vmatpush1.bf16.msra.mxu1 %v2972_v33  ;;  %4112 = vmatprep.subr.bf16.mxu0 %v2565_v35  ;;  %v2781_v33 = vunpack.c.h.s8.bf16 %v1509_v43  ;;  %v1508_v35 = vld [vmem:[%s6790_s7 + $0xf40] sm:$0xff] }
 0x3b1   : > { %5812 = vst [vmem:[%s7109_s17 + $0xe0] sm:$0xff] %v6204_v39  ;;  %4155 = vmatprep.subr.bf16.mxu1 %v2949_v58  ;;  %v3165_v58 = vunpack.c.h.s8.bf16 %v1701_v29  ;;  %v2780_v36 = vunpack.c.h.s8.bf16 %v1508_v35  ;;  %v3141_v39 = vunpack.c.l.s8.bf16 %v1701_v29  ;;  %v2756_v11 = vunpack.c.l.s8.bf16 %v1508_v35 }
 0x3b2   : > { %v6206_v51 = vpop.eup %6205 }
 0x3b3   : > { %5813 = vst [vmem:[%s7109_s17 + $0xe8] sm:$0xff] %v6206_v51  ;;  %4113 = vmatpush1.bf16.msra.mxu0 %v2564_v38  ;;  %v2757_v38 = vunpack.c.l.s8.bf16 %v1509_v43  ;;  %v1102_v51 = vld [vmem:[%s6790_s7 + $0x290] sm:$0xff] }
 0x3b4   : > { %4156 = vmatpush1.bf16.msra.mxu1 %v2948_v57  ;;  %4114 = vmatprep.subr.bf16.mxu0 %v2925_v62  ;;  %v1103_v57 = vld [vmem:[%s6790_s7 + $0x298] sm:$0xff] }
 0x3b5   : > { %4157 = vmatprep.subr.bf16.mxu1 %v3309_v45  ;;  %v1295_v62 = vld [vmem:[%s6790_s7 + $0x898] sm:$0xff]  ;;  %v3140_v45 = vunpack.c.l.s8.bf16 %v1700_v6  ;;  %v1967_v48 = vunpack.c.h.s8.bf16 %v1103_v57  ;;  %v1943_v55 = vunpack.c.l.s8.bf16 %v1103_v57  ;;  %v1030_v6 = vld [vmem:[%s6790_s7 + $0x50] sm:$0xff] }
 0x3b7   : > { %4115 = vmatpush2.bf16.msra.mxu0 %v2924_v52  ;;  %v2351_v52 = vunpack.c.h.s8.bf16 %v1295_v62 }
 0x3b8   : > { %4158 = vmatpush2.bf16.msra.mxu1 %v3308_v53  ;;  %4116 = vmatprep.subr.bf16.mxu0 %v2901_v54  ;;  %v1294_v53 = vld [vmem:[%s6790_s7 + $0x890] sm:$0xff]  ;;  %v1966_v54 = vunpack.c.h.s8.bf16 %v1102_v51 }
 0x3b9   : > { %4159 = vmatprep.subr.bf16.mxu1 %v3285_v63  ;;  %v2350_v63 = vunpack.c.h.s8.bf16 %v1294_v53  ;;  %v2326_v1 = vunpack.c.l.s8.bf16 %v1294_v53  ;;  %v1198_v53 = vld [vmem:[%s6790_s7 + $0x590] sm:$0xff] }
 0x3bb   : > { %4117 = vmatpush2.bf16.msra.mxu0 %v2900_v59  ;;  %v2327_v59 = vunpack.c.l.s8.bf16 %v1295_v62 }
 0x3bc   : > { %4160 = vmatpush2.bf16.msra.mxu1 %v3284_v60  ;;  %4118 = vmatprep.subr.bf16.mxu0 %v2877_v61  ;;  %v1271_v60 = vld [vmem:[%s6790_s7 + $0x7d8] sm:$0xff]  ;;  %v1942_v61 = vunpack.c.l.s8.bf16 %v1102_v51 }
 0x3bd   : > { %4161 = vmatprep.subr.bf16.mxu1 %v3261_v2  ;;  %v1919_v2 = vunpack.c.h.s8.bf16 %v1079_v56  ;;  %v2279_v17 = vunpack.c.l.s8.bf16 %v1271_v60 }
 0x3bf   : > { %4119 = vmatpush2.bf16.msra.mxu0 %v2876_v5  ;;  %v2303_v5 = vunpack.c.h.s8.bf16 %v1271_v60 }
 0x3c0   : > { %4162 = vmatpush2.bf16.msra.mxu1 %v3260_v8  ;;  %4120 = vmatprep.subr.bf16.mxu0 %v2853_v9  ;;  %v1270_v8 = vld [vmem:[%s6790_s7 + $0x7d0] sm:$0xff]  ;;  %v1918_v9 = vunpack.c.h.s8.bf16 %v1078_v4 }
 0x3c1   : > { %4163 = vmatprep.subr.bf16.mxu1 %v3237_v12  ;;  %v2302_v12 = vunpack.c.h.s8.bf16 %v1270_v8  ;;  %v2278_v0 = vunpack.c.l.s8.bf16 %v1270_v8  ;;  %v1174_v8 = vld [vmem:[%s6790_s7 + $0x4d0] sm:$0xff] }
 0x3c3   : > { %4121 = vmatpush2.bf16.msra.mxu0 %v2852_v18  ;;  %v1055_v18 = vld [vmem:[%s6790_s7 + $0x118] sm:$0xff] }
 0x3c4   : > { %4164 = vmatpush2.bf16.msra.mxu1 %v3236_v21  ;;  %4122 = vmatprep.subr.bf16.mxu0 %v2829_v22  ;;  %v1247_v21 = vld [vmem:[%s6790_s7 + $0x718] sm:$0xff]  ;;  %v1894_v22 = vunpack.c.l.s8.bf16 %v1078_v4  ;;  %v1847_v43 = vunpack.c.l.s8.bf16 %v1055_v18 }
 0x3c5   : > { %4165 = vmatprep.subr.bf16.mxu1 %v3213_v10  ;;  %v1871_v10 = vunpack.c.h.s8.bf16 %v1055_v18  ;;  %v2231_v29 = vunpack.c.l.s8.bf16 %v1247_v21 }
 0x3c7   : > { %4123 = vmatpush2.bf16.msra.mxu0 %v2828_v25  ;;  %v2255_v25 = vunpack.c.h.s8.bf16 %v1247_v21 }
 0x3c8   : > { %4166 = vmatpush2.bf16.msra.mxu1 %v3212_v26  ;;  %4124 = vmatprep.subr.bf16.mxu0 %v2805_v27  ;;  %v1246_v26 = vld [vmem:[%s6790_s7 + $0x710] sm:$0xff]  ;;  %v1870_v27 = vunpack.c.h.s8.bf16 %v1054_v24 }
 0x3c9   : > { %4167 = vmatprep.subr.bf16.mxu1 %v3189_v28  ;;  %v2254_v28 = vunpack.c.h.s8.bf16 %v1246_v26  ;;  %v2230_v35 = vunpack.c.l.s8.bf16 %v1246_v26  ;;  %v1150_v26 = vld [vmem:[%s6790_s7 + $0x410] sm:$0xff] }
 0x3cb   : > { %4125 = vmatpush2.bf16.msra.mxu0 %v2804_v30  ;;  %v1031_v30 = vld [vmem:[%s6790_s7 + $0x58] sm:$0xff] }
 0x3cc   : > { %4168 = vmatpush2.bf16.msra.mxu1 %v3188_v32  ;;  %4126 = vmatprep.subr.bf16.mxu0 %v2781_v33  ;;  %v1223_v32 = vld [vmem:[%s6790_s7 + $0x658] sm:$0xff]  ;;  %v1846_v33 = vunpack.c.l.s8.bf16 %v1054_v24  ;;  %v1799_v57 = vunpack.c.l.s8.bf16 %v1031_v30 }
 0x3cd   : > { %4169 = vmatprep.subr.bf16.mxu1 %v3165_v58  ;;  %v1823_v58 = vunpack.c.h.s8.bf16 %v1031_v30  ;;  %v2183_v62 = vunpack.c.l.s8.bf16 %v1223_v32 }
 0x3cf   : > { %4127 = vmatpush2.bf16.msra.mxu0 %v2780_v36  ;;  %v2207_v36 = vunpack.c.h.s8.bf16 %v1223_v32 }
 0x3d0   : > { %4170 = vmatpush2.bf16.msra.mxu1 %v3164_v37  ;;  %4128 = vmatprep.subr.bf16.mxu0 %v2757_v38  ;;  %v1222_v37 = vld [vmem:[%s6790_s7 + $0x650] sm:$0xff]  ;;  %v1822_v38 = vunpack.c.h.s8.bf16 %v1030_v6 }
 0x3d1   : > { %4171 = vmatprep.subr.bf16.mxu1 %v3141_v39  ;;  %v2206_v39 = vunpack.c.h.s8.bf16 %v1222_v37  ;;  %v2182_v51 = vunpack.c.l.s8.bf16 %v1222_v37 }
 0x3d3   : > { %4129 = vmatpush2.bf16.msra.mxu0 %v2756_v11  ;;  %v1199_v11 = vld [vmem:[%s6790_s7 + $0x598] sm:$0xff] }
 0x3d4   : > { %4172 = vmatpush2.bf16.msra.mxu1 %v3140_v45  ;;  %4184 = vmatprep.subr.bf16.mxu0 %v1967_v48  ;;  %v1391_v45 = vld [vmem:[%s6790_s7 + $0xb98] sm:$0xff]  ;;  %v1798_v48 = vunpack.c.l.s8.bf16 %v1030_v6 }
 0x3d5   : > { %4227 = vmatprep.subr.bf16.mxu1 %v2351_v52  ;;  %v2159_v52 = vunpack.c.h.s8.bf16 %v1199_v11  ;;  %v2519_v60 = vunpack.c.l.s8.bf16 %v1391_v45 }
 0x3d6   : > { %4131 = vmatmul.mubr.bf16.vlgmr.msra.gmra.mxu0 %v6966_v47  ;;  %v3874_v6 = vpop.f32.mrf.mxu0 }
 0x3d7   : > { %4174 = vmatmul.mubr.bf16.vlgmr.msra.gmra.mxu1 %v6968_v50  ;;  %4185 = vmatpush1.bf16.msra.mxu0 %v1966_v54  ;;  %v2543_v54 = vunpack.c.h.s8.bf16 %v1391_v45 }
 0x3d8   : > { %4216 = vmatprep.mubr.bf16.mxu0 %v6882_v13  ;;  %4228 = vmatpush1.bf16.msra.mxu1 %v2350_v63  ;;  %v1390_v63 = vld [vmem:[%s6790_s7 + $0xb90] sm:$0xff]  ;;  %v3876_v45 = vpop.f32.mrf.mxu0 }
 0x3d9   : > { %4259 = vmatprep.mubr.bf16.mxu1 %v6886_v16  ;;  %4186 = vmatprep.subr.bf16.mxu0 %v1943_v55  ;;  %v2158_v55 = vunpack.c.h.s8.bf16 %v1198_v53  ;;  %v2542_v56 = vunpack.c.h.s8.bf16 %v1390_v63  ;;  %v2518_v4 = vunpack.c.l.s8.bf16 %v1390_v63  ;;  %v1679_v63 = vld [vmem:[%s6790_s7 + $0x1498] sm:$0xff] }
 0x3da   : > { %4229 = vmatprep.subr.bf16.mxu1 %v2327_v59  ;;  %v2135_v59 = vunpack.c.l.s8.bf16 %v1199_v11 }
 0x3db   : > { %4187 = vmatpush1.bf16.msra.mxu0 %v1942_v61  ;;  %v1175_v61 = vld [vmem:[%s6790_s7 + $0x4d8] sm:$0xff] }
 0x3dc   : > { %4230 = vmatpush1.bf16.msra.mxu1 %v2326_v1  ;;  %4188 = vmatprep.subr.bf16.mxu0 %v1919_v2  ;;  %v1367_v1 = vld [vmem:[%s6790_s7 + $0xad8] sm:$0xff]  ;;  %v2134_v2 = vunpack.c.l.s8.bf16 %v1198_v53  ;;  %v2087_v18 = vunpack.c.l.s8.bf16 %v1175_v61 }
 0x3dd   : > { %4231 = vmatprep.subr.bf16.mxu1 %v2303_v5  ;;  %v2111_v5 = vunpack.c.h.s8.bf16 %v1175_v61  ;;  %v2471_v21 = vunpack.c.l.s8.bf16 %v1367_v1  ;;  %v1486_v61 = vld [vmem:[%s6790_s7 + $0xe90] sm:$0xff] }
 0x3df   : > { %4189 = vmatpush1.bf16.msra.mxu0 %v1918_v9  ;;  %v2495_v9 = vunpack.c.h.s8.bf16 %v1367_v1 }
 0x3e0   : > { %4232 = vmatpush1.bf16.msra.mxu1 %v2302_v12  ;;  %4190 = vmatprep.subr.bf16.mxu0 %v1895_v14  ;;  %v1366_v12 = vld [vmem:[%s6790_s7 + $0xad0] sm:$0xff]  ;;  %v2110_v14 = vunpack.c.h.s8.bf16 %v1174_v8 }
 0x3e1   : > { %4233 = vmatprep.subr.bf16.mxu1 %v2279_v17  ;;  %v2494_v17 = vunpack.c.h.s8.bf16 %v1366_v12  ;;  %v2470_v24 = vunpack.c.l.s8.bf16 %v1366_v12 }
 0x3e3   : > { %4191 = vmatpush1.bf16.msra.mxu0 %v1894_v22  ;;  %v1151_v22 = vld [vmem:[%s6790_s7 + $0x418] sm:$0xff] }
 0x3e4   : > { %4234 = vmatpush1.bf16.msra.mxu1 %v2278_v0  ;;  %4192 = vmatprep.subr.bf16.mxu0 %v1871_v10  ;;  %v1343_v0 = vld [vmem:[%s6790_s7 + $0xa18] sm:$0xff]  ;;  %v2086_v10 = vunpack.c.l.s8.bf16 %v1174_v8  ;;  %v2039_v30 = vunpack.c.l.s8.bf16 %v1151_v22 }
 0x3e5   : > { %4235 = vmatprep.subr.bf16.mxu1 %v2255_v25  ;;  %v2063_v25 = vunpack.c.h.s8.bf16 %v1151_v22  ;;  %v2423_v32 = vunpack.c.l.s8.bf16 %v1343_v0  ;;  %v3095_v22 = vunpack.c.l.s8.bf16 %v1679_v63 }
 0x3e7   : > { %4193 = vmatpush1.bf16.msra.mxu0 %v1870_v27  ;;  %v2447_v27 = vunpack.c.h.s8.bf16 %v1343_v0  ;;  %v1655_v0 = vld [vmem:[%s6790_s7 + $0x13d8] sm:$0xff] }
 0x3e8   : > { %4236 = vmatpush1.bf16.msra.mxu1 %v2254_v28  ;;  %4194 = vmatprep.subr.bf16.mxu0 %v1847_v43  ;;  %v1342_v28 = vld [vmem:[%s6790_s7 + $0xa10] sm:$0xff]  ;;  %v2062_v43 = vunpack.c.h.s8.bf16 %v1150_v26 }
 0x3e9   : > { %4237 = vmatprep.subr.bf16.mxu1 %v2231_v29  ;;  %v2446_v29 = vunpack.c.h.s8.bf16 %v1342_v28 }
 0x3eb   : > { %4195 = vmatpush1.bf16.msra.mxu0 %v1846_v33  ;;  %v1127_v33 = vld [vmem:[%s6790_s7 + $0x358] sm:$0xff] }
 0x3ec   : > { %4238 = vmatpush1.bf16.msra.mxu1 %v2230_v35  ;;  %4196 = vmatprep.subr.bf16.mxu0 %v1823_v58  ;;  %v1319_v35 = vld [vmem:[%s6790_s7 + $0x958] sm:$0xff]  ;;  %v2038_v58 = vunpack.c.l.s8.bf16 %v1150_v26  ;;  %v2015_v37 = vunpack.c.h.s8.bf16 %v1127_v33  ;;  %v5421_v26 = vrot.slane %v7261_v20, %v6948_v7 }
 0x3ed   : > { %4239 = vmatprep.subr.bf16.mxu1 %v2207_v36  ;;  %v2422_v36 = vunpack.c.l.s8.bf16 %v1342_v28  ;;  %v2375_v53 = vunpack.c.l.s8.bf16 %v1319_v35  ;;  %v1462_v28 = vld [vmem:[%s6790_s7 + $0xdd0] sm:$0xff] }
 0x3ef   : > { %4197 = vmatpush1.bf16.msra.mxu0 %v1822_v38  ;;  %v1126_v38 = vld [vmem:[%s6790_s7 + $0x350] sm:$0xff] }
 0x3f0   : > { %4240 = vmatpush1.bf16.msra.mxu1 %v2206_v39  ;;  %4198 = vmatprep.subr.bf16.mxu0 %v1799_v57  ;;  %v3917_v39 = vpop.f32.mrf.mxu1  ;;  %v2399_v57 = vunpack.c.h.s8.bf16 %v1319_v35  ;;  %v2014_v11 = vunpack.c.h.s8.bf16 %v1126_v38 }
 0x3f1   : > { %4241 = vmatprep.subr.bf16.mxu1 %v2183_v62  ;;  %v1318_v62 = vld [vmem:[%s6790_s7 + $0x950] sm:$0xff]  ;;  %v3918_v12 = vadd.f32 %v3917_v39, %v3874_v6  ;;  %v5599_v39 = vrot.slane %v7268_v23, %v6908_v49 }
 0x3f3   : > { %4199 = vmatpush1.bf16.msra.mxu0 %v1798_v48  ;;  %v2398_v48 = vunpack.c.h.s8.bf16 %v1318_v62 }
 0x3f4   : > { %4242 = vmatpush1.bf16.msra.mxu1 %v2182_v51  ;;  %4200 = vmatprep.subr.bf16.mxu0 %v2159_v52  ;;  %v1991_v51 = vunpack.c.l.s8.bf16 %v1127_v33  ;;  %v3919_v52 = vpop.f32.mrf.mxu1 }
 0x3f5   : > { %4243 = vmatprep.subr.bf16.mxu1 %v2543_v54  ;;  %v1487_v54 = vld [vmem:[%s6790_s7 + $0xe98] sm:$0xff] }
 0x3f6   : > { %v3921_v1 = vpop.f32.mrf.mxu1 }
 0x3f7   : > { %4201 = vmatpush2.bf16.msra.mxu0 %v2158_v55  ;;  %v1990_v55 = vunpack.c.l.s8.bf16 %v1126_v38  ;;  %v1654_v38 = vld [vmem:[%s6790_s7 + $0x13d0] sm:$0xff] }
 0x3f8   : > { %4244 = vmatpush2.bf16.msra.mxu1 %v2542_v56  ;;  %4202 = vmatprep.subr.bf16.mxu0 %v2135_v59  ;;  %v3878_v56 = vpop.f32.mrf.mxu0  ;;  %v2374_v59 = vunpack.c.l.s8.bf16 %v1318_v62  ;;  %v2686_v62 = vunpack.c.h.s8.bf16 %v1462_v28 }
 0x3f9   : > { %4245 = vmatprep.subr.bf16.mxu1 %v2519_v60  ;;  %v2735_v60 = vunpack.c.h.s8.bf16 %v1487_v54  ;;  %v3922_v35 = vadd.f32 %v3921_v1, %v3878_v56  ;;  %v2662_v1 = vunpack.c.l.s8.bf16 %v1462_v28  ;;  %v1607_v28 = vld [vmem:[%s6790_s7 + $0x1258] sm:$0xff] }
 0x3fa   : > { %v3880_v8 = vpop.f32.mrf.mxu0 }
 0x3fb   : > { %4203 = vmatpush2.bf16.msra.mxu0 %v2134_v2  ;;  %v3119_v2 = vunpack.c.h.s8.bf16 %v1679_v63  ;;  %v3047_v63 = vunpack.c.l.s8.bf16 %v1655_v0 }
 0x3fc   : > { %4246 = vmatpush2.bf16.msra.mxu1 %v2518_v4  ;;  %4204 = vmatprep.subr.bf16.mxu0 %v2111_v5  ;;  %v1678_v4 = vld [vmem:[%s6790_s7 + $0x1490] sm:$0xff]  ;;  %v2734_v5 = vunpack.c.h.s8.bf16 %v1486_v61 }
 0x3fd   : > { %4247 = vmatprep.subr.bf16.mxu1 %v2495_v9  ;;  %v3118_v9 = vunpack.c.h.s8.bf16 %v1678_v4 }
 0x3ff   : > { %4205 = vmatpush2.bf16.msra.mxu0 %v2110_v14  ;;  %v3923_v14 = vpop.f32.mrf.mxu1 }
 0x400   : > { %4248 = vmatpush2.bf16.msra.mxu1 %v2494_v17  ;;  %4206 = vmatprep.subr.bf16.mxu0 %v2087_v18  ;;  %v2711_v17 = vunpack.c.l.s8.bf16 %v1487_v54  ;;  %v1463_v18 = vld [vmem:[%s6790_s7 + $0xdd8] sm:$0xff] }
 0x401   : > { %4249 = vmatprep.subr.bf16.mxu1 %v2471_v21  ;;  %v2687_v33 = vunpack.c.h.s8.bf16 %v1463_v18  ;;  %v2663_v54 = vunpack.c.l.s8.bf16 %v1463_v18 }
 0x403   : > { %4207 = vmatpush2.bf16.msra.mxu0 %v2086_v10  ;;  %v3920_v10 = vadd.f32 %v3919_v52, %v3876_v45 }
 0x404   : > { %4250 = vmatpush2.bf16.msra.mxu1 %v2470_v24  ;;  %4208 = vmatprep.subr.bf16.mxu0 %v2063_v25 }
 0x405   : > { %4251 = vmatprep.subr.bf16.mxu1 %v2447_v27  ;;  %v2710_v27 = vunpack.c.l.s8.bf16 %v1486_v61 }
 0x407   : > { %4209 = vmatpush2.bf16.msra.mxu0 %v2062_v43  ;;  %v5595_v43 = vrot.slane %v7268_v23, %v6948_v7 }
 0x408   : > { %4252 = vmatpush2.bf16.msra.mxu1 %v2446_v29  ;;  %4210 = vmatprep.subr.bf16.mxu0 %v2039_v30  ;;  %v5425_v30 = vrot.slane %v7261_v20, %v6908_v49 }
 0x409   : > { %4253 = vmatprep.subr.bf16.mxu1 %v2423_v32  ;;  %v3094_v32 = vunpack.c.l.s8.bf16 %v1678_v4 }
 0x40b   : > { %4211 = vmatpush2.bf16.msra.mxu0 %v2038_v58 }
 0x40c   : > { %4254 = vmatpush2.bf16.msra.mxu1 %v2422_v36  ;;  %4212 = vmatprep.subr.bf16.mxu0 %v2015_v37  ;;  %v3071_v37 = vunpack.c.h.s8.bf16 %v1655_v0 }
 0x40d   : > { %4255 = vmatprep.subr.bf16.mxu1 %v2399_v57 }
 0x40f   : > { %4213 = vmatpush2.bf16.msra.mxu0 %v2014_v11  ;;  %v3924_v11 = vadd.f32 %v3923_v14, %v3880_v8  ;;  %v1438_v14 = vld [vmem:[%s6790_s7 + $0xd10] sm:$0xff] }
 0x410   : > { %4256 = vmatpush2.bf16.msra.mxu1 %v2398_v48  ;;  %4214 = vmatprep.subr.bf16.mxu0 %v1991_v51 }
 0x411   : > { %4257 = vmatprep.subr.bf16.mxu1 %v2375_v53  ;;  %v3070_v53 = vunpack.c.h.s8.bf16 %v1654_v38 }
 0x413   : > { %4215 = vmatpush2.bf16.msra.mxu0 %v1990_v55 }
 0x414   : > { %4258 = vmatpush2.bf16.msra.mxu1 %v2374_v59  ;;  %4270 = vmatprep.subr.bf16.mxu0 %v2735_v60  ;;  %v1439_v60 = vld [vmem:[%s6790_s7 + $0xd18] sm:$0xff] }
 0x415   : > { %4313 = vmatprep.subr.bf16.mxu1 %v3119_v2  ;;  %v1631_v2 = vld [vmem:[%s6790_s7 + $0x1318] sm:$0xff] }
 0x416   : > { %v3960_v21 = vpop.f32.mrf.mxu0  ;;  %4217 = vmatmul.mubr.bf16.vlgmr.msra.gmra.mxu0 %v6884_v15 }
 0x417   : > { %v3961_v24 = vadd.f32 %v3960_v21, %v3918_v12  ;;  %v4003_v25 = vpop.f32.mrf.mxu1  ;;  %4260 = vmatmul.mubr.bf16.vlgmr.msra.gmra.mxu1 %v6889_v19  ;;  %4271 = vmatpush1.bf16.msra.mxu0 %v2734_v5  ;;  %v2639_v12 = vunpack.c.h.s8.bf16 %v1439_v60  ;;  %v3023_v21 = vunpack.c.h.s8.bf16 %v1631_v2 }
 0x418   : > { %4302 = vmatprep.mubr.bf16.mxu0 %v6930_v31  ;;  %4314 = vmatpush1.bf16.msra.mxu1 %v3118_v9  ;;  %v3962_v29 = vpop.f32.mrf.mxu0  ;;  %v3046_v9 = vunpack.c.l.s8.bf16 %v1654_v38  ;;  %v2951_v38 = vunpack.c.l.s8.bf16 %v1607_v28 }
 0x419   : > { %v4004_v58 = vadd.f32 %v4003_v25, %v3961_v24  ;;  %4345 = vmatprep.mubr.bf16.mxu1 %v6932_v34  ;;  %v3963_v6 = vadd.f32 %v3962_v29, %v3920_v10  ;;  %v4005_v36 = vpop.f32.mrf.mxu1  ;;  %4272 = vmatprep.subr.bf16.mxu0 %v2711_v17  ;;  %v2638_v10 = vunpack.c.h.s8.bf16 %v1438_v14  ;;  %v2615_v25 = vunpack.c.l.s8.bf16 %v1439_v60  ;;  %v1751_v60 = vld [vmem:[%s6790_s7 + $0x16d8] sm:$0xff] }
 0x41a   : > { %v3964_v57 = vpop.f32.mrf.mxu0  ;;  %4315 = vmatprep.subr.bf16.mxu1 %v3095_v22  ;;  %v1630_v22 = vld [vmem:[%s6790_s7 + $0x1310] sm:$0xff] }
 0x41b   : > { %v5520_v45 = vmul.f32 %v5421_v26, %v4004_v58  ;;  %v4006_v20 = vadd.f32 %v4005_v36, %v3963_v6  ;;  %v3965_v48 = vadd.f32 %v3964_v57, %v3922_v35  ;;  %v4007_v51 = vpop.f32.mrf.mxu1  ;;  %4273 = vmatpush1.bf16.msra.mxu0 %v2710_v27  ;;  %v3022_v24 = vunpack.c.h.s8.bf16 %v1630_v22  ;;  %v1415_v27 = vld [vmem:[%s6790_s7 + $0xc58] sm:$0xff]  ;;  %v1606_v35 = vld [vmem:[%s6790_s7 + $0x1250] sm:$0xff] }
 0x41c   : > { %4316 = vmatpush1.bf16.msra.mxu1 %v3094_v32  ;;  %v3966_v52 = vpop.f32.mrf.mxu0  ;;  %4274 = vmatprep.subr.bf16.mxu0 %v2687_v33  ;;  %v2998_v29 = vunpack.c.l.s8.bf16 %v1630_v22  ;;  %v1414_v32 = vld [vmem:[%s6790_s7 + $0xc50] sm:$0xff]  ;;  %v2975_v33 = vunpack.c.h.s8.bf16 %v1607_v28  ;;  %v2974_v36 = vunpack.c.h.s8.bf16 %v1606_v35 }
 0x41d   : > { %v5694_v55 = vadd.f32 %v5595_v43, %v5520_v45  ;;  %v5521_v56 = vmul.f32 %v5425_v30, %v4006_v20  ;;  %v4008_v23 = vadd.f32 %v4007_v51, %v3965_v48  ;;  %v3967_v59 = vadd.f32 %v3966_v52, %v3924_v11  ;;  %4317 = vmatprep.subr.bf16.mxu1 %v3071_v37  ;;  %v4009_v61 = vpop.f32.mrf.mxu1  ;;  %v1582_v51 = vld [vmem:[%s6790_s7 + $0x1190] sm:$0xff] }
 0x41e   : > { %v2590_v58 = vunpack.c.h.s8.bf16 %v1414_v32  ;;  %v2567_v37 = vunpack.c.l.s8.bf16 %v1415_v27  ;;  %v2566_v11 = vunpack.c.l.s8.bf16 %v1414_v32  ;;  %v2950_v20 = vunpack.c.l.s8.bf16 %v1606_v35  ;;  %v1703_v32 = vld [vmem:[%s6790_s7 + $0x1558] sm:$0xff] }
 0x41f   : > { %6207 = vtanh.f32 %v5694_v55  ;;  %v5695_v4 = vadd.f32 %v5599_v39, %v5521_v56  ;;  %v5544_v5 = vmul.f32 %v5421_v26, %v4008_v23  ;;  %v4010_v8 = vadd.f32 %v4009_v61, %v3967_v59  ;;  %4275 = vmatpush1.bf16.msra.mxu0 %v2686_v62  ;;  %v1775_v62 = vld [vmem:[%s6790_s7 + $0x1798] sm:$0xff] }
 0x420   : > { %4318 = vmatpush1.bf16.msra.mxu1 %v3070_v53  ;;  %4276 = vmatprep.subr.bf16.mxu0 %v2663_v54  ;;  %v2999_v26 = vunpack.c.l.s8.bf16 %v1631_v2  ;;  %v3311_v52 = vunpack.c.h.s8.bf16 %v1775_v62  ;;  %v1774_v53 = vld [vmem:[%s6790_s7 + $0x1790] sm:$0xff]  ;;  %v3287_v23 = vunpack.c.l.s8.bf16 %v1775_v62  ;;  %v1559_v59 = vld [vmem:[%s6790_s7 + $0x10d8] sm:$0xff]  ;;  %v2902_v61 = vunpack.c.l.s8.bf16 %v1582_v51 }
 0x421   : > { %6209 = vtanh.f32 %v5695_v4  ;;  %v5718_v17 = vadd.f32 %v5595_v43, %v5544_v5  ;;  %v5545_v18 = vmul.f32 %v5425_v30, %v4010_v8  ;;  %4319 = vmatprep.subr.bf16.mxu1 %v3047_v63  ;;  %v2614_v43 = vunpack.c.l.s8.bf16 %v1438_v14  ;;  %v1558_v4 = vld [vmem:[%s6790_s7 + $0x10d0] sm:$0xff] }
 0x422   : > { %v2591_v30 = vunpack.c.h.s8.bf16 %v1415_v27  ;;  %v2926_v63 = vunpack.c.h.s8.bf16 %v1582_v51  ;;  %v3310_v55 = vunpack.c.h.s8.bf16 %v1774_v53  ;;  %v2879_v2 = vunpack.c.h.s8.bf16 %v1559_v59  ;;  %v1750_v8 = vld [vmem:[%s6790_s7 + $0x16d0] sm:$0xff] }
 0x423   : > { %6211 = vtanh.f32 %v5718_v17  ;;  %v5719_v0 = vadd.f32 %v5599_v39, %v5545_v18  ;;  %4277 = vmatpush1.bf16.msra.mxu0 %v2662_v1  ;;  %v1583_v39 = vld [vmem:[%s6790_s7 + $0x1198] sm:$0xff]  ;;  %v3286_v1 = vunpack.c.l.s8.bf16 %v1774_v53  ;;  %v3263_v5 = vunpack.c.h.s8.bf16 %v1751_v60 }
 0x424   : > { %4320 = vmatpush1.bf16.msra.mxu1 %v3046_v9  ;;  %4278 = vmatprep.subr.bf16.mxu0 %v2639_v12  ;;  %v2927_v48 = vunpack.c.h.s8.bf16 %v1583_v39  ;;  %v2903_v56 = vunpack.c.l.s8.bf16 %v1583_v39  ;;  %v2878_v9 = vunpack.c.h.s8.bf16 %v1558_v4  ;;  %v3262_v12 = vunpack.c.h.s8.bf16 %v1750_v8  ;;  %v1535_v18 = vld [vmem:[%s6790_s7 + $0x1018] sm:$0xff] }
 0x425   : > { %6213 = vtanh.f32 %v5719_v0  ;;  %4321 = vmatprep.subr.bf16.mxu1 %v3023_v21  ;;  %v2855_v14 = vunpack.c.l.s8.bf16 %v1559_v59  ;;  %v3239_v17 = vunpack.c.l.s8.bf16 %v1751_v60  ;;  %v1727_v21 = vld [vmem:[%s6790_s7 + $0x1618] sm:$0xff]  ;;  %v2854_v22 = vunpack.c.l.s8.bf16 %v1558_v4  ;;  %v1273_v60 = vld [vmem:[%s6790_s7 + $0x7e8] sm:$0xff]  ;;  %v1080_v4 = vld [vmem:[%s6790_s7 + $0x1e0] sm:$0xff] }
 0x426   : > { %v3238_v0 = vunpack.c.l.s8.bf16 %v1750_v8  ;;  %v3143_v62 = vunpack.c.l.s8.bf16 %v1703_v32  ;;  %v1272_v8 = vld [vmem:[%s6790_s7 + $0x7e0] sm:$0xff] }
 0x427   : > { %4279 = vmatpush1.bf16.msra.mxu0 %v2638_v10  ;;  %v2831_v10 = vunpack.c.h.s8.bf16 %v1535_v18 }
 0x428   : > { %4322 = vmatpush1.bf16.msra.mxu1 %v3022_v24  ;;  %4280 = vmatprep.subr.bf16.mxu0 %v2615_v25  ;;  %v1534_v24 = vld [vmem:[%s6790_s7 + $0x1010] sm:$0xff]  ;;  %v3215_v25 = vunpack.c.h.s8.bf16 %v1727_v21 }
 0x429   : > { %4323 = vmatprep.subr.bf16.mxu1 %v2999_v26  ;;  %v1726_v26 = vld [vmem:[%s6790_s7 + $0x1610] sm:$0xff]  ;;  %v2830_v27 = vunpack.c.h.s8.bf16 %v1534_v24 }
 0x42a   : > { %v3214_v28 = vunpack.c.h.s8.bf16 %v1726_v26  ;;  %v3190_v35 = vunpack.c.l.s8.bf16 %v1726_v26  ;;  %v1248_v26 = vld [vmem:[%s6790_s7 + $0x720] sm:$0xff] }
 0x42b   : > { %4281 = vmatpush1.bf16.msra.mxu0 %v2614_v43  ;;  %v2807_v43 = vunpack.c.l.s8.bf16 %v1535_v18  ;;  %v1057_v18 = vld [vmem:[%s6790_s7 + $0x128] sm:$0xff] }
 0x42c   : > { %v6208_v6 = vpop.eup %6207  ;;  %4324 = vmatpush1.bf16.msra.mxu1 %v2998_v29  ;;  %4282 = vmatprep.subr.bf16.mxu0 %v2591_v30  ;;  %v3191_v29 = vunpack.c.l.s8.bf16 %v1727_v21  ;;  %v1511_v30 = vld [vmem:[%s6790_s7 + $0xf58] sm:$0xff]  ;;  %v1249_v21 = vld [vmem:[%s6790_s7 + $0x728] sm:$0xff] }
 0x42d   : > { %5790 = vst [vmem:[%s7109_s17 + $0x30] sm:$0xff] %v6208_v6  ;;  %4325 = vmatprep.subr.bf16.mxu1 %v2975_v33  ;;  %v2806_v33 = vunpack.c.l.s8.bf16 %v1534_v24  ;;  %v1510_v6 = vld [vmem:[%s6790_s7 + $0xf50] sm:$0xff]  ;;  %v1056_v24 = vld [vmem:[%s6790_s7 + $0x120] sm:$0xff] }
 0x42e   : > { %v6210_v57 = vpop.eup %6209 }
 0x42f   : > { %5791 = vst [vmem:[%s7109_s17 + $0x38] sm:$0xff] %v6210_v57  ;;  %4283 = vmatpush1.bf16.msra.mxu0 %v2590_v58  ;;  %v2783_v58 = vunpack.c.h.s8.bf16 %v1511_v30  ;;  %v2759_v57 = vunpack.c.l.s8.bf16 %v1511_v30  ;;  %v1033_v30 = vld [vmem:[%s6790_s7 + $0x68] sm:$0xff] }
 0x430   : > { %v6212_v45 = vpop.eup %6211  ;;  %4326 = vmatpush1.bf16.msra.mxu1 %v2974_v36  ;;  %4284 = vmatprep.subr.bf16.mxu0 %v2567_v37  ;;  %v3167_v36 = vunpack.c.h.s8.bf16 %v1703_v32  ;;  %v1702_v37 = vld [vmem:[%s6790_s7 + $0x1550] sm:$0xff]  ;;  %v1225_v32 = vld [vmem:[%s6790_s7 + $0x668] sm:$0xff] }
 0x431   : > { %5814 = vst [vmem:[%s7109_s17 + $0xf0] sm:$0xff] %v6212_v45  ;;  %4327 = vmatprep.subr.bf16.mxu1 %v2951_v38  ;;  %v2782_v38 = vunpack.c.h.s8.bf16 %v1510_v6  ;;  %v3166_v39 = vunpack.c.h.s8.bf16 %v1702_v37  ;;  %v1297_v45 = vld [vmem:[%s6790_s7 + $0x8a8] sm:$0xff] }
 0x432   : > { %v6214_v54 = vpop.eup %6213  ;;  %v2353_v53 = vunpack.c.h.s8.bf16 %v1297_v45  ;;  %v2329_v59 = vunpack.c.l.s8.bf16 %v1297_v45  ;;  %v1393_v45 = vld [vmem:[%s6790_s7 + $0xba8] sm:$0xff] }
 0x433   : > { %5815 = vst [vmem:[%s7109_s17 + $0xf8] sm:$0xff] %v6214_v54  ;;  %4285 = vmatpush1.bf16.msra.mxu0 %v2566_v11  ;;  %v1105_v11 = vld [vmem:[%s6790_s7 + $0x2a8] sm:$0xff]  ;;  %v1296_v54 = vld [vmem:[%s6790_s7 + $0x8a0] sm:$0xff] }
 0x434   : > { %4328 = vmatpush1.bf16.msra.mxu1 %v2950_v20  ;;  %4286 = vmatprep.subr.bf16.mxu0 %v2927_v48  ;;  %v2758_v20 = vunpack.c.l.s8.bf16 %v1510_v6  ;;  %v3142_v48 = vunpack.c.l.s8.bf16 %v1702_v37  ;;  %v1969_v51 = vunpack.c.h.s8.bf16 %v1105_v11  ;;  %v1032_v6 = vld [vmem:[%s6790_s7 + $0x60] sm:$0xff] }
 0x435   : > { %4329 = vmatprep.subr.bf16.mxu1 %v3311_v52  ;;  %v1104_v52 = vld [vmem:[%s6790_s7 + $0x2a0] sm:$0xff] }
 0x436   : > { %v1224_v37 = vld [vmem:[%s6790_s7 + $0x660] sm:$0xff] }
 0x437   : > { %4287 = vmatpush2.bf16.msra.mxu0 %v2926_v63  ;;  %v1968_v63 = vunpack.c.h.s8.bf16 %v1104_v52 }
 0x438   : > { %4330 = vmatpush2.bf16.msra.mxu1 %v3310_v55  ;;  %4288 = vmatprep.subr.bf16.mxu0 %v2903_v56  ;;  %v2352_v55 = vunpack.c.h.s8.bf16 %v1296_v54  ;;  %v1945_v56 = vunpack.c.l.s8.bf16 %v1105_v11  ;;  %v1201_v11 = vld [vmem:[%s6790_s7 + $0x5a8] sm:$0xff] }
 0x439   : > { %4331 = vmatprep.subr.bf16.mxu1 %v3287_v23  ;;  %v1081_v23 = vld [vmem:[%s6790_s7 + $0x1e8] sm:$0xff] }
 0x43b   : > { %4289 = vmatpush2.bf16.msra.mxu0 %v2902_v61  ;;  %v1944_v61 = vunpack.c.l.s8.bf16 %v1104_v52  ;;  %v1200_v52 = vld [vmem:[%s6790_s7 + $0x5a0] sm:$0xff] }
 0x43c   : > { %4332 = vmatpush2.bf16.msra.mxu1 %v3286_v1  ;;  %4290 = vmatprep.subr.bf16.mxu0 %v2879_v2  ;;  %v2328_v1 = vunpack.c.l.s8.bf16 %v1296_v54  ;;  %v1921_v2 = vunpack.c.h.s8.bf16 %v1081_v23  ;;  %v1392_v54 = vld [vmem:[%s6790_s7 + $0xba0] sm:$0xff] }
 0x43d   : > { %4333 = vmatprep.subr.bf16.mxu1 %v3263_v5  ;;  %v2305_v5 = vunpack.c.h.s8.bf16 %v1273_v60 }
 0x43f   : > { %4291 = vmatpush2.bf16.msra.mxu0 %v2878_v9  ;;  %v1920_v9 = vunpack.c.h.s8.bf16 %v1080_v4 }
 0x440   : > { %4334 = vmatpush2.bf16.msra.mxu1 %v3262_v12  ;;  %4292 = vmatprep.subr.bf16.mxu0 %v2855_v14  ;;  %v2304_v12 = vunpack.c.h.s8.bf16 %v1272_v8  ;;  %v1897_v14 = vunpack.c.l.s8.bf16 %v1081_v23  ;;  %v2521_v23 = vunpack.c.l.s8.bf16 %v1393_v45 }
 0x441   : > { %4335 = vmatprep.subr.bf16.mxu1 %v3239_v17  ;;  %v2281_v17 = vunpack.c.l.s8.bf16 %v1273_v60  ;;  %v1369_v60 = vld [vmem:[%s6790_s7 + $0xae8] sm:$0xff] }
 0x443   : > { %4293 = vmatpush2.bf16.msra.mxu0 %v2854_v22  ;;  %v1896_v22 = vunpack.c.l.s8.bf16 %v1080_v4  ;;  %v1176_v4 = vld [vmem:[%s6790_s7 + $0x4e0] sm:$0xff] }
 0x444   : > { %4336 = vmatpush2.bf16.msra.mxu1 %v3238_v0  ;;  %4294 = vmatprep.subr.bf16.mxu0 %v2831_v10  ;;  %v2280_v0 = vunpack.c.l.s8.bf16 %v1272_v8  ;;  %v1873_v10 = vunpack.c.h.s8.bf16 %v1057_v18  ;;  %v1368_v8 = vld [vmem:[%s6790_s7 + $0xae0] sm:$0xff] }
 0x445   : > { %4337 = vmatprep.subr.bf16.mxu1 %v3215_v25  ;;  %v2257_v25 = vunpack.c.h.s8.bf16 %v1249_v21 }
 0x447   : > { %4295 = vmatpush2.bf16.msra.mxu0 %v2830_v27  ;;  %v1872_v27 = vunpack.c.h.s8.bf16 %v1056_v24 }
 0x448   : > { %4338 = vmatpush2.bf16.msra.mxu1 %v3214_v28  ;;  %4296 = vmatprep.subr.bf16.mxu0 %v2807_v43  ;;  %v2256_v28 = vunpack.c.h.s8.bf16 %v1248_v26  ;;  %v1849_v43 = vunpack.c.l.s8.bf16 %v1057_v18  ;;  %v1153_v18 = vld [vmem:[%s6790_s7 + $0x428] sm:$0xff] }
 0x449   : > { %4339 = vmatprep.subr.bf16.mxu1 %v3191_v29  ;;  %v2233_v29 = vunpack.c.l.s8.bf16 %v1249_v21  ;;  %v1345_v21 = vld [vmem:[%s6790_s7 + $0xa28] sm:$0xff] }
 0x44b   : > { %4297 = vmatpush2.bf16.msra.mxu0 %v2806_v33  ;;  %v1848_v33 = vunpack.c.l.s8.bf16 %v1056_v24  ;;  %v1152_v24 = vld [vmem:[%s6790_s7 + $0x420] sm:$0xff] }
 0x44c   : > { %4340 = vmatpush2.bf16.msra.mxu1 %v3190_v35  ;;  %4298 = vmatprep.subr.bf16.mxu0 %v2783_v58  ;;  %v2232_v35 = vunpack.c.l.s8.bf16 %v1248_v26  ;;  %v1825_v58 = vunpack.c.h.s8.bf16 %v1033_v30  ;;  %v1344_v26 = vld [vmem:[%s6790_s7 + $0xa20] sm:$0xff] }
 0x44d   : > { %4341 = vmatprep.subr.bf16.mxu1 %v3167_v36  ;;  %v2209_v36 = vunpack.c.h.s8.bf16 %v1225_v32 }
 0x44f   : > { %4299 = vmatpush2.bf16.msra.mxu0 %v2782_v38  ;;  %v1824_v38 = vunpack.c.h.s8.bf16 %v1032_v6 }
 0x450   : > { %4342 = vmatpush2.bf16.msra.mxu1 %v3166_v39  ;;  %4300 = vmatprep.subr.bf16.mxu0 %v2759_v57  ;;  %v2208_v39 = vunpack.c.h.s8.bf16 %v1224_v37  ;;  %v1801_v57 = vunpack.c.l.s8.bf16 %v1033_v30  ;;  %v1129_v30 = vld [vmem:[%s6790_s7 + $0x368] sm:$0xff] }
 0x451   : > { %4343 = vmatprep.subr.bf16.mxu1 %v3143_v62  ;;  %v2185_v62 = vunpack.c.l.s8.bf16 %v1225_v32  ;;  %v1321_v32 = vld [vmem:[%s6790_s7 + $0x968] sm:$0xff] }
 0x453   : > { %4301 = vmatpush2.bf16.msra.mxu0 %v2758_v20  ;;  %v1800_v20 = vunpack.c.l.s8.bf16 %v1032_v6  ;;  %v2017_v6 = vunpack.c.h.s8.bf16 %v1129_v30 }
 0x454   : > { %4344 = vmatpush2.bf16.msra.mxu1 %v3142_v48  ;;  %4356 = vmatprep.subr.bf16.mxu0 %v1969_v51  ;;  %v2184_v48 = vunpack.c.l.s8.bf16 %v1224_v37  ;;  %v2161_v51 = vunpack.c.h.s8.bf16 %v1201_v11 }
 0x455   : > { %4399 = vmatprep.subr.bf16.mxu1 %v2353_v53  ;;  %v2545_v53 = vunpack.c.h.s8.bf16 %v1393_v45  ;;  %v1993_v45 = vunpack.c.l.s8.bf16 %v1129_v30 }
 0x456   : > { %4303 = vmatmul.mubr.bf16.vlgmr.msra.gmra.mxu0 %v6966_v47 }
 0x457   : > { %4346 = vmatmul.mubr.bf16.vlgmr.msra.gmra.mxu1 %v6968_v50  ;;  %4357 = vmatpush1.bf16.msra.mxu0 %v1968_v63  ;;  %v2160_v63 = vunpack.c.h.s8.bf16 %v1200_v52  ;;  %v4089_v37 = vpop.f32.mrf.mxu1 }
 0x458   : > { %4388 = vmatprep.mubr.bf16.mxu0 %v6882_v13  ;;  %4400 = vmatpush1.bf16.msra.mxu1 %v2352_v55  ;;  %v2544_v55 = vunpack.c.h.s8.bf16 %v1392_v54 }
 0x459   : > { %4431 = vmatprep.mubr.bf16.mxu1 %v6886_v16  ;;  %4358 = vmatprep.subr.bf16.mxu0 %v1945_v56  ;;  %v2137_v56 = vunpack.c.l.s8.bf16 %v1201_v11 }
 0x45a   : > { %4401 = vmatprep.subr.bf16.mxu1 %v2329_v59  ;;  %v1177_v59 = vld [vmem:[%s6790_s7 + $0x4e8] sm:$0xff] }
 0x45b   : > { %4359 = vmatpush1.bf16.msra.mxu0 %v1944_v61  ;;  %v2136_v61 = vunpack.c.l.s8.bf16 %v1200_v52  ;;  %v1681_v52 = vld [vmem:[%s6790_s7 + $0x14a8] sm:$0xff] }
 0x45c   : > { %4402 = vmatpush1.bf16.msra.mxu1 %v2328_v1  ;;  %4360 = vmatprep.subr.bf16.mxu0 %v1921_v2  ;;  %v2520_v1 = vunpack.c.l.s8.bf16 %v1392_v54  ;;  %v2113_v2 = vunpack.c.h.s8.bf16 %v1177_v59 }
 0x45d   : > { %4403 = vmatprep.subr.bf16.mxu1 %v2305_v5  ;;  %v2497_v5 = vunpack.c.h.s8.bf16 %v1369_v60 }
 0x45f   : > { %4361 = vmatpush1.bf16.msra.mxu0 %v1920_v9  ;;  %v2112_v9 = vunpack.c.h.s8.bf16 %v1176_v4 }
 0x460   : > { %4404 = vmatpush1.bf16.msra.mxu1 %v2304_v12  ;;  %4362 = vmatprep.subr.bf16.mxu0 %v1897_v14  ;;  %v2496_v12 = vunpack.c.h.s8.bf16 %v1368_v8  ;;  %v2089_v14 = vunpack.c.l.s8.bf16 %v1177_v59  ;;  %v3121_v59 = vunpack.c.h.s8.bf16 %v1681_v52 }
 0x461   : > { %4405 = vmatprep.subr.bf16.mxu1 %v2281_v17  ;;  %v2473_v17 = vunpack.c.l.s8.bf16 %v1369_v60  ;;  %v1680_v60 = vld [vmem:[%s6790_s7 + $0x14a0] sm:$0xff] }
 0x463   : > { %4363 = vmatpush1.bf16.msra.mxu0 %v1896_v22  ;;  %v2088_v22 = vunpack.c.l.s8.bf16 %v1176_v4  ;;  %v3120_v4 = vunpack.c.h.s8.bf16 %v1680_v60 }
 0x464   : > { %4406 = vmatpush1.bf16.msra.mxu1 %v2280_v0  ;;  %4364 = vmatprep.subr.bf16.mxu0 %v1873_v10  ;;  %v2472_v0 = vunpack.c.l.s8.bf16 %v1368_v8  ;;  %v2065_v10 = vunpack.c.h.s8.bf16 %v1153_v18 }
 0x465   : > { %4407 = vmatprep.subr.bf16.mxu1 %v2257_v25  ;;  %v2449_v25 = vunpack.c.h.s8.bf16 %v1345_v21 }
 0x467   : > { %4365 = vmatpush1.bf16.msra.mxu0 %v1872_v27  ;;  %v2064_v27 = vunpack.c.h.s8.bf16 %v1152_v24 }
 0x468   : > { %4408 = vmatpush1.bf16.msra.mxu1 %v2256_v28  ;;  %4366 = vmatprep.subr.bf16.mxu0 %v1849_v43  ;;  %v2448_v28 = vunpack.c.h.s8.bf16 %v1344_v26  ;;  %v2041_v43 = vunpack.c.l.s8.bf16 %v1153_v18  ;;  %v3097_v18 = vunpack.c.l.s8.bf16 %v1681_v52 }
 0x469   : > { %4409 = vmatprep.subr.bf16.mxu1 %v2233_v29  ;;  %v2425_v29 = vunpack.c.l.s8.bf16 %v1345_v21  ;;  %v1657_v21 = vld [vmem:[%s6790_s7 + $0x13e8] sm:$0xff] }
 0x46b   : > { %4367 = vmatpush1.bf16.msra.mxu0 %v1848_v33  ;;  %v2040_v33 = vunpack.c.l.s8.bf16 %v1152_v24 }
 0x46c   : > { %4410 = vmatpush1.bf16.msra.mxu1 %v2232_v35  ;;  %4368 = vmatprep.subr.bf16.mxu0 %v1825_v58  ;;  %v4046_v35 = vpop.f32.mrf.mxu0  ;;  %v2424_v58 = vunpack.c.l.s8.bf16 %v1344_v26  ;;  %v1464_v26 = vld [vmem:[%s6790_s7 + $0xde0] sm:$0xff] }
 0x46d   : > { %4411 = vmatprep.subr.bf16.mxu1 %v2209_v36  ;;  %v1128_v36 = vld [vmem:[%s6790_s7 + $0x360] sm:$0xff] }
 0x46f   : > { %4369 = vmatpush1.bf16.msra.mxu0 %v1824_v38  ;;  %v2401_v38 = vunpack.c.h.s8.bf16 %v1321_v32 }
 0x470   : > { %4412 = vmatpush1.bf16.msra.mxu1 %v2208_v39  ;;  %4370 = vmatprep.subr.bf16.mxu0 %v1801_v57  ;;  %v1320_v39 = vld [vmem:[%s6790_s7 + $0x960] sm:$0xff]  ;;  %v2016_v57 = vunpack.c.h.s8.bf16 %v1128_v36 }
 0x471   : > { %4413 = vmatprep.subr.bf16.mxu1 %v2185_v62  ;;  %v4048_v62 = vpop.f32.mrf.mxu0  ;;  %v2400_v11 = vunpack.c.h.s8.bf16 %v1320_v39 }
 0x473   : > { %4371 = vmatpush1.bf16.msra.mxu0 %v1800_v20  ;;  %v4091_v20 = vpop.f32.mrf.mxu1  ;;  %v4050_v54 = vpop.f32.mrf.mxu0 }
 0x474   : > { %4414 = vmatpush1.bf16.msra.mxu1 %v2184_v48  ;;  %4372 = vmatprep.subr.bf16.mxu0 %v2161_v51  ;;  %v2377_v48 = vunpack.c.l.s8.bf16 %v1321_v32  ;;  %v1489_v51 = vld [vmem:[%s6790_s7 + $0xea8] sm:$0xff] }
 0x475   : > { %4415 = vmatprep.subr.bf16.mxu1 %v2545_v53  ;;  %v1992_v53 = vunpack.c.l.s8.bf16 %v1128_v36  ;;  %v1656_v36 = vld [vmem:[%s6790_s7 + $0x13e0] sm:$0xff] }
 0x477   : > { %4373 = vmatpush2.bf16.msra.mxu0 %v2160_v63  ;;  %v2376_v63 = vunpack.c.l.s8.bf16 %v1320_v39  ;;  %v2688_v39 = vunpack.c.h.s8.bf16 %v1464_v26 }
 0x478   : > { %4416 = vmatpush2.bf16.msra.mxu1 %v2544_v55  ;;  %4374 = vmatprep.subr.bf16.mxu0 %v2137_v56  ;;  %v2737_v55 = vunpack.c.h.s8.bf16 %v1489_v51  ;;  %v1488_v56 = vld [vmem:[%s6790_s7 + $0xea0] sm:$0xff] }
 0x479   : > { %4417 = vmatprep.subr.bf16.mxu1 %v2521_v23  ;;  %v4093_v23 = vpop.f32.mrf.mxu1 }
 0x47a   : > { %v4094_v32 = vadd.f32 %v4093_v23, %v4050_v54  ;;  %v1441_v23 = vld [vmem:[%s6790_s7 + $0xd28] sm:$0xff] }
 0x47b   : > { %4375 = vmatpush2.bf16.msra.mxu0 %v2136_v61  ;;  %v2736_v61 = vunpack.c.h.s8.bf16 %v1488_v56  ;;  %v4095_v8 = vpop.f32.mrf.mxu1 }
 0x47c   : > { %4418 = vmatpush2.bf16.msra.mxu1 %v2520_v1  ;;  %4376 = vmatprep.subr.bf16.mxu0 %v2113_v2  ;;  %v4052_v1 = vpop.f32.mrf.mxu0  ;;  %v7434_v2 = vld [vmem:[%s6797_s1 + $0x8] sm:$0xff] }
 0x47d   : > { %4419 = vmatprep.subr.bf16.mxu1 %v2497_v5  ;;  %v4090_v5 = vadd.f32 %v4089_v37, %v4046_v35  ;;  %v5429_v24 = vrot.slane %v7434_v2, %v6862_v41 }
 0x47f   : > { %4377 = vmatpush2.bf16.msra.mxu0 %v2112_v9  ;;  %v7437_v9 = vld [vmem:[%s6800_s15 + $0x8] sm:$0xff] }
 0x480   : > { %4420 = vmatpush2.bf16.msra.mxu1 %v2496_v12  ;;  %4378 = vmatprep.subr.bf16.mxu0 %v2089_v14  ;;  %v2713_v12 = vunpack.c.l.s8.bf16 %v1489_v51  ;;  %v1465_v14 = vld [vmem:[%s6790_s7 + $0xde8] sm:$0xff]  ;;  %v5607_v37 = vrot.slane %v7437_v9, %v6859_v40  ;;  %v3072_v51 = vunpack.c.h.s8.bf16 %v1656_v36 }
 0x481   : > { %4421 = vmatprep.subr.bf16.mxu1 %v2473_v17  ;;  %v2689_v30 = vunpack.c.h.s8.bf16 %v1465_v14  ;;  %v2665_v52 = vunpack.c.l.s8.bf16 %v1465_v14  ;;  %v1440_v14 = vld [vmem:[%s6790_s7 + $0xd20] sm:$0xff] }
 0x483   : > { %4379 = vmatpush2.bf16.msra.mxu0 %v2088_v22  ;;  %v4092_v22 = vadd.f32 %v4091_v20, %v4048_v62 }
 0x484   : > { %4422 = vmatpush2.bf16.msra.mxu1 %v2472_v0  ;;  %4380 = vmatprep.subr.bf16.mxu0 %v2065_v10 }
 0x485   : > { %4423 = vmatprep.subr.bf16.mxu1 %v2449_v25  ;;  %v2712_v25 = vunpack.c.l.s8.bf16 %v1488_v56 }
 0x487   : > { %4381 = vmatpush2.bf16.msra.mxu0 %v2064_v27  ;;  %v5603_v27 = vrot.slane %v7437_v9, %v6862_v41 }
 0x488   : > { %4424 = vmatpush2.bf16.msra.mxu1 %v2448_v28  ;;  %4382 = vmatprep.subr.bf16.mxu0 %v2041_v43  ;;  %v5433_v43 = vrot.slane %v7434_v2, %v6859_v40 }
 0x489   : > { %4425 = vmatprep.subr.bf16.mxu1 %v2425_v29  ;;  %v3096_v29 = vunpack.c.l.s8.bf16 %v1680_v60  ;;  %v2664_v60 = vunpack.c.l.s8.bf16 %v1464_v26 }
 0x48b   : > { %4383 = vmatpush2.bf16.msra.mxu0 %v2040_v33 }
 0x48c   : > { %4426 = vmatpush2.bf16.msra.mxu1 %v2424_v58  ;;  %4384 = vmatprep.subr.bf16.mxu0 %v2017_v6  ;;  %v3073_v6 = vunpack.c.h.s8.bf16 %v1657_v21 }
 0x48d   : > { %4427 = vmatprep.subr.bf16.mxu1 %v2401_v38 }
 0x48f   : > { %4385 = vmatpush2.bf16.msra.mxu0 %v2016_v57  ;;  %v4096_v57 = vadd.f32 %v4095_v8, %v4052_v1  ;;  %v3048_v8 = vunpack.c.l.s8.bf16 %v1656_v36 }
 0x490   : > { %4428 = vmatpush2.bf16.msra.mxu1 %v2400_v11  ;;  %4386 = vmatprep.subr.bf16.mxu0 %v1993_v45 }
 0x491   : > { %4429 = vmatprep.subr.bf16.mxu1 %v2377_v48 }
 0x493   : > { %4387 = vmatpush2.bf16.msra.mxu0 %v1992_v53  ;;  %v3049_v53 = vunpack.c.l.s8.bf16 %v1657_v21 }
 0x494   : > { %4430 = vmatpush2.bf16.msra.mxu1 %v2376_v63  ;;  %4442 = vmatprep.subr.bf16.mxu0 %v2737_v55 }
 0x495   : > { %4485 = vmatprep.subr.bf16.mxu1 %v3121_v59 }
 0x496   : > { %v4132_v17 = vpop.f32.mrf.mxu0  ;;  %4389 = vmatmul.mubr.bf16.vlgmr.msra.gmra.mxu0 %v6884_v15 }
 0x497   : > { %v4133_v0 = vadd.f32 %v4132_v17, %v4090_v5  ;;  %v4175_v10 = vpop.f32.mrf.mxu1  ;;  %4432 = vmatmul.mubr.bf16.vlgmr.msra.gmra.mxu1 %v6889_v19  ;;  %4443 = vmatpush1.bf16.msra.mxu0 %v2736_v61  ;;  %v1633_v61 = vld [vmem:[%s6790_s7 + $0x1328] sm:$0xff] }
 0x498   : > { %4474 = vmatprep.mubr.bf16.mxu0 %v6930_v31  ;;  %4486 = vmatpush1.bf16.msra.mxu1 %v3120_v4  ;;  %v4134_v28 = vpop.f32.mrf.mxu0  ;;  %v3025_v21 = vunpack.c.h.s8.bf16 %v1633_v61  ;;  %v3001_v26 = vunpack.c.l.s8.bf16 %v1633_v61 }
 0x499   : > { %v4176_v33 = vadd.f32 %v4175_v10, %v4133_v0  ;;  %4517 = vmatprep.mubr.bf16.mxu1 %v6932_v34  ;;  %v4135_v35 = vadd.f32 %v4134_v28, %v4092_v22  ;;  %v4177_v58 = vpop.f32.mrf.mxu1  ;;  %4444 = vmatprep.subr.bf16.mxu0 %v2713_v12  ;;  %v2641_v12 = vunpack.c.h.s8.bf16 %v1441_v23  ;;  %v1632_v22 = vld [vmem:[%s6790_s7 + $0x1320] sm:$0xff]  ;;  %v2640_v10 = vunpack.c.h.s8.bf16 %v1440_v14  ;;  %v1609_v28 = vld [vmem:[%s6790_s7 + $0x1268] sm:$0xff] }
 0x49a   : > { %v4136_v38 = vpop.f32.mrf.mxu0  ;;  %4487 = vmatprep.subr.bf16.mxu1 %v3097_v18 }
 0x49b   : > { %v5522_v62 = vmul.f32 %v5429_v24, %v4176_v33  ;;  %v4178_v11 = vadd.f32 %v4177_v58, %v4135_v35  ;;  %v4137_v45 = vadd.f32 %v4136_v38, %v4094_v32  ;;  %v4179_v20 = vpop.f32.mrf.mxu1  ;;  %4445 = vmatpush1.bf16.msra.mxu0 %v2712_v25  ;;  %v2617_v25 = vunpack.c.l.s8.bf16 %v1441_v23  ;;  %v1416_v32 = vld [vmem:[%s6790_s7 + $0xc60] sm:$0xff] }
 0x49c   : > { %4488 = vmatpush1.bf16.msra.mxu1 %v3096_v29  ;;  %v4138_v48 = vpop.f32.mrf.mxu0  ;;  %4446 = vmatprep.subr.bf16.mxu0 %v2689_v30  ;;  %v3000_v29 = vunpack.c.l.s8.bf16 %v1632_v22  ;;  %v2977_v33 = vunpack.c.h.s8.bf16 %v1609_v28  ;;  %v1608_v35 = vld [vmem:[%s6790_s7 + $0x1260] sm:$0xff]  ;;  %v2592_v58 = vunpack.c.h.s8.bf16 %v1416_v32  ;;  %v2953_v38 = vunpack.c.l.s8.bf16 %v1609_v28 }
 0x49d   : > { %v5696_v54 = vadd.f32 %v5603_v27, %v5522_v62  ;;  %v5523_v63 = vmul.f32 %v5433_v43, %v4178_v11  ;;  %v4180_v55 = vadd.f32 %v4179_v20, %v4137_v45  ;;  %v4139_v56 = vadd.f32 %v4138_v48, %v4096_v57  ;;  %4489 = vmatprep.subr.bf16.mxu1 %v3073_v6  ;;  %v4181_v59 = vpop.f32.mrf.mxu1  ;;  %v1777_v62 = vld [vmem:[%s6790_s7 + $0x17a8] sm:$0xff]  ;;  %v1728_v28 = vld [vmem:[%s6790_s7 + $0x1620] sm:$0xff] }
 0x49e   : > { %v2976_v36 = vunpack.c.h.s8.bf16 %v1608_v35  ;;  %v2568_v11 = vunpack.c.l.s8.bf16 %v1416_v32  ;;  %v2952_v20 = vunpack.c.l.s8.bf16 %v1608_v35  ;;  %v3289_v23 = vunpack.c.l.s8.bf16 %v1777_v62  ;;  %v1705_v35 = vld [vmem:[%s6790_s7 + $0x1568] sm:$0xff] }
 0x49f   : > { %6215 = vtanh.f32 %v5696_v54  ;;  %v5697_v1 = vadd.f32 %v5607_v37, %v5523_v63  ;;  %v5546_v4 = vmul.f32 %v5429_v24, %v4180_v55  ;;  %v4182_v5 = vadd.f32 %v4181_v59, %v4139_v56  ;;  %4447 = vmatpush1.bf16.msra.mxu0 %v2688_v39  ;;  %v1585_v39 = vld [vmem:[%s6790_s7 + $0x11a8] sm:$0xff] }
 0x4a0   : > { %4490 = vmatpush1.bf16.msra.mxu1 %v3072_v51  ;;  %4448 = vmatprep.subr.bf16.mxu0 %v2665_v52  ;;  %v3024_v24 = vunpack.c.h.s8.bf16 %v1632_v22  ;;  %v2929_v48 = vunpack.c.h.s8.bf16 %v1585_v39  ;;  %v1584_v51 = vld [vmem:[%s6790_s7 + $0x11a0] sm:$0xff]  ;;  %v3313_v52 = vunpack.c.h.s8.bf16 %v1777_v62  ;;  %v2905_v56 = vunpack.c.l.s8.bf16 %v1585_v39  ;;  %v1561_v59 = vld [vmem:[%s6790_s7 + $0x10e8] sm:$0xff] }
 0x4a1   : > { %6217 = vtanh.f32 %v5697_v1  ;;  %v5720_v17 = vadd.f32 %v5603_v27, %v5546_v4  ;;  %v5547_v18 = vmul.f32 %v5433_v43, %v4182_v5  ;;  %4491 = vmatprep.subr.bf16.mxu1 %v3049_v53  ;;  %v1417_v27 = vld [vmem:[%s6790_s7 + $0xc68] sm:$0xff]  ;;  %v2616_v43 = vunpack.c.l.s8.bf16 %v1440_v14  ;;  %v1776_v53 = vld [vmem:[%s6790_s7 + $0x17a0] sm:$0xff] }
 0x4a2   : > { %v2593_v30 = vunpack.c.h.s8.bf16 %v1417_v27  ;;  %v2928_v63 = vunpack.c.h.s8.bf16 %v1584_v51  ;;  %v3312_v55 = vunpack.c.h.s8.bf16 %v1776_v53  ;;  %v2904_v61 = vunpack.c.l.s8.bf16 %v1584_v51  ;;  %v1560_v5 = vld [vmem:[%s6790_s7 + $0x10e0] sm:$0xff]  ;;  %v1537_v22 = vld [vmem:[%s6790_s7 + $0x1028] sm:$0xff] }
 0x4a3   : > { %6219 = vtanh.f32 %v5720_v17  ;;  %v5721_v0 = vadd.f32 %v5607_v37, %v5547_v18  ;;  %4449 = vmatpush1.bf16.msra.mxu0 %v2664_v60  ;;  %v2569_v37 = vunpack.c.l.s8.bf16 %v1417_v27  ;;  %v1753_v60 = vld [vmem:[%s6790_s7 + $0x16e8] sm:$0xff]  ;;  %v3288_v1 = vunpack.c.l.s8.bf16 %v1776_v53  ;;  %v1704_v39 = vld [vmem:[%s6790_s7 + $0x1560] sm:$0xff] }
 0x4a4   : > { %4492 = vmatpush1.bf16.msra.mxu1 %v3048_v8  ;;  %4450 = vmatprep.subr.bf16.mxu0 %v2641_v12  ;;  %v2881_v4 = vunpack.c.h.s8.bf16 %v1561_v59  ;;  %v3265_v8 = vunpack.c.h.s8.bf16 %v1753_v60  ;;  %v1752_v12 = vld [vmem:[%s6790_s7 + $0x16e0] sm:$0xff]  ;;  %v2880_v14 = vunpack.c.h.s8.bf16 %v1560_v5  ;;  %v2857_v18 = vunpack.c.l.s8.bf16 %v1561_v59 }
 0x4a5   : > { %6221 = vtanh.f32 %v5721_v0  ;;  %4493 = vmatprep.subr.bf16.mxu1 %v3025_v21  ;;  %v3264_v17 = vunpack.c.h.s8.bf16 %v1752_v12  ;;  %v3241_v21 = vunpack.c.l.s8.bf16 %v1753_v60  ;;  %v1729_v0 = vld [vmem:[%s6790_s7 + $0x1628] sm:$0xff]  ;;  %v3168_v62 = vunpack.c.h.s8.bf16 %v1704_v39  ;;  %v1083_v60 = vld [vmem:[%s6790_s7 + $0x1f8] sm:$0xff] }
 0x4a6   : > { %v3217_v27 = vunpack.c.h.s8.bf16 %v1729_v0  ;;  %v3193_v32 = vunpack.c.l.s8.bf16 %v1729_v0 }
 0x4a7   : > { %4451 = vmatpush1.bf16.msra.mxu0 %v2640_v10  ;;  %v2856_v10 = vunpack.c.l.s8.bf16 %v1560_v5 }
 0x4a8   : > { %4494 = vmatpush1.bf16.msra.mxu1 %v3024_v24  ;;  %4452 = vmatprep.subr.bf16.mxu0 %v2617_v25  ;;  %v3240_v24 = vunpack.c.l.s8.bf16 %v1752_v12  ;;  %v2833_v25 = vunpack.c.h.s8.bf16 %v1537_v22  ;;  %v1082_v12 = vld [vmem:[%s6790_s7 + $0x1f0] sm:$0xff] }
 0x4a9   : > { %4495 = vmatprep.subr.bf16.mxu1 %v3001_v26  ;;  %v1536_v26 = vld [vmem:[%s6790_s7 + $0x1020] sm:$0xff] }
 0x4ab   : > { %4453 = vmatpush1.bf16.msra.mxu0 %v2616_v43  ;;  %v2832_v43 = vunpack.c.h.s8.bf16 %v1536_v26 }
 0x4ac   : > { %v6216_v6 = vpop.eup %6215  ;;  %4496 = vmatpush1.bf16.msra.mxu1 %v3000_v29  ;;  %4454 = vmatprep.subr.bf16.mxu0 %v2593_v30  ;;  %v3216_v29 = vunpack.c.h.s8.bf16 %v1728_v28  ;;  %v2809_v30 = vunpack.c.l.s8.bf16 %v1537_v22  ;;  %v1899_v22 = vunpack.c.l.s8.bf16 %v1083_v60 }
 0x4ad   : > { %5792 = vst [vmem:[%s7109_s17 + $0x40] sm:$0xff] %v6216_v6  ;;  %4497 = vmatprep.subr.bf16.mxu1 %v2977_v33  ;;  %v1513_v33 = vld [vmem:[%s6790_s7 + $0xf68] sm:$0xff]  ;;  %v3192_v6 = vunpack.c.l.s8.bf16 %v1728_v28  ;;  %v1058_v28 = vld [vmem:[%s6790_s7 + $0x130] sm:$0xff] }
 0x4ae   : > { %v6218_v57 = vpop.eup %6217 }
 0x4af   : > { %5793 = vst [vmem:[%s7109_s17 + $0x48] sm:$0xff] %v6218_v57  ;;  %4455 = vmatpush1.bf16.msra.mxu0 %v2592_v58  ;;  %v2808_v58 = vunpack.c.l.s8.bf16 %v1536_v26 }
 0x4b0   : > { %v6220_v45 = vpop.eup %6219  ;;  %4498 = vmatpush1.bf16.msra.mxu1 %v2976_v36  ;;  %4456 = vmatprep.subr.bf16.mxu0 %v2569_v37  ;;  %v2785_v36 = vunpack.c.h.s8.bf16 %v1513_v33  ;;  %v1512_v37 = vld [vmem:[%s6790_s7 + $0xf60] sm:$0xff] }
 0x4b1   : > { %5816 = vst [vmem:[%s7109_s17 + $0x100] sm:$0xff] %v6220_v45  ;;  %4499 = vmatprep.subr.bf16.mxu1 %v2953_v38  ;;  %v3169_v38 = vunpack.c.h.s8.bf16 %v1705_v35  ;;  %v2784_v57 = vunpack.c.h.s8.bf16 %v1512_v37  ;;  %v3145_v45 = vunpack.c.l.s8.bf16 %v1705_v35  ;;  %v2760_v51 = vunpack.c.l.s8.bf16 %v1512_v37 }
 0x4b2   : > { %v6222_v54 = vpop.eup %6221 }
 0x4b3   : > { %5817 = vst [vmem:[%s7109_s17 + $0x108] sm:$0xff] %v6222_v54  ;;  %4457 = vmatpush1.bf16.msra.mxu0 %v2568_v11  ;;  %v2761_v11 = vunpack.c.l.s8.bf16 %v1513_v33  ;;  %v1106_v54 = vld [vmem:[%s6790_s7 + $0x2b0] sm:$0xff] }
 0x4b4   : > { %4500 = vmatpush1.bf16.msra.mxu1 %v2952_v20  ;;  %4458 = vmatprep.subr.bf16.mxu0 %v2929_v48  ;;  %v1107_v20 = vld [vmem:[%s6790_s7 + $0x2b8] sm:$0xff] }
 0x4b5   : > { %4501 = vmatprep.subr.bf16.mxu1 %v3313_v52  ;;  %v1299_v48 = vld [vmem:[%s6790_s7 + $0x8b8] sm:$0xff]  ;;  %v3144_v52 = vunpack.c.l.s8.bf16 %v1704_v39  ;;  %v1971_v53 = vunpack.c.h.s8.bf16 %v1107_v20  ;;  %v1947_v59 = vunpack.c.l.s8.bf16 %v1107_v20  ;;  %v1034_v39 = vld [vmem:[%s6790_s7 + $0x70] sm:$0xff] }
 0x4b7   : > { %4459 = vmatpush2.bf16.msra.mxu0 %v2928_v63  ;;  %v2355_v63 = vunpack.c.h.s8.bf16 %v1299_v48 }
 0x4b8   : > { %4502 = vmatpush2.bf16.msra.mxu1 %v3312_v55  ;;  %4460 = vmatprep.subr.bf16.mxu0 %v2905_v56  ;;  %v1298_v55 = vld [vmem:[%s6790_s7 + $0x8b0] sm:$0xff]  ;;  %v1970_v56 = vunpack.c.h.s8.bf16 %v1106_v54 }
 0x4b9   : > { %4503 = vmatprep.subr.bf16.mxu1 %v3289_v23  ;;  %v2354_v23 = vunpack.c.h.s8.bf16 %v1298_v55  ;;  %v2330_v5 = vunpack.c.l.s8.bf16 %v1298_v55  ;;  %v1202_v55 = vld [vmem:[%s6790_s7 + $0x5b0] sm:$0xff] }
 0x4bb   : > { %4461 = vmatpush2.bf16.msra.mxu0 %v2904_v61  ;;  %v2331_v61 = vunpack.c.l.s8.bf16 %v1299_v48 }
 0x4bc   : > { %4504 = vmatpush2.bf16.msra.mxu1 %v3288_v1  ;;  %4462 = vmatprep.subr.bf16.mxu0 %v2881_v4  ;;  %v1275_v1 = vld [vmem:[%s6790_s7 + $0x7f8] sm:$0xff]  ;;  %v1946_v4 = vunpack.c.l.s8.bf16 %v1106_v54 }
 0x4bd   : > { %4505 = vmatprep.subr.bf16.mxu1 %v3265_v8  ;;  %v1923_v8 = vunpack.c.h.s8.bf16 %v1083_v60  ;;  %v2283_v0 = vunpack.c.l.s8.bf16 %v1275_v1 }
 0x4bf   : > { %4463 = vmatpush2.bf16.msra.mxu0 %v2880_v14  ;;  %v2307_v14 = vunpack.c.h.s8.bf16 %v1275_v1 }
 0x4c0   : > { %4506 = vmatpush2.bf16.msra.mxu1 %v3264_v17  ;;  %4464 = vmatprep.subr.bf16.mxu0 %v2857_v18  ;;  %v1274_v17 = vld [vmem:[%s6790_s7 + $0x7f0] sm:$0xff]  ;;  %v1922_v18 = vunpack.c.h.s8.bf16 %v1082_v12 }
 0x4c1   : > { %4507 = vmatprep.subr.bf16.mxu1 %v3241_v21  ;;  %v2306_v21 = vunpack.c.h.s8.bf16 %v1274_v17  ;;  %v2282_v26 = vunpack.c.l.s8.bf16 %v1274_v17  ;;  %v1178_v17 = vld [vmem:[%s6790_s7 + $0x4f0] sm:$0xff] }
 0x4c3   : > { %4465 = vmatpush2.bf16.msra.mxu0 %v2856_v10  ;;  %v1059_v10 = vld [vmem:[%s6790_s7 + $0x138] sm:$0xff] }
 0x4c4   : > { %4508 = vmatpush2.bf16.msra.mxu1 %v3240_v24  ;;  %4466 = vmatprep.subr.bf16.mxu0 %v2833_v25  ;;  %v1251_v24 = vld [vmem:[%s6790_s7 + $0x738] sm:$0xff]  ;;  %v1898_v25 = vunpack.c.l.s8.bf16 %v1082_v12  ;;  %v1851_v33 = vunpack.c.l.s8.bf16 %v1059_v10 }
 0x4c5   : > { %4509 = vmatprep.subr.bf16.mxu1 %v3217_v27  ;;  %v1875_v27 = vunpack.c.h.s8.bf16 %v1059_v10  ;;  %v2235_v35 = vunpack.c.l.s8.bf16 %v1251_v24 }
 0x4c7   : > { %4467 = vmatpush2.bf16.msra.mxu0 %v2832_v43  ;;  %v2259_v43 = vunpack.c.h.s8.bf16 %v1251_v24 }
 0x4c8   : > { %4510 = vmatpush2.bf16.msra.mxu1 %v3216_v29  ;;  %4468 = vmatprep.subr.bf16.mxu0 %v2809_v30  ;;  %v1250_v29 = vld [vmem:[%s6790_s7 + $0x730] sm:$0xff]  ;;  %v1874_v30 = vunpack.c.h.s8.bf16 %v1058_v28 }
 0x4c9   : > { %4511 = vmatprep.subr.bf16.mxu1 %v3193_v32  ;;  %v2258_v32 = vunpack.c.h.s8.bf16 %v1250_v29  ;;  %v2234_v37 = vunpack.c.l.s8.bf16 %v1250_v29  ;;  %v1154_v29 = vld [vmem:[%s6790_s7 + $0x430] sm:$0xff] }
 0x4cb   : > { %4469 = vmatpush2.bf16.msra.mxu0 %v2808_v58  ;;  %v1035_v58 = vld [vmem:[%s6790_s7 + $0x78] sm:$0xff] }
 0x4cc   : > { %4512 = vmatpush2.bf16.msra.mxu1 %v3192_v6  ;;  %4470 = vmatprep.subr.bf16.mxu0 %v2785_v36  ;;  %v1227_v6 = vld [vmem:[%s6790_s7 + $0x678] sm:$0xff]  ;;  %v1850_v36 = vunpack.c.l.s8.bf16 %v1058_v28  ;;  %v1803_v20 = vunpack.c.l.s8.bf16 %v1035_v58 }
 0x4cd   : > { %4513 = vmatprep.subr.bf16.mxu1 %v3169_v38  ;;  %v1827_v38 = vunpack.c.h.s8.bf16 %v1035_v58  ;;  %v2187_v48 = vunpack.c.l.s8.bf16 %v1227_v6 }
 0x4cf   : > { %4471 = vmatpush2.bf16.msra.mxu0 %v2784_v57  ;;  %v2211_v57 = vunpack.c.h.s8.bf16 %v1227_v6 }
 0x4d0   : > { %4514 = vmatpush2.bf16.msra.mxu1 %v3168_v62  ;;  %4472 = vmatprep.subr.bf16.mxu0 %v2761_v11  ;;  %v1226_v62 = vld [vmem:[%s6790_s7 + $0x670] sm:$0xff]  ;;  %v1826_v11 = vunpack.c.h.s8.bf16 %v1034_v39 }
 0x4d1   : > { %4515 = vmatprep.subr.bf16.mxu1 %v3145_v45  ;;  %v2210_v45 = vunpack.c.h.s8.bf16 %v1226_v62  ;;  %v2186_v54 = vunpack.c.l.s8.bf16 %v1226_v62 }
 0x4d3   : > { %4473 = vmatpush2.bf16.msra.mxu0 %v2760_v51  ;;  %v1203_v51 = vld [vmem:[%s6790_s7 + $0x5b8] sm:$0xff] }
 0x4d4   : > { %4516 = vmatpush2.bf16.msra.mxu1 %v3144_v52  ;;  %4528 = vmatprep.subr.bf16.mxu0 %v1971_v53  ;;  %v1395_v52 = vld [vmem:[%s6790_s7 + $0xbb8] sm:$0xff]  ;;  %v1802_v53 = vunpack.c.l.s8.bf16 %v1034_v39 }
 0x4d5   : > { %4571 = vmatprep.subr.bf16.mxu1 %v2355_v63  ;;  %v2163_v63 = vunpack.c.h.s8.bf16 %v1203_v51  ;;  %v2523_v1 = vunpack.c.l.s8.bf16 %v1395_v52 }
 0x4d6   : > { %4475 = vmatmul.mubr.bf16.vlgmr.msra.gmra.mxu0 %v6966_v47  ;;  %v4218_v39 = vpop.f32.mrf.mxu0 }
 0x4d7   : > { %4518 = vmatmul.mubr.bf16.vlgmr.msra.gmra.mxu1 %v6968_v50  ;;  %4529 = vmatpush1.bf16.msra.mxu0 %v1970_v56  ;;  %v2547_v56 = vunpack.c.h.s8.bf16 %v1395_v52 }
 0x4d8   : > { %4560 = vmatprep.mubr.bf16.mxu0 %v6882_v13  ;;  %4572 = vmatpush1.bf16.msra.mxu1 %v2354_v23  ;;  %v1394_v23 = vld [vmem:[%s6790_s7 + $0xbb0] sm:$0xff]  ;;  %v4220_v52 = vpop.f32.mrf.mxu0 }
 0x4d9   : > { %4603 = vmatprep.mubr.bf16.mxu1 %v6886_v16  ;;  %4530 = vmatprep.subr.bf16.mxu0 %v1947_v59  ;;  %v2162_v59 = vunpack.c.h.s8.bf16 %v1202_v55  ;;  %v2546_v60 = vunpack.c.h.s8.bf16 %v1394_v23  ;;  %v2522_v12 = vunpack.c.l.s8.bf16 %v1394_v23  ;;  %v1683_v23 = vld [vmem:[%s6790_s7 + $0x14b8] sm:$0xff] }
 0x4da   : > { %4573 = vmatprep.subr.bf16.mxu1 %v2331_v61  ;;  %v2139_v61 = vunpack.c.l.s8.bf16 %v1203_v51 }
 0x4db   : > { %4531 = vmatpush1.bf16.msra.mxu0 %v1946_v4  ;;  %v1179_v4 = vld [vmem:[%s6790_s7 + $0x4f8] sm:$0xff] }
 0x4dc   : > { %4574 = vmatpush1.bf16.msra.mxu1 %v2330_v5  ;;  %4532 = vmatprep.subr.bf16.mxu0 %v1923_v8  ;;  %v1371_v5 = vld [vmem:[%s6790_s7 + $0xaf8] sm:$0xff]  ;;  %v2138_v8 = vunpack.c.l.s8.bf16 %v1202_v55  ;;  %v2091_v10 = vunpack.c.l.s8.bf16 %v1179_v4 }
 0x4dd   : > { %4575 = vmatprep.subr.bf16.mxu1 %v2307_v14  ;;  %v2115_v14 = vunpack.c.h.s8.bf16 %v1179_v4  ;;  %v2475_v24 = vunpack.c.l.s8.bf16 %v1371_v5  ;;  %v1490_v4 = vld [vmem:[%s6790_s7 + $0xeb0] sm:$0xff] }
 0x4df   : > { %4533 = vmatpush1.bf16.msra.mxu0 %v1922_v18  ;;  %v2499_v18 = vunpack.c.h.s8.bf16 %v1371_v5 }
 0x4e0   : > { %4576 = vmatpush1.bf16.msra.mxu1 %v2306_v21  ;;  %4534 = vmatprep.subr.bf16.mxu0 %v1899_v22  ;;  %v1370_v21 = vld [vmem:[%s6790_s7 + $0xaf0] sm:$0xff]  ;;  %v2114_v22 = vunpack.c.h.s8.bf16 %v1178_v17 }
 0x4e1   : > { %4577 = vmatprep.subr.bf16.mxu1 %v2283_v0  ;;  %v2498_v0 = vunpack.c.h.s8.bf16 %v1370_v21  ;;  %v2474_v28 = vunpack.c.l.s8.bf16 %v1370_v21 }
 0x4e3   : > { %4535 = vmatpush1.bf16.msra.mxu0 %v1898_v25  ;;  %v1155_v25 = vld [vmem:[%s6790_s7 + $0x438] sm:$0xff] }
 0x4e4   : > { %4578 = vmatpush1.bf16.msra.mxu1 %v2282_v26  ;;  %4536 = vmatprep.subr.bf16.mxu0 %v1875_v27  ;;  %v1347_v26 = vld [vmem:[%s6790_s7 + $0xa38] sm:$0xff]  ;;  %v2090_v27 = vunpack.c.l.s8.bf16 %v1178_v17  ;;  %v2043_v58 = vunpack.c.l.s8.bf16 %v1155_v25 }
 0x4e5   : > { %4579 = vmatprep.subr.bf16.mxu1 %v2259_v43  ;;  %v2067_v43 = vunpack.c.h.s8.bf16 %v1155_v25  ;;  %v2427_v6 = vunpack.c.l.s8.bf16 %v1347_v26  ;;  %v3099_v25 = vunpack.c.l.s8.bf16 %v1683_v23 }
 0x4e7   : > { %4537 = vmatpush1.bf16.msra.mxu0 %v1874_v30  ;;  %v2451_v30 = vunpack.c.h.s8.bf16 %v1347_v26  ;;  %v1659_v26 = vld [vmem:[%s6790_s7 + $0x13f8] sm:$0xff] }
 0x4e8   : > { %4580 = vmatpush1.bf16.msra.mxu1 %v2258_v32  ;;  %4538 = vmatprep.subr.bf16.mxu0 %v1851_v33  ;;  %v1346_v32 = vld [vmem:[%s6790_s7 + $0xa30] sm:$0xff]  ;;  %v2066_v33 = vunpack.c.h.s8.bf16 %v1154_v29 }
 0x4e9   : > { %4581 = vmatprep.subr.bf16.mxu1 %v2235_v35  ;;  %v2450_v35 = vunpack.c.h.s8.bf16 %v1346_v32 }
 0x4eb   : > { %4539 = vmatpush1.bf16.msra.mxu0 %v1850_v36  ;;  %v1131_v36 = vld [vmem:[%s6790_s7 + $0x378] sm:$0xff] }
 0x4ec   : > { %4582 = vmatpush1.bf16.msra.mxu1 %v2234_v37  ;;  %4540 = vmatprep.subr.bf16.mxu0 %v1827_v38  ;;  %v1323_v37 = vld [vmem:[%s6790_s7 + $0x978] sm:$0xff]  ;;  %v2042_v38 = vunpack.c.l.s8.bf16 %v1154_v29  ;;  %v2019_v62 = vunpack.c.h.s8.bf16 %v1131_v36  ;;  %v5437_v29 = vrot.slane %v7434_v2, %v6870_v44 }
 0x4ed   : > { %4583 = vmatprep.subr.bf16.mxu1 %v2211_v57  ;;  %v2426_v57 = vunpack.c.l.s8.bf16 %v1346_v32  ;;  %v2379_v55 = vunpack.c.l.s8.bf16 %v1323_v37  ;;  %v1466_v32 = vld [vmem:[%s6790_s7 + $0xdf0] sm:$0xff] }
 0x4ef   : > { %4541 = vmatpush1.bf16.msra.mxu0 %v1826_v11  ;;  %v1130_v11 = vld [vmem:[%s6790_s7 + $0x370] sm:$0xff] }
 0x4f0   : > { %4584 = vmatpush1.bf16.msra.mxu1 %v2210_v45  ;;  %4542 = vmatprep.subr.bf16.mxu0 %v1803_v20  ;;  %v4261_v45 = vpop.f32.mrf.mxu1  ;;  %v2403_v20 = vunpack.c.h.s8.bf16 %v1323_v37  ;;  %v2018_v51 = vunpack.c.h.s8.bf16 %v1130_v11 }
 0x4f1   : > { %4585 = vmatprep.subr.bf16.mxu1 %v2187_v48  ;;  %v1322_v48 = vld [vmem:[%s6790_s7 + $0x970] sm:$0xff]  ;;  %v4262_v21 = vadd.f32 %v4261_v45, %v4218_v39  ;;  %v5615_v45 = vrot.slane %v7437_v9, %v6865_v42 }
 0x4f3   : > { %4543 = vmatpush1.bf16.msra.mxu0 %v1802_v53  ;;  %v2402_v53 = vunpack.c.h.s8.bf16 %v1322_v48 }
 0x4f4   : > { %4586 = vmatpush1.bf16.msra.mxu1 %v2186_v54  ;;  %4544 = vmatprep.subr.bf16.mxu0 %v2163_v63  ;;  %v1995_v54 = vunpack.c.l.s8.bf16 %v1131_v36  ;;  %v4263_v63 = vpop.f32.mrf.mxu1 }
 0x4f5   : > { %4587 = vmatprep.subr.bf16.mxu1 %v2547_v56  ;;  %v1491_v56 = vld [vmem:[%s6790_s7 + $0xeb8] sm:$0xff] }
 0x4f6   : > { %v4265_v5 = vpop.f32.mrf.mxu1 }
 0x4f7   : > { %4545 = vmatpush2.bf16.msra.mxu0 %v2162_v59  ;;  %v1994_v59 = vunpack.c.l.s8.bf16 %v1130_v11  ;;  %v1658_v11 = vld [vmem:[%s6790_s7 + $0x13f0] sm:$0xff] }
 0x4f8   : > { %4588 = vmatpush2.bf16.msra.mxu1 %v2546_v60  ;;  %4546 = vmatprep.subr.bf16.mxu0 %v2139_v61  ;;  %v4222_v60 = vpop.f32.mrf.mxu0  ;;  %v2378_v61 = vunpack.c.l.s8.bf16 %v1322_v48  ;;  %v2690_v48 = vunpack.c.h.s8.bf16 %v1466_v32 }
 0x4f9   : > { %4589 = vmatprep.subr.bf16.mxu1 %v2523_v1  ;;  %v2739_v1 = vunpack.c.h.s8.bf16 %v1491_v56  ;;  %v4266_v37 = vadd.f32 %v4265_v5, %v4222_v60  ;;  %v2666_v5 = vunpack.c.l.s8.bf16 %v1466_v32  ;;  %v1611_v32 = vld [vmem:[%s6790_s7 + $0x1278] sm:$0xff] }
 0x4fa   : > { %v4224_v17 = vpop.f32.mrf.mxu0 }
 0x4fb   : > { %4547 = vmatpush2.bf16.msra.mxu0 %v2138_v8  ;;  %v3123_v8 = vunpack.c.h.s8.bf16 %v1683_v23  ;;  %v3051_v23 = vunpack.c.l.s8.bf16 %v1659_v26 }
 0x4fc   : > { %4590 = vmatpush2.bf16.msra.mxu1 %v2522_v12  ;;  %4548 = vmatprep.subr.bf16.mxu0 %v2115_v14  ;;  %v1682_v12 = vld [vmem:[%s6790_s7 + $0x14b0] sm:$0xff]  ;;  %v2738_v14 = vunpack.c.h.s8.bf16 %v1490_v4 }
 0x4fd   : > { %4591 = vmatprep.subr.bf16.mxu1 %v2499_v18  ;;  %v3122_v18 = vunpack.c.h.s8.bf16 %v1682_v12 }
 0x4ff   : > { %4549 = vmatpush2.bf16.msra.mxu0 %v2114_v22  ;;  %v4267_v22 = vpop.f32.mrf.mxu1 }
 0x500   : > { %4592 = vmatpush2.bf16.msra.mxu1 %v2498_v0  ;;  %4550 = vmatprep.subr.bf16.mxu0 %v2091_v10  ;;  %v2715_v0 = vunpack.c.l.s8.bf16 %v1491_v56  ;;  %v1467_v10 = vld [vmem:[%s6790_s7 + $0xdf8] sm:$0xff] }
 0x501   : > { %4593 = vmatprep.subr.bf16.mxu1 %v2475_v24  ;;  %v2691_v36 = vunpack.c.h.s8.bf16 %v1467_v10  ;;  %v2667_v56 = vunpack.c.l.s8.bf16 %v1467_v10 }
 0x503   : > { %4551 = vmatpush2.bf16.msra.mxu0 %v2090_v27  ;;  %v4264_v27 = vadd.f32 %v4263_v63, %v4220_v52 }
 0x504   : > { %4594 = vmatpush2.bf16.msra.mxu1 %v2474_v28  ;;  %4552 = vmatprep.subr.bf16.mxu0 %v2067_v43 }
 0x505   : > { %4595 = vmatprep.subr.bf16.mxu1 %v2451_v30  ;;  %v2714_v30 = vunpack.c.l.s8.bf16 %v1490_v4 }
 0x507   : > { %4553 = vmatpush2.bf16.msra.mxu0 %v2066_v33  ;;  %v5611_v33 = vrot.slane %v7437_v9, %v6870_v44 }
 0x508   : > { %4596 = vmatpush2.bf16.msra.mxu1 %v2450_v35  ;;  %4554 = vmatprep.subr.bf16.mxu0 %v2043_v58  ;;  %v5441_v58 = vrot.slane %v7434_v2, %v6865_v42 }
 0x509   : > { %4597 = vmatprep.subr.bf16.mxu1 %v2427_v6  ;;  %v3098_v6 = vunpack.c.l.s8.bf16 %v1682_v12 }
 0x50b   : > { %4555 = vmatpush2.bf16.msra.mxu0 %v2042_v38 }
 0x50c   : > { %4598 = vmatpush2.bf16.msra.mxu1 %v2426_v57  ;;  %4556 = vmatprep.subr.bf16.mxu0 %v2019_v62  ;;  %v3075_v62 = vunpack.c.h.s8.bf16 %v1659_v26 }
 0x50d   : > { %4599 = vmatprep.subr.bf16.mxu1 %v2403_v20 }
 0x50f   : > { %4557 = vmatpush2.bf16.msra.mxu0 %v2018_v51  ;;  %v4268_v51 = vadd.f32 %v4267_v22, %v4224_v17  ;;  %v1442_v22 = vld [vmem:[%s6790_s7 + $0xd30] sm:$0xff] }
 0x510   : > { %4600 = vmatpush2.bf16.msra.mxu1 %v2402_v53  ;;  %4558 = vmatprep.subr.bf16.mxu0 %v1995_v54 }
 0x511   : > { %4601 = vmatprep.subr.bf16.mxu1 %v2379_v55  ;;  %v3074_v55 = vunpack.c.h.s8.bf16 %v1658_v11 }
 0x513   : > { %4559 = vmatpush2.bf16.msra.mxu0 %v1994_v59 }
 0x514   : > { %4602 = vmatpush2.bf16.msra.mxu1 %v2378_v61  ;;  %4614 = vmatprep.subr.bf16.mxu0 %v2739_v1  ;;  %v1443_v1 = vld [vmem:[%s6790_s7 + $0xd38] sm:$0xff] }
 0x515   : > { %4657 = vmatprep.subr.bf16.mxu1 %v3123_v8  ;;  %v1635_v8 = vld [vmem:[%s6790_s7 + $0x1338] sm:$0xff] }
 0x516   : > { %v4304_v24 = vpop.f32.mrf.mxu0  ;;  %4561 = vmatmul.mubr.bf16.vlgmr.msra.gmra.mxu0 %v6884_v15 }
 0x517   : > { %v4305_v28 = vadd.f32 %v4304_v24, %v4262_v21  ;;  %v4347_v43 = vpop.f32.mrf.mxu1  ;;  %4604 = vmatmul.mubr.bf16.vlgmr.msra.gmra.mxu1 %v6889_v19  ;;  %4615 = vmatpush1.bf16.msra.mxu0 %v2738_v14  ;;  %v2643_v21 = vunpack.c.h.s8.bf16 %v1443_v1  ;;  %v3027_v24 = vunpack.c.h.s8.bf16 %v1635_v8 }
 0x518   : > { %4646 = vmatprep.mubr.bf16.mxu0 %v6930_v31  ;;  %4658 = vmatpush1.bf16.msra.mxu1 %v3122_v18  ;;  %v4306_v35 = vpop.f32.mrf.mxu0  ;;  %v3050_v18 = vunpack.c.l.s8.bf16 %v1658_v11  ;;  %v2955_v11 = vunpack.c.l.s8.bf16 %v1611_v32 }
 0x519   : > { %v4348_v38 = vadd.f32 %v4347_v43, %v4305_v28  ;;  %4689 = vmatprep.mubr.bf16.mxu1 %v6932_v34  ;;  %v4307_v39 = vadd.f32 %v4306_v35, %v4264_v27  ;;  %v4349_v57 = vpop.f32.mrf.mxu1  ;;  %4616 = vmatprep.subr.bf16.mxu0 %v2715_v0  ;;  %v2642_v27 = vunpack.c.h.s8.bf16 %v1442_v22  ;;  %v2619_v43 = vunpack.c.l.s8.bf16 %v1443_v1  ;;  %v1755_v1 = vld [vmem:[%s6790_s7 + $0x16f8] sm:$0xff] }
 0x51a   : > { %v4308_v20 = vpop.f32.mrf.mxu0  ;;  %4659 = vmatprep.subr.bf16.mxu1 %v3099_v25  ;;  %v1634_v25 = vld [vmem:[%s6790_s7 + $0x1330] sm:$0xff] }
 0x51b   : > { %v5524_v52 = vmul.f32 %v5437_v29, %v4348_v38  ;;  %v4350_v2 = vadd.f32 %v4349_v57, %v4307_v39  ;;  %v4309_v53 = vadd.f32 %v4308_v20, %v4266_v37  ;;  %v4351_v54 = vpop.f32.mrf.mxu1  ;;  %4617 = vmatpush1.bf16.msra.mxu0 %v2714_v30  ;;  %v3026_v28 = vunpack.c.h.s8.bf16 %v1634_v25  ;;  %v1419_v30 = vld [vmem:[%s6790_s7 + $0xc78] sm:$0xff]  ;;  %v1610_v37 = vld [vmem:[%s6790_s7 + $0x1270] sm:$0xff] }
 0x51c   : > { %4660 = vmatpush1.bf16.msra.mxu1 %v3098_v6  ;;  %v4310_v63 = vpop.f32.mrf.mxu0  ;;  %4618 = vmatprep.subr.bf16.mxu0 %v2691_v36  ;;  %v3002_v35 = vunpack.c.l.s8.bf16 %v1634_v25  ;;  %v1418_v6 = vld [vmem:[%s6790_s7 + $0xc70] sm:$0xff]  ;;  %v2979_v36 = vunpack.c.h.s8.bf16 %v1611_v32  ;;  %v2978_v57 = vunpack.c.h.s8.bf16 %v1610_v37 }
 0x51d   : > { %v5698_v59 = vadd.f32 %v5611_v33, %v5524_v52  ;;  %v5525_v60 = vmul.f32 %v5441_v58, %v4350_v2  ;;  %v4352_v9 = vadd.f32 %v4351_v54, %v4309_v53  ;;  %v4311_v61 = vadd.f32 %v4310_v63, %v4268_v51  ;;  %4661 = vmatprep.subr.bf16.mxu1 %v3075_v62  ;;  %v4353_v4 = vpop.f32.mrf.mxu1  ;;  %v1586_v54 = vld [vmem:[%s6790_s7 + $0x11b0] sm:$0xff] }
 0x51e   : > { %v2594_v38 = vunpack.c.h.s8.bf16 %v1418_v6  ;;  %v2571_v62 = vunpack.c.l.s8.bf16 %v1419_v30  ;;  %v2570_v51 = vunpack.c.l.s8.bf16 %v1418_v6  ;;  %v2954_v2 = vunpack.c.l.s8.bf16 %v1610_v37  ;;  %v1707_v6 = vld [vmem:[%s6790_s7 + $0x1578] sm:$0xff] }
 0x51f   : > { %6223 = vtanh.f32 %v5698_v59  ;;  %v5699_v12 = vadd.f32 %v5615_v45, %v5525_v60  ;;  %v5548_v14 = vmul.f32 %v5437_v29, %v4352_v9  ;;  %v4354_v17 = vadd.f32 %v4353_v4, %v4311_v61  ;;  %4619 = vmatpush1.bf16.msra.mxu0 %v2690_v48  ;;  %v1779_v48 = vld [vmem:[%s6790_s7 + $0x17b8] sm:$0xff] }
 0x520   : > { %4662 = vmatpush1.bf16.msra.mxu1 %v3074_v55  ;;  %4620 = vmatprep.subr.bf16.mxu0 %v2667_v56  ;;  %v3003_v29 = vunpack.c.l.s8.bf16 %v1635_v8  ;;  %v3315_v63 = vunpack.c.h.s8.bf16 %v1779_v48  ;;  %v1778_v55 = vld [vmem:[%s6790_s7 + $0x17b0] sm:$0xff]  ;;  %v3291_v9 = vunpack.c.l.s8.bf16 %v1779_v48  ;;  %v1563_v61 = vld [vmem:[%s6790_s7 + $0x10f8] sm:$0xff]  ;;  %v2906_v4 = vunpack.c.l.s8.bf16 %v1586_v54 }
 0x521   : > { %6225 = vtanh.f32 %v5699_v12  ;;  %v5722_v0 = vadd.f32 %v5611_v33, %v5548_v14  ;;  %v5549_v10 = vmul.f32 %v5441_v58, %v4354_v17  ;;  %4663 = vmatprep.subr.bf16.mxu1 %v3051_v23  ;;  %v2618_v33 = vunpack.c.l.s8.bf16 %v1442_v22  ;;  %v1562_v12 = vld [vmem:[%s6790_s7 + $0x10f0] sm:$0xff] }
 0x522   : > { %v2595_v58 = vunpack.c.h.s8.bf16 %v1419_v30  ;;  %v2930_v23 = vunpack.c.h.s8.bf16 %v1586_v54  ;;  %v3314_v59 = vunpack.c.h.s8.bf16 %v1778_v55  ;;  %v2883_v8 = vunpack.c.h.s8.bf16 %v1563_v61  ;;  %v1754_v17 = vld [vmem:[%s6790_s7 + $0x16f0] sm:$0xff] }
 0x523   : > { %6227 = vtanh.f32 %v5722_v0  ;;  %v5723_v26 = vadd.f32 %v5615_v45, %v5549_v10  ;;  %4621 = vmatpush1.bf16.msra.mxu0 %v2666_v5  ;;  %v1587_v45 = vld [vmem:[%s6790_s7 + $0x11b8] sm:$0xff]  ;;  %v3290_v5 = vunpack.c.l.s8.bf16 %v1778_v55  ;;  %v3267_v14 = vunpack.c.h.s8.bf16 %v1755_v1 }
 0x524   : > { %4664 = vmatpush1.bf16.msra.mxu1 %v3050_v18  ;;  %4622 = vmatprep.subr.bf16.mxu0 %v2643_v21  ;;  %v2931_v53 = vunpack.c.h.s8.bf16 %v1587_v45  ;;  %v2907_v60 = vunpack.c.l.s8.bf16 %v1587_v45  ;;  %v2882_v18 = vunpack.c.h.s8.bf16 %v1562_v12  ;;  %v3266_v21 = vunpack.c.h.s8.bf16 %v1754_v17  ;;  %v1539_v10 = vld [vmem:[%s6790_s7 + $0x1038] sm:$0xff] }
 0x525   : > { %6229 = vtanh.f32 %v5723_v26  ;;  %4665 = vmatprep.subr.bf16.mxu1 %v3027_v24  ;;  %v2859_v22 = vunpack.c.l.s8.bf16 %v1563_v61  ;;  %v3243_v0 = vunpack.c.l.s8.bf16 %v1755_v1  ;;  %v1731_v24 = vld [vmem:[%s6790_s7 + $0x1638] sm:$0xff]  ;;  %v2858_v25 = vunpack.c.l.s8.bf16 %v1562_v12  ;;  %v1277_v1 = vld [vmem:[%s6790_s7 + $0x808] sm:$0xff]  ;;  %v1084_v12 = vld [vmem:[%s6790_s7 + $0x200] sm:$0xff] }
 0x526   : > { %v3242_v26 = vunpack.c.l.s8.bf16 %v1754_v17  ;;  %v3147_v48 = vunpack.c.l.s8.bf16 %v1707_v6  ;;  %v1276_v17 = vld [vmem:[%s6790_s7 + $0x800] sm:$0xff] }
 0x527   : > { %4623 = vmatpush1.bf16.msra.mxu0 %v2642_v27  ;;  %v2835_v27 = vunpack.c.h.s8.bf16 %v1539_v10 }
 0x528   : > { %4666 = vmatpush1.bf16.msra.mxu1 %v3026_v28  ;;  %4624 = vmatprep.subr.bf16.mxu0 %v2619_v43  ;;  %v1538_v28 = vld [vmem:[%s6790_s7 + $0x1030] sm:$0xff]  ;;  %v3219_v43 = vunpack.c.h.s8.bf16 %v1731_v24 }
 0x529   : > { %4667 = vmatprep.subr.bf16.mxu1 %v3003_v29  ;;  %v1730_v29 = vld [vmem:[%s6790_s7 + $0x1630] sm:$0xff]  ;;  %v2834_v30 = vunpack.c.h.s8.bf16 %v1538_v28 }
 0x52a   : > { %v3218_v32 = vunpack.c.h.s8.bf16 %v1730_v29  ;;  %v3194_v37 = vunpack.c.l.s8.bf16 %v1730_v29  ;;  %v1252_v29 = vld [vmem:[%s6790_s7 + $0x740] sm:$0xff] }
 0x52b   : > { %4625 = vmatpush1.bf16.msra.mxu0 %v2618_v33  ;;  %v2811_v33 = vunpack.c.l.s8.bf16 %v1539_v10  ;;  %v1061_v10 = vld [vmem:[%s6790_s7 + $0x148] sm:$0xff] }
 0x52c   : > { %v6224_v39 = vpop.eup %6223  ;;  %4668 = vmatpush1.bf16.msra.mxu1 %v3002_v35  ;;  %4626 = vmatprep.subr.bf16.mxu0 %v2595_v58  ;;  %v3195_v35 = vunpack.c.l.s8.bf16 %v1731_v24  ;;  %v1515_v58 = vld [vmem:[%s6790_s7 + $0xf78] sm:$0xff]  ;;  %v1253_v24 = vld [vmem:[%s6790_s7 + $0x748] sm:$0xff] }
 0x52d   : > { %5794 = vst [vmem:[%s7109_s17 + $0x50] sm:$0xff] %v6224_v39  ;;  %4669 = vmatprep.subr.bf16.mxu1 %v2979_v36  ;;  %v2810_v36 = vunpack.c.l.s8.bf16 %v1538_v28  ;;  %v1514_v39 = vld [vmem:[%s6790_s7 + $0xf70] sm:$0xff]  ;;  %v1060_v28 = vld [vmem:[%s6790_s7 + $0x140] sm:$0xff] }
 0x52e   : > { %v6226_v20 = vpop.eup %6225 }
 0x52f   : > { %5795 = vst [vmem:[%s7109_s17 + $0x58] sm:$0xff] %v6226_v20  ;;  %4627 = vmatpush1.bf16.msra.mxu0 %v2594_v38  ;;  %v2787_v38 = vunpack.c.h.s8.bf16 %v1515_v58  ;;  %v2763_v20 = vunpack.c.l.s8.bf16 %v1515_v58  ;;  %v1037_v58 = vld [vmem:[%s6790_s7 + $0x88] sm:$0xff] }
 0x530   : > { %v6228_v52 = vpop.eup %6227  ;;  %4670 = vmatpush1.bf16.msra.mxu1 %v2978_v57  ;;  %4628 = vmatprep.subr.bf16.mxu0 %v2571_v62  ;;  %v3171_v57 = vunpack.c.h.s8.bf16 %v1707_v6  ;;  %v1706_v62 = vld [vmem:[%s6790_s7 + $0x1570] sm:$0xff]  ;;  %v1229_v6 = vld [vmem:[%s6790_s7 + $0x688] sm:$0xff] }
 0x531   : > { %5818 = vst [vmem:[%s7109_s17 + $0x110] sm:$0xff] %v6228_v52  ;;  %4671 = vmatprep.subr.bf16.mxu1 %v2955_v11  ;;  %v2786_v11 = vunpack.c.h.s8.bf16 %v1514_v39  ;;  %v3170_v45 = vunpack.c.h.s8.bf16 %v1706_v62  ;;  %v1301_v52 = vld [vmem:[%s6790_s7 + $0x8c8] sm:$0xff] }
 0x532   : > { %v6230_v56 = vpop.eup %6229  ;;  %v2357_v55 = vunpack.c.h.s8.bf16 %v1301_v52  ;;  %v2333_v61 = vunpack.c.l.s8.bf16 %v1301_v52  ;;  %v1397_v52 = vld [vmem:[%s6790_s7 + $0xbc8] sm:$0xff] }
 0x533   : > { %5819 = vst [vmem:[%s7109_s17 + $0x118] sm:$0xff] %v6230_v56  ;;  %4629 = vmatpush1.bf16.msra.mxu0 %v2570_v51  ;;  %v1109_v51 = vld [vmem:[%s6790_s7 + $0x2c8] sm:$0xff]  ;;  %v1300_v56 = vld [vmem:[%s6790_s7 + $0x8c0] sm:$0xff] }
 0x534   : > { %4672 = vmatpush1.bf16.msra.mxu1 %v2954_v2  ;;  %4630 = vmatprep.subr.bf16.mxu0 %v2931_v53  ;;  %v2762_v2 = vunpack.c.l.s8.bf16 %v1514_v39  ;;  %v3146_v53 = vunpack.c.l.s8.bf16 %v1706_v62  ;;  %v1973_v54 = vunpack.c.h.s8.bf16 %v1109_v51  ;;  %v1036_v39 = vld [vmem:[%s6790_s7 + $0x80] sm:$0xff] }
 0x535   : > { %4673 = vmatprep.subr.bf16.mxu1 %v3315_v63  ;;  %v1108_v63 = vld [vmem:[%s6790_s7 + $0x2c0] sm:$0xff] }
 0x536   : > { %v1228_v62 = vld [vmem:[%s6790_s7 + $0x680] sm:$0xff] }
 0x537   : > { %4631 = vmatpush2.bf16.msra.mxu0 %v2930_v23  ;;  %v1972_v23 = vunpack.c.h.s8.bf16 %v1108_v63 }
 0x538   : > { %4674 = vmatpush2.bf16.msra.mxu1 %v3314_v59  ;;  %4632 = vmatprep.subr.bf16.mxu0 %v2907_v60  ;;  %v2356_v59 = vunpack.c.h.s8.bf16 %v1300_v56  ;;  %v1949_v60 = vunpack.c.l.s8.bf16 %v1109_v51  ;;  %v1205_v51 = vld [vmem:[%s6790_s7 + $0x5c8] sm:$0xff] }
 0x539   : > { %4675 = vmatprep.subr.bf16.mxu1 %v3291_v9  ;;  %v1085_v9 = vld [vmem:[%s6790_s7 + $0x208] sm:$0xff] }
 0x53b   : > { %4633 = vmatpush2.bf16.msra.mxu0 %v2906_v4  ;;  %v1948_v4 = vunpack.c.l.s8.bf16 %v1108_v63  ;;  %v1204_v63 = vld [vmem:[%s6790_s7 + $0x5c0] sm:$0xff] }
 0x53c   : > { %4676 = vmatpush2.bf16.msra.mxu1 %v3290_v5  ;;  %4634 = vmatprep.subr.bf16.mxu0 %v2883_v8  ;;  %v2332_v5 = vunpack.c.l.s8.bf16 %v1300_v56  ;;  %v1925_v8 = vunpack.c.h.s8.bf16 %v1085_v9  ;;  %v1396_v56 = vld [vmem:[%s6790_s7 + $0xbc0] sm:$0xff] }
 0x53d   : > { %4677 = vmatprep.subr.bf16.mxu1 %v3267_v14  ;;  %v2309_v14 = vunpack.c.h.s8.bf16 %v1277_v1 }
 0x53f   : > { %4635 = vmatpush2.bf16.msra.mxu0 %v2882_v18  ;;  %v1924_v18 = vunpack.c.h.s8.bf16 %v1084_v12 }
 0x540   : > { %4678 = vmatpush2.bf16.msra.mxu1 %v3266_v21  ;;  %4636 = vmatprep.subr.bf16.mxu0 %v2859_v22  ;;  %v2308_v21 = vunpack.c.h.s8.bf16 %v1276_v17  ;;  %v1901_v22 = vunpack.c.l.s8.bf16 %v1085_v9  ;;  %v2525_v9 = vunpack.c.l.s8.bf16 %v1397_v52 }
 0x541   : > { %4679 = vmatprep.subr.bf16.mxu1 %v3243_v0  ;;  %v2285_v0 = vunpack.c.l.s8.bf16 %v1277_v1  ;;  %v1373_v1 = vld [vmem:[%s6790_s7 + $0xb08] sm:$0xff] }
 0x543   : > { %4637 = vmatpush2.bf16.msra.mxu0 %v2858_v25  ;;  %v1900_v25 = vunpack.c.l.s8.bf16 %v1084_v12  ;;  %v1180_v12 = vld [vmem:[%s6790_s7 + $0x500] sm:$0xff] }
 0x544   : > { %4680 = vmatpush2.bf16.msra.mxu1 %v3242_v26  ;;  %4638 = vmatprep.subr.bf16.mxu0 %v2835_v27  ;;  %v2284_v26 = vunpack.c.l.s8.bf16 %v1276_v17  ;;  %v1877_v27 = vunpack.c.h.s8.bf16 %v1061_v10  ;;  %v1372_v17 = vld [vmem:[%s6790_s7 + $0xb00] sm:$0xff] }
 0x545   : > { %4681 = vmatprep.subr.bf16.mxu1 %v3219_v43  ;;  %v2261_v43 = vunpack.c.h.s8.bf16 %v1253_v24 }
 0x547   : > { %4639 = vmatpush2.bf16.msra.mxu0 %v2834_v30  ;;  %v1876_v30 = vunpack.c.h.s8.bf16 %v1060_v28 }
 0x548   : > { %4682 = vmatpush2.bf16.msra.mxu1 %v3218_v32  ;;  %4640 = vmatprep.subr.bf16.mxu0 %v2811_v33  ;;  %v2260_v32 = vunpack.c.h.s8.bf16 %v1252_v29  ;;  %v1853_v33 = vunpack.c.l.s8.bf16 %v1061_v10  ;;  %v1157_v10 = vld [vmem:[%s6790_s7 + $0x448] sm:$0xff] }
 0x549   : > { %4683 = vmatprep.subr.bf16.mxu1 %v3195_v35  ;;  %v2237_v35 = vunpack.c.l.s8.bf16 %v1253_v24  ;;  %v1349_v24 = vld [vmem:[%s6790_s7 + $0xa48] sm:$0xff] }
 0x54b   : > { %4641 = vmatpush2.bf16.msra.mxu0 %v2810_v36  ;;  %v1852_v36 = vunpack.c.l.s8.bf16 %v1060_v28  ;;  %v1156_v28 = vld [vmem:[%s6790_s7 + $0x440] sm:$0xff] }
 0x54c   : > { %4684 = vmatpush2.bf16.msra.mxu1 %v3194_v37  ;;  %4642 = vmatprep.subr.bf16.mxu0 %v2787_v38  ;;  %v2236_v37 = vunpack.c.l.s8.bf16 %v1252_v29  ;;  %v1829_v38 = vunpack.c.h.s8.bf16 %v1037_v58  ;;  %v1348_v29 = vld [vmem:[%s6790_s7 + $0xa40] sm:$0xff] }
 0x54d   : > { %4685 = vmatprep.subr.bf16.mxu1 %v3171_v57  ;;  %v2213_v57 = vunpack.c.h.s8.bf16 %v1229_v6 }
 0x54f   : > { %4643 = vmatpush2.bf16.msra.mxu0 %v2786_v11  ;;  %v1828_v11 = vunpack.c.h.s8.bf16 %v1036_v39 }
 0x550   : > { %4686 = vmatpush2.bf16.msra.mxu1 %v3170_v45  ;;  %4644 = vmatprep.subr.bf16.mxu0 %v2763_v20  ;;  %v2212_v45 = vunpack.c.h.s8.bf16 %v1228_v62  ;;  %v1805_v20 = vunpack.c.l.s8.bf16 %v1037_v58  ;;  %v1133_v58 = vld [vmem:[%s6790_s7 + $0x388] sm:$0xff] }
 0x551   : > { %4687 = vmatprep.subr.bf16.mxu1 %v3147_v48  ;;  %v2189_v48 = vunpack.c.l.s8.bf16 %v1229_v6  ;;  %v1325_v6 = vld [vmem:[%s6790_s7 + $0x988] sm:$0xff] }
 0x553   : > { %4645 = vmatpush2.bf16.msra.mxu0 %v2762_v2  ;;  %v1804_v2 = vunpack.c.l.s8.bf16 %v1036_v39  ;;  %v2021_v39 = vunpack.c.h.s8.bf16 %v1133_v58 }
 0x554   : > { %4688 = vmatpush2.bf16.msra.mxu1 %v3146_v53  ;;  %4700 = vmatprep.subr.bf16.mxu0 %v1973_v54  ;;  %v2188_v53 = vunpack.c.l.s8.bf16 %v1228_v62  ;;  %v2165_v54 = vunpack.c.h.s8.bf16 %v1205_v51 }
 0x555   : > { %4743 = vmatprep.subr.bf16.mxu1 %v2357_v55  ;;  %v2549_v55 = vunpack.c.h.s8.bf16 %v1397_v52  ;;  %v1997_v52 = vunpack.c.l.s8.bf16 %v1133_v58 }
 0x556   : > { %4647 = vmatmul.mubr.bf16.vlgmr.msra.gmra.mxu0 %v6966_v47 }
 0x557   : > { %4690 = vmatmul.mubr.bf16.vlgmr.msra.gmra.mxu1 %v6968_v50  ;;  %4701 = vmatpush1.bf16.msra.mxu0 %v1972_v23  ;;  %v2164_v23 = vunpack.c.h.s8.bf16 %v1204_v63  ;;  %v4433_v62 = vpop.f32.mrf.mxu1 }
 0x558   : > { %4732 = vmatprep.mubr.bf16.mxu0 %v6882_v13  ;;  %4744 = vmatpush1.bf16.msra.mxu1 %v2356_v59  ;;  %v2548_v59 = vunpack.c.h.s8.bf16 %v1396_v56 }
 0x559   : > { %4775 = vmatprep.mubr.bf16.mxu1 %v6886_v16  ;;  %4702 = vmatprep.subr.bf16.mxu0 %v1949_v60  ;;  %v2141_v60 = vunpack.c.l.s8.bf16 %v1205_v51 }
 0x55a   : > { %4745 = vmatprep.subr.bf16.mxu1 %v2333_v61  ;;  %v1181_v61 = vld [vmem:[%s6790_s7 + $0x508] sm:$0xff] }
 0x55b   : > { %4703 = vmatpush1.bf16.msra.mxu0 %v1948_v4  ;;  %v2140_v4 = vunpack.c.l.s8.bf16 %v1204_v63  ;;  %v1685_v63 = vld [vmem:[%s6790_s7 + $0x14c8] sm:$0xff] }
 0x55c   : > { %4746 = vmatpush1.bf16.msra.mxu1 %v2332_v5  ;;  %4704 = vmatprep.subr.bf16.mxu0 %v1925_v8  ;;  %v2524_v5 = vunpack.c.l.s8.bf16 %v1396_v56  ;;  %v2117_v8 = vunpack.c.h.s8.bf16 %v1181_v61 }
 0x55d   : > { %4747 = vmatprep.subr.bf16.mxu1 %v2309_v14  ;;  %v2501_v14 = vunpack.c.h.s8.bf16 %v1373_v1 }
 0x55f   : > { %4705 = vmatpush1.bf16.msra.mxu0 %v1924_v18  ;;  %v2116_v18 = vunpack.c.h.s8.bf16 %v1180_v12 }
 0x560   : > { %4748 = vmatpush1.bf16.msra.mxu1 %v2308_v21  ;;  %4706 = vmatprep.subr.bf16.mxu0 %v1901_v22  ;;  %v2500_v21 = vunpack.c.h.s8.bf16 %v1372_v17  ;;  %v2093_v22 = vunpack.c.l.s8.bf16 %v1181_v61  ;;  %v3125_v61 = vunpack.c.h.s8.bf16 %v1685_v63 }
 0x561   : > { %4749 = vmatprep.subr.bf16.mxu1 %v2285_v0  ;;  %v2477_v0 = vunpack.c.l.s8.bf16 %v1373_v1  ;;  %v1684_v1 = vld [vmem:[%s6790_s7 + $0x14c0] sm:$0xff] }
 0x563   : > { %4707 = vmatpush1.bf16.msra.mxu0 %v1900_v25  ;;  %v2092_v25 = vunpack.c.l.s8.bf16 %v1180_v12 }
 0x564   : > { %4750 = vmatpush1.bf16.msra.mxu1 %v2284_v26  ;;  %4708 = vmatprep.subr.bf16.mxu0 %v1877_v27  ;;  %v2476_v26 = vunpack.c.l.s8.bf16 %v1372_v17  ;;  %v2069_v27 = vunpack.c.h.s8.bf16 %v1157_v10 }
 0x565   : > { %4751 = vmatprep.subr.bf16.mxu1 %v2261_v43  ;;  %v2453_v43 = vunpack.c.h.s8.bf16 %v1349_v24 }
 0x567   : > { %4709 = vmatpush1.bf16.msra.mxu0 %v1876_v30  ;;  %v2068_v30 = vunpack.c.h.s8.bf16 %v1156_v28 }
 0x568   : > { %4752 = vmatpush1.bf16.msra.mxu1 %v2260_v32  ;;  %4710 = vmatprep.subr.bf16.mxu0 %v1853_v33  ;;  %v2452_v32 = vunpack.c.h.s8.bf16 %v1348_v29  ;;  %v2045_v33 = vunpack.c.l.s8.bf16 %v1157_v10 }
 0x569   : > { %4753 = vmatprep.subr.bf16.mxu1 %v2237_v35  ;;  %v2429_v35 = vunpack.c.l.s8.bf16 %v1349_v24 }
 0x56b   : > { %4711 = vmatpush1.bf16.msra.mxu0 %v1852_v36  ;;  %v2044_v36 = vunpack.c.l.s8.bf16 %v1156_v28 }
 0x56c   : > { %4754 = vmatpush1.bf16.msra.mxu1 %v2236_v37  ;;  %4712 = vmatprep.subr.bf16.mxu0 %v1829_v38  ;;  %v4390_v37 = vpop.f32.mrf.mxu0  ;;  %v2428_v38 = vunpack.c.l.s8.bf16 %v1348_v29  ;;  %v7620_v29 = vld [vmem:[%s6800_s15 + $0x8] sm:$0xff] }
 0x56d   : > { %4755 = vmatprep.subr.bf16.mxu1 %v2213_v57  ;;  %v1132_v57 = vld [vmem:[%s6790_s7 + $0x380] sm:$0xff]  ;;  %v4434_v12 = vadd.f32 %v4433_v62, %v4390_v37  ;;  %v5623_v62 = vrot.slane %v7620_v29, %v6905_v46 }
 0x56f   : > { %4713 = vmatpush1.bf16.msra.mxu0 %v1828_v11  ;;  %v2405_v11 = vunpack.c.h.s8.bf16 %v1325_v6 }
 0x570   : > { %4756 = vmatpush1.bf16.msra.mxu1 %v2212_v45  ;;  %4714 = vmatprep.subr.bf16.mxu0 %v1805_v20  ;;  %v1324_v45 = vld [vmem:[%s6790_s7 + $0x980] sm:$0xff]  ;;  %v2020_v20 = vunpack.c.h.s8.bf16 %v1132_v57 }
 0x571   : > { %4757 = vmatprep.subr.bf16.mxu1 %v2189_v48  ;;  %v4392_v48 = vpop.f32.mrf.mxu0  ;;  %v2404_v51 = vunpack.c.h.s8.bf16 %v1324_v45 }
 0x573   : > { %4715 = vmatpush1.bf16.msra.mxu0 %v1804_v2  ;;  %v4435_v2 = vpop.f32.mrf.mxu1  ;;  %v4394_v56 = vpop.f32.mrf.mxu0 }
 0x574   : > { %4758 = vmatpush1.bf16.msra.mxu1 %v2188_v53  ;;  %4716 = vmatprep.subr.bf16.mxu0 %v2165_v54  ;;  %v2381_v53 = vunpack.c.l.s8.bf16 %v1325_v6  ;;  %v1493_v54 = vld [vmem:[%s6790_s7 + $0xec8] sm:$0xff]  ;;  %v4436_v10 = vadd.f32 %v4435_v2, %v4392_v48 }
 0x575   : > { %4759 = vmatprep.subr.bf16.mxu1 %v2549_v55  ;;  %v1996_v55 = vunpack.c.l.s8.bf16 %v1132_v57  ;;  %v2717_v17 = vunpack.c.l.s8.bf16 %v1493_v54  ;;  %v1660_v57 = vld [vmem:[%s6790_s7 + $0x1400] sm:$0xff] }
 0x577   : > { %4717 = vmatpush2.bf16.msra.mxu0 %v2164_v23  ;;  %v2380_v23 = vunpack.c.l.s8.bf16 %v1324_v45 }
 0x578   : > { %4760 = vmatpush2.bf16.msra.mxu1 %v2548_v59  ;;  %4718 = vmatprep.subr.bf16.mxu0 %v2141_v60  ;;  %v2741_v59 = vunpack.c.h.s8.bf16 %v1493_v54  ;;  %v1492_v60 = vld [vmem:[%s6790_s7 + $0xec0] sm:$0xff]  ;;  %v3076_v54 = vunpack.c.h.s8.bf16 %v1660_v57 }
 0x579   : > { %4761 = vmatprep.subr.bf16.mxu1 %v2525_v9  ;;  %v4437_v9 = vpop.f32.mrf.mxu1  ;;  %v2716_v28 = vunpack.c.l.s8.bf16 %v1492_v60 }
 0x57a   : > { %v4438_v6 = vadd.f32 %v4437_v9, %v4394_v56  ;;  %v1445_v9 = vld [vmem:[%s6790_s7 + $0xd48] sm:$0xff] }
 0x57b   : > { %4719 = vmatpush2.bf16.msra.mxu0 %v2140_v4  ;;  %v2740_v4 = vunpack.c.h.s8.bf16 %v1492_v60 }
 0x57c   : > { %4762 = vmatpush2.bf16.msra.mxu1 %v2524_v5  ;;  %4720 = vmatprep.subr.bf16.mxu0 %v2117_v8  ;;  %v4396_v5 = vpop.f32.mrf.mxu0  ;;  %v3124_v8 = vunpack.c.h.s8.bf16 %v1684_v1 }
 0x57d   : > { %4763 = vmatprep.subr.bf16.mxu1 %v2501_v14  ;;  %v4439_v14 = vpop.f32.mrf.mxu1 }
 0x57f   : > { %4721 = vmatpush2.bf16.msra.mxu0 %v2116_v18  ;;  %v1469_v18 = vld [vmem:[%s6790_s7 + $0xe08] sm:$0xff] }
 0x580   : > { %4764 = vmatpush2.bf16.msra.mxu1 %v2500_v21  ;;  %4722 = vmatprep.subr.bf16.mxu0 %v2093_v22  ;;  %v3101_v22 = vunpack.c.l.s8.bf16 %v1685_v63  ;;  %v2693_v58 = vunpack.c.h.s8.bf16 %v1469_v18  ;;  %v2669_v63 = vunpack.c.l.s8.bf16 %v1469_v18  ;;  %v1444_v18 = vld [vmem:[%s6790_s7 + $0xd40] sm:$0xff] }
 0x581   : > { %4765 = vmatprep.subr.bf16.mxu1 %v2477_v0  ;;  %v7610_v0 = vld [vmem:[%s6790_s7 + $0x1408] sm:$0xff] }
 0x583   : > { %4723 = vmatpush2.bf16.msra.mxu0 %v2092_v25 }
 0x584   : > { %4766 = vmatpush2.bf16.msra.mxu1 %v2476_v26  ;;  %4724 = vmatprep.subr.bf16.mxu0 %v2069_v27  ;;  %v7613_v26 = vld [vmem:[%s6797_s1 + $0x8] sm:$0xff] }
 0x585   : > { %4767 = vmatprep.subr.bf16.mxu1 %v2453_v43  ;;  %v5445_v27 = vrot.slane %v7613_v26, %v6945_v3  ;;  %v1468_v43 = vld [vmem:[%s6790_s7 + $0xe00] sm:$0xff] }
 0x586   : > { %v2692_v45 = vunpack.c.h.s8.bf16 %v1468_v43 }
 0x587   : > { %4725 = vmatpush2.bf16.msra.mxu0 %v2068_v30  ;;  %v5619_v30 = vrot.slane %v7620_v29, %v6945_v3 }
 0x588   : > { %4768 = vmatpush2.bf16.msra.mxu1 %v2452_v32  ;;  %4726 = vmatprep.subr.bf16.mxu0 %v2045_v33  ;;  %v5449_v33 = vrot.slane %v7613_v26, %v6905_v46 }
 0x589   : > { %4769 = vmatprep.subr.bf16.mxu1 %v2429_v35  ;;  %v3100_v35 = vunpack.c.l.s8.bf16 %v1684_v1  ;;  %v2668_v1 = vunpack.c.l.s8.bf16 %v1468_v43 }
 0x58b   : > { %4727 = vmatpush2.bf16.msra.mxu0 %v2044_v36 }
 0x58c   : > { %4770 = vmatpush2.bf16.msra.mxu1 %v2428_v38  ;;  %4728 = vmatprep.subr.bf16.mxu0 %v2021_v39  ;;  %v3077_v39 = vunpack.c.h.s8.bf16 %v7610_v0 }
 0x58d   : > { %4771 = vmatprep.subr.bf16.mxu1 %v2405_v11 }
 0x58f   : > { %4729 = vmatpush2.bf16.msra.mxu0 %v2020_v20  ;;  %v4440_v20 = vadd.f32 %v4439_v14, %v4396_v5  ;;  %v3052_v14 = vunpack.c.l.s8.bf16 %v1660_v57 }
 0x590   : > { %4772 = vmatpush2.bf16.msra.mxu1 %v2404_v51  ;;  %4730 = vmatprep.subr.bf16.mxu0 %v1997_v52 }
 0x591   : > { %4773 = vmatprep.subr.bf16.mxu1 %v2381_v53 }
 0x593   : > { %4731 = vmatpush2.bf16.msra.mxu0 %v1996_v55  ;;  %v3053_v55 = vunpack.c.l.s8.bf16 %v7610_v0 }
 0x594   : > { %4774 = vmatpush2.bf16.msra.mxu1 %v2380_v23  ;;  %4786 = vmatprep.subr.bf16.mxu0 %v2741_v59 }
 0x595   : > { %4829 = vmatprep.subr.bf16.mxu1 %v3125_v61 }
 0x596   : > { %v4476_v21 = vpop.f32.mrf.mxu0  ;;  %4733 = vmatmul.mubr.bf16.vlgmr.msra.gmra.mxu0 %v6884_v15 }
 0x597   : > { %v4477_v24 = vadd.f32 %v4476_v21, %v4434_v12  ;;  %v4519_v25 = vpop.f32.mrf.mxu1  ;;  %4776 = vmatmul.mubr.bf16.vlgmr.msra.gmra.mxu1 %v6889_v19  ;;  %4787 = vmatpush1.bf16.msra.mxu0 %v2740_v4  ;;  %v1637_v4 = vld [vmem:[%s6790_s7 + $0x1348] sm:$0xff] }
 0x598   : > { %4818 = vmatprep.mubr.bf16.mxu0 %v6930_v31  ;;  %4830 = vmatpush1.bf16.msra.mxu1 %v3124_v8  ;;  %v4478_v32 = vpop.f32.mrf.mxu0  ;;  %v3029_v0 = vunpack.c.h.s8.bf16 %v1637_v4  ;;  %v3005_v43 = vunpack.c.l.s8.bf16 %v1637_v4 }
 0x599   : > { %v4520_v36 = vadd.f32 %v4519_v25, %v4477_v24  ;;  %4861 = vmatprep.mubr.bf16.mxu1 %v6932_v34  ;;  %v4479_v37 = vadd.f32 %v4478_v32, %v4436_v10  ;;  %v4521_v38 = vpop.f32.mrf.mxu1  ;;  %4788 = vmatprep.subr.bf16.mxu0 %v2717_v17  ;;  %v2645_v17 = vunpack.c.h.s8.bf16 %v1445_v9  ;;  %v1636_v10 = vld [vmem:[%s6790_s7 + $0x1340] sm:$0xff]  ;;  %v2644_v25 = vunpack.c.h.s8.bf16 %v1444_v18  ;;  %v1613_v32 = vld [vmem:[%s6790_s7 + $0x1288] sm:$0xff] }
 0x59a   : > { %v4480_v11 = vpop.f32.mrf.mxu0  ;;  %4831 = vmatprep.subr.bf16.mxu1 %v3101_v22 }
 0x59b   : > { %v5526_v48 = vmul.f32 %v5445_v27, %v4520_v36  ;;  %v4522_v51 = vadd.f32 %v4521_v38, %v4479_v37  ;;  %v4481_v52 = vadd.f32 %v4480_v11, %v4438_v6  ;;  %v4523_v2 = vpop.f32.mrf.mxu1  ;;  %4789 = vmatpush1.bf16.msra.mxu0 %v2716_v28  ;;  %v2621_v28 = vunpack.c.l.s8.bf16 %v1445_v9  ;;  %v1420_v6 = vld [vmem:[%s6790_s7 + $0xc80] sm:$0xff] }
 0x59c   : > { %4832 = vmatpush1.bf16.msra.mxu1 %v3100_v35  ;;  %v4482_v53 = vpop.f32.mrf.mxu0  ;;  %4790 = vmatprep.subr.bf16.mxu0 %v2693_v58  ;;  %v3004_v35 = vunpack.c.l.s8.bf16 %v1636_v10  ;;  %v2981_v36 = vunpack.c.h.s8.bf16 %v1613_v32  ;;  %v1612_v37 = vld [vmem:[%s6790_s7 + $0x1280] sm:$0xff]  ;;  %v2596_v38 = vunpack.c.h.s8.bf16 %v1420_v6  ;;  %v2957_v11 = vunpack.c.l.s8.bf16 %v1613_v32 }
 0x59d   : > { %v5700_v56 = vadd.f32 %v5619_v30, %v5526_v48  ;;  %v5527_v23 = vmul.f32 %v5449_v33, %v4522_v51  ;;  %v4524_v59 = vadd.f32 %v4523_v2, %v4481_v52  ;;  %v4483_v60 = vadd.f32 %v4482_v53, %v4440_v20  ;;  %4833 = vmatprep.subr.bf16.mxu1 %v3077_v39  ;;  %v4525_v61 = vpop.f32.mrf.mxu1  ;;  %v1781_v48 = vld [vmem:[%s6790_s7 + $0x17c8] sm:$0xff]  ;;  %v1732_v32 = vld [vmem:[%s6790_s7 + $0x1640] sm:$0xff] }
 0x59e   : > { %v2980_v57 = vunpack.c.h.s8.bf16 %v1612_v37  ;;  %v2572_v51 = vunpack.c.l.s8.bf16 %v1420_v6  ;;  %v2956_v2 = vunpack.c.l.s8.bf16 %v1612_v37  ;;  %v3293_v9 = vunpack.c.l.s8.bf16 %v1781_v48  ;;  %v1709_v37 = vld [vmem:[%s6790_s7 + $0x1588] sm:$0xff] }
 0x59f   : > { %6231 = vtanh.f32 %v5700_v56  ;;  %v5701_v5 = vadd.f32 %v5623_v62, %v5527_v23  ;;  %v5550_v8 = vmul.f32 %v5445_v27, %v4524_v59  ;;  %v4526_v12 = vadd.f32 %v4525_v61, %v4483_v60  ;;  %4791 = vmatpush1.bf16.msra.mxu0 %v2692_v45  ;;  %v1589_v45 = vld [vmem:[%s6790_s7 + $0x11c8] sm:$0xff] }
 0x5a0   : > { %4834 = vmatpush1.bf16.msra.mxu1 %v3076_v54  ;;  %4792 = vmatprep.subr.bf16.mxu0 %v2669_v63  ;;  %v3028_v27 = vunpack.c.h.s8.bf16 %v1636_v10  ;;  %v2933_v53 = vunpack.c.h.s8.bf16 %v1589_v45  ;;  %v1588_v54 = vld [vmem:[%s6790_s7 + $0x11c0] sm:$0xff]  ;;  %v3317_v63 = vunpack.c.h.s8.bf16 %v1781_v48  ;;  %v2909_v60 = vunpack.c.l.s8.bf16 %v1589_v45  ;;  %v1565_v61 = vld [vmem:[%s6790_s7 + $0x1108] sm:$0xff] }
 0x5a1   : > { %6233 = vtanh.f32 %v5701_v5  ;;  %v5724_v21 = vadd.f32 %v5619_v30, %v5550_v8  ;;  %v5551_v22 = vmul.f32 %v5449_v33, %v4526_v12  ;;  %4835 = vmatprep.subr.bf16.mxu1 %v3053_v55  ;;  %v1421_v30 = vld [vmem:[%s6790_s7 + $0xc88] sm:$0xff]  ;;  %v2620_v33 = vunpack.c.l.s8.bf16 %v1444_v18  ;;  %v1780_v55 = vld [vmem:[%s6790_s7 + $0x17c0] sm:$0xff] }
 0x5a2   : > { %v2597_v58 = vunpack.c.h.s8.bf16 %v1421_v30  ;;  %v2932_v23 = vunpack.c.h.s8.bf16 %v1588_v54  ;;  %v3316_v59 = vunpack.c.h.s8.bf16 %v1780_v55  ;;  %v2908_v4 = vunpack.c.l.s8.bf16 %v1588_v54  ;;  %v1564_v12 = vld [vmem:[%s6790_s7 + $0x1100] sm:$0xff]  ;;  %v1541_v10 = vld [vmem:[%s6790_s7 + $0x1048] sm:$0xff] }
 0x5a3   : > { %6235 = vtanh.f32 %v5724_v21  ;;  %v5725_v24 = vadd.f32 %v5623_v62, %v5551_v22  ;;  %4793 = vmatpush1.bf16.msra.mxu0 %v2668_v1  ;;  %v2573_v62 = vunpack.c.l.s8.bf16 %v1421_v30  ;;  %v1757_v1 = vld [vmem:[%s6790_s7 + $0x1708] sm:$0xff]  ;;  %v3292_v5 = vunpack.c.l.s8.bf16 %v1780_v55  ;;  %v1708_v45 = vld [vmem:[%s6790_s7 + $0x1580] sm:$0xff] }
 0x5a4   : > { %4836 = vmatpush1.bf16.msra.mxu1 %v3052_v14  ;;  %4794 = vmatprep.subr.bf16.mxu0 %v2645_v17  ;;  %v2885_v8 = vunpack.c.h.s8.bf16 %v1565_v61  ;;  %v3269_v14 = vunpack.c.h.s8.bf16 %v1757_v1  ;;  %v1756_v17 = vld [vmem:[%s6790_s7 + $0x1700] sm:$0xff]  ;;  %v2884_v18 = vunpack.c.h.s8.bf16 %v1564_v12  ;;  %v2861_v22 = vunpack.c.l.s8.bf16 %v1565_v61 }
 0x5a5   : > { %6237 = vtanh.f32 %v5725_v24  ;;  %4837 = vmatprep.subr.bf16.mxu1 %v3029_v0  ;;  %v3268_v21 = vunpack.c.h.s8.bf16 %v1756_v17  ;;  %v3245_v0 = vunpack.c.l.s8.bf16 %v1757_v1  ;;  %v1733_v24 = vld [vmem:[%s6790_s7 + $0x1648] sm:$0xff]  ;;  %v3172_v48 = vunpack.c.h.s8.bf16 %v1708_v45  ;;  %v1087_v1 = vld [vmem:[%s6790_s7 + $0x218] sm:$0xff] }
 0x5a6   : > { %v3221_v30 = vunpack.c.h.s8.bf16 %v1733_v24  ;;  %v3197_v6 = vunpack.c.l.s8.bf16 %v1733_v24 }
 0x5a7   : > { %4795 = vmatpush1.bf16.msra.mxu0 %v2644_v25  ;;  %v2860_v25 = vunpack.c.l.s8.bf16 %v1564_v12 }
 0x5a8   : > { %4838 = vmatpush1.bf16.msra.mxu1 %v3028_v27  ;;  %4796 = vmatprep.subr.bf16.mxu0 %v2621_v28  ;;  %v3244_v27 = vunpack.c.l.s8.bf16 %v1756_v17  ;;  %v2837_v28 = vunpack.c.h.s8.bf16 %v1541_v10  ;;  %v1086_v17 = vld [vmem:[%s6790_s7 + $0x210] sm:$0xff] }
 0x5a9   : > { %4839 = vmatprep.subr.bf16.mxu1 %v3005_v43  ;;  %v1540_v43 = vld [vmem:[%s6790_s7 + $0x1040] sm:$0xff] }
 0x5ab   : > { %4797 = vmatpush1.bf16.msra.mxu0 %v2620_v33  ;;  %v2836_v33 = vunpack.c.h.s8.bf16 %v1540_v43 }
 0x5ac   : > { %v6232_v39 = vpop.eup %6231  ;;  %4840 = vmatpush1.bf16.msra.mxu1 %v3004_v35  ;;  %4798 = vmatprep.subr.bf16.mxu0 %v2597_v58  ;;  %v3220_v35 = vunpack.c.h.s8.bf16 %v1732_v32  ;;  %v2813_v58 = vunpack.c.l.s8.bf16 %v1541_v10  ;;  %v1903_v10 = vunpack.c.l.s8.bf16 %v1087_v1 }
 0x5ad   : > { %5796 = vst [vmem:[%s7109_s17 + $0x60] sm:$0xff] %v6232_v39  ;;  %4841 = vmatprep.subr.bf16.mxu1 %v2981_v36  ;;  %v1517_v36 = vld [vmem:[%s6790_s7 + $0xf88] sm:$0xff]  ;;  %v3196_v39 = vunpack.c.l.s8.bf16 %v1732_v32  ;;  %v1062_v32 = vld [vmem:[%s6790_s7 + $0x150] sm:$0xff] }
 0x5ae   : > { %v6234_v20 = vpop.eup %6233 }
 0x5af   : > { %5797 = vst [vmem:[%s7109_s17 + $0x68] sm:$0xff] %v6234_v20  ;;  %4799 = vmatpush1.bf16.msra.mxu0 %v2596_v38  ;;  %v2812_v38 = vunpack.c.l.s8.bf16 %v1540_v43 }
 0x5b0   : > { %v6236_v52 = vpop.eup %6235  ;;  %4842 = vmatpush1.bf16.msra.mxu1 %v2980_v57  ;;  %4800 = vmatprep.subr.bf16.mxu0 %v2573_v62  ;;  %v2789_v57 = vunpack.c.h.s8.bf16 %v1517_v36  ;;  %v1516_v62 = vld [vmem:[%s6790_s7 + $0xf80] sm:$0xff] }
 0x5b1   : > { %5820 = vst [vmem:[%s7109_s17 + $0x120] sm:$0xff] %v6236_v52  ;;  %4843 = vmatprep.subr.bf16.mxu1 %v2957_v11  ;;  %v3173_v11 = vunpack.c.h.s8.bf16 %v1709_v37  ;;  %v2788_v20 = vunpack.c.h.s8.bf16 %v1516_v62  ;;  %v3149_v52 = vunpack.c.l.s8.bf16 %v1709_v37  ;;  %v2764_v54 = vunpack.c.l.s8.bf16 %v1516_v62 }
 0x5b2   : > { %v6238_v56 = vpop.eup %6237 }
 0x5b3   : > { %5821 = vst [vmem:[%s7109_s17 + $0x128] sm:$0xff] %v6238_v56  ;;  %4801 = vmatpush1.bf16.msra.mxu0 %v2572_v51  ;;  %v2765_v51 = vunpack.c.l.s8.bf16 %v1517_v36  ;;  %v1110_v56 = vld [vmem:[%s6790_s7 + $0x2d0] sm:$0xff] }
 0x5b4   : > { %4844 = vmatpush1.bf16.msra.mxu1 %v2956_v2  ;;  %4802 = vmatprep.subr.bf16.mxu0 %v2933_v53  ;;  %v1111_v2 = vld [vmem:[%s6790_s7 + $0x2d8] sm:$0xff] }
 0x5b5   : > { %4845 = vmatprep.subr.bf16.mxu1 %v3317_v63  ;;  %v1303_v53 = vld [vmem:[%s6790_s7 + $0x8d8] sm:$0xff]  ;;  %v3148_v63 = vunpack.c.l.s8.bf16 %v1708_v45  ;;  %v1975_v55 = vunpack.c.h.s8.bf16 %v1111_v2  ;;  %v1951_v61 = vunpack.c.l.s8.bf16 %v1111_v2  ;;  %v1038_v45 = vld [vmem:[%s6790_s7 + $0x90] sm:$0xff] }
 0x5b7   : > { %4803 = vmatpush2.bf16.msra.mxu0 %v2932_v23  ;;  %v2359_v23 = vunpack.c.h.s8.bf16 %v1303_v53 }
 0x5b8   : > { %4846 = vmatpush2.bf16.msra.mxu1 %v3316_v59  ;;  %4804 = vmatprep.subr.bf16.mxu0 %v2909_v60  ;;  %v1302_v59 = vld [vmem:[%s6790_s7 + $0x8d0] sm:$0xff]  ;;  %v1974_v60 = vunpack.c.h.s8.bf16 %v1110_v56 }
 0x5b9   : > { %4847 = vmatprep.subr.bf16.mxu1 %v3293_v9  ;;  %v2358_v9 = vunpack.c.h.s8.bf16 %v1302_v59  ;;  %v2334_v12 = vunpack.c.l.s8.bf16 %v1302_v59  ;;  %v1206_v59 = vld [vmem:[%s6790_s7 + $0x5d0] sm:$0xff] }
 0x5bb   : > { %4805 = vmatpush2.bf16.msra.mxu0 %v2908_v4  ;;  %v2335_v4 = vunpack.c.l.s8.bf16 %v1303_v53 }
 0x5bc   : > { %4848 = vmatpush2.bf16.msra.mxu1 %v3292_v5  ;;  %4806 = vmatprep.subr.bf16.mxu0 %v2885_v8  ;;  %v1279_v5 = vld [vmem:[%s6790_s7 + $0x818] sm:$0xff]  ;;  %v1950_v8 = vunpack.c.l.s8.bf16 %v1110_v56 }
 0x5bd   : > { %4849 = vmatprep.subr.bf16.mxu1 %v3269_v14  ;;  %v1927_v14 = vunpack.c.h.s8.bf16 %v1087_v1  ;;  %v2287_v24 = vunpack.c.l.s8.bf16 %v1279_v5 }
 0x5bf   : > { %4807 = vmatpush2.bf16.msra.mxu0 %v2884_v18  ;;  %v2311_v18 = vunpack.c.h.s8.bf16 %v1279_v5 }
 0x5c0   : > { %4850 = vmatpush2.bf16.msra.mxu1 %v3268_v21  ;;  %4808 = vmatprep.subr.bf16.mxu0 %v2861_v22  ;;  %v1278_v21 = vld [vmem:[%s6790_s7 + $0x810] sm:$0xff]  ;;  %v1926_v22 = vunpack.c.h.s8.bf16 %v1086_v17 }
 0x5c1   : > { %4851 = vmatprep.subr.bf16.mxu1 %v3245_v0  ;;  %v2310_v0 = vunpack.c.h.s8.bf16 %v1278_v21  ;;  %v2286_v43 = vunpack.c.l.s8.bf16 %v1278_v21  ;;  %v1182_v21 = vld [vmem:[%s6790_s7 + $0x510] sm:$0xff] }
 0x5c3   : > { %4809 = vmatpush2.bf16.msra.mxu0 %v2860_v25  ;;  %v1063_v25 = vld [vmem:[%s6790_s7 + $0x158] sm:$0xff] }
 0x5c4   : > { %4852 = vmatpush2.bf16.msra.mxu1 %v3244_v27  ;;  %4810 = vmatprep.subr.bf16.mxu0 %v2837_v28  ;;  %v1255_v27 = vld [vmem:[%s6790_s7 + $0x758] sm:$0xff]  ;;  %v1902_v28 = vunpack.c.l.s8.bf16 %v1086_v17  ;;  %v1855_v36 = vunpack.c.l.s8.bf16 %v1063_v25 }
 0x5c5   : > { %4853 = vmatprep.subr.bf16.mxu1 %v3221_v30  ;;  %v1879_v30 = vunpack.c.h.s8.bf16 %v1063_v25  ;;  %v2239_v37 = vunpack.c.l.s8.bf16 %v1255_v27 }
 0x5c7   : > { %4811 = vmatpush2.bf16.msra.mxu0 %v2836_v33  ;;  %v2263_v33 = vunpack.c.h.s8.bf16 %v1255_v27 }
 0x5c8   : > { %4854 = vmatpush2.bf16.msra.mxu1 %v3220_v35  ;;  %4812 = vmatprep.subr.bf16.mxu0 %v2813_v58  ;;  %v1254_v35 = vld [vmem:[%s6790_s7 + $0x750] sm:$0xff]  ;;  %v1878_v58 = vunpack.c.h.s8.bf16 %v1062_v32 }
 0x5c9   : > { %4855 = vmatprep.subr.bf16.mxu1 %v3197_v6  ;;  %v2262_v6 = vunpack.c.h.s8.bf16 %v1254_v35  ;;  %v2238_v62 = vunpack.c.l.s8.bf16 %v1254_v35  ;;  %v1158_v35 = vld [vmem:[%s6790_s7 + $0x450] sm:$0xff] }
 0x5cb   : > { %4813 = vmatpush2.bf16.msra.mxu0 %v2812_v38  ;;  %v1039_v38 = vld [vmem:[%s6790_s7 + $0x98] sm:$0xff] }
 0x5cc   : > { %4856 = vmatpush2.bf16.msra.mxu1 %v3196_v39  ;;  %4814 = vmatprep.subr.bf16.mxu0 %v2789_v57  ;;  %v1231_v39 = vld [vmem:[%s6790_s7 + $0x698] sm:$0xff]  ;;  %v1854_v57 = vunpack.c.l.s8.bf16 %v1062_v32  ;;  %v1807_v2 = vunpack.c.l.s8.bf16 %v1039_v38 }
 0x5cd   : > { %4857 = vmatprep.subr.bf16.mxu1 %v3173_v11  ;;  %v1831_v11 = vunpack.c.h.s8.bf16 %v1039_v38  ;;  %v2191_v53 = vunpack.c.l.s8.bf16 %v1231_v39 }
 0x5cf   : > { %4815 = vmatpush2.bf16.msra.mxu0 %v2788_v20  ;;  %v2215_v20 = vunpack.c.h.s8.bf16 %v1231_v39 }
 0x5d0   : > { %4858 = vmatpush2.bf16.msra.mxu1 %v3172_v48  ;;  %4816 = vmatprep.subr.bf16.mxu0 %v2765_v51  ;;  %v1230_v48 = vld [vmem:[%s6790_s7 + $0x690] sm:$0xff]  ;;  %v1830_v51 = vunpack.c.h.s8.bf16 %v1038_v45 }
 0x5d1   : > { %4859 = vmatprep.subr.bf16.mxu1 %v3149_v52  ;;  %v2214_v52 = vunpack.c.h.s8.bf16 %v1230_v48  ;;  %v2190_v56 = vunpack.c.l.s8.bf16 %v1230_v48 }
 0x5d3   : > { %4817 = vmatpush2.bf16.msra.mxu0 %v2764_v54  ;;  %v1207_v54 = vld [vmem:[%s6790_s7 + $0x5d8] sm:$0xff] }
 0x5d4   : > { %4860 = vmatpush2.bf16.msra.mxu1 %v3148_v63  ;;  %4872 = vmatprep.subr.bf16.mxu0 %v1975_v55  ;;  %v1399_v63 = vld [vmem:[%s6790_s7 + $0xbd8] sm:$0xff]  ;;  %v1806_v55 = vunpack.c.l.s8.bf16 %v1038_v45 }
 0x5d5   : > { %4915 = vmatprep.subr.bf16.mxu1 %v2359_v23  ;;  %v2167_v23 = vunpack.c.h.s8.bf16 %v1207_v54  ;;  %v2527_v5 = vunpack.c.l.s8.bf16 %v1399_v63 }
 0x5d6   : > { %4819 = vmatmul.mubr.bf16.vlgmr.msra.gmra.mxu0 %v6966_v47  ;;  %v4562_v45 = vpop.f32.mrf.mxu0 }
 0x5d7   : > { %4862 = vmatmul.mubr.bf16.vlgmr.msra.gmra.mxu1 %v6968_v50  ;;  %4873 = vmatpush1.bf16.msra.mxu0 %v1974_v60  ;;  %v2551_v60 = vunpack.c.h.s8.bf16 %v1399_v63 }
 0x5d8   : > { %4904 = vmatprep.mubr.bf16.mxu0 %v6882_v13  ;;  %4916 = vmatpush1.bf16.msra.mxu1 %v2358_v9  ;;  %v1398_v9 = vld [vmem:[%s6790_s7 + $0xbd0] sm:$0xff]  ;;  %v4564_v63 = vpop.f32.mrf.mxu0 }
 0x5d9   : > { %4947 = vmatprep.mubr.bf16.mxu1 %v6886_v16  ;;  %4874 = vmatprep.subr.bf16.mxu0 %v1951_v61  ;;  %v2166_v61 = vunpack.c.h.s8.bf16 %v1206_v59  ;;  %v2550_v1 = vunpack.c.h.s8.bf16 %v1398_v9  ;;  %v2526_v17 = vunpack.c.l.s8.bf16 %v1398_v9  ;;  %v1687_v9 = vld [vmem:[%s6790_s7 + $0x14d8] sm:$0xff] }
 0x5da   : > { %4917 = vmatprep.subr.bf16.mxu1 %v2335_v4  ;;  %v2143_v4 = vunpack.c.l.s8.bf16 %v1207_v54 }
 0x5db   : > { %4875 = vmatpush1.bf16.msra.mxu0 %v1950_v8  ;;  %v1183_v8 = vld [vmem:[%s6790_s7 + $0x518] sm:$0xff] }
 0x5dc   : > { %4918 = vmatpush1.bf16.msra.mxu1 %v2334_v12  ;;  %4876 = vmatprep.subr.bf16.mxu0 %v1927_v14  ;;  %v1375_v12 = vld [vmem:[%s6790_s7 + $0xb18] sm:$0xff]  ;;  %v2142_v14 = vunpack.c.l.s8.bf16 %v1206_v59  ;;  %v2095_v25 = vunpack.c.l.s8.bf16 %v1183_v8 }
 0x5dd   : > { %4919 = vmatprep.subr.bf16.mxu1 %v2311_v18  ;;  %v2119_v18 = vunpack.c.h.s8.bf16 %v1183_v8  ;;  %v2479_v27 = vunpack.c.l.s8.bf16 %v1375_v12  ;;  %v1494_v8 = vld [vmem:[%s6790_s7 + $0xed0] sm:$0xff] }
 0x5df   : > { %4877 = vmatpush1.bf16.msra.mxu0 %v1926_v22  ;;  %v2503_v22 = vunpack.c.h.s8.bf16 %v1375_v12 }
 0x5e0   : > { %4920 = vmatpush1.bf16.msra.mxu1 %v2310_v0  ;;  %4878 = vmatprep.subr.bf16.mxu0 %v1903_v10  ;;  %v1374_v0 = vld [vmem:[%s6790_s7 + $0xb10] sm:$0xff]  ;;  %v2118_v10 = vunpack.c.h.s8.bf16 %v1182_v21 }
 0x5e1   : > { %4921 = vmatprep.subr.bf16.mxu1 %v2287_v24  ;;  %v2502_v24 = vunpack.c.h.s8.bf16 %v1374_v0  ;;  %v2478_v32 = vunpack.c.l.s8.bf16 %v1374_v0 }
 0x5e3   : > { %4879 = vmatpush1.bf16.msra.mxu0 %v1902_v28  ;;  %v1159_v28 = vld [vmem:[%s6790_s7 + $0x458] sm:$0xff] }
 0x5e4   : > { %4922 = vmatpush1.bf16.msra.mxu1 %v2286_v43  ;;  %4880 = vmatprep.subr.bf16.mxu0 %v1879_v30  ;;  %v1351_v43 = vld [vmem:[%s6790_s7 + $0xa58] sm:$0xff]  ;;  %v2094_v30 = vunpack.c.l.s8.bf16 %v1182_v21  ;;  %v2047_v38 = vunpack.c.l.s8.bf16 %v1159_v28 }
 0x5e5   : > { %4923 = vmatprep.subr.bf16.mxu1 %v2263_v33  ;;  %v2071_v33 = vunpack.c.h.s8.bf16 %v1159_v28  ;;  %v2431_v39 = vunpack.c.l.s8.bf16 %v1351_v43  ;;  %v3103_v28 = vunpack.c.l.s8.bf16 %v1687_v9 }
 0x5e7   : > { %4881 = vmatpush1.bf16.msra.mxu0 %v1878_v58  ;;  %v2455_v58 = vunpack.c.h.s8.bf16 %v1351_v43  ;;  %v1663_v43 = vld [vmem:[%s6790_s7 + $0x1418] sm:$0xff] }
 0x5e8   : > { %4924 = vmatpush1.bf16.msra.mxu1 %v2262_v6  ;;  %4882 = vmatprep.subr.bf16.mxu0 %v1855_v36  ;;  %v1350_v6 = vld [vmem:[%s6790_s7 + $0xa50] sm:$0xff]  ;;  %v2070_v36 = vunpack.c.h.s8.bf16 %v1158_v35 }
 0x5e9   : > { %4925 = vmatprep.subr.bf16.mxu1 %v2239_v37  ;;  %v2454_v37 = vunpack.c.h.s8.bf16 %v1350_v6 }
 0x5eb   : > { %4883 = vmatpush1.bf16.msra.mxu0 %v1854_v57  ;;  %v1135_v57 = vld [vmem:[%s6790_s7 + $0x398] sm:$0xff] }
 0x5ec   : > { %4926 = vmatpush1.bf16.msra.mxu1 %v2238_v62  ;;  %4884 = vmatprep.subr.bf16.mxu0 %v1831_v11  ;;  %v1327_v62 = vld [vmem:[%s6790_s7 + $0x998] sm:$0xff]  ;;  %v2046_v11 = vunpack.c.l.s8.bf16 %v1158_v35  ;;  %v2023_v48 = vunpack.c.h.s8.bf16 %v1135_v57  ;;  %v5453_v35 = vrot.slane %v7613_v26, %v6948_v7 }
 0x5ed   : > { %4927 = vmatprep.subr.bf16.mxu1 %v2215_v20  ;;  %v2430_v20 = vunpack.c.l.s8.bf16 %v1350_v6  ;;  %v2383_v59 = vunpack.c.l.s8.bf16 %v1327_v62  ;;  %v1470_v6 = vld [vmem:[%s6790_s7 + $0xe10] sm:$0xff] }
 0x5ef   : > { %4885 = vmatpush1.bf16.msra.mxu0 %v1830_v51  ;;  %v1134_v51 = vld [vmem:[%s6790_s7 + $0x390] sm:$0xff] }
 0x5f0   : > { %4928 = vmatpush1.bf16.msra.mxu1 %v2214_v52  ;;  %4886 = vmatprep.subr.bf16.mxu0 %v1807_v2  ;;  %v4605_v52 = vpop.f32.mrf.mxu1  ;;  %v2407_v2 = vunpack.c.h.s8.bf16 %v1327_v62  ;;  %v2022_v54 = vunpack.c.h.s8.bf16 %v1134_v51 }
 0x5f1   : > { %4929 = vmatprep.subr.bf16.mxu1 %v2191_v53  ;;  %v1326_v53 = vld [vmem:[%s6790_s7 + $0x990] sm:$0xff]  ;;  %v4606_v0 = vadd.f32 %v4605_v52, %v4562_v45  ;;  %v5631_v52 = vrot.slane %v7620_v29, %v6908_v49 }
 0x5f3   : > { %4887 = vmatpush1.bf16.msra.mxu0 %v1806_v55  ;;  %v2406_v55 = vunpack.c.h.s8.bf16 %v1326_v53 }
 0x5f4   : > { %4930 = vmatpush1.bf16.msra.mxu1 %v2190_v56  ;;  %4888 = vmatprep.subr.bf16.mxu0 %v2167_v23  ;;  %v1999_v56 = vunpack.c.l.s8.bf16 %v1135_v57  ;;  %v4607_v23 = vpop.f32.mrf.mxu1 }
 0x5f5   : > { %4931 = vmatprep.subr.bf16.mxu1 %v2551_v60  ;;  %v1495_v60 = vld [vmem:[%s6790_s7 + $0xed8] sm:$0xff] }
 0x5f6   : > { %v4609_v12 = vpop.f32.mrf.mxu1 }
 0x5f7   : > { %4889 = vmatpush2.bf16.msra.mxu0 %v2166_v61  ;;  %v1998_v61 = vunpack.c.l.s8.bf16 %v1134_v51  ;;  %v1662_v51 = vld [vmem:[%s6790_s7 + $0x1410] sm:$0xff] }
 0x5f8   : > { %4932 = vmatpush2.bf16.msra.mxu1 %v2550_v1  ;;  %4890 = vmatprep.subr.bf16.mxu0 %v2143_v4  ;;  %v4566_v1 = vpop.f32.mrf.mxu0  ;;  %v2382_v4 = vunpack.c.l.s8.bf16 %v1326_v53  ;;  %v2694_v53 = vunpack.c.h.s8.bf16 %v1470_v6 }
 0x5f9   : > { %4933 = vmatprep.subr.bf16.mxu1 %v2527_v5  ;;  %v2743_v5 = vunpack.c.h.s8.bf16 %v1495_v60  ;;  %v4610_v62 = vadd.f32 %v4609_v12, %v4566_v1  ;;  %v2670_v12 = vunpack.c.l.s8.bf16 %v1470_v6  ;;  %v1615_v6 = vld [vmem:[%s6790_s7 + $0x1298] sm:$0xff] }
 0x5fa   : > { %v4568_v21 = vpop.f32.mrf.mxu0 }
 0x5fb   : > { %4891 = vmatpush2.bf16.msra.mxu0 %v2142_v14  ;;  %v3127_v14 = vunpack.c.h.s8.bf16 %v1687_v9  ;;  %v3055_v9 = vunpack.c.l.s8.bf16 %v1663_v43 }
 0x5fc   : > { %4934 = vmatpush2.bf16.msra.mxu1 %v2526_v17  ;;  %4892 = vmatprep.subr.bf16.mxu0 %v2119_v18  ;;  %v1686_v17 = vld [vmem:[%s6790_s7 + $0x14d0] sm:$0xff]  ;;  %v2742_v18 = vunpack.c.h.s8.bf16 %v1494_v8 }
 0x5fd   : > { %4935 = vmatprep.subr.bf16.mxu1 %v2503_v22  ;;  %v3126_v22 = vunpack.c.h.s8.bf16 %v1686_v17 }
 0x5ff   : > { %4893 = vmatpush2.bf16.msra.mxu0 %v2118_v10  ;;  %v4611_v10 = vpop.f32.mrf.mxu1 }
 0x600   : > { %4936 = vmatpush2.bf16.msra.mxu1 %v2502_v24  ;;  %4894 = vmatprep.subr.bf16.mxu0 %v2095_v25  ;;  %v2719_v24 = vunpack.c.l.s8.bf16 %v1495_v60  ;;  %v1471_v25 = vld [vmem:[%s6790_s7 + $0xe18] sm:$0xff] }
 0x601   : > { %4937 = vmatprep.subr.bf16.mxu1 %v2479_v27  ;;  %v2695_v57 = vunpack.c.h.s8.bf16 %v1471_v25  ;;  %v2671_v60 = vunpack.c.l.s8.bf16 %v1471_v25 }
 0x603   : > { %4895 = vmatpush2.bf16.msra.mxu0 %v2094_v30  ;;  %v4608_v30 = vadd.f32 %v4607_v23, %v4564_v63 }
 0x604   : > { %4938 = vmatpush2.bf16.msra.mxu1 %v2478_v32  ;;  %4896 = vmatprep.subr.bf16.mxu0 %v2071_v33 }
 0x605   : > { %4939 = vmatprep.subr.bf16.mxu1 %v2455_v58  ;;  %v2718_v58 = vunpack.c.l.s8.bf16 %v1494_v8 }
 0x607   : > { %4897 = vmatpush2.bf16.msra.mxu0 %v2070_v36  ;;  %v5627_v36 = vrot.slane %v7620_v29, %v6948_v7 }
 0x608   : > { %4940 = vmatpush2.bf16.msra.mxu1 %v2454_v37  ;;  %4898 = vmatprep.subr.bf16.mxu0 %v2047_v38  ;;  %v5457_v38 = vrot.slane %v7613_v26, %v6908_v49 }
 0x609   : > { %4941 = vmatprep.subr.bf16.mxu1 %v2431_v39  ;;  %v3102_v39 = vunpack.c.l.s8.bf16 %v1686_v17 }
 0x60b   : > { %4899 = vmatpush2.bf16.msra.mxu0 %v2046_v11 }
 0x60c   : > { %4942 = vmatpush2.bf16.msra.mxu1 %v2430_v20  ;;  %4900 = vmatprep.subr.bf16.mxu0 %v2023_v48  ;;  %v3079_v48 = vunpack.c.h.s8.bf16 %v1663_v43 }
 0x60d   : > { %4943 = vmatprep.subr.bf16.mxu1 %v2407_v2 }
 0x60f   : > { %4901 = vmatpush2.bf16.msra.mxu0 %v2022_v54  ;;  %v4612_v54 = vadd.f32 %v4611_v10, %v4568_v21  ;;  %v1446_v10 = vld [vmem:[%s6790_s7 + $0xd50] sm:$0xff] }
 0x610   : > { %4944 = vmatpush2.bf16.msra.mxu1 %v2406_v55  ;;  %4902 = vmatprep.subr.bf16.mxu0 %v1999_v56 }
 0x611   : > { %4945 = vmatprep.subr.bf16.mxu1 %v2383_v59  ;;  %v3078_v59 = vunpack.c.h.s8.bf16 %v1662_v51 }
 0x613   : > { %4903 = vmatpush2.bf16.msra.mxu0 %v1998_v61 }
 0x614   : > { %4946 = vmatpush2.bf16.msra.mxu1 %v2382_v4  ;;  %4958 = vmatprep.subr.bf16.mxu0 %v2743_v5  ;;  %v1447_v5 = vld [vmem:[%s6790_s7 + $0xd58] sm:$0xff] }
 0x615   : > { %5001 = vmatprep.subr.bf16.mxu1 %v3127_v14  ;;  %v1639_v14 = vld [vmem:[%s6790_s7 + $0x1358] sm:$0xff] }
 0x616   : > { %v4648_v27 = vpop.f32.mrf.mxu0  ;;  %4905 = vmatmul.mubr.bf16.vlgmr.msra.gmra.mxu0 %v6884_v15 }
 0x617   : > { %v4649_v32 = vadd.f32 %v4648_v27, %v4606_v0  ;;  %v4691_v33 = vpop.f32.mrf.mxu1  ;;  %4948 = vmatmul.mubr.bf16.vlgmr.msra.gmra.mxu1 %v6889_v19  ;;  %4959 = vmatpush1.bf16.msra.mxu0 %v2742_v18  ;;  %v2647_v0 = vunpack.c.h.s8.bf16 %v1447_v5  ;;  %v3031_v27 = vunpack.c.h.s8.bf16 %v1639_v14 }
 0x618   : > { %4990 = vmatprep.mubr.bf16.mxu0 %v6930_v31  ;;  %5002 = vmatpush1.bf16.msra.mxu1 %v3126_v22  ;;  %v4650_v37 = vpop.f32.mrf.mxu0  ;;  %v3054_v22 = vunpack.c.l.s8.bf16 %v1662_v51  ;;  %v2959_v51 = vunpack.c.l.s8.bf16 %v1615_v6 }
 0x619   : > { %v4692_v11 = vadd.f32 %v4691_v33, %v4649_v32  ;;  %5033 = vmatprep.mubr.bf16.mxu1 %v6932_v34  ;;  %v4651_v45 = vadd.f32 %v4650_v37, %v4608_v30  ;;  %v4693_v20 = vpop.f32.mrf.mxu1  ;;  %4960 = vmatprep.subr.bf16.mxu0 %v2719_v24  ;;  %v2646_v30 = vunpack.c.h.s8.bf16 %v1446_v10  ;;  %v2623_v33 = vunpack.c.l.s8.bf16 %v1447_v5  ;;  %v1759_v5 = vld [vmem:[%s6790_s7 + $0x1718] sm:$0xff] }
 0x61a   : > { %v4652_v2 = vpop.f32.mrf.mxu0  ;;  %5003 = vmatprep.subr.bf16.mxu1 %v3103_v28  ;;  %v1638_v28 = vld [vmem:[%s6790_s7 + $0x1350] sm:$0xff] }
 0x61b   : > { %v5528_v63 = vmul.f32 %v5453_v35, %v4692_v11  ;;  %v4694_v26 = vadd.f32 %v4693_v20, %v4651_v45  ;;  %v4653_v55 = vadd.f32 %v4652_v2, %v4610_v62  ;;  %v4695_v56 = vpop.f32.mrf.mxu1  ;;  %4961 = vmatpush1.bf16.msra.mxu0 %v2718_v58  ;;  %v3030_v32 = vunpack.c.h.s8.bf16 %v1638_v28  ;;  %v1423_v58 = vld [vmem:[%s6790_s7 + $0xc98] sm:$0xff]  ;;  %v1614_v62 = vld [vmem:[%s6790_s7 + $0x1290] sm:$0xff] }
 0x61c   : > { %5004 = vmatpush1.bf16.msra.mxu1 %v3102_v39  ;;  %v4654_v23 = vpop.f32.mrf.mxu0  ;;  %4962 = vmatprep.subr.bf16.mxu0 %v2695_v57  ;;  %v3006_v37 = vunpack.c.l.s8.bf16 %v1638_v28  ;;  %v1422_v39 = vld [vmem:[%s6790_s7 + $0xc90] sm:$0xff]  ;;  %v2983_v57 = vunpack.c.h.s8.bf16 %v1615_v6  ;;  %v2982_v20 = vunpack.c.h.s8.bf16 %v1614_v62 }
 0x61d   : > { %v5702_v61 = vadd.f32 %v5627_v36, %v5528_v63  ;;  %v5529_v1 = vmul.f32 %v5457_v38, %v4694_v26  ;;  %v4696_v29 = vadd.f32 %v4695_v56, %v4653_v55  ;;  %v4655_v4 = vadd.f32 %v4654_v23, %v4612_v54  ;;  %5005 = vmatprep.subr.bf16.mxu1 %v3079_v48  ;;  %v4697_v8 = vpop.f32.mrf.mxu1  ;;  %v1590_v56 = vld [vmem:[%s6790_s7 + $0x11d0] sm:$0xff] }
 0x61e   : > { %v2598_v11 = vunpack.c.h.s8.bf16 %v1422_v39  ;;  %v2575_v48 = vunpack.c.l.s8.bf16 %v1423_v58  ;;  %v2574_v54 = vunpack.c.l.s8.bf16 %v1422_v39  ;;  %v2958_v26 = vunpack.c.l.s8.bf16 %v1614_v62  ;;  %v1711_v39 = vld [vmem:[%s6790_s7 + $0x1598] sm:$0xff] }
 0x61f   : > { %6239 = vtanh.f32 %v5702_v61  ;;  %v5703_v17 = vadd.f32 %v5631_v52, %v5529_v1  ;;  %v5552_v18 = vmul.f32 %v5453_v35, %v4696_v29  ;;  %v4698_v21 = vadd.f32 %v4697_v8, %v4655_v4  ;;  %4963 = vmatpush1.bf16.msra.mxu0 %v2694_v53  ;;  %v1783_v53 = vld [vmem:[%s6790_s7 + $0x17d8] sm:$0xff] }
 0x620   : > { %5006 = vmatpush1.bf16.msra.mxu1 %v3078_v59  ;;  %4964 = vmatprep.subr.bf16.mxu0 %v2671_v60  ;;  %v3007_v35 = vunpack.c.l.s8.bf16 %v1639_v14  ;;  %v3319_v23 = vunpack.c.h.s8.bf16 %v1783_v53  ;;  %v1782_v59 = vld [vmem:[%s6790_s7 + $0x17d0] sm:$0xff]  ;;  %v3295_v29 = vunpack.c.l.s8.bf16 %v1783_v53  ;;  %v1567_v4 = vld [vmem:[%s6790_s7 + $0x1118] sm:$0xff]  ;;  %v2910_v8 = vunpack.c.l.s8.bf16 %v1590_v56 }
 0x621   : > { %6241 = vtanh.f32 %v5703_v17  ;;  %v5726_v24 = vadd.f32 %v5627_v36, %v5552_v18  ;;  %v5553_v25 = vmul.f32 %v5457_v38, %v4698_v21  ;;  %5007 = vmatprep.subr.bf16.mxu1 %v3055_v9  ;;  %v2622_v36 = vunpack.c.l.s8.bf16 %v1446_v10  ;;  %v1566_v17 = vld [vmem:[%s6790_s7 + $0x1110] sm:$0xff] }
 0x622   : > { %v2599_v38 = vunpack.c.h.s8.bf16 %v1423_v58  ;;  %v2934_v9 = vunpack.c.h.s8.bf16 %v1590_v56  ;;  %v3318_v61 = vunpack.c.h.s8.bf16 %v1782_v59  ;;  %v2887_v14 = vunpack.c.h.s8.bf16 %v1567_v4  ;;  %v1758_v21 = vld [vmem:[%s6790_s7 + $0x1710] sm:$0xff] }
 0x623   : > { %6243 = vtanh.f32 %v5726_v24  ;;  %v5727_v43 = vadd.f32 %v5631_v52, %v5553_v25  ;;  %4965 = vmatpush1.bf16.msra.mxu0 %v2670_v12  ;;  %v1591_v52 = vld [vmem:[%s6790_s7 + $0x11d8] sm:$0xff]  ;;  %v3294_v12 = vunpack.c.l.s8.bf16 %v1782_v59  ;;  %v3271_v18 = vunpack.c.h.s8.bf16 %v1759_v5 }
 0x624   : > { %5008 = vmatpush1.bf16.msra.mxu1 %v3054_v22  ;;  %4966 = vmatprep.subr.bf16.mxu0 %v2647_v0  ;;  %v2935_v55 = vunpack.c.h.s8.bf16 %v1591_v52  ;;  %v2911_v1 = vunpack.c.l.s8.bf16 %v1591_v52  ;;  %v2886_v22 = vunpack.c.h.s8.bf16 %v1566_v17  ;;  %v3270_v0 = vunpack.c.h.s8.bf16 %v1758_v21  ;;  %v1543_v25 = vld [vmem:[%s6790_s7 + $0x1058] sm:$0xff] }
 0x625   : > { %6245 = vtanh.f32 %v5727_v43  ;;  %5009 = vmatprep.subr.bf16.mxu1 %v3031_v27  ;;  %v2863_v10 = vunpack.c.l.s8.bf16 %v1567_v4  ;;  %v3247_v24 = vunpack.c.l.s8.bf16 %v1759_v5  ;;  %v1735_v27 = vld [vmem:[%s6790_s7 + $0x1658] sm:$0xff]  ;;  %v2862_v28 = vunpack.c.l.s8.bf16 %v1566_v17  ;;  %v1281_v5 = vld [vmem:[%s6790_s7 + $0x828] sm:$0xff]  ;;  %v1088_v17 = vld [vmem:[%s6790_s7 + $0x220] sm:$0xff] }
 0x626   : > { %v3246_v43 = vunpack.c.l.s8.bf16 %v1758_v21  ;;  %v3151_v53 = vunpack.c.l.s8.bf16 %v1711_v39  ;;  %v1280_v21 = vld [vmem:[%s6790_s7 + $0x820] sm:$0xff] }
 0x627   : > { %4967 = vmatpush1.bf16.msra.mxu0 %v2646_v30  ;;  %v2839_v30 = vunpack.c.h.s8.bf16 %v1543_v25 }
 0x628   : > { %5010 = vmatpush1.bf16.msra.mxu1 %v3030_v32  ;;  %4968 = vmatprep.subr.bf16.mxu0 %v2623_v33  ;;  %v1542_v32 = vld [vmem:[%s6790_s7 + $0x1050] sm:$0xff]  ;;  %v3223_v33 = vunpack.c.h.s8.bf16 %v1735_v27 }
 0x629   : > { %5011 = vmatprep.subr.bf16.mxu1 %v3007_v35  ;;  %v1734_v35 = vld [vmem:[%s6790_s7 + $0x1650] sm:$0xff]  ;;  %v2838_v58 = vunpack.c.h.s8.bf16 %v1542_v32 }
 0x62a   : > { %v3222_v6 = vunpack.c.h.s8.bf16 %v1734_v35  ;;  %v3198_v62 = vunpack.c.l.s8.bf16 %v1734_v35  ;;  %v1256_v35 = vld [vmem:[%s6790_s7 + $0x760] sm:$0xff] }
 0x62b   : > { %4969 = vmatpush1.bf16.msra.mxu0 %v2622_v36  ;;  %v2815_v36 = vunpack.c.l.s8.bf16 %v1543_v25  ;;  %v1065_v25 = vld [vmem:[%s6790_s7 + $0x168] sm:$0xff] }
 0x62c   : > { %v6240_v45 = vpop.eup %6239  ;;  %5012 = vmatpush1.bf16.msra.mxu1 %v3006_v37  ;;  %4970 = vmatprep.subr.bf16.mxu0 %v2599_v38  ;;  %v3199_v37 = vunpack.c.l.s8.bf16 %v1735_v27  ;;  %v1519_v38 = vld [vmem:[%s6790_s7 + $0xf98] sm:$0xff]  ;;  %v1257_v27 = vld [vmem:[%s6790_s7 + $0x768] sm:$0xff] }
 0x62d   : > { %5798 = vst [vmem:[%s7109_s17 + $0x70] sm:$0xff] %v6240_v45  ;;  %5013 = vmatprep.subr.bf16.mxu1 %v2983_v57  ;;  %v2814_v57 = vunpack.c.l.s8.bf16 %v1542_v32  ;;  %v1518_v45 = vld [vmem:[%s6790_s7 + $0xf90] sm:$0xff]  ;;  %v1064_v32 = vld [vmem:[%s6790_s7 + $0x160] sm:$0xff] }
 0x62e   : > { %v6242_v2 = vpop.eup %6241 }
 0x62f   : > { %5799 = vst [vmem:[%s7109_s17 + $0x78] sm:$0xff] %v6242_v2  ;;  %4971 = vmatpush1.bf16.msra.mxu0 %v2598_v11  ;;  %v2791_v11 = vunpack.c.h.s8.bf16 %v1519_v38  ;;  %v2767_v2 = vunpack.c.l.s8.bf16 %v1519_v38  ;;  %v1041_v38 = vld [vmem:[%s6790_s7 + $0xa8] sm:$0xff] }
 0x630   : > { %v6244_v63 = vpop.eup %6243  ;;  %5014 = vmatpush1.bf16.msra.mxu1 %v2982_v20  ;;  %4972 = vmatprep.subr.bf16.mxu0 %v2575_v48  ;;  %v3175_v20 = vunpack.c.h.s8.bf16 %v1711_v39  ;;  %v1710_v48 = vld [vmem:[%s6790_s7 + $0x1590] sm:$0xff]  ;;  %v1233_v39 = vld [vmem:[%s6790_s7 + $0x6a8] sm:$0xff] }
 0x631   : > { %5822 = vst [vmem:[%s7109_s17 + $0x130] sm:$0xff] %v6244_v63  ;;  %5015 = vmatprep.subr.bf16.mxu1 %v2959_v51  ;;  %v2790_v51 = vunpack.c.h.s8.bf16 %v1518_v45  ;;  %v3174_v52 = vunpack.c.h.s8.bf16 %v1710_v48  ;;  %v1305_v63 = vld [vmem:[%s6790_s7 + $0x8e8] sm:$0xff] }
 0x632   : > { %v6246_v60 = vpop.eup %6245  ;;  %v2361_v59 = vunpack.c.h.s8.bf16 %v1305_v63  ;;  %v2337_v4 = vunpack.c.l.s8.bf16 %v1305_v63  ;;  %v1401_v63 = vld [vmem:[%s6790_s7 + $0xbe8] sm:$0xff] }
 0x633   : > { %5823 = vst [vmem:[%s7109_s17 + $0x138] sm:$0xff] %v6246_v60  ;;  %4973 = vmatpush1.bf16.msra.mxu0 %v2574_v54  ;;  %v1113_v54 = vld [vmem:[%s6790_s7 + $0x2e8] sm:$0xff]  ;;  %v1304_v60 = vld [vmem:[%s6790_s7 + $0x8e0] sm:$0xff] }
 0x634   : > { %5016 = vmatpush1.bf16.msra.mxu1 %v2958_v26  ;;  %4974 = vmatprep.subr.bf16.mxu0 %v2935_v55  ;;  %v2766_v26 = vunpack.c.l.s8.bf16 %v1518_v45  ;;  %v3150_v55 = vunpack.c.l.s8.bf16 %v1710_v48  ;;  %v1977_v56 = vunpack.c.h.s8.bf16 %v1113_v54  ;;  %v1040_v45 = vld [vmem:[%s6790_s7 + $0xa0] sm:$0xff] }
 0x635   : > { %5017 = vmatprep.subr.bf16.mxu1 %v3319_v23  ;;  %v1112_v23 = vld [vmem:[%s6790_s7 + $0x2e0] sm:$0xff] }
 0x636   : > { %v1232_v48 = vld [vmem:[%s6790_s7 + $0x6a0] sm:$0xff] }
 0x637   : > { %4975 = vmatpush2.bf16.msra.mxu0 %v2934_v9  ;;  %v1976_v9 = vunpack.c.h.s8.bf16 %v1112_v23 }
 0x638   : > { %5018 = vmatpush2.bf16.msra.mxu1 %v3318_v61  ;;  %4976 = vmatprep.subr.bf16.mxu0 %v2911_v1  ;;  %v2360_v61 = vunpack.c.h.s8.bf16 %v1304_v60  ;;  %v1953_v1 = vunpack.c.l.s8.bf16 %v1113_v54  ;;  %v1209_v54 = vld [vmem:[%s6790_s7 + $0x5e8] sm:$0xff] }
 0x639   : > { %5019 = vmatprep.subr.bf16.mxu1 %v3295_v29  ;;  %v1089_v29 = vld [vmem:[%s6790_s7 + $0x228] sm:$0xff] }
 0x63b   : > { %4977 = vmatpush2.bf16.msra.mxu0 %v2910_v8  ;;  %v1952_v8 = vunpack.c.l.s8.bf16 %v1112_v23  ;;  %v1208_v23 = vld [vmem:[%s6790_s7 + $0x5e0] sm:$0xff] }
 0x63c   : > { %5020 = vmatpush2.bf16.msra.mxu1 %v3294_v12  ;;  %4978 = vmatprep.subr.bf16.mxu0 %v2887_v14  ;;  %v2336_v12 = vunpack.c.l.s8.bf16 %v1304_v60  ;;  %v1929_v14 = vunpack.c.h.s8.bf16 %v1089_v29  ;;  %v1400_v60 = vld [vmem:[%s6790_s7 + $0xbe0] sm:$0xff] }
 0x63d   : > { %5021 = vmatprep.subr.bf16.mxu1 %v3271_v18  ;;  %v2313_v18 = vunpack.c.h.s8.bf16 %v1281_v5 }
 0x63f   : > { %4979 = vmatpush2.bf16.msra.mxu0 %v2886_v22  ;;  %v1928_v22 = vunpack.c.h.s8.bf16 %v1088_v17 }
 0x640   : > { %5022 = vmatpush2.bf16.msra.mxu1 %v3270_v0  ;;  %4980 = vmatprep.subr.bf16.mxu0 %v2863_v10  ;;  %v2312_v0 = vunpack.c.h.s8.bf16 %v1280_v21  ;;  %v1905_v10 = vunpack.c.l.s8.bf16 %v1089_v29  ;;  %v2529_v29 = vunpack.c.l.s8.bf16 %v1401_v63 }
 0x641   : > { %5023 = vmatprep.subr.bf16.mxu1 %v3247_v24  ;;  %v2289_v24 = vunpack.c.l.s8.bf16 %v1281_v5  ;;  %v1377_v5 = vld [vmem:[%s6790_s7 + $0xb28] sm:$0xff] }
 0x643   : > { %4981 = vmatpush2.bf16.msra.mxu0 %v2862_v28  ;;  %v1904_v28 = vunpack.c.l.s8.bf16 %v1088_v17  ;;  %v1184_v17 = vld [vmem:[%s6790_s7 + $0x520] sm:$0xff] }
 0x644   : > { %5024 = vmatpush2.bf16.msra.mxu1 %v3246_v43  ;;  %4982 = vmatprep.subr.bf16.mxu0 %v2839_v30  ;;  %v2288_v43 = vunpack.c.l.s8.bf16 %v1280_v21  ;;  %v1881_v30 = vunpack.c.h.s8.bf16 %v1065_v25  ;;  %v1376_v21 = vld [vmem:[%s6790_s7 + $0xb20] sm:$0xff] }
 0x645   : > { %5025 = vmatprep.subr.bf16.mxu1 %v3223_v33  ;;  %v2265_v33 = vunpack.c.h.s8.bf16 %v1257_v27 }
 0x647   : > { %4983 = vmatpush2.bf16.msra.mxu0 %v2838_v58  ;;  %v1880_v58 = vunpack.c.h.s8.bf16 %v1064_v32 }
 0x648   : > { %5026 = vmatpush2.bf16.msra.mxu1 %v3222_v6  ;;  %4984 = vmatprep.subr.bf16.mxu0 %v2815_v36  ;;  %v2264_v6 = vunpack.c.h.s8.bf16 %v1256_v35  ;;  %v1857_v36 = vunpack.c.l.s8.bf16 %v1065_v25  ;;  %v1161_v25 = vld [vmem:[%s6790_s7 + $0x468] sm:$0xff] }
 0x649   : > { %5027 = vmatprep.subr.bf16.mxu1 %v3199_v37  ;;  %v2241_v37 = vunpack.c.l.s8.bf16 %v1257_v27  ;;  %v1353_v27 = vld [vmem:[%s6790_s7 + $0xa68] sm:$0xff] }
 0x64b   : > { %4985 = vmatpush2.bf16.msra.mxu0 %v2814_v57  ;;  %v1856_v57 = vunpack.c.l.s8.bf16 %v1064_v32  ;;  %v1160_v32 = vld [vmem:[%s6790_s7 + $0x460] sm:$0xff] }
 0x64c   : > { %5028 = vmatpush2.bf16.msra.mxu1 %v3198_v62  ;;  %4986 = vmatprep.subr.bf16.mxu0 %v2791_v11  ;;  %v2240_v62 = vunpack.c.l.s8.bf16 %v1256_v35  ;;  %v1833_v11 = vunpack.c.h.s8.bf16 %v1041_v38  ;;  %v1352_v35 = vld [vmem:[%s6790_s7 + $0xa60] sm:$0xff] }
 0x64d   : > { %5029 = vmatprep.subr.bf16.mxu1 %v3175_v20  ;;  %v2217_v20 = vunpack.c.h.s8.bf16 %v1233_v39 }
 0x64f   : > { %4987 = vmatpush2.bf16.msra.mxu0 %v2790_v51  ;;  %v1832_v51 = vunpack.c.h.s8.bf16 %v1040_v45 }
 0x650   : > { %5030 = vmatpush2.bf16.msra.mxu1 %v3174_v52  ;;  %4988 = vmatprep.subr.bf16.mxu0 %v2767_v2  ;;  %v2216_v52 = vunpack.c.h.s8.bf16 %v1232_v48  ;;  %v1809_v2 = vunpack.c.l.s8.bf16 %v1041_v38  ;;  %v1137_v38 = vld [vmem:[%s6790_s7 + $0x3a8] sm:$0xff] }
 0x651   : > { %5031 = vmatprep.subr.bf16.mxu1 %v3151_v53  ;;  %v2193_v53 = vunpack.c.l.s8.bf16 %v1233_v39  ;;  %v1329_v39 = vld [vmem:[%s6790_s7 + $0x9a8] sm:$0xff] }
 0x653   : > { %4989 = vmatpush2.bf16.msra.mxu0 %v2766_v26  ;;  %v1808_v26 = vunpack.c.l.s8.bf16 %v1040_v45  ;;  %v2025_v45 = vunpack.c.h.s8.bf16 %v1137_v38 }
 0x654   : > { %5032 = vmatpush2.bf16.msra.mxu1 %v3150_v55  ;;  %5044 = vmatprep.subr.bf16.mxu0 %v1977_v56  ;;  %v2192_v55 = vunpack.c.l.s8.bf16 %v1232_v48  ;;  %v2169_v56 = vunpack.c.h.s8.bf16 %v1209_v54 }
 0x655   : > { %5087 = vmatprep.subr.bf16.mxu1 %v2361_v59  ;;  %v2553_v59 = vunpack.c.h.s8.bf16 %v1401_v63  ;;  %v2001_v63 = vunpack.c.l.s8.bf16 %v1137_v38 }
 0x656   : > { %4991 = vmatmul.mubr.bf16.vlgmr.msra.gmra.mxu0 %v6966_v47 }
 0x657   : > { %5034 = vmatmul.mubr.bf16.vlgmr.msra.gmra.mxu1 %v6968_v50  ;;  %5045 = vmatpush1.bf16.msra.mxu0 %v1976_v9  ;;  %v2168_v9 = vunpack.c.h.s8.bf16 %v1208_v23  ;;  %v4777_v48 = vpop.f32.mrf.mxu1 }
 0x658   : > { %5076 = vmatprep.mubr.bf16.mxu0 %v6882_v13  ;;  %5088 = vmatpush1.bf16.msra.mxu1 %v2360_v61  ;;  %v2552_v61 = vunpack.c.h.s8.bf16 %v1400_v60 }
 0x659   : > { %5119 = vmatprep.mubr.bf16.mxu1 %v6886_v16  ;;  %5046 = vmatprep.subr.bf16.mxu0 %v1953_v1  ;;  %v2145_v1 = vunpack.c.l.s8.bf16 %v1209_v54 }
 0x65a   : > { %5089 = vmatprep.subr.bf16.mxu1 %v2337_v4  ;;  %v1185_v4 = vld [vmem:[%s6790_s7 + $0x528] sm:$0xff] }
 0x65b   : > { %5047 = vmatpush1.bf16.msra.mxu0 %v1952_v8  ;;  %v2144_v8 = vunpack.c.l.s8.bf16 %v1208_v23  ;;  %v1689_v23 = vld [vmem:[%s6790_s7 + $0x14e8] sm:$0xff] }
 0x65c   : > { %5090 = vmatpush1.bf16.msra.mxu1 %v2336_v12  ;;  %5048 = vmatprep.subr.bf16.mxu0 %v1929_v14  ;;  %v2528_v12 = vunpack.c.l.s8.bf16 %v1400_v60  ;;  %v2121_v14 = vunpack.c.h.s8.bf16 %v1185_v4 }
 0x65d   : > { %5091 = vmatprep.subr.bf16.mxu1 %v2313_v18  ;;  %v2505_v18 = vunpack.c.h.s8.bf16 %v1377_v5 }
 0x65f   : > { %5049 = vmatpush1.bf16.msra.mxu0 %v1928_v22  ;;  %v2120_v22 = vunpack.c.h.s8.bf16 %v1184_v17 }
 0x660   : > { %5092 = vmatpush1.bf16.msra.mxu1 %v2312_v0  ;;  %5050 = vmatprep.subr.bf16.mxu0 %v1905_v10  ;;  %v2504_v0 = vunpack.c.h.s8.bf16 %v1376_v21  ;;  %v2097_v10 = vunpack.c.l.s8.bf16 %v1185_v4  ;;  %v3129_v4 = vunpack.c.h.s8.bf16 %v1689_v23 }
 0x661   : > { %5093 = vmatprep.subr.bf16.mxu1 %v2289_v24  ;;  %v2481_v24 = vunpack.c.l.s8.bf16 %v1377_v5  ;;  %v1688_v5 = vld [vmem:[%s6790_s7 + $0x14e0] sm:$0xff] }
 0x663   : > { %5051 = vmatpush1.bf16.msra.mxu0 %v1904_v28  ;;  %v2096_v28 = vunpack.c.l.s8.bf16 %v1184_v17  ;;  %v3128_v17 = vunpack.c.h.s8.bf16 %v1688_v5 }
 0x664   : > { %5094 = vmatpush1.bf16.msra.mxu1 %v2288_v43  ;;  %5052 = vmatprep.subr.bf16.mxu0 %v1881_v30  ;;  %v2480_v43 = vunpack.c.l.s8.bf16 %v1376_v21  ;;  %v2073_v30 = vunpack.c.h.s8.bf16 %v1161_v25 }
 0x665   : > { %5095 = vmatprep.subr.bf16.mxu1 %v2265_v33  ;;  %v2457_v33 = vunpack.c.h.s8.bf16 %v1353_v27 }
 0x667   : > { %5053 = vmatpush1.bf16.msra.mxu0 %v1880_v58  ;;  %v2072_v58 = vunpack.c.h.s8.bf16 %v1160_v32 }
 0x668   : > { %5096 = vmatpush1.bf16.msra.mxu1 %v2264_v6  ;;  %5054 = vmatprep.subr.bf16.mxu0 %v1857_v36  ;;  %v2456_v6 = vunpack.c.h.s8.bf16 %v1352_v35  ;;  %v2049_v36 = vunpack.c.l.s8.bf16 %v1161_v25  ;;  %v3105_v25 = vunpack.c.l.s8.bf16 %v1689_v23 }
 0x669   : > { %5097 = vmatprep.subr.bf16.mxu1 %v2241_v37  ;;  %v2433_v37 = vunpack.c.l.s8.bf16 %v1353_v27  ;;  %v1665_v27 = vld [vmem:[%s6790_s7 + $0x1428] sm:$0xff] }
 0x66a   : > { %v3057_v23 = vunpack.c.l.s8.bf16 %v1665_v27 }
 0x66b   : > { %5055 = vmatpush1.bf16.msra.mxu0 %v1856_v57  ;;  %v2048_v57 = vunpack.c.l.s8.bf16 %v1160_v32 }
 0x66c   : > { %5098 = vmatpush1.bf16.msra.mxu1 %v2240_v62  ;;  %5056 = vmatprep.subr.bf16.mxu0 %v1833_v11  ;;  %v4734_v62 = vpop.f32.mrf.mxu0  ;;  %v2432_v11 = vunpack.c.l.s8.bf16 %v1352_v35  ;;  %v1472_v35 = vld [vmem:[%s6790_s7 + $0xe20] sm:$0xff] }
 0x66d   : > { %5099 = vmatprep.subr.bf16.mxu1 %v2217_v20  ;;  %v1136_v20 = vld [vmem:[%s6790_s7 + $0x3a0] sm:$0xff] }
 0x66f   : > { %5057 = vmatpush1.bf16.msra.mxu0 %v1832_v51  ;;  %v2409_v51 = vunpack.c.h.s8.bf16 %v1329_v39 }
 0x670   : > { %5100 = vmatpush1.bf16.msra.mxu1 %v2216_v52  ;;  %5058 = vmatprep.subr.bf16.mxu0 %v1809_v2  ;;  %v1328_v52 = vld [vmem:[%s6790_s7 + $0x9a0] sm:$0xff]  ;;  %v2024_v2 = vunpack.c.h.s8.bf16 %v1136_v20 }
 0x671   : > { %5101 = vmatprep.subr.bf16.mxu1 %v2193_v53  ;;  %v4736_v53 = vpop.f32.mrf.mxu0  ;;  %v2408_v54 = vunpack.c.h.s8.bf16 %v1328_v52 }
 0x673   : > { %5059 = vmatpush1.bf16.msra.mxu0 %v1808_v26  ;;  %v4779_v26 = vpop.f32.mrf.mxu1  ;;  %v4738_v60 = vpop.f32.mrf.mxu0 }
 0x674   : > { %5102 = vmatpush1.bf16.msra.mxu1 %v2192_v55  ;;  %5060 = vmatprep.subr.bf16.mxu0 %v2169_v56  ;;  %v2385_v55 = vunpack.c.l.s8.bf16 %v1329_v39  ;;  %v1497_v56 = vld [vmem:[%s6790_s7 + $0xee8] sm:$0xff] }
 0x675   : > { %5103 = vmatprep.subr.bf16.mxu1 %v2553_v59  ;;  %v2000_v59 = vunpack.c.l.s8.bf16 %v1136_v20  ;;  %v1664_v20 = vld [vmem:[%s6790_s7 + $0x1420] sm:$0xff] }
 0x677   : > { %5061 = vmatpush2.bf16.msra.mxu0 %v2168_v9  ;;  %v2384_v9 = vunpack.c.l.s8.bf16 %v1328_v52 }
 0x678   : > { %5104 = vmatpush2.bf16.msra.mxu1 %v2552_v61  ;;  %5062 = vmatprep.subr.bf16.mxu0 %v2145_v1  ;;  %v2745_v61 = vunpack.c.h.s8.bf16 %v1497_v56  ;;  %v1496_v1 = vld [vmem:[%s6790_s7 + $0xee0] sm:$0xff] }
 0x679   : > { %5105 = vmatprep.subr.bf16.mxu1 %v2529_v29  ;;  %v4781_v29 = vpop.f32.mrf.mxu1 }
 0x67a   : > { %v4782_v39 = vadd.f32 %v4781_v29, %v4738_v60  ;;  %v2672_v29 = vunpack.c.l.s8.bf16 %v1472_v35 }
 0x67b   : > { %5063 = vmatpush2.bf16.msra.mxu0 %v2144_v8  ;;  %v2744_v8 = vunpack.c.h.s8.bf16 %v1496_v1  ;;  %v4783_v21 = vpop.f32.mrf.mxu1 }
 0x67c   : > { %5106 = vmatpush2.bf16.msra.mxu1 %v2528_v12  ;;  %5064 = vmatprep.subr.bf16.mxu0 %v2121_v14  ;;  %v4740_v12 = vpop.f32.mrf.mxu0  ;;  %v7786_v14 = vld [vmem:[%s6797_s1 + $0x10] sm:$0xff] }
 0x67d   : > { %5107 = vmatprep.subr.bf16.mxu1 %v2505_v18  ;;  %v4778_v18 = vadd.f32 %v4777_v48, %v4734_v62  ;;  %v5461_v32 = vrot.slane %v7786_v14, %v6862_v41  ;;  %v4784_v52 = vadd.f32 %v4783_v21, %v4740_v12  ;;  %v1448_v21 = vld [vmem:[%s6790_s7 + $0xd60] sm:$0xff] }
 0x67f   : > { %5065 = vmatpush2.bf16.msra.mxu0 %v2120_v22  ;;  %v7789_v22 = vld [vmem:[%s6800_s15 + $0x10] sm:$0xff] }
 0x680   : > { %5108 = vmatpush2.bf16.msra.mxu1 %v2504_v0  ;;  %5066 = vmatprep.subr.bf16.mxu0 %v2097_v10  ;;  %v2721_v0 = vunpack.c.l.s8.bf16 %v1497_v56  ;;  %v1473_v10 = vld [vmem:[%s6790_s7 + $0xe28] sm:$0xff] }
 0x681   : > { %5109 = vmatprep.subr.bf16.mxu1 %v2481_v24  ;;  %v2697_v38 = vunpack.c.h.s8.bf16 %v1473_v10  ;;  %v2673_v56 = vunpack.c.l.s8.bf16 %v1473_v10 }
 0x683   : > { %5067 = vmatpush2.bf16.msra.mxu0 %v2096_v28  ;;  %v4780_v28 = vadd.f32 %v4779_v26, %v4736_v53 }
 0x684   : > { %5110 = vmatpush2.bf16.msra.mxu1 %v2480_v43  ;;  %5068 = vmatprep.subr.bf16.mxu0 %v2073_v30 }
 0x685   : > { %5111 = vmatprep.subr.bf16.mxu1 %v2457_v33  ;;  %v2720_v33 = vunpack.c.l.s8.bf16 %v1496_v1 }
 0x687   : > { %5069 = vmatpush2.bf16.msra.mxu0 %v2072_v58  ;;  %v5635_v58 = vrot.slane %v7789_v22, %v6862_v41  ;;  %v5639_v41 = vrot.slane %v7789_v22, %v6859_v40 }
 0x688   : > { %5112 = vmatpush2.bf16.msra.mxu1 %v2456_v6  ;;  %5070 = vmatprep.subr.bf16.mxu0 %v2049_v36  ;;  %v5465_v36 = vrot.slane %v7786_v14, %v6859_v40 }
 0x689   : > { %5113 = vmatprep.subr.bf16.mxu1 %v2433_v37  ;;  %v3104_v37 = vunpack.c.l.s8.bf16 %v1688_v5 }
 0x68b   : > { %5071 = vmatpush2.bf16.msra.mxu0 %v2048_v57 }
 0x68c   : > { %5114 = vmatpush2.bf16.msra.mxu1 %v2432_v11  ;;  %5072 = vmatprep.subr.bf16.mxu0 %v2025_v45  ;;  %v3081_v45 = vunpack.c.h.s8.bf16 %v1665_v27 }
 0x68d   : > { %5115 = vmatprep.subr.bf16.mxu1 %v2409_v51  ;;  %v2696_v51 = vunpack.c.h.s8.bf16 %v1472_v35  ;;  %v1617_v35 = vld [vmem:[%s6790_s7 + $0x12a8] sm:$0xff] }
 0x68f   : > { %5073 = vmatpush2.bf16.msra.mxu0 %v2024_v2 }
 0x690   : > { %5116 = vmatpush2.bf16.msra.mxu1 %v2408_v54  ;;  %5074 = vmatprep.subr.bf16.mxu0 %v2001_v63 }
 0x691   : > { %5117 = vmatprep.subr.bf16.mxu1 %v2385_v55  ;;  %v3080_v55 = vunpack.c.h.s8.bf16 %v1664_v20 }
 0x693   : > { %5075 = vmatpush2.bf16.msra.mxu0 %v2000_v59 }
 0x694   : > { %5118 = vmatpush2.bf16.msra.mxu1 %v2384_v9  ;;  %5130 = vmatprep.subr.bf16.mxu0 %v2745_v61  ;;  %v1449_v61 = vld [vmem:[%s6790_s7 + $0xd68] sm:$0xff] }
 0x695   : > { %5173 = vmatprep.subr.bf16.mxu1 %v3129_v4  ;;  %v1641_v4 = vld [vmem:[%s6790_s7 + $0x1368] sm:$0xff] }
 0x696   : > { %v4820_v24 = vpop.f32.mrf.mxu0  ;;  %5077 = vmatmul.mubr.bf16.vlgmr.msra.gmra.mxu0 %v6884_v15 }
 0x697   : > { %v4821_v43 = vadd.f32 %v4820_v24, %v4778_v18  ;;  %v4863_v30 = vpop.f32.mrf.mxu1  ;;  %5120 = vmatmul.mubr.bf16.vlgmr.msra.gmra.mxu1 %v6889_v19  ;;  %5131 = vmatpush1.bf16.msra.mxu0 %v2744_v8  ;;  %v2649_v18 = vunpack.c.h.s8.bf16 %v1449_v61  ;;  %v3033_v24 = vunpack.c.h.s8.bf16 %v1641_v4 }
 0x698   : > { %5162 = vmatprep.mubr.bf16.mxu0 %v6930_v31  ;;  %5174 = vmatpush1.bf16.msra.mxu1 %v3128_v17  ;;  %v4822_v6 = vpop.f32.mrf.mxu0  ;;  %v3056_v17 = vunpack.c.l.s8.bf16 %v1664_v20  ;;  %v2961_v20 = vunpack.c.l.s8.bf16 %v1617_v35 }
 0x699   : > { %v4864_v57 = vadd.f32 %v4863_v30, %v4821_v43  ;;  %5205 = vmatprep.mubr.bf16.mxu1 %v6932_v34  ;;  %v4823_v62 = vadd.f32 %v4822_v6, %v4780_v28  ;;  %v4865_v11 = vpop.f32.mrf.mxu1  ;;  %5132 = vmatprep.subr.bf16.mxu0 %v2721_v0  ;;  %v2648_v28 = vunpack.c.h.s8.bf16 %v1448_v21  ;;  %v2625_v30 = vunpack.c.l.s8.bf16 %v1449_v61  ;;  %v1761_v61 = vld [vmem:[%s6790_s7 + $0x1728] sm:$0xff] }
 0x69a   : > { %v4824_v48 = vpop.f32.mrf.mxu0  ;;  %5175 = vmatprep.subr.bf16.mxu1 %v3105_v25  ;;  %v1640_v25 = vld [vmem:[%s6790_s7 + $0x1360] sm:$0xff] }
 0x69b   : > { %v5530_v2 = vmul.f32 %v5461_v32, %v4864_v57  ;;  %v4866_v53 = vadd.f32 %v4865_v11, %v4823_v62  ;;  %v4825_v54 = vadd.f32 %v4824_v48, %v4782_v39  ;;  %v4867_v63 = vpop.f32.mrf.mxu1  ;;  %5133 = vmatpush1.bf16.msra.mxu0 %v2720_v33  ;;  %v3032_v43 = vunpack.c.h.s8.bf16 %v1640_v25  ;;  %v1425_v33 = vld [vmem:[%s6790_s7 + $0xca8] sm:$0xff]  ;;  %v1616_v39 = vld [vmem:[%s6790_s7 + $0x12a0] sm:$0xff] }
 0x69c   : > { %5176 = vmatpush1.bf16.msra.mxu1 %v3104_v37  ;;  %v4826_v26 = vpop.f32.mrf.mxu0  ;;  %5134 = vmatprep.subr.bf16.mxu0 %v2697_v38  ;;  %v3008_v6 = vunpack.c.l.s8.bf16 %v1640_v25  ;;  %v1424_v37 = vld [vmem:[%s6790_s7 + $0xca0] sm:$0xff]  ;;  %v2985_v38 = vunpack.c.h.s8.bf16 %v1617_v35  ;;  %v2984_v11 = vunpack.c.h.s8.bf16 %v1616_v39 }
 0x69d   : > { %v5704_v59 = vadd.f32 %v5635_v58, %v5530_v2  ;;  %v5531_v60 = vmul.f32 %v5465_v36, %v4866_v53  ;;  %v4868_v40 = vadd.f32 %v4867_v63, %v4825_v54  ;;  %v4827_v9 = vadd.f32 %v4826_v26, %v4784_v52  ;;  %5177 = vmatprep.subr.bf16.mxu1 %v3081_v45  ;;  %v4869_v1 = vpop.f32.mrf.mxu1  ;;  %v1592_v63 = vld [vmem:[%s6790_s7 + $0x11e0] sm:$0xff] }
 0x69e   : > { %v2600_v57 = vunpack.c.h.s8.bf16 %v1424_v37  ;;  %v2577_v45 = vunpack.c.l.s8.bf16 %v1425_v33  ;;  %v2576_v52 = vunpack.c.l.s8.bf16 %v1424_v37  ;;  %v2960_v53 = vunpack.c.l.s8.bf16 %v1616_v39  ;;  %v1713_v37 = vld [vmem:[%s6790_s7 + $0x15a8] sm:$0xff] }
 0x69f   : > { %6247 = vtanh.f32 %v5704_v59  ;;  %v5705_v5 = vadd.f32 %v5639_v41, %v5531_v60  ;;  %v5554_v8 = vmul.f32 %v5461_v32, %v4868_v40  ;;  %v4870_v12 = vadd.f32 %v4869_v1, %v4827_v9  ;;  %5135 = vmatpush1.bf16.msra.mxu0 %v2696_v51  ;;  %v1785_v51 = vld [vmem:[%s6790_s7 + $0x17e8] sm:$0xff] }
 0x6a0   : > { %5178 = vmatpush1.bf16.msra.mxu1 %v3080_v55  ;;  %5136 = vmatprep.subr.bf16.mxu0 %v2673_v56  ;;  %v3009_v32 = vunpack.c.l.s8.bf16 %v1641_v4  ;;  %v3321_v26 = vunpack.c.h.s8.bf16 %v1785_v51  ;;  %v1784_v55 = vld [vmem:[%s6790_s7 + $0x17e0] sm:$0xff]  ;;  %v3297_v40 = vunpack.c.l.s8.bf16 %v1785_v51  ;;  %v1569_v9 = vld [vmem:[%s6790_s7 + $0x1128] sm:$0xff]  ;;  %v2912_v1 = vunpack.c.l.s8.bf16 %v1592_v63 }
 0x6a1   : > { %6249 = vtanh.f32 %v5705_v5  ;;  %v5728_v0 = vadd.f32 %v5635_v58, %v5554_v8  ;;  %v5555_v10 = vmul.f32 %v5465_v36, %v4870_v12  ;;  %5179 = vmatprep.subr.bf16.mxu1 %v3057_v23  ;;  %v2624_v58 = vunpack.c.l.s8.bf16 %v1448_v21  ;;  %v1568_v5 = vld [vmem:[%s6790_s7 + $0x1120] sm:$0xff] }
 0x6a2   : > { %v2601_v36 = vunpack.c.h.s8.bf16 %v1425_v33  ;;  %v2936_v23 = vunpack.c.h.s8.bf16 %v1592_v63  ;;  %v3320_v59 = vunpack.c.h.s8.bf16 %v1784_v55  ;;  %v2889_v4 = vunpack.c.h.s8.bf16 %v1569_v9  ;;  %v1760_v12 = vld [vmem:[%s6790_s7 + $0x1720] sm:$0xff] }
 0x6a3   : > { %6251 = vtanh.f32 %v5728_v0  ;;  %v5729_v27 = vadd.f32 %v5639_v41, %v5555_v10  ;;  %5137 = vmatpush1.bf16.msra.mxu0 %v2672_v29  ;;  %v1593_v41 = vld [vmem:[%s6790_s7 + $0x11e8] sm:$0xff]  ;;  %v3296_v29 = vunpack.c.l.s8.bf16 %v1784_v55  ;;  %v3273_v8 = vunpack.c.h.s8.bf16 %v1761_v61 }
 0x6a4   : > { %5180 = vmatpush1.bf16.msra.mxu1 %v3056_v17  ;;  %5138 = vmatprep.subr.bf16.mxu0 %v2649_v18  ;;  %v2937_v54 = vunpack.c.h.s8.bf16 %v1593_v41  ;;  %v2913_v60 = vunpack.c.l.s8.bf16 %v1593_v41  ;;  %v2888_v17 = vunpack.c.h.s8.bf16 %v1568_v5  ;;  %v3272_v18 = vunpack.c.h.s8.bf16 %v1760_v12  ;;  %v1545_v10 = vld [vmem:[%s6790_s7 + $0x1068] sm:$0xff] }
 0x6a5   : > { %6253 = vtanh.f32 %v5729_v27  ;;  %5181 = vmatprep.subr.bf16.mxu1 %v3033_v24  ;;  %v2865_v21 = vunpack.c.l.s8.bf16 %v1569_v9  ;;  %v3249_v0 = vunpack.c.l.s8.bf16 %v1761_v61  ;;  %v1737_v24 = vld [vmem:[%s6790_s7 + $0x1668] sm:$0xff]  ;;  %v2864_v25 = vunpack.c.l.s8.bf16 %v1568_v5  ;;  %v1283_v61 = vld [vmem:[%s6790_s7 + $0x838] sm:$0xff]  ;;  %v1090_v5 = vld [vmem:[%s6790_s7 + $0x230] sm:$0xff] }
 0x6a6   : > { %v3248_v27 = vunpack.c.l.s8.bf16 %v1760_v12  ;;  %v3153_v51 = vunpack.c.l.s8.bf16 %v1713_v37  ;;  %v1282_v12 = vld [vmem:[%s6790_s7 + $0x830] sm:$0xff] }
 0x6a7   : > { %5139 = vmatpush1.bf16.msra.mxu0 %v2648_v28  ;;  %v2841_v28 = vunpack.c.h.s8.bf16 %v1545_v10 }
 0x6a8   : > { %5182 = vmatpush1.bf16.msra.mxu1 %v3032_v43  ;;  %5140 = vmatprep.subr.bf16.mxu0 %v2625_v30  ;;  %v1544_v43 = vld [vmem:[%s6790_s7 + $0x1060] sm:$0xff]  ;;  %v3225_v30 = vunpack.c.h.s8.bf16 %v1737_v24 }
 0x6a9   : > { %5183 = vmatprep.subr.bf16.mxu1 %v3009_v32  ;;  %v1736_v32 = vld [vmem:[%s6790_s7 + $0x1660] sm:$0xff]  ;;  %v2840_v33 = vunpack.c.h.s8.bf16 %v1544_v43 }
 0x6aa   : > { %v3224_v35 = vunpack.c.h.s8.bf16 %v1736_v32  ;;  %v3200_v39 = vunpack.c.l.s8.bf16 %v1736_v32 }
 0x6ab   : > { %5141 = vmatpush1.bf16.msra.mxu0 %v2624_v58  ;;  %v2817_v58 = vunpack.c.l.s8.bf16 %v1545_v10  ;;  %v1259_v10 = vld [vmem:[%s6790_s7 + $0x778] sm:$0xff] }
 0x6ac   : > { %v6248_v62 = vpop.eup %6247  ;;  %5184 = vmatpush1.bf16.msra.mxu1 %v3008_v6  ;;  %5142 = vmatprep.subr.bf16.mxu0 %v2601_v36  ;;  %v3201_v6 = vunpack.c.l.s8.bf16 %v1737_v24  ;;  %v1521_v36 = vld [vmem:[%s6790_s7 + $0xfa8] sm:$0xff]  ;;  %v1906_v24 = vunpack.c.l.s8.bf16 %v1090_v5 }
 0x6ad   : > { %5800 = vst [vmem:[%s7109_s17 + $0x80] sm:$0xff] %v6248_v62  ;;  %5185 = vmatprep.subr.bf16.mxu1 %v2985_v38  ;;  %v2816_v38 = vunpack.c.l.s8.bf16 %v1544_v43  ;;  %v1520_v62 = vld [vmem:[%s6790_s7 + $0xfa0] sm:$0xff]  ;;  %v1258_v43 = vld [vmem:[%s6790_s7 + $0x770] sm:$0xff] }
 0x6ae   : > { %v6250_v48 = vpop.eup %6249  ;;  %v2266_v32 = vunpack.c.h.s8.bf16 %v1258_v43 }
 0x6af   : > { %5801 = vst [vmem:[%s7109_s17 + $0x88] sm:$0xff] %v6250_v48  ;;  %5143 = vmatpush1.bf16.msra.mxu0 %v2600_v57  ;;  %v2793_v57 = vunpack.c.h.s8.bf16 %v1521_v36  ;;  %v2769_v48 = vunpack.c.l.s8.bf16 %v1521_v36 }
 0x6b0   : > { %v6252_v2 = vpop.eup %6251  ;;  %5186 = vmatpush1.bf16.msra.mxu1 %v2984_v11  ;;  %5144 = vmatprep.subr.bf16.mxu0 %v2577_v45  ;;  %v3177_v11 = vunpack.c.h.s8.bf16 %v1713_v37  ;;  %v1712_v45 = vld [vmem:[%s6790_s7 + $0x15a0] sm:$0xff]  ;;  %v2242_v37 = vunpack.c.l.s8.bf16 %v1258_v43 }
 0x6b1   : > { %5824 = vst [vmem:[%s7109_s17 + $0x140] sm:$0xff] %v6252_v2  ;;  %5187 = vmatprep.subr.bf16.mxu1 %v2961_v20  ;;  %v2792_v20 = vunpack.c.h.s8.bf16 %v1520_v62  ;;  %v3176_v41 = vunpack.c.h.s8.bf16 %v1712_v45  ;;  %v1307_v2 = vld [vmem:[%s6790_s7 + $0x8f8] sm:$0xff] }
 0x6b2   : > { %v6254_v56 = vpop.eup %6253  ;;  %v2363_v55 = vunpack.c.h.s8.bf16 %v1307_v2  ;;  %v2339_v9 = vunpack.c.l.s8.bf16 %v1307_v2 }
 0x6b3   : > { %5825 = vst [vmem:[%s7109_s17 + $0x148] sm:$0xff] %v6254_v56  ;;  %5145 = vmatpush1.bf16.msra.mxu0 %v2576_v52  ;;  %v1115_v52 = vld [vmem:[%s6790_s7 + $0x2f8] sm:$0xff]  ;;  %v1306_v56 = vld [vmem:[%s6790_s7 + $0x8f0] sm:$0xff] }
 0x6b4   : > { %5188 = vmatpush1.bf16.msra.mxu1 %v2960_v53  ;;  %5146 = vmatprep.subr.bf16.mxu0 %v2937_v54  ;;  %v2768_v53 = vunpack.c.l.s8.bf16 %v1520_v62  ;;  %v3152_v54 = vunpack.c.l.s8.bf16 %v1712_v45  ;;  %v1979_v63 = vunpack.c.h.s8.bf16 %v1115_v52  ;;  %v1234_v62 = vld [vmem:[%s6790_s7 + $0x6b0] sm:$0xff] }
 0x6b5   : > { %5189 = vmatprep.subr.bf16.mxu1 %v3321_v26  ;;  %v1114_v26 = vld [vmem:[%s6790_s7 + $0x2f0] sm:$0xff]  ;;  %v2218_v45 = vunpack.c.h.s8.bf16 %v1234_v62  ;;  %v2194_v2 = vunpack.c.l.s8.bf16 %v1234_v62 }
 0x6b6   : > { %v1330_v62 = vld [vmem:[%s6790_s7 + $0x9b0] sm:$0xff] }
 0x6b7   : > { %5147 = vmatpush2.bf16.msra.mxu0 %v2936_v23  ;;  %v1978_v23 = vunpack.c.h.s8.bf16 %v1114_v26 }
 0x6b8   : > { %5190 = vmatpush2.bf16.msra.mxu1 %v3320_v59  ;;  %5148 = vmatprep.subr.bf16.mxu0 %v2913_v60  ;;  %v2362_v59 = vunpack.c.h.s8.bf16 %v1306_v56  ;;  %v1955_v60 = vunpack.c.l.s8.bf16 %v1115_v52 }
 0x6b9   : > { %5191 = vmatprep.subr.bf16.mxu1 %v3297_v40  ;;  %v1091_v40 = vld [vmem:[%s6790_s7 + $0x238] sm:$0xff] }
 0x6bb   : > { %5149 = vmatpush2.bf16.msra.mxu0 %v2912_v1  ;;  %v1954_v1 = vunpack.c.l.s8.bf16 %v1114_v26  ;;  %v1402_v26 = vld [vmem:[%s6790_s7 + $0xbf0] sm:$0xff] }
 0x6bc   : > { %5192 = vmatpush2.bf16.msra.mxu1 %v3296_v29  ;;  %5150 = vmatprep.subr.bf16.mxu0 %v2889_v4  ;;  %v2338_v29 = vunpack.c.l.s8.bf16 %v1306_v56  ;;  %v1931_v4 = vunpack.c.h.s8.bf16 %v1091_v40  ;;  %v2554_v56 = vunpack.c.h.s8.bf16 %v1402_v26 }
 0x6bd   : > { %5193 = vmatprep.subr.bf16.mxu1 %v3273_v8  ;;  %v2315_v8 = vunpack.c.h.s8.bf16 %v1283_v61 }
 0x6bf   : > { %5151 = vmatpush2.bf16.msra.mxu0 %v2888_v17  ;;  %v1930_v17 = vunpack.c.h.s8.bf16 %v1090_v5  ;;  %v1378_v5 = vld [vmem:[%s6790_s7 + $0xb30] sm:$0xff] }
 0x6c0   : > { %5194 = vmatpush2.bf16.msra.mxu1 %v3272_v18  ;;  %5152 = vmatprep.subr.bf16.mxu0 %v2865_v21  ;;  %v2314_v18 = vunpack.c.h.s8.bf16 %v1282_v12  ;;  %v2291_v21 = vunpack.c.l.s8.bf16 %v1283_v61  ;;  %v2530_v61 = vunpack.c.l.s8.bf16 %v1402_v26 }
 0x6c1   : > { %5195 = vmatprep.subr.bf16.mxu1 %v3249_v0  ;;  %v1067_v0 = vld [vmem:[%s6790_s7 + $0x178] sm:$0xff] }
 0x6c3   : > { %5153 = vmatpush2.bf16.msra.mxu0 %v2864_v25  ;;  %v1883_v25 = vunpack.c.h.s8.bf16 %v1067_v0 }
 0x6c4   : > { %5196 = vmatpush2.bf16.msra.mxu1 %v3248_v27  ;;  %5154 = vmatprep.subr.bf16.mxu0 %v2841_v28  ;;  %v1066_v27 = vld [vmem:[%s6790_s7 + $0x170] sm:$0xff]  ;;  %v2267_v28 = vunpack.c.h.s8.bf16 %v1259_v10 }
 0x6c5   : > { %5197 = vmatprep.subr.bf16.mxu1 %v3225_v30  ;;  %v1882_v30 = vunpack.c.h.s8.bf16 %v1066_v27  ;;  %v1858_v36 = vunpack.c.l.s8.bf16 %v1066_v27  ;;  %v1354_v27 = vld [vmem:[%s6790_s7 + $0xa70] sm:$0xff] }
 0x6c6   : > { %v2458_v43 = vunpack.c.h.s8.bf16 %v1354_v27 }
 0x6c7   : > { %5155 = vmatpush2.bf16.msra.mxu0 %v2840_v33  ;;  %v1859_v33 = vunpack.c.l.s8.bf16 %v1067_v0 }
 0x6c8   : > { %5198 = vmatpush2.bf16.msra.mxu1 %v3224_v35  ;;  %5156 = vmatprep.subr.bf16.mxu0 %v2817_v58  ;;  %v2243_v35 = vunpack.c.l.s8.bf16 %v1259_v10  ;;  %v1043_v58 = vld [vmem:[%s6790_s7 + $0xb8] sm:$0xff]  ;;  %v2482_v10 = vunpack.c.l.s8.bf16 %v1378_v5 }
 0x6c9   : > { %5199 = vmatprep.subr.bf16.mxu1 %v3201_v6  ;;  %v1235_v6 = vld [vmem:[%s6790_s7 + $0x6b8] sm:$0xff] }
 0x6cb   : > { %5157 = vmatpush2.bf16.msra.mxu0 %v2816_v38  ;;  %v1835_v38 = vunpack.c.h.s8.bf16 %v1043_v58 }
 0x6cc   : > { %5200 = vmatpush2.bf16.msra.mxu1 %v3200_v39  ;;  %5158 = vmatprep.subr.bf16.mxu0 %v2793_v57  ;;  %v1042_v39 = vld [vmem:[%s6790_s7 + $0xb0] sm:$0xff]  ;;  %v2219_v57 = vunpack.c.h.s8.bf16 %v1235_v6 }
 0x6cd   : > { %5201 = vmatprep.subr.bf16.mxu1 %v3177_v11  ;;  %v1834_v11 = vunpack.c.h.s8.bf16 %v1042_v39  ;;  %v1810_v52 = vunpack.c.l.s8.bf16 %v1042_v39 }
 0x6cf   : > { %5159 = vmatpush2.bf16.msra.mxu0 %v2792_v20  ;;  %v1811_v20 = vunpack.c.l.s8.bf16 %v1043_v58 }
 0x6d0   : > { %5202 = vmatpush2.bf16.msra.mxu1 %v3176_v41  ;;  %5160 = vmatprep.subr.bf16.mxu0 %v2769_v48  ;;  %v2195_v41 = vunpack.c.l.s8.bf16 %v1235_v6  ;;  %v1211_v48 = vld [vmem:[%s6790_s7 + $0x5f8] sm:$0xff] }
 0x6d1   : > { %5203 = vmatprep.subr.bf16.mxu1 %v3153_v51  ;;  %v1403_v51 = vld [vmem:[%s6790_s7 + $0xbf8] sm:$0xff] }
 0x6d3   : > { %5161 = vmatpush2.bf16.msra.mxu0 %v2768_v53  ;;  %v2171_v53 = vunpack.c.h.s8.bf16 %v1211_v48 }
 0x6d4   : > { %5204 = vmatpush2.bf16.msra.mxu1 %v3152_v54  ;;  %5216 = vmatprep.subr.bf16.mxu0 %v1979_v63  ;;  %v1210_v54 = vld [vmem:[%s6790_s7 + $0x5f0] sm:$0xff]  ;;  %v2555_v63 = vunpack.c.h.s8.bf16 %v1403_v51 }
 0x6d5   : > { %5259 = vmatprep.subr.bf16.mxu1 %v2363_v55  ;;  %v2170_v55 = vunpack.c.h.s8.bf16 %v1210_v54 }
 0x6d6   : > { %5163 = vmatmul.mubr.bf16.vlgmr.msra.gmra.mxu0 %v6966_v47  ;;  %v4906_v6 = vpop.f32.mrf.mxu0 }
 0x6d7   : > { %5206 = vmatmul.mubr.bf16.vlgmr.msra.gmra.mxu1 %v6968_v50  ;;  %5217 = vmatpush1.bf16.msra.mxu0 %v1978_v23  ;;  %v2147_v23 = vunpack.c.l.s8.bf16 %v1211_v48  ;;  %v4949_v39 = vpop.f32.mrf.mxu1 }
 0x6d8   : > { %5248 = vmatprep.mubr.bf16.mxu0 %v6882_v13  ;;  %5260 = vmatpush1.bf16.msra.mxu1 %v2362_v59  ;;  %v1907_v13 = vunpack.c.l.s8.bf16 %v1091_v40  ;;  %v2531_v59 = vunpack.c.l.s8.bf16 %v1403_v51  ;;  %v1379_v40 = vld [vmem:[%s6790_s7 + $0xb38] sm:$0xff] }
 0x6d9   : > { %5291 = vmatprep.mubr.bf16.mxu1 %v6886_v16  ;;  %5218 = vmatprep.subr.bf16.mxu0 %v1955_v60  ;;  %v2290_v16 = vunpack.c.l.s8.bf16 %v1282_v12  ;;  %v1187_v60 = vld [vmem:[%s6790_s7 + $0x538] sm:$0xff]  ;;  %v2506_v12 = vunpack.c.h.s8.bf16 %v1378_v5  ;;  %v4951_v48 = vpop.f32.mrf.mxu1 }
 0x6da   : > { %5261 = vmatprep.subr.bf16.mxu1 %v2339_v9  ;;  %v2146_v9 = vunpack.c.l.s8.bf16 %v1210_v54 }
 0x6db   : > { %5219 = vmatpush1.bf16.msra.mxu0 %v1954_v1  ;;  %v2123_v1 = vunpack.c.h.s8.bf16 %v1187_v60 }
 0x6dc   : > { %5262 = vmatpush1.bf16.msra.mxu1 %v2338_v29  ;;  %5220 = vmatprep.subr.bf16.mxu0 %v1931_v4  ;;  %v1186_v29 = vld [vmem:[%s6790_s7 + $0x530] sm:$0xff]  ;;  %v2507_v4 = vunpack.c.h.s8.bf16 %v1379_v40 }
 0x6dd   : > { %5263 = vmatprep.subr.bf16.mxu1 %v2315_v8  ;;  %v2122_v8 = vunpack.c.h.s8.bf16 %v1186_v29  ;;  %v2098_v0 = vunpack.c.l.s8.bf16 %v1186_v29 }
 0x6df   : > { %5221 = vmatpush1.bf16.msra.mxu0 %v1930_v17  ;;  %v2099_v17 = vunpack.c.l.s8.bf16 %v1187_v60 }
 0x6e0   : > { %5264 = vmatpush1.bf16.msra.mxu1 %v2314_v18  ;;  %5222 = vmatprep.subr.bf16.mxu0 %v1907_v13  ;;  %v2483_v18 = vunpack.c.l.s8.bf16 %v1379_v40  ;;  %v1163_v13 = vld [vmem:[%s6790_s7 + $0x478] sm:$0xff] }
 0x6e1   : > { %5265 = vmatprep.subr.bf16.mxu1 %v2291_v21  ;;  %v1355_v21 = vld [vmem:[%s6790_s7 + $0xa78] sm:$0xff] }
 0x6e3   : > { %5223 = vmatpush1.bf16.msra.mxu0 %v1906_v24  ;;  %v2075_v24 = vunpack.c.h.s8.bf16 %v1163_v13 }
 0x6e4   : > { %5266 = vmatpush1.bf16.msra.mxu1 %v2290_v16  ;;  %5224 = vmatprep.subr.bf16.mxu0 %v1883_v25  ;;  %v1162_v16 = vld [vmem:[%s6790_s7 + $0x470] sm:$0xff]  ;;  %v2459_v25 = vunpack.c.h.s8.bf16 %v1355_v21 }
 0x6e5   : > { %5267 = vmatprep.subr.bf16.mxu1 %v2267_v28  ;;  %v2074_v28 = vunpack.c.h.s8.bf16 %v1162_v16  ;;  %v2050_v58 = vunpack.c.l.s8.bf16 %v1162_v16  ;;  %v5473_v16 = vrot.slane %v7786_v14, %v6865_v42 }
 0x6e7   : > { %5225 = vmatpush1.bf16.msra.mxu0 %v1882_v30  ;;  %v2051_v30 = vunpack.c.l.s8.bf16 %v1163_v13 }
 0x6e8   : > { %5268 = vmatpush1.bf16.msra.mxu1 %v2266_v32  ;;  %5226 = vmatprep.subr.bf16.mxu0 %v1859_v33  ;;  %v2435_v32 = vunpack.c.l.s8.bf16 %v1355_v21  ;;  %v1139_v33 = vld [vmem:[%s6790_s7 + $0x3b8] sm:$0xff]  ;;  %v5469_v21 = vrot.slane %v7786_v14, %v6870_v44 }
 0x6e9   : > { %5269 = vmatprep.subr.bf16.mxu1 %v2243_v35  ;;  %v1331_v35 = vld [vmem:[%s6790_s7 + $0x9b8] sm:$0xff] }
 0x6ea   : > { %v2387_v51 = vunpack.c.l.s8.bf16 %v1331_v35 }
 0x6eb   : > { %5227 = vmatpush1.bf16.msra.mxu0 %v1858_v36  ;;  %v2434_v36 = vunpack.c.l.s8.bf16 %v1354_v27 }
 0x6ec   : > { %5270 = vmatpush1.bf16.msra.mxu1 %v2242_v37  ;;  %5228 = vmatprep.subr.bf16.mxu0 %v1835_v38  ;;  %v2027_v37 = vunpack.c.h.s8.bf16 %v1139_v33  ;;  %v1138_v38 = vld [vmem:[%s6790_s7 + $0x3b0] sm:$0xff] }
 0x6ed   : > { %5271 = vmatprep.subr.bf16.mxu1 %v2219_v57  ;;  %v2411_v57 = vunpack.c.h.s8.bf16 %v1331_v35 }
 0x6ef   : > { %5229 = vmatpush1.bf16.msra.mxu0 %v1834_v11  ;;  %v2026_v11 = vunpack.c.h.s8.bf16 %v1138_v38 }
 0x6f0   : > { %5272 = vmatpush1.bf16.msra.mxu1 %v2218_v45  ;;  %5230 = vmatprep.subr.bf16.mxu0 %v1811_v20  ;;  %v4908_v45 = vpop.f32.mrf.mxu0  ;;  %v2410_v20 = vunpack.c.h.s8.bf16 %v1330_v62 }
 0x6f1   : > { %5273 = vmatprep.subr.bf16.mxu1 %v2195_v41  ;;  %v2003_v41 = vunpack.c.l.s8.bf16 %v1139_v33  ;;  %v1666_v33 = vld [vmem:[%s6790_s7 + $0x1430] sm:$0xff] }
 0x6f2   : > { %v4910_v54 = vpop.f32.mrf.mxu0 }
 0x6f3   : > { %5231 = vmatpush1.bf16.msra.mxu0 %v1810_v52  ;;  %v1499_v52 = vld [vmem:[%s6790_s7 + $0xef8] sm:$0xff] }
 0x6f4   : > { %5274 = vmatpush1.bf16.msra.mxu1 %v2194_v2  ;;  %5232 = vmatprep.subr.bf16.mxu0 %v2171_v53  ;;  %v1691_v2 = vld [vmem:[%s6790_s7 + $0x14f8] sm:$0xff]  ;;  %v2002_v53 = vunpack.c.l.s8.bf16 %v1138_v38  ;;  %v2747_v26 = vunpack.c.h.s8.bf16 %v1499_v52  ;;  %v4912_v40 = vpop.f32.mrf.mxu0  ;;  %v2723_v29 = vunpack.c.l.s8.bf16 %v1499_v52  ;;  %v3082_v38 = vunpack.c.h.s8.bf16 %v1666_v33 }
 0x6f5   : > { %5275 = vmatprep.subr.bf16.mxu1 %v2555_v63  ;;  %v2386_v63 = vunpack.c.l.s8.bf16 %v1330_v62 }
 0x6f7   : > { %5233 = vmatpush2.bf16.msra.mxu0 %v2170_v55  ;;  %v1498_v55 = vld [vmem:[%s6790_s7 + $0xef0] sm:$0xff] }
 0x6f8   : > { %5276 = vmatpush2.bf16.msra.mxu1 %v2554_v56  ;;  %5234 = vmatprep.subr.bf16.mxu0 %v2147_v23  ;;  %v4953_v56 = vpop.f32.mrf.mxu1  ;;  %v3131_v23 = vunpack.c.h.s8.bf16 %v1691_v2  ;;  %v2746_v60 = vunpack.c.h.s8.bf16 %v1498_v55 }
 0x6f9   : > { %5277 = vmatprep.subr.bf16.mxu1 %v2531_v59  ;;  %v1690_v59 = vld [vmem:[%s6790_s7 + $0x14f0] sm:$0xff] }
 0x6fb   : > { %5235 = vmatpush2.bf16.msra.mxu0 %v2146_v9  ;;  %v3130_v9 = vunpack.c.h.s8.bf16 %v1690_v59 }
 0x6fc   : > { %5278 = vmatpush2.bf16.msra.mxu1 %v2530_v61  ;;  %5236 = vmatprep.subr.bf16.mxu0 %v2123_v1  ;;  %v4950_v61 = vadd.f32 %v4949_v39, %v4906_v6  ;;  %v4955_v1 = vpop.f32.mrf.mxu1 }
 0x6fd   : > { %5279 = vmatprep.subr.bf16.mxu1 %v2507_v4  ;;  %v1475_v4 = vld [vmem:[%s6790_s7 + $0xe38] sm:$0xff] }
 0x6fe   : > { %v2699_v27 = vunpack.c.h.s8.bf16 %v1475_v4  ;;  %v2675_v39 = vunpack.c.l.s8.bf16 %v1475_v4 }
 0x6ff   : > { %5237 = vmatpush2.bf16.msra.mxu0 %v2122_v8  ;;  %v3107_v8 = vunpack.c.l.s8.bf16 %v1691_v2 }
 0x700   : > { %5280 = vmatpush2.bf16.msra.mxu1 %v2506_v12  ;;  %5238 = vmatprep.subr.bf16.mxu0 %v2099_v17  ;;  %v1667_v12 = vld [vmem:[%s6790_s7 + $0x1438] sm:$0xff]  ;;  %v4952_v17 = vadd.f32 %v4951_v48, %v4908_v45 }
 0x701   : > { %5281 = vmatprep.subr.bf16.mxu1 %v2483_v18  ;;  %v1451_v45 = vld [vmem:[%s6790_s7 + $0xd78] sm:$0xff] }
 0x702   : > { %v1643_v48 = vld [vmem:[%s6790_s7 + $0x1378] sm:$0xff] }
 0x703   : > { %5239 = vmatpush2.bf16.msra.mxu0 %v2098_v0  ;;  %v2722_v0 = vunpack.c.l.s8.bf16 %v1498_v55 }
 0x704   : > { %5282 = vmatpush2.bf16.msra.mxu1 %v2482_v10  ;;  %5240 = vmatprep.subr.bf16.mxu0 %v2075_v24  ;;  %v1474_v10 = vld [vmem:[%s6790_s7 + $0xe30] sm:$0xff]  ;;  %v5643_v24 = vrot.slane %v7789_v22, %v6870_v44  ;;  %v5647_v44 = vrot.slane %v7789_v22, %v6865_v42 }
 0x705   : > { %5283 = vmatprep.subr.bf16.mxu1 %v2459_v25  ;;  %v3106_v25 = vunpack.c.l.s8.bf16 %v1690_v59  ;;  %v2698_v35 = vunpack.c.h.s8.bf16 %v1474_v10 }
 0x707   : > { %5241 = vmatpush2.bf16.msra.mxu0 %v2074_v28  ;;  %v4954_v28 = vadd.f32 %v4953_v56, %v4910_v54  ;;  %v2651_v54 = vunpack.c.h.s8.bf16 %v1451_v45  ;;  %v3035_v56 = vunpack.c.h.s8.bf16 %v1643_v48 }
 0x708   : > { %5284 = vmatpush2.bf16.msra.mxu1 %v2458_v43  ;;  %5242 = vmatprep.subr.bf16.mxu0 %v2051_v30 }
 0x709   : > { %5285 = vmatprep.subr.bf16.mxu1 %v2435_v32  ;;  %v3083_v32 = vunpack.c.h.s8.bf16 %v1667_v12 }
 0x70b   : > { %5243 = vmatpush2.bf16.msra.mxu0 %v2050_v58  ;;  %v4956_v58 = vadd.f32 %v4955_v1, %v4912_v40  ;;  %v1427_v1 = vld [vmem:[%s6790_s7 + $0xcb8] sm:$0xff] }
 0x70c   : > { %5286 = vmatpush2.bf16.msra.mxu1 %v2434_v36  ;;  %5244 = vmatprep.subr.bf16.mxu0 %v2027_v37 }
 0x70d   : > { %5287 = vmatprep.subr.bf16.mxu1 %v2411_v57  ;;  %v3059_v57 = vunpack.c.l.s8.bf16 %v1667_v12  ;;  %v1426_v12 = vld [vmem:[%s6790_s7 + $0xcb0] sm:$0xff] }
 0x70f   : > { %5245 = vmatpush2.bf16.msra.mxu0 %v2026_v11 }
 0x710   : > { %5288 = vmatpush2.bf16.msra.mxu1 %v2410_v20  ;;  %5246 = vmatprep.subr.bf16.mxu0 %v2003_v41  ;;  %v2674_v41 = vunpack.c.l.s8.bf16 %v1474_v10  ;;  %v2579_v10 = vunpack.c.l.s8.bf16 %v1427_v1 }
 0x711   : > { %5289 = vmatprep.subr.bf16.mxu1 %v2387_v51 }
 0x713   : > { %5247 = vmatpush2.bf16.msra.mxu0 %v2002_v53  ;;  %v3058_v53 = vunpack.c.l.s8.bf16 %v1666_v33  ;;  %v1786_v33 = vld [vmem:[%s6790_s7 + $0x17f0] sm:$0xff] }
 0x714   : > { %5290 = vmatpush2.bf16.msra.mxu1 %v2386_v63  ;;  %5302 = vmatprep.subr.bf16.mxu0 %v2747_v26  ;;  %v1450_v63 = vld [vmem:[%s6790_s7 + $0xd70] sm:$0xff] }
 0x715   : > { %5345 = vmatprep.subr.bf16.mxu1 %v3131_v23  ;;  %v1642_v23 = vld [vmem:[%s6790_s7 + $0x1370] sm:$0xff]  ;;  %v2626_v4 = vunpack.c.l.s8.bf16 %v1450_v63 }
 0x716   : > { %v4992_v5 = vpop.f32.mrf.mxu0  ;;  %5249 = vmatmul.mubr.bf16.vlgmr.msra.gmra.mxu0 %v6884_v15  ;;  %v3034_v40 = vunpack.c.h.s8.bf16 %v1642_v23 }
 0x717   : > { %v4993_v18 = vadd.f32 %v4992_v5, %v4950_v61  ;;  %v5035_v13 = vpop.f32.mrf.mxu1  ;;  %5292 = vmatmul.mubr.bf16.vlgmr.msra.gmra.mxu1 %v6889_v19  ;;  %5303 = vmatpush1.bf16.msra.mxu0 %v2746_v60  ;;  %v2650_v60 = vunpack.c.h.s8.bf16 %v1450_v63  ;;  %v3011_v61 = vunpack.c.l.s8.bf16 %v1643_v48  ;;  %v3010_v5 = vunpack.c.l.s8.bf16 %v1642_v23  ;;  %v1523_v23 = vld [vmem:[%s6790_s7 + $0xfb8] sm:$0xff] }
 0x718   : > { %5334 = vmatprep.mubr.bf16.mxu0 %v6930_v31  ;;  %5346 = vmatpush1.bf16.msra.mxu1 %v3130_v9  ;;  %v4994_v15 = vpop.f32.mrf.mxu0  ;;  %v2627_v9 = vunpack.c.l.s8.bf16 %v1451_v45 }
 0x719   : > { %v5036_v43 = vadd.f32 %v5035_v13, %v4993_v18  ;;  %5377 = vmatprep.mubr.bf16.mxu1 %v6932_v34  ;;  %v4995_v19 = vadd.f32 %v4994_v15, %v4952_v17  ;;  %v5037_v30 = vpop.f32.mrf.mxu1  ;;  %5304 = vmatprep.subr.bf16.mxu0 %v2723_v29  ;;  %v1619_v29 = vld [vmem:[%s6790_s7 + $0x12b8] sm:$0xff]  ;;  %v1618_v18 = vld [vmem:[%s6790_s7 + $0x12b0] sm:$0xff]  ;;  %v2602_v13 = vunpack.c.h.s8.bf16 %v1426_v12 }
 0x71a   : > { %v4996_v31 = vpop.f32.mrf.mxu0  ;;  %5347 = vmatprep.subr.bf16.mxu1 %v3107_v8  ;;  %v2603_v8 = vunpack.c.h.s8.bf16 %v1427_v1  ;;  %v2987_v17 = vunpack.c.h.s8.bf16 %v1619_v29  ;;  %v1595_v15 = vld [vmem:[%s6790_s7 + $0x11f8] sm:$0xff] }
 0x71b   : > { %v5532_v6 = vmul.f32 %v5469_v21, %v5036_v43  ;;  %v5038_v14 = vadd.f32 %v5037_v30, %v4995_v19  ;;  %v4997_v36 = vadd.f32 %v4996_v31, %v4954_v28  ;;  %v5039_v37 = vpop.f32.mrf.mxu1  ;;  %5305 = vmatpush1.bf16.msra.mxu0 %v2722_v0  ;;  %v2986_v0 = vunpack.c.h.s8.bf16 %v1618_v18  ;;  %v1594_v30 = vld [vmem:[%s6790_s7 + $0x11f0] sm:$0xff] }
 0x71c   : > { %5348 = vmatpush1.bf16.msra.mxu1 %v3106_v25  ;;  %v4998_v34 = vpop.f32.mrf.mxu0  ;;  %5306 = vmatprep.subr.bf16.mxu0 %v2699_v27  ;;  %v1787_v25 = vld [vmem:[%s6790_s7 + $0x17f8] sm:$0xff]  ;;  %v2578_v27 = vunpack.c.l.s8.bf16 %v1426_v12  ;;  %v2962_v43 = vunpack.c.l.s8.bf16 %v1618_v18  ;;  %v2939_v19 = vunpack.c.h.s8.bf16 %v1595_v15  ;;  %v2938_v31 = vunpack.c.h.s8.bf16 %v1594_v30 }
 0x71d   : > { %v5706_v62 = vadd.f32 %v5643_v24, %v5532_v6  ;;  %v5533_v11 = vmul.f32 %v5473_v16, %v5038_v14  ;;  %v5040_v42 = vadd.f32 %v5039_v37, %v4997_v36  ;;  %v4999_v22 = vadd.f32 %v4998_v34, %v4956_v58  ;;  %5349 = vmatprep.subr.bf16.mxu1 %v3083_v32  ;;  %v5041_v20 = vpop.f32.mrf.mxu1  ;;  %v1571_v14 = vld [vmem:[%s6790_s7 + $0x1138] sm:$0xff] }
 0x71e   : > { %v3323_v32 = vunpack.c.h.s8.bf16 %v1787_v25  ;;  %v2915_v58 = vunpack.c.l.s8.bf16 %v1595_v15  ;;  %v3299_v6 = vunpack.c.l.s8.bf16 %v1787_v25  ;;  %v1763_v36 = vld [vmem:[%s6790_s7 + $0x1738] sm:$0xff]  ;;  %v2914_v37 = vunpack.c.l.s8.bf16 %v1594_v30 }
 0x71f   : > { %6255 = vtanh.f32 %v5706_v62  ;;  %v5707_v51 = vadd.f32 %v5647_v44, %v5533_v11  ;;  %v5556_v52 = vmul.f32 %v5469_v21, %v5040_v42  ;;  %v5042_v2 = vadd.f32 %v5041_v20, %v4999_v22  ;;  %5307 = vmatpush1.bf16.msra.mxu0 %v2698_v35  ;;  %v1762_v62 = vld [vmem:[%s6790_s7 + $0x1730] sm:$0xff]  ;;  %v1547_v20 = vld [vmem:[%s6790_s7 + $0x1078] sm:$0xff] }
 0x720   : > { %5350 = vmatpush1.bf16.msra.mxu1 %v3082_v38  ;;  %5308 = vmatprep.subr.bf16.mxu0 %v2675_v39  ;;  %v3322_v35 = vunpack.c.h.s8.bf16 %v1786_v33  ;;  %v3298_v34 = vunpack.c.l.s8.bf16 %v1786_v33  ;;  %v2891_v38 = vunpack.c.h.s8.bf16 %v1571_v14  ;;  %v1570_v39 = vld [vmem:[%s6790_s7 + $0x1130] sm:$0xff]  ;;  %v3274_v42 = vunpack.c.h.s8.bf16 %v1762_v62 }
 0x721   : > { %6257 = vtanh.f32 %v5707_v51  ;;  %v5730_v26 = vadd.f32 %v5643_v24, %v5556_v52  ;;  %v5557_v55 = vmul.f32 %v5473_v16, %v5042_v2  ;;  %5351 = vmatprep.subr.bf16.mxu1 %v3059_v57  ;;  %v2963_v24 = vunpack.c.l.s8.bf16 %v1619_v29  ;;  %v1546_v2 = vld [vmem:[%s6790_s7 + $0x1070] sm:$0xff] }
 0x722   : > { %v3275_v57 = vunpack.c.h.s8.bf16 %v1763_v36  ;;  %v2890_v11 = vunpack.c.h.s8.bf16 %v1570_v39  ;;  %v2867_v22 = vunpack.c.l.s8.bf16 %v1571_v14  ;;  %v3251_v45 = vunpack.c.l.s8.bf16 %v1763_v36  ;;  %v1714_v29 = vld [vmem:[%s6790_s7 + $0x15b0] sm:$0xff] }
 0x723   : > { %6259 = vtanh.f32 %v5730_v26  ;;  %v5731_v59 = vadd.f32 %v5647_v44, %v5557_v55  ;;  %5309 = vmatpush1.bf16.msra.mxu0 %v2674_v41  ;;  %v1739_v41 = vld [vmem:[%s6790_s7 + $0x1678] sm:$0xff]  ;;  %v2866_v48 = vunpack.c.l.s8.bf16 %v1570_v39  ;;  %v3250_v51 = vunpack.c.l.s8.bf16 %v1762_v62 }
 0x724   : > { %5352 = vmatpush1.bf16.msra.mxu1 %v3058_v53  ;;  %5310 = vmatprep.subr.bf16.mxu0 %v2651_v54  ;;  %v2843_v52 = vunpack.c.h.s8.bf16 %v1547_v20  ;;  %v3227_v53 = vunpack.c.h.s8.bf16 %v1739_v41  ;;  %v1738_v54 = vld [vmem:[%s6790_s7 + $0x1670] sm:$0xff]  ;;  %v2842_v63 = vunpack.c.h.s8.bf16 %v1546_v2  ;;  %v2819_v55 = vunpack.c.l.s8.bf16 %v1547_v20 }
 0x725   : > { %6261 = vtanh.f32 %v5731_v59  ;;  %5353 = vmatprep.subr.bf16.mxu1 %v3035_v56  ;;  %v3226_v26 = vunpack.c.h.s8.bf16 %v1738_v54  ;;  %v3203_v56 = vunpack.c.l.s8.bf16 %v1739_v41  ;;  %v1715_v59 = vld [vmem:[%s6790_s7 + $0x15b8] sm:$0xff]  ;;  %v3154_v18 = vunpack.c.l.s8.bf16 %v1714_v29 }
 0x726   : > { %v3179_v1 = vunpack.c.h.s8.bf16 %v1715_v59  ;;  %v3155_v12 = vunpack.c.l.s8.bf16 %v1715_v59 }
 0x727   : > { %5311 = vmatpush1.bf16.msra.mxu0 %v2650_v60  ;;  %v2818_v60 = vunpack.c.l.s8.bf16 %v1546_v2 }
 0x728   : > { %5354 = vmatpush1.bf16.msra.mxu1 %v3034_v40  ;;  %5312 = vmatprep.subr.bf16.mxu0 %v2627_v9  ;;  %v3202_v40 = vunpack.c.l.s8.bf16 %v1738_v54  ;;  %v2795_v9 = vunpack.c.h.s8.bf16 %v1523_v23 }
 0x729   : > { %5355 = vmatprep.subr.bf16.mxu1 %v3011_v61  ;;  %v1522_v61 = vld [vmem:[%s6790_s7 + $0xfb0] sm:$0xff] }
 0x72b   : > { %5313 = vmatpush1.bf16.msra.mxu0 %v2626_v4  ;;  %v2794_v4 = vunpack.c.h.s8.bf16 %v1522_v61 }
 0x72c   : > { %v6256_v21 = vpop.eup %6255  ;;  %5356 = vmatpush1.bf16.msra.mxu1 %v3010_v5  ;;  %5314 = vmatprep.subr.bf16.mxu0 %v2603_v8  ;;  %v3178_v5 = vunpack.c.h.s8.bf16 %v1714_v29  ;;  %v2771_v8 = vunpack.c.l.s8.bf16 %v1523_v23 }
 0x72d   : > { %5802 = vst [vmem:[%s7109_s17 + $0x90] sm:$0xff] %v6256_v21  ;;  %5357 = vmatprep.subr.bf16.mxu1 %v2987_v17  ;;  %v2770_v17 = vunpack.c.l.s8.bf16 %v1522_v61 }
 0x72e   : > { %v6258_v16 = vpop.eup %6257 }
 0x72f   : > { %5803 = vst [vmem:[%s7109_s17 + $0x98] sm:$0xff] %v6258_v16  ;;  %5315 = vmatpush1.bf16.msra.mxu0 %v2602_v13 }
 0x730   : > { %v6260_v28 = vpop.eup %6259  ;;  %5358 = vmatpush1.bf16.msra.mxu1 %v2986_v0  ;;  %5316 = vmatprep.subr.bf16.mxu0 %v2579_v10 }
 0x731   : > { %5826 = vst [vmem:[%s7109_s17 + $0x150] sm:$0xff] %v6260_v28  ;;  %5359 = vmatprep.subr.bf16.mxu1 %v2963_v24 }
 0x732   : > { %v6262_v44 = vpop.eup %6261 }
 0x733   : > { %5827 = vst [vmem:[%s7109_s17 + $0x158] sm:$0xff] %v6262_v44  ;;  %5317 = vmatpush1.bf16.msra.mxu0 %v2578_v27 }
 0x734   : > { %5360 = vmatpush1.bf16.msra.mxu1 %v2962_v43  ;;  %5318 = vmatprep.subr.bf16.mxu0 %v2939_v19 }
 0x735   : > { %5361 = vmatprep.subr.bf16.mxu1 %v3323_v32  ;;  %v6283_v32 = vld [vmem:[%s6797_s1 + $0x10] sm:$0xff] }
 0x736   : > { %v5477_v33 = vrot.slane %v6283_v32, %v6945_v3  ;;  %v5481_v14 = vrot.slane %v6283_v32, %v6905_v46 }
 0x737   : > { %5319 = vmatpush2.bf16.msra.mxu0 %v2938_v31 }
 0x738   : > { %5362 = vmatpush2.bf16.msra.mxu1 %v3322_v35  ;;  %5320 = vmatprep.subr.bf16.mxu0 %v2915_v58 }
 0x739   : > { %5363 = vmatprep.subr.bf16.mxu1 %v3299_v6 }
 0x73b   : > { %5321 = vmatpush2.bf16.msra.mxu0 %v2914_v37 }
 0x73c   : > { %5364 = vmatpush2.bf16.msra.mxu1 %v3298_v34  ;;  %5322 = vmatprep.subr.bf16.mxu0 %v2891_v38 }
 0x73d   : > { %5365 = vmatprep.subr.bf16.mxu1 %v3275_v57 }
 0x73f   : > { %5323 = vmatpush2.bf16.msra.mxu0 %v2890_v11 }
 0x740   : > { %5366 = vmatpush2.bf16.msra.mxu1 %v3274_v42  ;;  %5324 = vmatprep.subr.bf16.mxu0 %v2867_v22 }
 0x741   : > { %5367 = vmatprep.subr.bf16.mxu1 %v3251_v45 }
 0x743   : > { %5325 = vmatpush2.bf16.msra.mxu0 %v2866_v48 }
 0x744   : > { %5368 = vmatpush2.bf16.msra.mxu1 %v3250_v51  ;;  %5326 = vmatprep.subr.bf16.mxu0 %v2843_v52 }
 0x745   : > { %5369 = vmatprep.subr.bf16.mxu1 %v3227_v53 }
 0x747   : > { %5327 = vmatpush2.bf16.msra.mxu0 %v2842_v63 }
 0x748   : > { %5370 = vmatpush2.bf16.msra.mxu1 %v3226_v26  ;;  %5328 = vmatprep.subr.bf16.mxu0 %v2819_v55 }
 0x749   : > { %5371 = vmatprep.subr.bf16.mxu1 %v3203_v56 }
 0x74b   : > { %5329 = vmatpush2.bf16.msra.mxu0 %v2818_v60 }
 0x74c   : > { %5372 = vmatpush2.bf16.msra.mxu1 %v3202_v40  ;;  %5330 = vmatprep.subr.bf16.mxu0 %v2795_v9 }
 0x74d   : > { %5373 = vmatprep.subr.bf16.mxu1 %v3179_v1 }
 0x74f   : > { %5331 = vmatpush2.bf16.msra.mxu0 %v2794_v4 }
 0x750   : > { %5374 = vmatpush2.bf16.msra.mxu1 %v3178_v5  ;;  %5332 = vmatprep.subr.bf16.mxu0 %v2771_v8 }
 0x751   : > { %5375 = vmatprep.subr.bf16.mxu1 %v3155_v12  ;;  %v5485_v12 = vrot.slane %v6283_v32, %v6948_v7 }
 0x753   : > { %5333 = vmatpush2.bf16.msra.mxu0 %v2770_v17 }
 0x754   : > { %5376 = vmatpush2.bf16.msra.mxu1 %v3154_v18 }
 0x756   : > { %5335 = vmatmul.mubr.bf16.vlgmr.msra.gmra.mxu0 %v6966_v47  ;;  %v5078_v13 = vpop.f32.mrf.mxu0  ;;  %v6284_v47 = vld [vmem:[%s6800_s15 + $0x10] sm:$0xff] }
 0x757   : > { %5378 = vmatmul.mubr.bf16.vlgmr.msra.gmra.mxu1 %v6968_v50  ;;  %v5121_v21 = vpop.f32.mrf.mxu1  ;;  %v5651_v50 = vrot.slane %v6284_v47, %v6945_v3  ;;  %v5655_v36 = vrot.slane %v6284_v47, %v6905_v46  ;;  %v5659_v17 = vrot.slane %v6284_v47, %v6948_v7 }
 0x758   : > { %v5080_v0 = vpop.f32.mrf.mxu0  ;;  %v5122_v25 = vadd.f32 %v5121_v21, %v5078_v13 }
 0x759   : > { %v5123_v10 = vpop.f32.mrf.mxu1 }
 0x75a   : > { %v5082_v24 = vpop.f32.mrf.mxu0  ;;  %v5124_v43 = vadd.f32 %v5123_v10, %v5080_v0 }
 0x75b   : > { %v5125_v15 = vpop.f32.mrf.mxu1 }
 0x75c   : > { %v5084_v16 = vpop.f32.mrf.mxu0  ;;  %v5126_v31 = vadd.f32 %v5125_v15, %v5082_v24  ;;  %v5489_v24 = vrot.slane %v6283_v32, %v6908_v49  ;;  %v5663_v15 = vrot.slane %v6284_v47, %v6908_v49 }
 0x75d   : > { %v5127_v27 = vpop.f32.mrf.mxu1 }
 0x75e   : > { %v5128_v34 = vadd.f32 %v5127_v27, %v5084_v16 }
 0x796   : > { %v5164_v28 = vpop.f32.mrf.mxu0 }
 0x797   : > { %v5165_v19 = vadd.f32 %v5164_v28, %v5122_v25  ;;  %v5207_v30 = vpop.f32.mrf.mxu1 }
 0x798   : > { %v5166_v44 = vpop.f32.mrf.mxu0 }
 0x799   : > { %v5208_v35 = vadd.f32 %v5207_v30, %v5165_v19  ;;  %v5167_v58 = vadd.f32 %v5166_v44, %v5124_v43  ;;  %v5209_v6 = vpop.f32.mrf.mxu1 }
 0x79a   : > { %v5168_v37 = vpop.f32.mrf.mxu0 }
 0x79b   : > { %v5534_v38 = vmul.f32 %v5477_v33, %v5208_v35  ;;  %v5210_v39 = vadd.f32 %v5209_v6, %v5167_v58  ;;  %v5169_v57 = vadd.f32 %v5168_v37, %v5126_v31  ;;  %v5211_v62 = vpop.f32.mrf.mxu1 }
 0x79c   : > { %v5170_v11 = vpop.f32.mrf.mxu0 }
 0x79d   : > { %v5708_v42 = vadd.f32 %v5651_v50, %v5534_v38  ;;  %v5535_v22 = vmul.f32 %v5481_v14, %v5210_v39  ;;  %v5212_v3 = vadd.f32 %v5211_v62, %v5169_v57  ;;  %v5171_v45 = vadd.f32 %v5170_v11, %v5128_v34  ;;  %v5213_v20 = vpop.f32.mrf.mxu1 }
 0x79f   : > { %6263 = vtanh.f32 %v5708_v42  ;;  %v5709_v41 = vadd.f32 %v5655_v36, %v5535_v22  ;;  %v5558_v48 = vmul.f32 %v5477_v33, %v5212_v3  ;;  %v5214_v46 = vadd.f32 %v5213_v20, %v5171_v45 }
 0x7a1   : > { %6265 = vtanh.f32 %v5709_v41  ;;  %v5732_v51 = vadd.f32 %v5651_v50, %v5558_v48  ;;  %v5559_v52 = vmul.f32 %v5481_v14, %v5214_v46 }
 0x7a3   : > { %6267 = vtanh.f32 %v5732_v51  ;;  %v5733_v2 = vadd.f32 %v5655_v36, %v5559_v52 }
 0x7a5   : > { %6269 = vtanh.f32 %v5733_v2 }
 0x7ac   : > { %v6264_v53 = vpop.eup %6263 }
 0x7ad   : > { %5804 = vst [vmem:[%s7109_s17 + $0xa0] sm:$0xff] %v6264_v53 }
 0x7ae   : > { %v6266_v54 = vpop.eup %6265 }
 0x7af   : > { %5805 = vst [vmem:[%s7109_s17 + $0xa8] sm:$0xff] %v6266_v54 }
 0x7b0   : > { %v6268_v63 = vpop.eup %6267 }
 0x7b1   : > { %5828 = vst [vmem:[%s7109_s17 + $0x160] sm:$0xff] %v6268_v63 }
 0x7b2   : > { %v6270_v26 = vpop.eup %6269 }
 0x7b3   : > { %5829 = vst [vmem:[%s7109_s17 + $0x168] sm:$0xff] %v6270_v26 }
 0x7d6   : > { %v5250_v55 = vpop.f32.mrf.mxu0 }
 0x7d7   : > { %v5293_v56 = vpop.f32.mrf.mxu1 }
 0x7d8   : > { %v5252_v23 = vpop.f32.mrf.mxu0  ;;  %v5294_v61 = vadd.f32 %v5293_v56, %v5250_v55 }
 0x7d9   : > { %v5295_v59 = vpop.f32.mrf.mxu1 }
 0x7da   : > { %v5254_v60 = vpop.f32.mrf.mxu0  ;;  %v5296_v4 = vadd.f32 %v5295_v59, %v5252_v23 }
 0x7db   : > { %v5297_v40 = vpop.f32.mrf.mxu1 }
 0x7dc   : > { %v5256_v9 = vpop.f32.mrf.mxu0  ;;  %v5298_v13 = vadd.f32 %v5297_v40, %v5254_v60 }
 0x7dd   : > { %v5299_v1 = vpop.f32.mrf.mxu1 }
 0x7de   : > { %v5300_v25 = vadd.f32 %v5299_v1, %v5256_v9 }
 0x816   : > { %v5336_v29 = vpop.f32.mrf.mxu0 }
 0x817   : > { %v5337_v5 = vadd.f32 %v5336_v29, %v5294_v61  ;;  %v5379_v8 = vpop.f32.mrf.mxu1 }
 0x818   : > { %v5338_v18 = vpop.f32.mrf.mxu0 }
 0x819   : > { %v5380_v21 = vadd.f32 %v5379_v8, %v5337_v5  ;;  %v5339_v0 = vadd.f32 %v5338_v18, %v5296_v4  ;;  %v5381_v10 = vpop.f32.mrf.mxu1 }
 0x81a   : > { %v5340_v16 = vpop.f32.mrf.mxu0 }
 0x81b   : > { %v5536_v27 = vmul.f32 %v5485_v12, %v5380_v21  ;;  %v5382_v28 = vadd.f32 %v5381_v10, %v5339_v0  ;;  %v5341_v43 = vadd.f32 %v5340_v16, %v5298_v13  ;;  %v5383_v19 = vpop.f32.mrf.mxu1 }
 0x81c   : > { %v5342_v30 = vpop.f32.mrf.mxu0 }
 0x81d   : > { %v5710_v33 = vadd.f32 %v5659_v17, %v5536_v27  ;;  %v5537_v50 = vmul.f32 %v5489_v24, %v5382_v28  ;;  %v5384_v7 = vadd.f32 %v5383_v19, %v5341_v43  ;;  %v5343_v44 = vadd.f32 %v5342_v30, %v5300_v25  ;;  %v5385_v31 = vpop.f32.mrf.mxu1 }
 0x81f   : > { %6271 = vtanh.f32 %v5710_v33  ;;  %v5711_v32 = vadd.f32 %v5663_v15, %v5537_v50  ;;  %v5560_v35 = vmul.f32 %v5485_v12, %v5384_v7  ;;  %v5386_v49 = vadd.f32 %v5385_v31, %v5343_v44 }
 0x821   : > { %6273 = vtanh.f32 %v5711_v32  ;;  %v5734_v47 = vadd.f32 %v5659_v17, %v5560_v35  ;;  %v5561_v58 = vmul.f32 %v5489_v24, %v5386_v49 }
 0x823   : > { %6275 = vtanh.f32 %v5734_v47  ;;  %v5735_v6 = vadd.f32 %v5663_v15, %v5561_v58 }
 0x825   : > { %6277 = vtanh.f32 %v5735_v6 }
 0x82c   : > { %v6272_v14 = vpop.eup %6271 }
 0x82d   : > { %5806 = vst [vmem:[%s7109_s17 + $0xb0] sm:$0xff] %v6272_v14 }
 0x82e   : > { %v6274_v36 = vpop.eup %6273 }
 0x82f   : > { %5807 = vst [vmem:[%s7109_s17 + $0xb8] sm:$0xff] %v6274_v36 }
 0x830   : > { %v6276_v37 = vpop.eup %6275 }
 0x831   : > { %5830 = vst [vmem:[%s7109_s17 + $0x170] sm:$0xff] %v6276_v37 }
 0x832   : > { %v6278_v34 = vpop.eup %6277 }
 0x833   : > { %5831 = vst [vmem:[%s7109_s17 + $0x178] sm:$0xff] %v6278_v34 }
 0x834   : > { %6460 = shalt.err (!%p6457_p0)
}
 0x835   : > { %s6461_s11 = scalar_lea.hbm %s7942_s30, 6144  ;;  %s6465_s29 = scalar_lea.hbm %s7994_s6, 24576 }
 0x836   : > { %p6462_p10 = scmp.ne.s32.totalorder %s7942_s30, %s6461_s11  ;;  %p6466_p11 = scmp.lt.s32.totalorder %s7942_s30, %s7994_s6 }
 0x837   : > { %p6467_p12 = scmp.lt.s32.totalorder %s6465_s29, %s6461_s11 }
 0x838   : > { %p6463_p5 = pnand %p6462_p10, %p8029_p4 }
 0x839   : > { %p6468_p1 = por %p6467_p12, %p6466_p11 }
 0x83a   : > { %p6464_p6 = pneg %p6463_p5 }
 0x83c   : > { %p6469_p7 = pnand %p6468_p1, %p6464_p6 }
 0x83e   : > { %6472 = shalt.err (!%p6469_p7)
}
 0x83f   : > { %s6540_s15 = smov 3072   ;;  %s6541_s8 = smov 12288  }
 0x840   : > { %s6542_s17 = smov 192  }
 0x841   : > { %6102 = dma.vmem_to_hbm [thread:$0]  (%p8029_p4), %s7944_s20, 6144, %s7942_s30, %s5833_s28, %s6540_s15, %s6541_s8, %s6542_s17  }
 0x842 PF: > { %p6135_p13 = scmp.ge.s32.totalorder %s6523_s24, 2  ;;  %s5861_s13 = sand.u32 1, %s6511_s21  }
 0x843   : > { %p8030_p2 = scmp.ne.s32.totalorder %s8012_s10, 0  ;;  %s5862_s27 = scalar_lea.sflag [#allocation4], %s5861_s13 }
 0x845   : > { %p6125_p3 = pnand %p6135_p13, %p8030_p2 }
 0x847   : > { %p6126_p8 = pneg %p6125_p3 }
 0x849   : > { %6506 = dma.done.wait (%p6126_p8), %s5862_s27, 6144  }
 0x84a   : > { %6508 = vsyncadd (%p6126_p8), %s5862_s27, 4294961152  ;;  %s8031_s24 = sld [smem:[#allocation19_spill]]  ;;  %s8033_s21 = smov %s6515_s22 }
 0x84b   : > { %s8032_s12 = sld [smem:[#allocation20_spill]]  ;;  %s8034_s22 = smov %s6519_s23 }
 0x850   : > { %p24_p9 = scmp.ge.s32.totalorder %s8031_s24, 6  }
 0x851   : > { %s8035_s23 = smov %s8032_s12 }
 0x852   :  { %26 = sbr.rel (!%p24_p9) target bundleno = 12 (0xc), region = 126 }
 0x857   :  { %5867 = vsyncpa [#allocation3], 1 }
 0x858   :  { %5869 = vsyncpa [#allocation3 + $0x1], 1 }
 0x859   :  { %5870 = vsyncpa [#allocation6], 1 }
 0x85a   :  { %5871 = vsyncpa [#allocation9], 1 }
 0x85b   :  { %5873 = vsyncpa [#allocation9 + $0x1], 1 }
 0x85c   :  { %5874 = vsyncpa [#allocation12], 1 }
 0x85d   :  { %5876 = vsyncpa [#allocation12 + $0x1], 1 }
 0x85e   :  { %5877 = vsyncpa [#allocation4], 1 }
 0x85f   :  { %5879 = vsyncpa [#allocation4 + $0x1], 1 }

</bundles_post_ra>
